<compile_context>
chip_gen: v7x
topology: tpu7x:2x2x1
jax: 0.10.0
libtpu: 0.0.40
codegen_flags: <defaults>
</compile_context>

<pallas_src>
import jax
import jax.numpy as jnp
import numpy as np
from jax import lax
from jax.experimental import pallas as pl
from jax.experimental.pallas import tpu as pltpu


def _head_kernel(f_ref, wconv_ref, wcombT_ref, out_ref):
    # f_ref block: (Bt, C, S) features for Bt batch elements (bf16 or f32).
    f = f_ref[...].astype(jnp.float32)                       # (Bt, C, S)
    Bt, C, S = f.shape
    Kc = wcombT_ref.shape[1]                                 # ncls + nswap

    # AdaptiveAvgPool2d(output_size=1) == mean over all spatial positions.
    pooled = jnp.mean(f, axis=2)                             # (Bt, C)

    # Fused classifier + classifier_swap (both Linear(C, *, bias=False)):
    # one (Bt, C) @ (C, ncls+nswap) MXU matmul instead of two GEMVs.
    logits = jnp.dot(pooled, wcombT_ref[...],
                     preferred_element_type=jnp.float32)     # (Bt, Kc)

    # conv_dim: 1x1 conv 512 -> 6, no bias == per-sample channel matmul.
    # Single batched dot_general over the whole block (broadcast weight hoisted).
    wconv_b = jnp.broadcast_to(wconv_ref[...], (Bt,) + wconv_ref.shape)   # (Bt, 6, C)
    f1 = lax.dot_general(wconv_b, f, (((2,), (1,)), ((0,), (0,))),
                         preferred_element_type=jnp.float32)              # (Bt, 6, S)

    # cal_covariance: center rows over spatial dim, X @ X.T / (H*W - 1) per sample.
    fc = f1 - jnp.mean(f1, axis=2, keepdims=True)
    cov = lax.dot_general(fc, fc, (((2,), (2,)), ((0,), (0,))),
                          preferred_element_type=jnp.float32)             # (Bt, 6, 6)
    cov = cov * jnp.float32(1.0 / (S - 1))

    # Pack everything into one lane-dense slab:
    #   [ logits(ncls) | swap(2) | cov flattened row-major (36) | zero pad ]
    # -> a single unmasked full-width store and one write-back DMA per step.
    cov_rows = [cov[:, i, :] for i in range(cov.shape[1])]   # 6 x (Bt, 6), row-major order
    pieces = [logits] + cov_rows
    pad = out_ref.shape[1] - (Kc + 36)
    if pad > 0:
        pieces.append(jnp.zeros((Bt, pad), jnp.float32))
    out_ref[...] = jnp.concatenate(pieces, axis=1)           # (Bt, out_lanes)


def mainmodel3_head(f_nchw, w_conv, w_cls, w_swap, *, block_b=8):
    """f_nchw: (B, 512, H, W) backbone feature map (NCHW), f32 or bf16.
    w_conv: (6, 512)   (the Conv2d(512, 6, 1, bias=False) weight squeezed)
    w_cls:  (num_classes, 512)   w_swap: (2, 512)
    Returns [logits, swap_logits, f_cov] exactly like MainModel3.forward."""
    B, C, H, W = f_nchw.shape
    S = H * W
    assert S > 1, "cal_covariance divides by (H*W - 1); need H*W > 1"
    ncls = w_cls.shape[0]
    nswap = w_swap.shape[0]
    Kc = ncls + nswap
    out_lanes = ((Kc + 36 + 127) // 128) * 128   # lane-dense packed output width

    # Cap block so the double-buffered input block stays well under v5e's 16 MiB
    # default scoped VMEM (and v7x's 64 MiB total) while amortizing per-step cost.
    itemsize = jnp.dtype(f_nchw.dtype).itemsize
    vmem_cap = max(1, (8 * 1024 * 1024) // (2 * C * S * itemsize))
    block_b = max(1, min(block_b, vmem_cap, B))
    # Keep >= 2 grid steps so both v7x TensorCores get work (no-op on v5e/v6e).
    if B >= 2:
        block_b = min(block_b, (B + 1) // 2)

    n_steps = pl.cdiv(B, block_b)
    Bp = n_steps * block_b

    f = f_nchw.reshape(B, C, S)                  # keep caller dtype (bf16 halves HBM traffic)
    if Bp != B:
        f = jnp.pad(f, ((0, Bp - B), (0, 0), (0, 0)))

    wconv = w_conv.reshape(6, C).astype(jnp.float32)                          # (6, C)
    wcombT = jnp.concatenate([w_cls, w_swap], axis=0).T.astype(jnp.float32)   # (C, Kc)

    grid_spec = pltpu.PrefetchScalarGridSpec(
        num_scalar_prefetch=0,
        grid=(n_steps,),
        in_specs=[
            pl.BlockSpec((block_b, C, S), lambda i: (i, 0, 0)),   # feature slab per step
            pl.BlockSpec((6, C), lambda i: (0, 0)),               # conv_dim weight (resident)
            pl.BlockSpec((C, Kc), lambda i: (0, 0)),              # fused classifier weight^T
        ],
        out_specs=pl.BlockSpec((block_b, out_lanes), lambda i: (i, 0)),
    )

    packed = pl.pallas_call(
        _head_kernel,
        out_shape=jax.ShapeDtypeStruct((Bp, out_lanes), jnp.float32),
        grid_spec=grid_spec,
        compiler_params=pltpu.CompilerParams(
            dimension_semantics=("parallel",)),
    )(f, wconv, wcombT)

    logits = packed[:B, 0:ncls]
    swap_logits = packed[:B, ncls:Kc]
    f_cov = packed[:B, Kc:Kc + 36]               # f_cov.view(x.shape[0], 36), row-major
    return [logits, swap_logits, f_cov]


def _reference(f_nchw, w_conv, w_cls, w_swap):
    """Pure-JAX reference of the same head (for a correctness check)."""
    B, C, H, W = f_nchw.shape
    f = f_nchw.reshape(B, C, H * W).astype(jnp.float32)
    pooled = jnp.mean(f, axis=2)                               # (B, C)
    logits = pooled @ w_cls.T
    swap = pooled @ w_swap.T
    f1 = jnp.einsum('oc,bcs->bos', w_conv.astype(jnp.float32), f)   # (B, 6, S)
    fc = f1 - jnp.mean(f1, axis=2, keepdims=True)
    cov = jnp.einsum('bos,bps->bop', fc, fc) / (H * W - 1)     # (B, 6, 6)
    return [logits, swap, cov.reshape(B, 36)]


if __name__ == "__main__":
    key = jax.random.PRNGKey(0)
    B, C, H, W = 16, 512, 8, 8         # resnet18 trunk -> 512 channels, 8x8 feature map
    num_classes = 10                   # config.numcls (small synthetic value)
    k1, k2, k3, k4 = jax.random.split(key, 4)

    # Backbone features in bf16 (kernel is HBM-bound; bf16 halves input traffic).
    f = jax.random.normal(k1, (B, C, H, W), jnp.float32).astype(jnp.bfloat16)
    # Deterministic synthetic parameters (fan-in scaled), no checkpoint loading.
    w_conv = jax.random.normal(k2, (6, C), jnp.float32) / np.sqrt(C)           # Conv2d(512,6,1)
    w_cls = jax.random.normal(k3, (num_classes, C), jnp.float32) / np.sqrt(C)  # Linear(512,numcls)
    w_swap = jax.random.normal(k4, (2, C), jnp.float32) / np.sqrt(C)           # Linear(512,2)

    outs = mainmodel3_head(f, w_conv, w_cls, w_swap)
    outs = [jax.block_until_ready(o) for o in outs]

    refs = _reference(f, w_conv, w_cls, w_swap)
    for o, r in zip(outs, refs):
        np.testing.assert_allclose(np.asarray(o), np.asarray(r), rtol=2e-2, atol=2e-2)

    print("KERNEL_OK")
</pallas_src>

<mosaic_0001>
module attributes {stable_mosaic.version = 11 : i64} {
  func.func @_head_kernel(%arg0: i32, %arg1: memref<8x512x64xbf16, #tpu.memory_space<vmem>>, %arg2: memref<6x512xf32, #tpu.memory_space<vmem>>, %arg3: memref<512x12xf32, #tpu.memory_space<vmem>>, %arg4: memref<8x128xf32, #tpu.memory_space<vmem>>) attributes {dimension_semantics = [#tpu.dimension_semantics<parallel>], iteration_bounds = array<i64: 2>, scalar_prefetch = 0 : i64, scratch_operands = 0 : i64, tpu.core_type = #tpu.core_type<tc>, window_params = [{transform_indices = @transform_0, window_bounds = array<i64: 8, 512, 64>}, {pipeline_mode = #tpu.pipeline_mode<synchronous>, transform_indices = @transform_1, window_bounds = array<i64: 6, 512>}, {pipeline_mode = #tpu.pipeline_mode<synchronous>, transform_indices = @transform_2, window_bounds = array<i64: 512, 12>}, {transform_indices = @transform_3, window_bounds = array<i64: 8, 128>}]} {
    %c0 = arith.constant 0 : index
    %c0_0 = arith.constant 0 : index
    %c0_1 = arith.constant 0 : index
    %0 = vector.load %arg1[%c0, %c0_0, %c0_1] : memref<8x512x64xbf16, #tpu.memory_space<vmem>>, vector<8x512x64xbf16>
    %1 = arith.extf %0 : vector<8x512x64xbf16> to vector<8x512x64xf32>
    %cst = arith.constant dense<0.000000e+00> : vector<8x512xf32>
    %2 = vector.multi_reduction <add>, %1, %cst [2] : vector<8x512x64xf32> to vector<8x512xf32>
    %cst_2 = arith.constant 6.400000e+01 : f32
    %3 = vector.broadcast %cst_2 : f32 to vector<8x512xf32>
    %4 = arith.divf %2, %3 : vector<8x512xf32>
    %c0_3 = arith.constant 0 : index
    %c0_4 = arith.constant 0 : index
    %5 = vector.load %arg3[%c0_3, %c0_4] : memref<512x12xf32, #tpu.memory_space<vmem>>, vector<512x12xf32>
    %cst_5 = arith.constant dense<0.000000e+00> : vector<8x12xf32>
    %6 = tpu.matmul %4, %5, %cst_5 {dimension_numbers = #tpu.dot_dimension_numbers<[1], [0], [0], [1], [0, 0, 1, 1], [], []>} : vector<8x512xf32>, vector<512x12xf32>, vector<8x12xf32> -> vector<8x12xf32>
    %c0_6 = arith.constant 0 : index
    %c0_7 = arith.constant 0 : index
    %7 = vector.load %arg2[%c0_6, %c0_7] : memref<6x512xf32, #tpu.memory_space<vmem>>, vector<6x512xf32>
    %8 = vector.shape_cast %7 : vector<6x512xf32> to vector<1x6x512xf32>
    %9 = vector.broadcast %8 : vector<1x6x512xf32> to vector<8x6x512xf32>
    %cst_8 = arith.constant dense<0.000000e+00> : vector<8x6x64xf32>
    %10 = tpu.matmul %9, %1, %cst_8 {dimension_numbers = #tpu.dot_dimension_numbers<[2], [1], [1], [2], [0, 0, 0, 1, 1, 2], [0], [0]>} : vector<8x6x512xf32>, vector<8x512x64xf32>, vector<8x6x64xf32> -> vector<8x6x64xf32>
    %cst_9 = arith.constant dense<0.000000e+00> : vector<8x6xf32>
    %11 = vector.multi_reduction <add>, %10, %cst_9 [2] : vector<8x6x64xf32> to vector<8x6xf32>
    %12 = vector.shape_cast %11 : vector<8x6xf32> to vector<8x6x1xf32>
    %cst_10 = arith.constant 6.400000e+01 : f32
    %13 = vector.broadcast %cst_10 : f32 to vector<8x6x1xf32>
    %14 = arith.divf %12, %13 : vector<8x6x1xf32>
    %15 = vector.broadcast %14 : vector<8x6x1xf32> to vector<8x6x64xf32>
    %16 = arith.subf %10, %15 : vector<8x6x64xf32>
    %cst_11 = arith.constant dense<0.000000e+00> : vector<8x6x6xf32>
    %17 = tpu.matmul %16, %16, %cst_11 {dimension_numbers = #tpu.dot_dimension_numbers<[2], [2], [1], [1], [0, 0, 0, 1, 1, 1], [0], [0]>} : vector<8x6x64xf32>, vector<8x6x64xf32>, vector<8x6x6xf32> -> vector<8x6x6xf32>
    %cst_12 = arith.constant 0.0158730168 : f32
    %18 = vector.broadcast %cst_12 : f32 to vector<8x6x6xf32>
    %19 = arith.mulf %17, %18 : vector<8x6x6xf32>
    %20 = vector.extract_strided_slice %19 {offsets = [0, 0, 0], sizes = [8, 1, 6], strides = [1, 1, 1]} : vector<8x6x6xf32> to vector<8x1x6xf32>
    %21 = vector.shape_cast %20 : vector<8x1x6xf32> to vector<8x6xf32>
    %22 = vector.extract_strided_slice %19 {offsets = [0, 1, 0], sizes = [8, 1, 6], strides = [1, 1, 1]} : vector<8x6x6xf32> to vector<8x1x6xf32>
    %23 = vector.shape_cast %22 : vector<8x1x6xf32> to vector<8x6xf32>
    %24 = vector.extract_strided_slice %19 {offsets = [0, 2, 0], sizes = [8, 1, 6], strides = [1, 1, 1]} : vector<8x6x6xf32> to vector<8x1x6xf32>
    %25 = vector.shape_cast %24 : vector<8x1x6xf32> to vector<8x6xf32>
    %26 = vector.extract_strided_slice %19 {offsets = [0, 3, 0], sizes = [8, 1, 6], strides = [1, 1, 1]} : vector<8x6x6xf32> to vector<8x1x6xf32>
    %27 = vector.shape_cast %26 : vector<8x1x6xf32> to vector<8x6xf32>
    %28 = vector.extract_strided_slice %19 {offsets = [0, 4, 0], sizes = [8, 1, 6], strides = [1, 1, 1]} : vector<8x6x6xf32> to vector<8x1x6xf32>
    %29 = vector.shape_cast %28 : vector<8x1x6xf32> to vector<8x6xf32>
    %30 = vector.extract_strided_slice %19 {offsets = [0, 5, 0], sizes = [8, 1, 6], strides = [1, 1, 1]} : vector<8x6x6xf32> to vector<8x1x6xf32>
    %31 = vector.shape_cast %30 : vector<8x1x6xf32> to vector<8x6xf32>
    %cst_13 = arith.constant 0.000000e+00 : f32
    %32 = vector.broadcast %cst_13 : f32 to vector<8x80xf32>
    %33 = tpu.concatenate %6, %21, %23, %25, %27, %29, %31, %32 in 1 : vector<8x12xf32>, vector<8x6xf32>, vector<8x6xf32>, vector<8x6xf32>, vector<8x6xf32>, vector<8x6xf32>, vector<8x6xf32>, vector<8x80xf32> -> vector<8x128xf32>
    %c0_14 = arith.constant 0 : index
    %c0_15 = arith.constant 0 : index
    %34 = vector.load %arg4[%c0_14, %c0_15] : memref<8x128xf32, #tpu.memory_space<vmem>>, vector<8x128xf32>
    tpu.vector_store %arg4[%c0_14, %c0_15], %33 {strides = array<i32>} : memref<8x128xf32, #tpu.memory_space<vmem>>, vector<8x128xf32>,
    return
  }
  func.func @transform_0(%arg0: i32) -> (i32, i32, i32) {
    %c0_i32 = arith.constant 0 : i32
    %c0_i32_0 = arith.constant 0 : i32
    %c0_i32_1 = arith.constant 0 : i32
    return %arg0, %c0_i32, %c0_i32_0 : i32, i32, i32
  }
  func.func @transform_1(%arg0: i32) -> (i32, i32) {
    %c0_i32 = arith.constant 0 : i32
    %c0_i32_0 = arith.constant 0 : i32
    %c0_i32_1 = arith.constant 0 : i32
    return %c0_i32, %c0_i32_0 : i32, i32
  }
  func.func @transform_2(%arg0: i32) -> (i32, i32) {
    %c0_i32 = arith.constant 0 : i32
    %c0_i32_0 = arith.constant 0 : i32
    %c0_i32_1 = arith.constant 0 : i32
    return %c0_i32, %c0_i32_0 : i32, i32
  }
  func.func @transform_3(%arg0: i32) -> (i32, i32) {
    %c0_i32 = arith.constant 0 : i32
    %c0_i32_0 = arith.constant 0 : i32
    return %arg0, %c0_i32 : i32, i32
  }
}

</mosaic_0001>

<bundles_post_ra>
// kernel: tpu_custom_call.1
= control target key start
LH: loop header
LB: loop body
LE: loop exit
PB: predicated region body
PF: predicated region fallthrough
CT: control target
= control target key end

     0   :  { %8 = vsyncpa [#allocation3], 0  ;;  %s15987_s0 = inlined_call_operand.vmem [shape: bf16[16,512,64], index: 0, kind: input, shape index: {}]   ;;  %s15988_s1 = inlined_call_operand.vmem [shape: f32[6,512], index: 1, kind: input, shape index: {}]   ;;  %s15989_s2 = inlined_call_operand.vmem [shape: f32[512,12], index: 2, kind: input, shape index: {}]   ;;  %s15990_s3 = inlined_call_operand.hbm [shape: f32[16,128], index: 3, kind: output, shape index: {}]  }
   0x1   :  { %10 = vsyncpa [#allocation3 + $0x1], 0  ;;  %s11484_s12 = smov 0   ;;  %s11486_s13 = smov 0  }
   0x2   :  { %s11488_s14 = smov 0   ;;  %s11490_s15 = smov 0  }
   0x3 LB: > { %s11505_s16 = sadd.s32 4294967295, %s11453_s15   ;;  %s8518_s17 = sadd.s32 4294967294, %s11453_s15   ;;  %s11453_s15 = sphi %s11490_s15, %s16086_s15   ;;  %s11449_s14 = sphi %s11488_s14, %s16085_s14   ;;  %s11445_s13 = sphi %s11486_s13, %s16084_s13   ;;  %s11441_s12 = sphi %s11484_s12, %s16083_s12  }
   0x4   : > { %s11509_s18 = sadd.s32 1, %s11453_s15   ;;  %s91_s19 = sadd.s32 1, %s11449_s14 }
   0x5   : > { %s88_s20 = ssub.s32 %s11453_s15, %s11509_s18  ;;  %p101_p0 = scmp.ne.s32.totalorder %s11449_s14, %s11445_s13 }
   0x6   : > { %p89_p1 = scmp.eq.s32.totalorder %s88_s20, 0  ;;  %p102_p2 = scmp.eq.s32.totalorder %s11505_s16, 1 }
   0x7   : > { %p107_p3 = scmp.ne.s32.totalorder %s11445_s13, %s11441_s12  ;;  %p108_p4 = scmp.eq.s32.totalorder %s8518_s17, 1 }
   0x8   : > { %s11520_s21 = scalar_select %p89_p1, %s11449_s14, %s91_s19  }
   0x9   : > { %p11522_p5 = por %p102_p2, %p101_p0  ;;  %p11526_p6 = por %p108_p4, %p107_p3 }
   0xa   : > { %p8521_p7 = scmp.ge.s32.totalorder %s11453_s15, 1  ;;  %p142_p8 = scmp.lt.s32.totalorder %s11453_s15, 3 }
   0xc   : > { %p143_p9 = pnand %p8521_p7, %p142_p8 }
   0xe   : > { %146 = sbr.rel (%p143_p9) target bundleno = 2182 (0x886), region = 32 }
  0x15   : > { %s8523_s24 = sshll.u32 %s11505_s16, 3  ;;  %vm1198_vm0 = vcmask 523264   ;;  %vm3835_vm1 = vcmask 130112   ;;  %vm3842_vm2 = vcmask 195712   ;;  %vm3849_vm3 = vcmask 261312   ;;  %s11458_s29 = smov 12  }
  0x16   : > { %p168_p10 = scmp.lt.s32.totalorder %s8523_s24, 15  ;;  %vm3856_vm4 = vcmask 326912   ;;  %vm3863_vm5 = vcmask 392512   ;;  %vm3870_vm6 = vcmask 458112   ;;  %vm3877_vm7 = vcmask 523712   ;;  %s11459_s30 = smov 24  }
  0x17   : > { %vm3884_vm8 = vcmask 589312   ;;  %vm3891_vm9 = vcmask 654912   ;;  %vm3898_vm10 = vcmask 720512   ;;  %vm3905_vm11 = vcmask 786112   ;;  %s11460_s4 = smov 36   ;;  %s11461_s5 = smov 30  }
  0x18   : > { %s16088_s24 = smov (!%p168_p10, %s8523_s24), 15  ;;  %vm3912_vm12 = vcmask 851712   ;;  %vm3919_vm13 = vcmask 917312   ;;  %vm3926_vm14 = vcmask 982912   ;;  %vm3933_vm15 = vcmask 1048512   ;;  %s11462_s6 = smov 42  }
  0x19   : > { %s8546_s25 = sshll.u32 %s16088_s24, 8  ;;  %s164_s7 = sand.u32 1, %s11445_s13  }
  0x1a   : > { %s11536_s28 = scalar_lea.vmem %s15987_s0, %s8546_s25  ;;  %s8522_s8 = sshll.u32 %s164_s7, 3 }
  0x1b   : > { %v9571_v0 = vld [vmem:[%s11536_s28 + $0x8] sm:$0xff]   ;;  %v8548_v1 = vld [vmem:[%s11536_s28] sm:$0xff]   ;;  %v9572_v6 = vld [vmem:[%s11536_s28 + $0x10] sm:$0xff]   ;;  %s8543_s9 = sshll.u32 %s11505_s16, 7  ;;  %s166_s10 = scalar_lea.vmem [#allocation2], %s8522_s8 }
  0x1c   : > { %v8553_v2 = vunpack.c.l.bf16 %v9571_v0  ;;  %v8549_v3 = vunpack.c.l.bf16 %v8548_v1  ;;  %v8554_v4 = vunpack.c.h.bf16 %v9571_v0  ;;  %v8550_v5 = vunpack.c.h.bf16 %v8548_v1  ;;  %v9573_v13 = vld [vmem:[%s11536_s28 + $0x18] sm:$0xff]   ;;  %v9574_v18 = vld [vmem:[%s11536_s28 + $0x20] sm:$0xff]   ;;  %v9575_v23 = vld [vmem:[%s11536_s28 + $0x28] sm:$0xff]   ;;  %s8459_s11 = sshll.u32 %s166_s10, 4  ;;  %s15945_s20 = scalar_lea.hbm %s15990_s3, %s8543_s9  ;;  %s15947_s11 = int_to_ptr.vmem [resolvable:$true] %s8459_s11 }
  0x1d   : > { %v8558_v11 = vunpack.c.h.bf16 %v9572_v6  ;;  %v8557_v12 = vunpack.c.l.bf16 %v9572_v6  ;;  %v8562_v16 = vunpack.c.h.bf16 %v9573_v13  ;;  %v8561_v17 = vunpack.c.l.bf16 %v9573_v13  ;;  %v9576_v28 = vld [vmem:[%s11536_s28 + $0x30] sm:$0xff]   ;;  %v9577_v33 = vld [vmem:[%s11536_s28 + $0x38] sm:$0xff]   ;;  %v9578_v38 = vld [vmem:[%s11536_s28 + $0x40] sm:$0xff]   ;;  %s8446_s16 = scalar_lea.sflag [#allocation3], %s164_s7  ;;  %s11391_s24 = scalar_lea.vmem %s15947_s11, 128 }
  0x1e   : > { %v1205_v7 = vsel %vm1198_vm0, %v8553_v2, 0.0  ;;  %v1199_v8 = vsel %vm1198_vm0, %v8549_v3, 0.0  ;;  %v1208_v9 = vsel %vm1198_vm0, %v8554_v4, 0.0  ;;  %v1202_v10 = vsel %vm1198_vm0, %v8550_v5, 0.0  ;;  %v9579_v43 = vld [vmem:[%s11536_s28 + $0x48] sm:$0xff]   ;;  %v9580_v48 = vld [vmem:[%s11536_s28 + $0x50] sm:$0xff]   ;;  %p11392_p11 = scmp.ne.s32.totalorder %s15947_s11, %s11391_s24 }
  0x1f   : > { %1206 = vadd.xlane.f32.xlu1 %v1205_v7  ;;  %1200 = vadd.xlane.f32.xlu0 %v1199_v8  ;;  %v1214_v14 = vsel %vm1198_vm0, %v8558_v11, 0.0  ;;  %v1211_v15 = vsel %vm1198_vm0, %v8557_v12, 0.0  ;;  %v1220_v19 = vsel %vm1198_vm0, %v8562_v16, 0.0  ;;  %v1217_v20 = vsel %vm1198_vm0, %v8561_v17, 0.0  ;;  %v9581_v53 = vld [vmem:[%s11536_s28 + $0x58] sm:$0xff]   ;;  %v9582_v58 = vld [vmem:[%s11536_s28 + $0x60] sm:$0xff]  }
  0x20   : > { %v8566_v21 = vunpack.c.h.bf16 %v9574_v18  ;;  %v8565_v22 = vunpack.c.l.bf16 %v9574_v18  ;;  %v8570_v26 = vunpack.c.h.bf16 %v9575_v23  ;;  %v8569_v27 = vunpack.c.l.bf16 %v9575_v23  ;;  %v9583_v63 = vld [vmem:[%s11536_s28 + $0x68] sm:$0xff]   ;;  %v9584_v4 = vld [vmem:[%s11536_s28 + $0x70] sm:$0xff]   ;;  %p11393_p12 = pnand %p11392_p11, %p11522_p5  ;;  %s11463_s25 = smov [#allocation2]  }
  0x21   : > { %v8574_v31 = vunpack.c.h.bf16 %v9576_v28  ;;  %v8573_v32 = vunpack.c.l.bf16 %v9576_v28  ;;  %v8578_v36 = vunpack.c.h.bf16 %v9577_v33  ;;  %v8577_v37 = vunpack.c.l.bf16 %v9577_v33  ;;  %s11395_s26 = sshll.u32 %s11463_s25, 4  ;;  %s11396_s26 = int_to_ptr.vmem [resolvable:$false] %s11395_s26 }
  0x22   : > { %v1226_v24 = vsel %vm1198_vm0, %v8566_v21, 0.0  ;;  %v1223_v25 = vsel %vm1198_vm0, %v8565_v22, 0.0  ;;  %v1232_v29 = vsel %vm1198_vm0, %v8570_v26, 0.0  ;;  %v1229_v30 = vsel %vm1198_vm0, %v8569_v27, 0.0  ;;  %p11394_p13 = pneg %p11393_p12  ;;  %s11397_s27 = scalar_lea.vmem %s11396_s26, 256 }
  0x23   : > { %1209 = vadd.xlane.f32.xlu1 %v1208_v9  ;;  %1203 = vadd.xlane.f32.xlu0 %v1202_v10  ;;  %v1238_v34 = vsel %vm1198_vm0, %v8574_v31, 0.0  ;;  %v1235_v35 = vsel %vm1198_vm0, %v8573_v32, 0.0  ;;  %v1244_v39 = vsel %vm1198_vm0, %v8578_v36, 0.0  ;;  %v1241_v40 = vsel %vm1198_vm0, %v8577_v37, 0.0  ;;  %v9585_v9 = vld [vmem:[%s11536_s28 + $0x78] sm:$0xff]   ;;  %p11398_p0 = scmp.lt.s32.totalorder %s15947_s11, %s11396_s26  ;;  %p11399_p1 = scmp.lt.s32.totalorder %s11397_s27, %s11391_s24 }
  0x24   : > { %v8582_v41 = vunpack.c.h.bf16 %v9578_v38  ;;  %v8581_v42 = vunpack.c.l.bf16 %v9578_v38  ;;  %v8586_v46 = vunpack.c.h.bf16 %v9579_v43  ;;  %v8585_v47 = vunpack.c.l.bf16 %v9579_v43 }
  0x25   : > { %v8590_v51 = vunpack.c.h.bf16 %v9580_v48  ;;  %v8589_v52 = vunpack.c.l.bf16 %v9580_v48  ;;  %v8594_v56 = vunpack.c.h.bf16 %v9581_v53  ;;  %v8593_v57 = vunpack.c.l.bf16 %v9581_v53  ;;  %p11400_p2 = por %p11399_p1, %p11398_p0 }
  0x26   : > { %v1250_v44 = vsel %vm1198_vm0, %v8582_v41, 0.0  ;;  %v1247_v45 = vsel %vm1198_vm0, %v8581_v42, 0.0  ;;  %v1256_v49 = vsel %vm1198_vm0, %v8586_v46, 0.0  ;;  %v1253_v50 = vsel %vm1198_vm0, %v8585_v47, 0.0 }
  0x27   : > { %1215 = vadd.xlane.f32.xlu1 %v1214_v14  ;;  %1212 = vadd.xlane.f32.xlu0 %v1211_v15  ;;  %v1262_v54 = vsel %vm1198_vm0, %v8590_v51, 0.0  ;;  %v1259_v55 = vsel %vm1198_vm0, %v8589_v52, 0.0  ;;  %v1268_v59 = vsel %vm1198_vm0, %v8594_v56, 0.0  ;;  %v1265_v60 = vsel %vm1198_vm0, %v8593_v57, 0.0  ;;  %v9586_v14 = vld [vmem:[%s11536_s28 + $0x80] sm:$0xff]   ;;  %p11401_p3 = pnand %p11400_p2, %p11394_p13 }
  0x28   : > { %v8598_v61 = vunpack.c.h.bf16 %v9582_v58  ;;  %v8597_v62 = vunpack.c.l.bf16 %v9582_v58  ;;  %v8602_v2 = vunpack.c.h.bf16 %v9583_v63  ;;  %v8601_v3 = vunpack.c.l.bf16 %v9583_v63 }
  0x29   : > { %v8606_v7 = vunpack.c.h.bf16 %v9584_v4  ;;  %v8605_v8 = vunpack.c.l.bf16 %v9584_v4  ;;  %v8610_v12 = vunpack.c.h.bf16 %v9585_v9  ;;  %v8609_v13 = vunpack.c.l.bf16 %v9585_v9 }
  0x2a   : > { %v1274_v0 = vsel %vm1198_vm0, %v8598_v61, 0.0  ;;  %v1271_v1 = vsel %vm1198_vm0, %v8597_v62, 0.0  ;;  %v1280_v5 = vsel %vm1198_vm0, %v8602_v2, 0.0  ;;  %v1277_v6 = vsel %vm1198_vm0, %v8601_v3, 0.0 }
  0x2b   : > { %1221 = vadd.xlane.f32.xlu1 %v1220_v19  ;;  %1218 = vadd.xlane.f32.xlu0 %v1217_v20  ;;  %v1286_v10 = vsel %vm1198_vm0, %v8606_v7, 0.0  ;;  %v1283_v11 = vsel %vm1198_vm0, %v8605_v8, 0.0  ;;  %v1292_v15 = vsel %vm1198_vm0, %v8610_v12, 0.0  ;;  %v1289_v16 = vsel %vm1198_vm0, %v8609_v13, 0.0  ;;  %v9587_v19 = vld [vmem:[%s11536_s28 + $0x88] sm:$0xff]  }
  0x2c   : > { %v8614_v17 = vunpack.c.h.bf16 %v9586_v14  ;;  %v8613_v18 = vunpack.c.l.bf16 %v9586_v14  ;;  %v8618_v22 = vunpack.c.h.bf16 %v9587_v19  ;;  %v8617_v23 = vunpack.c.l.bf16 %v9587_v19 }
  0x2e   : > { %v1298_v20 = vsel %vm1198_vm0, %v8614_v17, 0.0  ;;  %v1295_v21 = vsel %vm1198_vm0, %v8613_v18, 0.0  ;;  %v1301_v26 = vsel %vm1198_vm0, %v8617_v23, 0.0 }
  0x2f   : > { %1227 = vadd.xlane.f32.xlu1 %v1226_v24  ;;  %1224 = vadd.xlane.f32.xlu0 %v1223_v25  ;;  %v9588_v24 = vld [vmem:[%s11536_s28 + $0x90] sm:$0xff]   ;;  %v1304_v25 = vsel %vm1198_vm0, %v8618_v22, 0.0 }
  0x30   : > { %v8622_v27 = vunpack.c.h.bf16 %v9588_v24  ;;  %v8621_v28 = vunpack.c.l.bf16 %v9588_v24 }
  0x32   : > { %v1307_v31 = vsel %vm1198_vm0, %v8621_v28, 0.0 }
  0x33   : > { %1233 = vadd.xlane.f32.xlu1 %v1232_v29  ;;  %1230 = vadd.xlane.f32.xlu0 %v1229_v30  ;;  %v9589_v29 = vld [vmem:[%s11536_s28 + $0x98] sm:$0xff]   ;;  %v1310_v30 = vsel %vm1198_vm0, %v8622_v27, 0.0 }
  0x34   : > { %v8626_v32 = vunpack.c.h.bf16 %v9589_v29  ;;  %v8625_v33 = vunpack.c.l.bf16 %v9589_v29 }
  0x36   : > { %v1313_v36 = vsel %vm1198_vm0, %v8625_v33, 0.0 }
  0x37   : > { %1239 = vadd.xlane.f32.xlu1 %v1238_v34  ;;  %1236 = vadd.xlane.f32.xlu0 %v1235_v35  ;;  %v9590_v34 = vld [vmem:[%s11536_s28 + $0xa0] sm:$0xff]   ;;  %v1316_v35 = vsel %vm1198_vm0, %v8626_v32, 0.0 }
  0x38   : > { %v8630_v37 = vunpack.c.h.bf16 %v9590_v34  ;;  %v8629_v38 = vunpack.c.l.bf16 %v9590_v34 }
  0x3a   : > { %v1319_v41 = vsel %vm1198_vm0, %v8629_v38, 0.0 }
  0x3b   : > { %1245 = vadd.xlane.f32.xlu1 %v1244_v39  ;;  %1242 = vadd.xlane.f32.xlu0 %v1241_v40  ;;  %v9591_v39 = vld [vmem:[%s11536_s28 + $0xa8] sm:$0xff]   ;;  %v1322_v40 = vsel %vm1198_vm0, %v8630_v37, 0.0 }
  0x3c   : > { %v8634_v42 = vunpack.c.h.bf16 %v9591_v39  ;;  %v8633_v43 = vunpack.c.l.bf16 %v9591_v39 }
  0x3e   : > { %v1325_v46 = vsel %vm1198_vm0, %v8633_v43, 0.0 }
  0x3f   : > { %1251 = vadd.xlane.f32.xlu1 %v1250_v44  ;;  %1248 = vadd.xlane.f32.xlu0 %v1247_v45  ;;  %v9592_v44 = vld [vmem:[%s11536_s28 + $0xb0] sm:$0xff]   ;;  %v1328_v45 = vsel %vm1198_vm0, %v8634_v42, 0.0 }
  0x40   : > { %v8638_v47 = vunpack.c.h.bf16 %v9592_v44  ;;  %v8637_v48 = vunpack.c.l.bf16 %v9592_v44 }
  0x42   : > { %v1331_v51 = vsel %vm1198_vm0, %v8637_v48, 0.0 }
  0x43   : > { %1257 = vadd.xlane.f32.xlu1 %v1256_v49  ;;  %1254 = vadd.xlane.f32.xlu0 %v1253_v50  ;;  %v9593_v49 = vld [vmem:[%s11536_s28 + $0xb8] sm:$0xff]   ;;  %v1334_v50 = vsel %vm1198_vm0, %v8638_v47, 0.0 }
  0x44   : > { %v8642_v52 = vunpack.c.h.bf16 %v9593_v49  ;;  %v8641_v53 = vunpack.c.l.bf16 %v9593_v49 }
  0x46   : > { %v1337_v56 = vsel %vm1198_vm0, %v8641_v53, 0.0 }
  0x47   : > { %1263 = vadd.xlane.f32.xlu1 %v1262_v54  ;;  %1260 = vadd.xlane.f32.xlu0 %v1259_v55  ;;  %v9594_v54 = vld [vmem:[%s11536_s28 + $0xc0] sm:$0xff]   ;;  %v1340_v55 = vsel %vm1198_vm0, %v8642_v52, 0.0  ;;  %v11649_v52 = vld [vmem:[%s11536_s28 + $0x1c8] sm:$0xff]  }
  0x48   : > { %v8646_v57 = vunpack.c.h.bf16 %v9594_v54  ;;  %v8645_v58 = vunpack.c.l.bf16 %v9594_v54 }
  0x4a   : > { %v1343_v61 = vsel %vm1198_vm0, %v8645_v58, 0.0  ;;  %v9642_v58 = vld [vmem:[%s11536_s28 + $0x240] sm:$0xff]  }
  0x4b   : > { %1269 = vadd.xlane.f32.xlu1 %v1268_v59  ;;  %1266 = vadd.xlane.f32.xlu0 %v1265_v60  ;;  %v9595_v59 = vld [vmem:[%s11536_s28 + $0xc8] sm:$0xff]   ;;  %v1346_v60 = vsel %vm1198_vm0, %v8646_v57, 0.0 }
  0x4c   : > { %v8650_v62 = vunpack.c.h.bf16 %v9595_v59  ;;  %v8649_v63 = vunpack.c.l.bf16 %v9595_v59 }
  0x4e   : > { %v1349_v2 = vsel %vm1198_vm0, %v8649_v63, 0.0 }
  0x4f   : > { %1275 = vadd.xlane.f32.xlu1 %v1274_v0  ;;  %1272 = vadd.xlane.f32.xlu0 %v1271_v1  ;;  %v9596_v0 = vld [vmem:[%s11536_s28 + $0xd0] sm:$0xff]   ;;  %v1352_v1 = vsel %vm1198_vm0, %v8650_v62, 0.0  ;;  %v9658_v62 = vld [vmem:[%s11536_s28 + $0x2c0] sm:$0xff]  }
  0x50   : > { %v8654_v3 = vunpack.c.h.bf16 %v9596_v0  ;;  %v8653_v4 = vunpack.c.l.bf16 %v9596_v0 }
  0x52   : > { %v1355_v7 = vsel %vm1198_vm0, %v8653_v4, 0.0  ;;  %v8837_v4 = vunpack.c.l.bf16 %v9642_v58 }
  0x53   : > { %1281 = vadd.xlane.f32.xlu1 %v1280_v5  ;;  %1278 = vadd.xlane.f32.xlu0 %v1277_v6  ;;  %v9597_v5 = vld [vmem:[%s11536_s28 + $0xd8] sm:$0xff]   ;;  %v1358_v6 = vsel %vm1198_vm0, %v8654_v3, 0.0 }
  0x54   : > { %v8658_v8 = vunpack.c.h.bf16 %v9597_v5  ;;  %v8657_v9 = vunpack.c.l.bf16 %v9597_v5 }
  0x56   : > { %v1361_v12 = vsel %vm1198_vm0, %v8657_v9, 0.0 }
  0x57   : > { %1287 = vadd.xlane.f32.xlu1 %v1286_v10  ;;  %1284 = vadd.xlane.f32.xlu0 %v1283_v11  ;;  %v9598_v10 = vld [vmem:[%s11536_s28 + $0xe0] sm:$0xff]   ;;  %v1364_v11 = vsel %vm1198_vm0, %v8658_v8, 0.0  ;;  %v8902_v8 = vunpack.c.h.bf16 %v9658_v62 }
  0x58   : > { %v8662_v13 = vunpack.c.h.bf16 %v9598_v10  ;;  %v8661_v14 = vunpack.c.l.bf16 %v9598_v10 }
  0x5a   : > { %v1367_v17 = vsel %vm1198_vm0, %v8661_v14, 0.0 }
  0x5b   : > { %1293 = vadd.xlane.f32.xlu1 %v1292_v15  ;;  %1290 = vadd.xlane.f32.xlu0 %v1289_v16  ;;  %v9599_v15 = vld [vmem:[%s11536_s28 + $0xe8] sm:$0xff]   ;;  %v1370_v16 = vsel %vm1198_vm0, %v8662_v13, 0.0 }
  0x5c   : > { %v8666_v18 = vunpack.c.h.bf16 %v9599_v15  ;;  %v8665_v19 = vunpack.c.l.bf16 %v9599_v15 }
  0x5e   : > { %v1373_v22 = vsel %vm1198_vm0, %v8665_v19, 0.0 }
  0x5f   : > { %1299 = vadd.xlane.f32.xlu1 %v1298_v20  ;;  %1296 = vadd.xlane.f32.xlu0 %v1295_v21  ;;  %v9600_v20 = vld [vmem:[%s11536_s28 + $0xf0] sm:$0xff]   ;;  %v1376_v21 = vsel %vm1198_vm0, %v8666_v18, 0.0  ;;  %v1631_v18 = vsel %vm1198_vm0, %v8837_v4, 0.0 }
  0x60   : > { %v8670_v23 = vunpack.c.h.bf16 %v9600_v20  ;;  %v8669_v24 = vunpack.c.l.bf16 %v9600_v20 }
  0x62   : > { %v1379_v27 = vsel %vm1198_vm0, %v8669_v24, 0.0  ;;  %v1730_v24 = vsel %vm1198_vm0, %v8902_v8, 0.0 }
  0x63   : > { %1305 = vadd.xlane.f32.xlu1 %v1304_v25  ;;  %1302 = vadd.xlane.f32.xlu0 %v1301_v26  ;;  %v9601_v25 = vld [vmem:[%s11536_s28 + $0xf8] sm:$0xff]   ;;  %v1382_v26 = vsel %vm1198_vm0, %v8670_v23, 0.0 }
  0x64   : > { %v8674_v28 = vunpack.c.h.bf16 %v9601_v25  ;;  %v8673_v29 = vunpack.c.l.bf16 %v9601_v25 }
  0x66   : > { %v1385_v32 = vsel %vm1198_vm0, %v8673_v29, 0.0 }
  0x67   : > { %1311 = vadd.xlane.f32.xlu1 %v1310_v30  ;;  %1308 = vadd.xlane.f32.xlu0 %v1307_v31  ;;  %v9610_v30 = vld [vmem:[%s11536_s28 + $0x140] sm:$0xff]   ;;  %v1388_v31 = vsel %vm1198_vm0, %v8674_v28, 0.0 }
  0x68   : > { %v8710_v33 = vunpack.c.h.bf16 %v9610_v30  ;;  %v8709_v34 = vunpack.c.l.bf16 %v9610_v30 }
  0x6a   : > { %v1439_v37 = vsel %vm1198_vm0, %v8709_v34, 0.0 }
  0x6b   : > { %1317 = vadd.xlane.f32.xlu1 %v1316_v35  ;;  %1314 = vadd.xlane.f32.xlu0 %v1313_v36  ;;  %v9626_v35 = vld [vmem:[%s11536_s28 + $0x1c0] sm:$0xff]   ;;  %v1442_v36 = vsel %vm1198_vm0, %v8710_v33, 0.0 }
  0x6c   : > { %v8774_v38 = vunpack.c.h.bf16 %v9626_v35  ;;  %v8773_v39 = vunpack.c.l.bf16 %v9626_v35 }
  0x6e   : > { %v1535_v42 = vsel %vm1198_vm0, %v8773_v39, 0.0 }
  0x6f   : > { %1323 = vadd.xlane.f32.xlu1 %v1322_v40  ;;  %1320 = vadd.xlane.f32.xlu0 %v1319_v41  ;;  %v9602_v40 = vld [vmem:[%s11536_s28 + $0x100] sm:$0xff]   ;;  %v1538_v41 = vsel %vm1198_vm0, %v8774_v38, 0.0 }
  0x70   : > { %v8678_v43 = vunpack.c.h.bf16 %v9602_v40  ;;  %v8677_v44 = vunpack.c.l.bf16 %v9602_v40  ;;  %v11703_v40 = vld [vmem:[%s11536_s28 + $0x188] sm:$0xff]  }
  0x72   : > { %v1394_v48 = vsel %vm1198_vm0, %v8678_v43, 0.0  ;;  %v1391_v49 = vsel %vm1198_vm0, %v8677_v44, 0.0 }
  0x73   : > { %1329 = vadd.xlane.f32.xlu1 %v1328_v45  ;;  %1326 = vadd.xlane.f32.xlu0 %v1325_v46  ;;  %v9618_v45 = vld [vmem:[%s11536_s28 + $0x180] sm:$0xff]   ;;  %v11643_v46 = vld [vmem:[%s11536_s28 + $0x148] sm:$0xff]  }
  0x74   : > { %v8741_v47 = vunpack.c.l.bf16 %v9618_v45  ;;  %v8742_v57 = vunpack.c.h.bf16 %v9618_v45  ;;  %v8714_v34 = vunpack.c.h.bf16 %v11643_v46 }
  0x76   : > { %v1487_v53 = vsel %vm1198_vm0, %v8741_v47, 0.0  ;;  %v1490_v3 = vsel %vm1198_vm0, %v8742_v57, 0.0 }
  0x77   : > { %1335 = vadd.xlane.f32.xlu1 %v1334_v50  ;;  %1332 = vadd.xlane.f32.xlu0 %v1331_v51  ;;  %v8713_v50 = vunpack.c.l.bf16 %v11643_v46  ;;  %v3824_v51 = vlaneseq }
  0x79   : > { %v1445_v54 = vsel %vm1198_vm0, %v8713_v50, 0.0  ;;  %v11657_v59 = vshrl.u32 %v3824_v51, 7 }
  0x7b   : > { %1341 = vadd.xlane.f32.xlu1 %v1340_v55  ;;  %1338 = vadd.xlane.f32.xlu0 %v1337_v56  ;;  %v11653_v55 = vand.u32 127, %v3824_v51  ;;  %v8777_v56 = vunpack.c.l.bf16 %v11649_v52  ;;  %v1448_v51 = vsel %vm1198_vm0, %v8714_v34, 0.0 }
  0x7d   : > { %v3837_v63 = vadd.s32 4294967280, %v11653_v55  ;;  %v3844_v5 = vadd.s32 4294967272, %v11653_v55  ;;  %v3872_v25 = vadd.s32 4294967240, %v11653_v55  ;;  %v3886_v44 = vadd.s32 4294967224, %v11653_v55 }
  0x7f   : > { %1347 = vadd.xlane.f32.xlu1 %v1346_v60  ;;  %1344 = vadd.xlane.f32.xlu0 %v1343_v61  ;;  %v3830_v60 = vadd.s32 4294967288, %v11653_v55  ;;  %v8838_v61 = vunpack.c.h.bf16 %v9642_v58  ;;  %v11675_v13 = vsub.s32 %v3837_v63, %v11657_v59  ;;  %v11680_v19 = vsub.s32 %v3844_v5, %v11657_v59 }
  0x80   : > { %v11725_v63 = vsub.s32 %v3886_v44, %v11657_v59  ;;  %v3928_v44 = vadd.s32 4294967176, %v11653_v55 }
  0x81   : > { %v11671_v10 = vsub.s32 %v3830_v60, %v11657_v59 }
  0x82   : > { %16013 = vst [vmem:[#allocation5_spill] sm:$0xff] %v11725_v63 }
  0x83   : > { %1353 = vadd.xlane.f32.xlu1 %v1352_v1  ;;  %1350 = vadd.xlane.f32.xlu0 %v1349_v2  ;;  %v1541_v2 = vsel %vm1198_vm0, %v8777_v56, 0.0  ;;  %v8745_v56 = vunpack.c.l.bf16 %v11703_v40 }
  0x85   : > { %v1493_v8 = vsel %vm1198_vm0, %v8745_v56, 0.0 }
  0x87   : > { %1359 = vadd.xlane.f32.xlu1 %v1358_v6  ;;  %1356 = vadd.xlane.f32.xlu0 %v1355_v7  ;;  %v11667_v6 = vsub.s32 %v11653_v55, %v11657_v59  ;;  %v3858_v7 = vadd.s32 4294967256, %v11653_v55 }
  0x89   : > { %v11686_v23 = vsub.s32 %v3858_v7, %v11657_v59 }
  0x8b   : > { %1365 = vadd.xlane.f32.xlu1 %v1364_v11  ;;  %1362 = vadd.xlane.f32.xlu0 %v1361_v12  ;;  %v3851_v11 = vadd.s32 4294967264, %v11653_v55  ;;  %v8901_v12 = vunpack.c.l.bf16 %v9658_v62 }
  0x8d   : > { %v11694_v29 = vsub.s32 %v3851_v11, %v11657_v59  ;;  %v1727_v30 = vsel %vm1198_vm0, %v8901_v12, 0.0 }
  0x8f   : > { %1371 = vadd.xlane.f32.xlu1 %v1370_v16  ;;  %1368 = vadd.xlane.f32.xlu0 %v1367_v17  ;;  %v1634_v17 = vsel %vm1198_vm0, %v8838_v61, 0.0  ;;  %v9634_v61 = vld [vmem:[%s11536_s28 + $0x200] sm:$0xff]  }
  0x90   : > { %v8805_v11 = vunpack.c.l.bf16 %v9634_v61 }
  0x93   : > { %1377 = vadd.xlane.f32.xlu1 %v1376_v21  ;;  %1374 = vadd.xlane.f32.xlu0 %v1373_v22  ;;  %v11683_v22 = vld [vmem:[%s11536_s28 + $0x108] sm:$0xff]  }
  0x94   : > { %v8681_v35 = vunpack.c.l.bf16 %v11683_v22 }
  0x97   : > { %1383 = vadd.xlane.f32.xlu1 %v1382_v26  ;;  %1380 = vadd.xlane.f32.xlu0 %v1379_v27  ;;  %v3865_v26 = vadd.s32 4294967248, %v11653_v55 }
  0x99   : > { %v11710_v43 = vsub.s32 %v3865_v26, %v11657_v59 }
  0x9b   : > { %1389 = vadd.xlane.f32.xlu1 %v1388_v31  ;;  %1386 = vadd.xlane.f32.xlu0 %v1385_v32 }
  0x9f   : > { %1443 = vadd.xlane.f32.xlu1 %v1442_v36  ;;  %1440 = vadd.xlane.f32.xlu0 %v1439_v37 }
  0xa3   : > { %1539 = vadd.xlane.f32.xlu1 %v1538_v41  ;;  %1536 = vadd.xlane.f32.xlu0 %v1535_v42  ;;  %v11707_v42 = vsub.s32 %v3872_v25, %v11657_v59 }
  0xa7   : > { %1395 = vadd.xlane.f32.xlu1 %v1394_v48  ;;  %1392 = vadd.xlane.f32.xlu0 %v1391_v49  ;;  %v3879_v48 = vadd.s32 4294967232, %v11653_v55 }
  0xab   : > { %1488 = vadd.xlane.f32.xlu1 %v1487_v53  ;;  %1446 = vadd.xlane.f32.xlu0 %v1445_v54  ;;  %v1397_v53 = vsel %vm1198_vm0, %v8681_v35, 0.0  ;;  %v8778_v54 = vunpack.c.h.bf16 %v11649_v52 }
  0xac   : > { %v1207_v0 = vpop.xlane.xlu1 %1206  ;;  %v1201_v1 = vpop.xlane.xlu0 %1200 }
  0xad   : > { %v2736_v9 = vmul.f32 0.015625, %v1201_v1  ;;  %v2738_v14 = vmul.f32 0.015625, %v1207_v0  ;;  %v3900_v0 = vadd.s32 4294967208, %v11653_v55  ;;  %v1544_v7 = vsel %vm1198_vm0, %v8778_v54, 0.0 }
  0xaf   : > { %1542 = vadd.xlane.f32.xlu1 %v1541_v2  ;;  %1491 = vadd.xlane.f32.xlu0 %v1490_v3  ;;  %v3829_v27 = vrot.slane %v2736_v9, %v11667_v6  ;;  %v3841_v31 = vrot.slane %v2738_v14, %v11675_v13  ;;  %v11731_v2 = vsub.s32 %v3879_v48, %v11657_v59  ;;  %v3893_v3 = vadd.s32 4294967216, %v11653_v55 }
  0xb0   : > { %v1210_v15 = vpop.xlane.xlu1 %1209  ;;  %v1204_v16 = vpop.xlane.xlu0 %1203  ;;  %v8806_v9 = vunpack.c.h.bf16 %v9634_v61  ;;  %v3921_v48 = vadd.s32 4294967184, %v11653_v55  ;;  %v9674_v61 = vld [vmem:[%s11536_s28 + $0x340] sm:$0xff]  }
  0xb1   : > { %v2739_v20 = vmul.f32 0.015625, %v1210_v15  ;;  %v2737_v21 = vmul.f32 0.015625, %v1204_v16  ;;  %v9650_v16 = vld [vmem:[%s11536_s28 + $0x280] sm:$0xff]   ;;  %v11749_v26 = vsub.s32 %v3893_v3, %v11657_v59 }
  0xb2   : > { %v8870_v56 = vunpack.c.h.bf16 %v9650_v16 }
  0xb3   : > { %v3834_v28 = vrot.slane %v2737_v21, %v11671_v10  ;;  %1635 = vadd.xlane.f32.xlu1 %v1634_v17  ;;  %1632 = vadd.xlane.f32.xlu0 %v1631_v18  ;;  %v3848_v36 = vrot.slane %v2739_v20, %v11680_v19  ;;  %v11739_v17 = vld [vmem:[%s11536_s28 + $0x248] sm:$0xff]   ;;  %v11743_v20 = vsub.s32 %v3900_v0, %v11657_v59  ;;  %v3914_v21 = vadd.s32 4294967192, %v11653_v55 }
  0xb4   : > { %v1216_v32 = vpop.xlane.xlu1 %1215  ;;  %v1213_v33 = vpop.xlane.xlu0 %1212  ;;  %16015 = vst [vmem:[#allocation7_spill] sm:$0xff] %v11749_v26  ;;  %v8841_v34 = vunpack.c.l.bf16 %v11739_v17  ;;  %v11777_v0 = vsub.s32 %v3928_v44, %v11657_v59 }
  0xb5   : > { %v3836_v37 = vsel %vm3835_vm1, %v3834_v28, %v3829_v27  ;;  %v2741_v38 = vmul.f32 0.015625, %v1216_v32  ;;  %v2740_v39 = vmul.f32 0.015625, %v1213_v33  ;;  %16014 = vst [vmem:[#allocation6_spill] sm:$0xff] %v11743_v20  ;;  %v3907_v27 = vadd.s32 4294967200, %v11653_v55 }
  0xb6   : > { %v3843_v41 = vsel %vm3842_vm2, %v3841_v31, %v3836_v37  ;;  %v1586_v31 = vsel %vm1198_vm0, %v8806_v9, 0.0  ;;  %v1583_v32 = vsel %vm1198_vm0, %v8805_v11, 0.0  ;;  %v8869_v33 = vunpack.c.l.bf16 %v9650_v16  ;;  %16018 = vst [vmem:[#allocation10_spill] sm:$0xff] %v11777_v0 }
  0xb7   : > { %v3862_v45 = vrot.slane %v2741_v38, %v11686_v23  ;;  %v3850_v46 = vsel %vm3849_vm3, %v3848_v36, %v3843_v41  ;;  %v3855_v47 = vrot.slane %v2740_v39, %v11694_v29  ;;  %1731 = vadd.xlane.f32.xlu1 %v1730_v24  ;;  %1728 = vadd.xlane.f32.xlu0 %v1727_v30  ;;  %v11757_v38 = vld [vmem:[%s11536_s28 + $0x2c8] sm:$0xff]   ;;  %v8965_v9 = vunpack.c.l.bf16 %v9674_v61 }
  0xb8   : > { %v1222_v49 = vpop.xlane.xlu1 %1221  ;;  %v1219_v50 = vpop.xlane.xlu0 %1218  ;;  %v11761_v41 = vsub.s32 %v3914_v21, %v11657_v59  ;;  %v8905_v54 = vunpack.c.l.bf16 %v11757_v38 }
  0xb9   : > { %v3857_v57 = vsel %vm3856_vm4, %v3855_v47, %v3850_v46  ;;  %v2743_v58 = vmul.f32 0.015625, %v1222_v49  ;;  %v2742_v60 = vmul.f32 0.015625, %v1219_v50  ;;  %v11767_v47 = vsub.s32 %v3907_v27, %v11657_v59 }
  0xba   : > { %v3864_v62 = vsel %vm3863_vm5, %v3862_v45, %v3857_v57  ;;  %16016 = vst [vmem:[#allocation8_spill] sm:$0xff] %v11761_v41  ;;  %v1823_v27 = vsel %vm1198_vm0, %v8965_v9, 0.0 }
  0xbb   : > { %v3876_v1 = vrot.slane %v2743_v58, %v11707_v42  ;;  %v3869_v52 = vrot.slane %v2742_v60, %v11710_v43  ;;  %1449 = vadd.xlane.f32.xlu1 %v1448_v51  ;;  %1398 = vadd.xlane.f32.xlu0 %v1397_v53  ;;  %16017 = vst [vmem:[#allocation9_spill] sm:$0xff] %v11767_v47  ;;  %v1679_v51 = vsel %vm1198_vm0, %v8869_v33, 0.0  ;;  %v1637_v53 = vsel %vm1198_vm0, %v8841_v34, 0.0  ;;  %v11795_v34 = vld [vmem:[%s11536_s28 + $0x150] sm:$0xff]  }
  0xbc   : > { %v1228_v4 = vpop.xlane.xlu1 %1227  ;;  %v1225_v5 = vpop.xlane.xlu0 %1224 }
  0xbd   : > { %v3871_v12 = vsel %vm3870_vm6, %v3869_v52, %v3864_v62  ;;  %v2745_v14 = vmul.f32 0.015625, %v1228_v4  ;;  %v2744_v15 = vmul.f32 0.015625, %v1225_v5  ;;  %v11782_v52 = vsub.s32 %v3921_v48, %v11657_v59 }
  0xbe   : > { %v3878_v18 = vsel %vm3877_vm7, %v3876_v1, %v3871_v12  ;;  %v1733_v5 = vsel %vm1198_vm0, %v8905_v54, 0.0  ;;  %v8717_v48 = vunpack.c.l.bf16 %v11795_v34  ;;  %v11808_v54 = vld [vmem:[%s11536_s28 + $0x1d0] sm:$0xff]  }
  0xbf   : > { %v3890_v24 = vrot.slane %v2745_v14, %v11725_v63  ;;  %v3883_v25 = vrot.slane %v2744_v15, %v11731_v2  ;;  %1545 = vadd.xlane.f32.xlu1 %v1544_v7  ;;  %1494 = vadd.xlane.f32.xlu0 %v1493_v8  ;;  %16019 = vst [vmem:[#allocation11_spill] sm:$0xff] %v11782_v52  ;;  %v1682_v7 = vsel %vm1198_vm0, %v8870_v56, 0.0  ;;  %v8966_v8 = vunpack.c.h.bf16 %v9674_v61  ;;  %v9690_v15 = vld [vmem:[%s11536_s28 + $0x3c0] sm:$0xff]  }
  0xc0   : > { %v1234_v28 = vpop.xlane.xlu1 %1233  ;;  %v1231_v30 = vpop.xlane.xlu0 %1230  ;;  %v1451_v61 = vsel %vm1198_vm0, %v8717_v48, 0.0 }
  0xc1   : > { %v3885_v35 = vsel %vm3884_vm8, %v3883_v25, %v3878_v18  ;;  %v2747_v36 = vmul.f32 0.015625, %v1234_v28  ;;  %v2746_v37 = vmul.f32 0.015625, %v1231_v30  ;;  %v1826_v25 = vsel %vm1198_vm0, %v8966_v8, 0.0 }
  0xc2   : > { %v3892_v39 = vsel %vm3891_vm9, %v3890_v24, %v3885_v35  ;;  %v9030_v28 = vunpack.c.h.bf16 %v9690_v15  ;;  %v9029_v30 = vunpack.c.l.bf16 %v9690_v15  ;;  %v8842_v15 = vunpack.c.h.bf16 %v11739_v17 }
  0xc3   : > { %v3904_v45 = vrot.slane %v2747_v36, %v11743_v20  ;;  %v3897_v46 = vrot.slane %v2746_v37, %v11749_v26  ;;  %1587 = vadd.xlane.f32.xlu1 %v1586_v31  ;;  %1584 = vadd.xlane.f32.xlu0 %v1583_v32 }
  0xc4   : > { %v1240_v49 = vpop.xlane.xlu1 %1239  ;;  %v1237_v50 = vpop.xlane.xlu0 %1236  ;;  %v1640_v17 = vsel %vm1198_vm0, %v8842_v15, 0.0 }
  0xc5   : > { %v3899_v57 = vsel %vm3898_vm10, %v3897_v46, %v3892_v39  ;;  %v2749_v58 = vmul.f32 0.015625, %v1240_v49  ;;  %v2748_v60 = vmul.f32 0.015625, %v1237_v50  ;;  %v1919_v46 = vsel %vm1198_vm0, %v9029_v30, 0.0 }
  0xc6   : > { %v3906_v62 = vsel %vm3905_vm11, %v3904_v45, %v3899_v57  ;;  %v1922_v45 = vsel %vm1198_vm0, %v9030_v28, 0.0  ;;  %v8682_v49 = vunpack.c.h.bf16 %v11683_v22  ;;  %v8781_v22 = vunpack.c.l.bf16 %v11808_v54 }
  0xc7   : > { %v3918_v55 = vrot.slane %v2749_v58, %v11761_v41  ;;  %v3911_v1 = vrot.slane %v2748_v60, %v11767_v47  ;;  %1680 = vadd.xlane.f32.xlu1 %v1679_v51  ;;  %1638 = vadd.xlane.f32.xlu0 %v1637_v53 }
  0xc8   : > { %v1246_v3 = vpop.xlane.xlu1 %1245  ;;  %v1243_v4 = vpop.xlane.xlu0 %1242 }
  0xc9   : > { %v3913_v11 = vsel %vm3912_vm12, %v3911_v1, %v3906_v62  ;;  %v2751_v12 = vmul.f32 0.015625, %v1246_v3  ;;  %v2750_v14 = vmul.f32 0.015625, %v1243_v4  ;;  %v1400_v62 = vsel %vm1198_vm0, %v8682_v49, 0.0 }
  0xca   : > { %v3920_v16 = vsel %vm3919_vm13, %v3918_v55, %v3913_v11  ;;  %v8746_v55 = vunpack.c.h.bf16 %v11703_v40 }
  0xcb   : > { %v3932_v59 = vrot.slane %v2751_v12, %v11777_v0  ;;  %v3925_v18 = vrot.slane %v2750_v14, %v11782_v52  ;;  %1734 = vadd.xlane.f32.xlu1 %v1733_v5  ;;  %1683 = vadd.xlane.f32.xlu0 %v1682_v7  ;;  %v11818_v5 = vld [vmem:[%s11536_s28 + $0x208] sm:$0xff]   ;;  %v1547_v14 = vsel %vm1198_vm0, %v8781_v22, 0.0 }
  0xcc   : > { %v1252_v21 = vpop.xlane.xlu1 %1251  ;;  %v1249_v24 = vpop.xlane.xlu0 %1248  ;;  %v1496_v40 = vsel %vm1198_vm0, %v8746_v55, 0.0  ;;  %v11848_v22 = vld [vmem:[%s11536_s28 + $0x348] sm:$0xff]  }
  0xcd   : > { %v3927_v31 = vsel %vm3926_vm14, %v3925_v18, %v3920_v16  ;;  %v2753_v32 = vmul.f32 0.015625, %v1252_v21  ;;  %v2752_v33 = vmul.f32 0.015625, %v1249_v24  ;;  %v8809_v16 = vunpack.c.l.bf16 %v11818_v5  ;;  %v11829_v24 = vld [vmem:[%s11536_s28 + $0x288] sm:$0xff]  }
  0xce   : > { %v11798_v35 = vsel %vm3933_vm15, %v3932_v59, %v3927_v31 }
  0xcf   : > { %16020 = vst [vmem:[#allocation12_spill] sm:$0xff] %v11798_v35  ;;  %v3942_v36 = vrot.slane %v2753_v32, %v11671_v10  ;;  %v3938_v37 = vrot.slane %v2752_v33, %v11667_v6  ;;  %1827 = vadd.xlane.f32.xlu1 %v1826_v25  ;;  %1824 = vadd.xlane.f32.xlu0 %v1823_v27  ;;  %v1589_v32 = vsel %vm1198_vm0, %v8809_v16, 0.0  ;;  %v8906_v33 = vunpack.c.h.bf16 %v11757_v38  ;;  %v11858_v16 = vld [vmem:[%s11536_s28 + $0x3c8] sm:$0xff]  }
  0xd0   : > { %v1258_v39 = vpop.xlane.xlu1 %1257  ;;  %v1255_v44 = vpop.xlane.xlu0 %1254 }
  0xd1   : > { %v3943_v50 = vsel %vm3835_vm1, %v3942_v36, %v3938_v37  ;;  %v2755_v51 = vmul.f32 0.015625, %v1258_v39  ;;  %v2754_v53 = vmul.f32 0.015625, %v1255_v44  ;;  %v8873_v36 = vunpack.c.l.bf16 %v11829_v24 }
  0xd2   : > { %v1736_v38 = vsel %vm1198_vm0, %v8906_v33, 0.0 }
  0xd3   : > { %v3952_v56 = vrot.slane %v2755_v51, %v11680_v19  ;;  %v3947_v57 = vrot.slane %v2754_v53, %v11675_v13  ;;  %1923 = vadd.xlane.f32.xlu1 %v1922_v45  ;;  %1920 = vadd.xlane.f32.xlu0 %v1919_v46  ;;  %v9666_v45 = vld [vmem:[%s11536_s28 + $0x300] sm:$0xff]   ;;  %v1685_v53 = vsel %vm1198_vm0, %v8873_v36, 0.0 }
  0xd4   : > { %v1264_v58 = vpop.xlane.xlu1 %1263  ;;  %v1261_v60 = vpop.xlane.xlu0 %1260 }
  0xd5   : > { %v3948_v1 = vsel %vm3842_vm2, %v3947_v57, %v3943_v50  ;;  %v2757_v3 = vmul.f32 0.015625, %v1264_v58  ;;  %v2756_v4 = vmul.f32 0.015625, %v1261_v60  ;;  %v8933_v57 = vunpack.c.l.bf16 %v9666_v45 }
  0xd6   : > { %v3953_v7 = vsel %vm3849_vm3, %v3952_v56, %v3948_v1  ;;  %v8934_v56 = vunpack.c.h.bf16 %v9666_v45 }
  0xd7   : > { %v3962_v8 = vrot.slane %v2757_v3, %v11686_v23  ;;  %v3957_v9 = vrot.slane %v2756_v4, %v11694_v29  ;;  %1452 = vadd.xlane.f32.xlu1 %v1451_v61  ;;  %1401 = vadd.xlane.f32.xlu0 %v1400_v62  ;;  %v9682_v62 = vld [vmem:[%s11536_s28 + $0x380] sm:$0xff]  }
  0xd8   : > { %v1270_v11 = vpop.xlane.xlu1 %1269  ;;  %v1267_v12 = vpop.xlane.xlu0 %1266 }
  0xd9   : > { %v3958_v59 = vsel %vm3856_vm4, %v3957_v9, %v3953_v7  ;;  %v2759_v18 = vmul.f32 0.015625, %v1270_v11  ;;  %v2758_v21 = vmul.f32 0.015625, %v1267_v12  ;;  %v1775_v9 = vsel %vm1198_vm0, %v8933_v57, 0.0 }
  0xda   : > { %v3963_v25 = vsel %vm3863_vm5, %v3962_v8, %v3958_v59  ;;  %v1778_v8 = vsel %vm1198_vm0, %v8934_v56, 0.0  ;;  %v8997_v11 = vunpack.c.l.bf16 %v9682_v62  ;;  %v8969_v12 = vunpack.c.l.bf16 %v11848_v22 }
  0xdb   : > { %v3972_v27 = vrot.slane %v2759_v18, %v11707_v42  ;;  %v3967_v28 = vrot.slane %v2758_v21, %v11710_v43  ;;  %1548 = vadd.xlane.f32.xlu1 %v1547_v14  ;;  %1497 = vadd.xlane.f32.xlu0 %v1496_v40 }
  0xdc   : > { %v1276_v30 = vpop.xlane.xlu1 %1275  ;;  %v1273_v31 = vpop.xlane.xlu0 %1272 }
  0xdd   : > { %v3968_v37 = vsel %vm3870_vm6, %v3967_v28, %v3963_v25  ;;  %v2761_v39 = vmul.f32 0.015625, %v1276_v30  ;;  %v2760_v44 = vmul.f32 0.015625, %v1273_v31  ;;  %v1871_v28 = vsel %vm1198_vm0, %v8997_v11, 0.0 }
  0xde   : > { %v3973_v46 = vsel %vm3877_vm7, %v3972_v27, %v3968_v37  ;;  %v1829_v30 = vsel %vm1198_vm0, %v8969_v12, 0.0  ;;  %v9033_v31 = vunpack.c.l.bf16 %v11858_v16  ;;  %v9706_v37 = vld [vmem:[%s11536_s28 + $0x440] sm:$0xff]  }
  0xdf   : > { %v3982_v48 = vrot.slane %v2761_v39, %v11725_v63  ;;  %v3977_v49 = vrot.slane %v2760_v44, %v11731_v2  ;;  %1641 = vadd.xlane.f32.xlu1 %v1640_v17  ;;  %1590 = vadd.xlane.f32.xlu0 %v1589_v32  ;;  %v8998_v17 = vunpack.c.h.bf16 %v9682_v62 }
  0xe0   : > { %v1282_v50 = vpop.xlane.xlu1 %1281  ;;  %v1279_v51 = vpop.xlane.xlu0 %1278 }
  0xe1   : > { %v3978_v58 = vsel %vm3884_vm8, %v3977_v49, %v3973_v46  ;;  %v2763_v60 = vmul.f32 0.015625, %v1282_v50  ;;  %v2762_v61 = vmul.f32 0.015625, %v1279_v51  ;;  %v1925_v49 = vsel %vm1198_vm0, %v9033_v31, 0.0 }
  0xe2   : > { %v3983_v55 = vsel %vm3891_vm9, %v3982_v48, %v3978_v58  ;;  %v1874_v50 = vsel %vm1198_vm0, %v8998_v17, 0.0  ;;  %v9094_v51 = vunpack.c.h.bf16 %v9706_v37  ;;  %v9722_v58 = vld [vmem:[%s11536_s28 + $0x4c0] sm:$0xff]  }
  0xe3   : > { %v3992_v1 = vrot.slane %v2763_v60, %v11743_v20  ;;  %v3987_v3 = vrot.slane %v2762_v61, %v11749_v26  ;;  %1737 = vadd.xlane.f32.xlu1 %v1736_v38  ;;  %1686 = vadd.xlane.f32.xlu0 %v1685_v53  ;;  %v9093_v38 = vunpack.c.l.bf16 %v9706_v37 }
  0xe4   : > { %v1288_v4 = vpop.xlane.xlu1 %1287  ;;  %v1285_v7 = vpop.xlane.xlu0 %1284 }
  0xe5   : > { %v3988_v14 = vsel %vm3898_vm10, %v3987_v3, %v3983_v55  ;;  %v2765_v40 = vmul.f32 0.015625, %v1288_v4  ;;  %v2764_v15 = vmul.f32 0.015625, %v1285_v7  ;;  %v2018_v3 = vsel %vm1198_vm0, %v9094_v51, 0.0 }
  0xe6   : > { %v3993_v59 = vsel %vm3905_vm11, %v3992_v1, %v3988_v14  ;;  %v2015_v4 = vsel %vm1198_vm0, %v9093_v38, 0.0  ;;  %v9158_v7 = vunpack.c.h.bf16 %v9722_v58  ;;  %v11884_v14 = vld [vmem:[%s11536_s28 + $0x110] sm:$0xff]  }
  0xe7   : > { %v4002_v18 = vrot.slane %v2765_v40, %v11761_v41  ;;  %v3997_v21 = vrot.slane %v2764_v15, %v11767_v47  ;;  %1779 = vadd.xlane.f32.xlu1 %v1778_v8  ;;  %1776 = vadd.xlane.f32.xlu0 %v1775_v9  ;;  %v9157_v8 = vunpack.c.l.bf16 %v9722_v58  ;;  %v11905_v38 = vld [vmem:[%s11536_s28 + $0x250] sm:$0xff]  }
  0xe8   : > { %v1294_v25 = vpop.xlane.xlu1 %1293  ;;  %v1291_v27 = vpop.xlane.xlu0 %1290 }
  0xe9   : > { %v3998_v32 = vsel %vm3912_vm12, %v3997_v21, %v3993_v59  ;;  %v2767_v33 = vmul.f32 0.015625, %v1294_v25  ;;  %v2766_v36 = vmul.f32 0.015625, %v1291_v27  ;;  %v2114_v21 = vsel %vm1198_vm0, %v9158_v7, 0.0 }
  0xea   : > { %v4003_v39 = vsel %vm3919_vm13, %v4002_v18, %v3998_v32  ;;  %v2111_v25 = vsel %vm1198_vm0, %v9157_v8, 0.0  ;;  %v8718_v27 = vunpack.c.h.bf16 %v11795_v34  ;;  %v11894_v32 = vld [vmem:[%s11536_s28 + $0x190] sm:$0xff]  }
  0xeb   : > { %v4012_v44 = vrot.slane %v2767_v33, %v11777_v0  ;;  %v4007_v45 = vrot.slane %v2766_v36, %v11782_v52  ;;  %1872 = vadd.xlane.f32.xlu1 %v1871_v28  ;;  %1830 = vadd.xlane.f32.xlu0 %v1829_v30  ;;  %v8685_v28 = vunpack.c.l.bf16 %v11884_v14  ;;  %v11916_v8 = vld [vmem:[%s11536_s28 + $0x2d0] sm:$0xff]  }
  0xec   : > { %v1300_v46 = vpop.xlane.xlu1 %1299  ;;  %v1297_v48 = vpop.xlane.xlu0 %1296  ;;  %v1454_v34 = vsel %vm1198_vm0, %v8718_v27, 0.0 }
  0xed   : > { %v4008_v53 = vsel %vm3926_vm14, %v4007_v45, %v4003_v39  ;;  %v2769_v56 = vmul.f32 0.015625, %v1300_v46  ;;  %v2768_v57 = vmul.f32 0.015625, %v1297_v48  ;;  %v1403_v45 = vsel %vm1198_vm0, %v8685_v28, 0.0 }
  0xee   : > { %v11876_v60 = vsel %vm3933_vm15, %v4012_v44, %v4008_v53  ;;  %v8782_v46 = vunpack.c.h.bf16 %v11808_v54  ;;  %v8749_v48 = vunpack.c.l.bf16 %v11894_v32 }
  0xef   : > { %16021 = vst [vmem:[#allocation13_spill] sm:$0xff] %v11876_v60  ;;  %v4021_v61 = vrot.slane %v2769_v56, %v11671_v10  ;;  %v4017_v62 = vrot.slane %v2768_v57, %v11667_v6  ;;  %1926 = vadd.xlane.f32.xlu1 %v1925_v49  ;;  %1875 = vadd.xlane.f32.xlu0 %v1874_v50 }
  0xf0   : > { %v1306_v55 = vpop.xlane.xlu1 %1305  ;;  %v1303_v1 = vpop.xlane.xlu0 %1302  ;;  %v1550_v54 = vsel %vm1198_vm0, %v8782_v46, 0.0 }
  0xf1   : > { %v4022_v9 = vsel %vm3835_vm1, %v4021_v61, %v4017_v62  ;;  %v2771_v11 = vmul.f32 0.015625, %v1306_v55  ;;  %v2770_v12 = vmul.f32 0.015625, %v1303_v1  ;;  %v1499_v62 = vsel %vm1198_vm0, %v8749_v48, 0.0 }
  0xf2   : > { %v8845_v55 = vunpack.c.l.bf16 %v11905_v38  ;;  %v8810_v1 = vunpack.c.h.bf16 %v11818_v5 }
  0xf3   : > { %v4031_v40 = vrot.slane %v2771_v11, %v11680_v19  ;;  %v4026_v15 = vrot.slane %v2770_v12, %v11675_v13  ;;  %2019 = vadd.xlane.f32.xlu1 %v2018_v3  ;;  %2016 = vadd.xlane.f32.xlu0 %v2015_v4 }
  0xf4   : > { %v1312_v59 = vpop.xlane.xlu1 %1311  ;;  %v1309_v18 = vpop.xlane.xlu0 %1308  ;;  %v1592_v5 = vsel %vm1198_vm0, %v8810_v1, 0.0 }
  0xf5   : > { %v4027_v30 = vsel %vm3842_vm2, %v4026_v15, %v4022_v9  ;;  %v2773_v31 = vmul.f32 0.015625, %v1312_v59  ;;  %v2772_v17 = vmul.f32 0.015625, %v1309_v18  ;;  %v1643_v59 = vsel %vm1198_vm0, %v8845_v55, 0.0 }
  0xf6   : > { %v4032_v33 = vsel %vm3849_vm3, %v4031_v40, %v4027_v30  ;;  %v8909_v18 = vunpack.c.l.bf16 %v11916_v8  ;;  %v11927_v30 = vld [vmem:[%s11536_s28 + $0x308] sm:$0xff]  }
  0xf7   : > { %v4041_v36 = vrot.slane %v2773_v31, %v11686_v23  ;;  %v4036_v37 = vrot.slane %v2772_v17, %v11694_v29  ;;  %2115 = vadd.xlane.f32.xlu1 %v2114_v21  ;;  %2112 = vadd.xlane.f32.xlu0 %v2111_v25  ;;  %v8874_v21 = vunpack.c.h.bf16 %v11829_v24 }
  0xf8   : > { %v1318_v39 = vpop.xlane.xlu1 %1317  ;;  %v1315_v44 = vpop.xlane.xlu0 %1314 }
  0xf9   : > { %v4037_v49 = vsel %vm3856_vm4, %v4036_v37, %v4032_v33  ;;  %v2775_v50 = vmul.f32 0.015625, %v1318_v39  ;;  %v2774_v51 = vmul.f32 0.015625, %v1315_v44  ;;  %v1739_v39 = vsel %vm1198_vm0, %v8909_v18, 0.0 }
  0xfa   : > { %v4042_v53 = vsel %vm3863_vm5, %v4041_v36, %v4037_v49  ;;  %v1688_v24 = vsel %vm1198_vm0, %v8874_v21, 0.0  ;;  %v8970_v44 = vunpack.c.h.bf16 %v11848_v22  ;;  %v11938_v49 = vld [vmem:[%s11536_s28 + $0x388] sm:$0xff]  }
  0xfb   : > { %v4051_v56 = vrot.slane %v2775_v50, %v11707_v42  ;;  %v4046_v57 = vrot.slane %v2774_v51, %v11710_v43  ;;  %1455 = vadd.xlane.f32.xlu1 %v1454_v34  ;;  %1404 = vadd.xlane.f32.xlu0 %v1403_v45  ;;  %v8937_v34 = vunpack.c.l.bf16 %v11927_v30 }
  0xfc   : > { %v1324_v58 = vpop.xlane.xlu1 %1323  ;;  %v1321_v61 = vpop.xlane.xlu0 %1320  ;;  %v1832_v22 = vsel %vm1198_vm0, %v8970_v44, 0.0 }
  0xfd   : > { %v4047_v3 = vsel %vm3870_vm6, %v4046_v57, %v4042_v53  ;;  %v2777_v4 = vmul.f32 0.015625, %v1324_v58  ;;  %v2776_v7 = vmul.f32 0.015625, %v1321_v61  ;;  %v1781_v58 = vsel %vm1198_vm0, %v8937_v34, 0.0 }
  0xfe   : > { %v4052_v9 = vsel %vm3877_vm7, %v4051_v56, %v4047_v3  ;;  %v9034_v61 = vunpack.c.h.bf16 %v11858_v16  ;;  %v9698_v3 = vld [vmem:[%s11536_s28 + $0x400] sm:$0xff]  }
  0xff   : > { %v4061_v11 = vrot.slane %v2777_v4, %v11725_v63  ;;  %v4056_v12 = vrot.slane %v2776_v7, %v11731_v2  ;;  %1551 = vadd.xlane.f32.xlu1 %v1550_v54  ;;  %1500 = vadd.xlane.f32.xlu0 %v1499_v62  ;;  %v9001_v54 = vunpack.c.l.bf16 %v11938_v49 }
 0x100   : > { %v1330_v40 = vpop.xlane.xlu1 %1329  ;;  %v1327_v15 = vpop.xlane.xlu0 %1326  ;;  %v1928_v16 = vsel %vm1198_vm0, %v9034_v61, 0.0 }
 0x101   : > { %v4057_v25 = vsel %vm3884_vm8, %v4056_v12, %v4052_v9  ;;  %v2779_v27 = vmul.f32 0.015625, %v1330_v40  ;;  %v2778_v28 = vmul.f32 0.015625, %v1327_v15  ;;  %v1877_v40 = vsel %vm1198_vm0, %v9001_v54, 0.0 }
 0x102   : > { %v4062_v31 = vsel %vm3891_vm9, %v4061_v11, %v4057_v25  ;;  %v9062_v15 = vunpack.c.h.bf16 %v9698_v3  ;;  %v9714_v25 = vld [vmem:[%s11536_s28 + $0x480] sm:$0xff]  }
 0x103   : > { %v4071_v17 = vrot.slane %v2779_v27, %v11743_v20  ;;  %v4066_v33 = vrot.slane %v2778_v28, %v11749_v26  ;;  %1644 = vadd.xlane.f32.xlu1 %v1643_v59  ;;  %1593 = vadd.xlane.f32.xlu0 %v1592_v5  ;;  %v9061_v59 = vunpack.c.l.bf16 %v9698_v3  ;;  %v11957_v27 = vld [vmem:[%s11536_s28 + $0x448] sm:$0xff]   ;;  %v9126_v61 = vunpack.c.h.bf16 %v9714_v25 }
 0x104   : > { %v1336_v36 = vpop.xlane.xlu1 %1335  ;;  %v1333_v37 = vpop.xlane.xlu0 %1332  ;;  %v9097_v44 = vunpack.c.l.bf16 %v11957_v27 }
 0x105   : > { %v4067_v45 = vsel %vm3898_vm10, %v4066_v33, %v4062_v31  ;;  %v2781_v46 = vmul.f32 0.015625, %v1336_v36  ;;  %v2780_v48 = vmul.f32 0.015625, %v1333_v37  ;;  %v1970_v37 = vsel %vm1198_vm0, %v9062_v15, 0.0 }
 0x106   : > { %v4072_v50 = vsel %vm3905_vm11, %v4071_v17, %v4067_v45 }
 0x107   : > { %v4081_v51 = vrot.slane %v2781_v46, %v11761_v41  ;;  %v4076_v53 = vrot.slane %v2780_v48, %v11767_v47  ;;  %1740 = vadd.xlane.f32.xlu1 %v1739_v39  ;;  %1689 = vadd.xlane.f32.xlu0 %v1688_v24  ;;  %v1967_v39 = vsel %vm1198_vm0, %v9061_v59, 0.0  ;;  %v9125_v24 = vunpack.c.l.bf16 %v9714_v25  ;;  %v11969_v48 = vld [vmem:[%s11536_s28 + $0x4c8] sm:$0xff]  }
 0x108   : > { %v1342_v56 = vpop.xlane.xlu1 %1341  ;;  %v1339_v57 = vpop.xlane.xlu0 %1338 }
 0x109   : > { %v4077_v62 = vsel %vm3912_vm12, %v4076_v53, %v4072_v50  ;;  %v2783_v55 = vmul.f32 0.015625, %v1342_v56  ;;  %v2782_v1 = vmul.f32 0.015625, %v1339_v57  ;;  %v2063_v57 = vsel %vm1198_vm0, %v9125_v24, 0.0 }
 0x10a   : > { %v4082_v4 = vsel %vm3919_vm13, %v4081_v51, %v4077_v62 }
 0x10b   : > { %v4091_v7 = vrot.slane %v2783_v55, %v11777_v0  ;;  %v4086_v9 = vrot.slane %v2782_v1, %v11782_v52  ;;  %1833 = vadd.xlane.f32.xlu1 %v1832_v22  ;;  %1782 = vadd.xlane.f32.xlu0 %v1781_v58  ;;  %v2021_v22 = vsel %vm1198_vm0, %v9097_v44, 0.0  ;;  %v9161_v58 = vunpack.c.l.bf16 %v11969_v48  ;;  %v9738_v1 = vld [vmem:[%s11536_s28 + $0x540] sm:$0xff]  }
 0x10c   : > { %v1348_v11 = vpop.xlane.xlu1 %1347  ;;  %v1345_v12 = vpop.xlane.xlu0 %1344  ;;  %v9221_v15 = vunpack.c.l.bf16 %v9738_v1 }
 0x10d   : > { %v4087_v5 = vsel %vm3926_vm14, %v4086_v9, %v4082_v4  ;;  %v2785_v18 = vmul.f32 0.015625, %v1348_v11  ;;  %v2784_v21 = vmul.f32 0.015625, %v1345_v12  ;;  %v2117_v12 = vsel %vm1198_vm0, %v9161_v58, 0.0 }
 0x10e   : > { %v11960_v28 = vsel %vm3933_vm15, %v4091_v7, %v4087_v5 }
 0x10f   : > { %16022 = vst [vmem:[#allocation14_spill] sm:$0xff] %v11960_v28  ;;  %v4100_v31 = vrot.slane %v2785_v18, %v11671_v10  ;;  %v4096_v17 = vrot.slane %v2784_v21, %v11667_v6  ;;  %1929 = vadd.xlane.f32.xlu1 %v1928_v16  ;;  %1878 = vadd.xlane.f32.xlu0 %v1877_v40  ;;  %v2066_v16 = vsel %vm1198_vm0, %v9126_v61, 0.0  ;;  %v9222_v40 = vunpack.c.h.bf16 %v9738_v1  ;;  %v9754_v21 = vld [vmem:[%s11536_s28 + $0x5c0] sm:$0xff]  }
 0x110   : > { %v1354_v33 = vpop.xlane.xlu1 %1353  ;;  %v1351_v36 = vpop.xlane.xlu0 %1350  ;;  %v9286_v24 = vunpack.c.h.bf16 %v9754_v21  ;;  %v9285_v44 = vunpack.c.l.bf16 %v9754_v21 }
 0x111   : > { %v4101_v34 = vsel %vm3835_vm1, %v4100_v31, %v4096_v17  ;;  %v2787_v45 = vmul.f32 0.015625, %v1354_v33  ;;  %v2786_v46 = vmul.f32 0.015625, %v1351_v36 }
 0x112   : > { %v2306_v58 = vsel %vm1198_vm0, %v9286_v24, 0.0  ;;  %v2303_v61 = vsel %vm1198_vm0, %v9285_v44, 0.0  ;;  %v8846_v24 = vunpack.c.h.bf16 %v11905_v38 }
 0x113   : > { %v4110_v50 = vrot.slane %v2787_v45, %v11680_v19  ;;  %v4105_v51 = vrot.slane %v2786_v46, %v11675_v13  ;;  %1971 = vadd.xlane.f32.xlu1 %v1970_v37  ;;  %1968 = vadd.xlane.f32.xlu0 %v1967_v39  ;;  %v2210_v37 = vsel %vm1198_vm0, %v9222_v40, 0.0  ;;  %v2207_v39 = vsel %vm1198_vm0, %v9221_v15, 0.0 }
 0x114   : > { %v1360_v53 = vpop.xlane.xlu1 %1359  ;;  %v1357_v56 = vpop.xlane.xlu0 %1356  ;;  %v1646_v38 = vsel %vm1198_vm0, %v8846_v24, 0.0  ;;  %v9002_v24 = vunpack.c.h.bf16 %v11938_v49  ;;  %v9098_v49 = vunpack.c.h.bf16 %v11957_v27 }
 0x115   : > { %v4106_v54 = vsel %vm3842_vm2, %v4105_v51, %v4101_v34  ;;  %v2789_v62 = vmul.f32 0.015625, %v1360_v53  ;;  %v2788_v55 = vmul.f32 0.015625, %v1357_v56 }
 0x116   : > { %v4111_v3 = vsel %vm3849_vm3, %v4110_v50, %v4106_v54  ;;  %v11992_v50 = vld [vmem:[%s11536_s28 + $0x158] sm:$0xff]  }
 0x117   : > { %v4120_v4 = vrot.slane %v2789_v62, %v11686_v23  ;;  %v4115_v7 = vrot.slane %v2788_v55, %v11694_v29  ;;  %2064 = vadd.xlane.f32.xlu1 %v2063_v57  ;;  %2022 = vadd.xlane.f32.xlu0 %v2021_v22  ;;  %v8721_v54 = vunpack.c.l.bf16 %v11992_v50  ;;  %v8686_v62 = vunpack.c.h.bf16 %v11884_v14 }
 0x118   : > { %v1366_v9 = vpop.xlane.xlu1 %1365  ;;  %v1363_v11 = vpop.xlane.xlu0 %1362 }
 0x119   : > { %v4116_v59 = vsel %vm3856_vm4, %v4115_v7, %v4111_v3  ;;  %v2791_v5 = vmul.f32 0.015625, %v1366_v9  ;;  %v2790_v18 = vmul.f32 0.015625, %v1363_v11  ;;  %v1457_v40 = vsel %vm1198_vm0, %v8721_v54, 0.0 }
 0x11a   : > { %v4121_v25 = vsel %vm3863_vm5, %v4120_v4, %v4116_v59  ;;  %v12003_v4 = vld [vmem:[%s11536_s28 + $0x1d8] sm:$0xff]   ;;  %v1406_v14 = vsel %vm1198_vm0, %v8686_v62, 0.0  ;;  %v8750_v59 = vunpack.c.h.bf16 %v11894_v32  ;;  %v8910_v54 = vunpack.c.h.bf16 %v11916_v8 }
 0x11b   : > { %v4130_v31 = vrot.slane %v2791_v5, %v11707_v42  ;;  %v4125_v17 = vrot.slane %v2790_v18, %v11710_v43  ;;  %2118 = vadd.xlane.f32.xlu1 %v2117_v12  ;;  %2067 = vadd.xlane.f32.xlu0 %v2066_v16  ;;  %v8785_v15 = vunpack.c.l.bf16 %v12003_v4 }
 0x11c   : > { %v1372_v33 = vpop.xlane.xlu1 %1371  ;;  %v1369_v36 = vpop.xlane.xlu0 %1368  ;;  %v1502_v32 = vsel %vm1198_vm0, %v8750_v59, 0.0  ;;  %v8938_v59 = vunpack.c.h.bf16 %v11927_v30 }
 0x11d   : > { %v4126_v34 = vsel %vm3870_vm6, %v4125_v17, %v4121_v25  ;;  %v2793_v45 = vmul.f32 0.015625, %v1372_v33  ;;  %v2792_v46 = vmul.f32 0.015625, %v1369_v36  ;;  %v12014_v25 = vld [vmem:[%s11536_s28 + $0x210] sm:$0xff]  }
 0x11e   : > { %v4131_v51 = vsel %vm3877_vm7, %v4130_v31, %v4126_v34  ;;  %v8813_v44 = vunpack.c.l.bf16 %v12014_v25 }
 0x11f   : > { %v4140_v53 = vrot.slane %v2793_v45, %v11725_v63  ;;  %v4135_v56 = vrot.slane %v2792_v46, %v11731_v2  ;;  %2211 = vadd.xlane.f32.xlu1 %v2210_v37  ;;  %2208 = vadd.xlane.f32.xlu0 %v2207_v39  ;;  %v1553_v39 = vsel %vm1198_vm0, %v8785_v15, 0.0  ;;  %v12876_v63 = vld [vmem:[%s11536_s28 + $0x418] sm:$0xff]  }
 0x120   : > { %v1378_v57 = vpop.xlane.xlu1 %1377  ;;  %v1375_v22 = vpop.xlane.xlu0 %1374  ;;  %16024 = vst [vmem:[#allocation16_spill] sm:$0xff] %v12876_v63 }
 0x121   : > { %v4136_v55 = vsel %vm3884_vm8, %v4135_v56, %v4131_v51  ;;  %v2795_v1 = vmul.f32 0.015625, %v1378_v57  ;;  %v2794_v3 = vmul.f32 0.015625, %v1375_v22  ;;  %v12025_v51 = vld [vmem:[%s11536_s28 + $0x290] sm:$0xff]  }
 0x122   : > { %v4141_v7 = vsel %vm3891_vm9, %v4140_v53, %v4136_v55  ;;  %v8877_v62 = vunpack.c.l.bf16 %v12025_v51 }
 0x123   : > { %v4150_v9 = vrot.slane %v2795_v1, %v11743_v20  ;;  %v4145_v11 = vrot.slane %v2794_v3, %v11749_v26  ;;  %2307 = vadd.xlane.f32.xlu1 %v2306_v58  ;;  %2304 = vadd.xlane.f32.xlu0 %v2303_v61  ;;  %v1595_v61 = vsel %vm1198_vm0, %v8813_v44, 0.0 }
 0x124   : > { %v1384_v12 = vpop.xlane.xlu1 %1383  ;;  %v1381_v16 = vpop.xlane.xlu0 %1380 }
 0x125   : > { %v4146_v5 = vsel %vm3898_vm10, %v4145_v11, %v4141_v7  ;;  %v2797_v18 = vmul.f32 0.015625, %v1384_v12  ;;  %v2796_v21 = vmul.f32 0.015625, %v1381_v16  ;;  %v12036_v7 = vld [vmem:[%s11536_s28 + $0x350] sm:$0xff]  }
 0x126   : > { %v4151_v31 = vsel %vm3905_vm11, %v4150_v9, %v4146_v5  ;;  %v8973_v15 = vunpack.c.l.bf16 %v12036_v7 }
 0x127   : > { %v4160_v17 = vrot.slane %v2797_v18, %v11761_v41  ;;  %v4155_v33 = vrot.slane %v2796_v21, %v11767_v47  ;;  %1458 = vadd.xlane.f32.xlu1 %v1457_v40  ;;  %1407 = vadd.xlane.f32.xlu0 %v1406_v14  ;;  %v1742_v40 = vsel %vm1198_vm0, %v8910_v54, 0.0  ;;  %v1691_v14 = vsel %vm1198_vm0, %v8877_v62, 0.0  ;;  %v12641_v41 = vld [vmem:[%s11536_s28 + $0x398] sm:$0xff]  }
 0x128   : > { %v1390_v36 = vpop.xlane.xlu1 %1389  ;;  %v1387_v37 = vpop.xlane.xlu0 %1386 }
 0x129   : > { %v4156_v34 = vsel %vm3912_vm12, %v4155_v33, %v4151_v31  ;;  %v2799_v45 = vmul.f32 0.015625, %v1390_v36  ;;  %v2798_v46 = vmul.f32 0.015625, %v1387_v37  ;;  %v12049_v31 = vld [vmem:[%s11536_s28 + $0x3d0] sm:$0xff]  }
 0x12a   : > { %v4161_v53 = vsel %vm3919_vm13, %v4160_v17, %v4156_v34  ;;  %v9037_v30 = vunpack.c.l.bf16 %v12049_v31 }
 0x12b   : > { %v4170_v56 = vrot.slane %v2799_v45, %v11777_v0  ;;  %v4165_v57 = vrot.slane %v2798_v46, %v11782_v52  ;;  %1554 = vadd.xlane.f32.xlu1 %v1553_v39  ;;  %1503 = vadd.xlane.f32.xlu0 %v1502_v32  ;;  %v1835_v39 = vsel %vm1198_vm0, %v8973_v15, 0.0  ;;  %v1784_v32 = vsel %vm1198_vm0, %v8938_v59, 0.0  ;;  %v12059_v46 = vld [vmem:[%s11536_s28 + $0x408] sm:$0xff]  }
 0x12c   : > { %v1444_v22 = vpop.xlane.xlu1 %1443  ;;  %v1441_v58 = vpop.xlane.xlu0 %1440 }
 0x12d   : > { %v4166_v55 = vsel %vm3926_vm14, %v4165_v57, %v4161_v53  ;;  %v2817_v1 = vmul.f32 0.015625, %v1444_v22  ;;  %v2816_v3 = vmul.f32 0.015625, %v1441_v58  ;;  %v1931_v58 = vsel %vm1198_vm0, %v9037_v30, 0.0 }
 0x12e   : > { %v12039_v9 = vsel %vm3933_vm15, %v4170_v56, %v4166_v55  ;;  %v12071_v55 = vld [vmem:[%s11536_s28 + $0x488] sm:$0xff]  }
 0x12f   : > { %16023 = vst [vmem:[#allocation15_spill] sm:$0xff] %v12039_v9  ;;  %v4258_v11 = vrot.slane %v2817_v1, %v11671_v10  ;;  %v4254_v12 = vrot.slane %v2816_v3, %v11667_v6  ;;  %1647 = vadd.xlane.f32.xlu1 %v1646_v38  ;;  %1596 = vadd.xlane.f32.xlu0 %v1595_v61  ;;  %v1880_v38 = vsel %vm1198_vm0, %v9002_v24, 0.0  ;;  %v9065_v61 = vunpack.c.l.bf16 %v12059_v46 }
 0x130   : > { %v1540_v16 = vpop.xlane.xlu1 %1539  ;;  %v1537_v8 = vpop.xlane.xlu0 %1536 }
 0x131   : > { %v4259_v5 = vsel %vm3835_vm1, %v4258_v11, %v4254_v12  ;;  %v2849_v18 = vmul.f32 0.015625, %v1540_v16  ;;  %v2848_v21 = vmul.f32 0.015625, %v1537_v8  ;;  %v2024_v16 = vsel %vm1198_vm0, %v9098_v49, 0.0 }
 0x132   : > { %v1973_v27 = vsel %vm1198_vm0, %v9065_v61, 0.0  ;;  %v9162_v8 = vunpack.c.h.bf16 %v11969_v48 }
 0x133   : > { %v4416_v17 = vrot.slane %v2849_v18, %v11671_v10  ;;  %v4412_v33 = vrot.slane %v2848_v21, %v11667_v6  ;;  %1743 = vadd.xlane.f32.xlu1 %v1742_v40  ;;  %1692 = vadd.xlane.f32.xlu0 %v1691_v14  ;;  %v9129_v40 = vunpack.c.l.bf16 %v12071_v55  ;;  %v9730_v18 = vld [vmem:[%s11536_s28 + $0x500] sm:$0xff]  }
 0x134   : > { %v1396_v36 = vpop.xlane.xlu1 %1395  ;;  %v1393_v37 = vpop.xlane.xlu0 %1392  ;;  %v2120_v48 = vsel %vm1198_vm0, %v9162_v8, 0.0 }
 0x135   : > { %v4417_v44 = vsel %vm3835_vm1, %v4416_v17, %v4412_v33  ;;  %v2801_v34 = vmul.f32 0.015625, %v1396_v36  ;;  %v2800_v45 = vmul.f32 0.015625, %v1393_v37 }
 0x137   : > { %v4179_v53 = vrot.slane %v2801_v34, %v11671_v10  ;;  %v4175_v56 = vrot.slane %v2800_v45, %v11667_v6  ;;  %1836 = vadd.xlane.f32.xlu1 %v1835_v39  ;;  %1785 = vadd.xlane.f32.xlu0 %v1784_v32  ;;  %v2069_v39 = vsel %vm1198_vm0, %v9129_v40, 0.0  ;;  %v9189_v32 = vunpack.c.l.bf16 %v9730_v18 }
 0x138   : > { %v1489_v57 = vpop.xlane.xlu1 %1488  ;;  %v1447_v22 = vpop.xlane.xlu0 %1446 }
 0x139   : > { %v12068_v54 = vsel %vm3835_vm1, %v4179_v53, %v4175_v56  ;;  %v2818_v62 = vmul.f32 0.015625, %v1447_v22  ;;  %v2832_v1 = vmul.f32 0.015625, %v1489_v57  ;;  %v9746_v53 = vld [vmem:[%s11536_s28 + $0x580] sm:$0xff]   ;;  %v12089_v56 = vld [vmem:[%s11536_s28 + $0x548] sm:$0xff]  }
 0x13a   : > { %v9253_v61 = vunpack.c.l.bf16 %v9746_v53 }
 0x13b   : > { %v4263_v3 = vrot.slane %v2818_v62, %v11675_v13  ;;  %1932 = vadd.xlane.f32.xlu1 %v1931_v58  ;;  %1881 = vadd.xlane.f32.xlu0 %v1880_v38  ;;  %v4333_v21 = vrot.slane %v2832_v1, %v11667_v6  ;;  %v9225_v62 = vunpack.c.l.bf16 %v12089_v56 }
 0x13c   : > { %v1543_v11 = vpop.xlane.xlu1 %1542  ;;  %v1492_v12 = vpop.xlane.xlu0 %1491 }
 0x13d   : > { %v4264_v14 = vsel %vm3842_vm2, %v4263_v3, %v4259_v5  ;;  %v2850_v15 = vmul.f32 0.015625, %v1543_v11  ;;  %v2833_v59 = vmul.f32 0.015625, %v1492_v12  ;;  %v9190_v5 = vunpack.c.h.bf16 %v9730_v18  ;;  %v12100_v12 = vld [vmem:[%s11536_s28 + $0x5c8] sm:$0xff]  }
 0x13e   : > { %v9289_v18 = vunpack.c.l.bf16 %v12100_v12 }
 0x13f   : > { %v4421_v17 = vrot.slane %v2850_v15, %v11675_v13  ;;  %v4337_v33 = vrot.slane %v2833_v59, %v11671_v10  ;;  %2025 = vadd.xlane.f32.xlu1 %v2024_v16  ;;  %1974 = vadd.xlane.f32.xlu0 %v1973_v27  ;;  %v2162_v49 = vsel %vm1198_vm0, %v9190_v5, 0.0  ;;  %v2255_v15 = vsel %vm1198_vm0, %v9253_v61, 0.0 }
 0x140   : > { %v1636_v36 = vpop.xlane.xlu1 %1635  ;;  %v1633_v37 = vpop.xlane.xlu0 %1632  ;;  %v2213_v59 = vsel %vm1198_vm0, %v9225_v62, 0.0 }
 0x141   : > { %v4422_v30 = vsel %vm3842_vm2, %v4421_v17, %v4417_v44  ;;  %v4338_v24 = vsel %vm3835_vm1, %v4337_v33, %v4333_v21  ;;  %v2881_v34 = vmul.f32 0.015625, %v1636_v36  ;;  %v2880_v45 = vmul.f32 0.015625, %v1633_v37  ;;  %v9770_v37 = vld [vmem:[%s11536_s28 + $0x640] sm:$0xff]  }
 0x142   : > { %v2159_v44 = vsel %vm1198_vm0, %v9189_v32, 0.0  ;;  %v9254_v21 = vunpack.c.h.bf16 %v9746_v53  ;;  %v9350_v53 = vunpack.c.h.bf16 %v9770_v37 }
 0x143   : > { %v4574_v57 = vrot.slane %v2881_v34, %v11671_v10  ;;  %v4570_v22 = vrot.slane %v2880_v45, %v11667_v6  ;;  %2121 = vadd.xlane.f32.xlu1 %v2120_v48  ;;  %2070 = vadd.xlane.f32.xlu0 %v2069_v39  ;;  %v2309_v34 = vsel %vm1198_vm0, %v9289_v18, 0.0  ;;  %v12134_v18 = vld [vmem:[%s11536_s28 + $0x118] sm:$0xff]  }
 0x144   : > { %v1732_v58 = vpop.xlane.xlu1 %1731  ;;  %v1729_v38 = vpop.xlane.xlu0 %1728  ;;  %v2258_v45 = vsel %vm1198_vm0, %v9254_v21, 0.0 }
 0x145   : > { %v12097_v1 = vsel %vm3835_vm1, %v4574_v57, %v4570_v22  ;;  %v2913_v3 = vmul.f32 0.015625, %v1732_v58  ;;  %v2912_v11 = vmul.f32 0.015625, %v1729_v38  ;;  %v9349_v57 = vunpack.c.l.bf16 %v9770_v37 }
 0x147   : > { %v4732_v16 = vrot.slane %v2913_v3, %v11671_v10  ;;  %v4728_v27 = vrot.slane %v2912_v11, %v11667_v6  ;;  %2163 = vadd.xlane.f32.xlu1 %v2162_v49  ;;  %2160 = vadd.xlane.f32.xlu0 %v2159_v44  ;;  %v9786_v44 = vld [vmem:[%s11536_s28 + $0x6c0] sm:$0xff]  }
 0x148   : > { %v1450_v8 = vpop.xlane.xlu1 %1449  ;;  %v1399_v40 = vpop.xlane.xlu0 %1398 }
 0x149   : > { %v12108_v17 = vsel %vm3835_vm1, %v4732_v16, %v4728_v27  ;;  %v2819_v33 = vmul.f32 0.015625, %v1450_v8  ;;  %v2802_v36 = vmul.f32 0.015625, %v1399_v40  ;;  %v2402_v16 = vsel %vm1198_vm0, %v9350_v53, 0.0 }
 0x14a   : > { %v9414_v27 = vunpack.c.h.bf16 %v9786_v44  ;;  %v9413_v8 = vunpack.c.l.bf16 %v9786_v44  ;;  %v8786_v44 = vunpack.c.h.bf16 %v12003_v4 }
 0x14b   : > { %v4268_v48 = vrot.slane %v2819_v33, %v11680_v19  ;;  %v4184_v39 = vrot.slane %v2802_v36, %v11675_v13  ;;  %2256 = vadd.xlane.f32.xlu1 %v2255_v15  ;;  %2214 = vadd.xlane.f32.xlu0 %v2213_v59 }
 0x14c   : > { %v1546_v5 = vpop.xlane.xlu1 %1545  ;;  %v1495_v32 = vpop.xlane.xlu0 %1494 }
 0x14d   : > { %v12116_v22 = vsel %vm3849_vm3, %v4268_v48, %v4264_v14  ;;  %v12120_v58 = vsel %vm3842_vm2, %v4184_v39, %v12068_v54  ;;  %v2851_v38 = vmul.f32 0.015625, %v1546_v5  ;;  %v2834_v49 = vmul.f32 0.015625, %v1495_v32 }
 0x14e   : > { %v2399_v14 = vsel %vm1198_vm0, %v9349_v57, 0.0  ;;  %v2498_v48 = vsel %vm1198_vm0, %v9414_v27, 0.0  ;;  %v8689_v39 = vunpack.c.l.bf16 %v12134_v18 }
 0x14f   : > { %v4426_v61 = vrot.slane %v2851_v38, %v11680_v19  ;;  %v4342_v62 = vrot.slane %v2834_v49, %v11675_v13  ;;  %2310 = vadd.xlane.f32.xlu1 %v2309_v34  ;;  %2259 = vadd.xlane.f32.xlu0 %v2258_v45  ;;  %v12146_v34 = vld [vmem:[%s11536_s28 + $0x198] sm:$0xff]  }
 0x150   : > { %v1588_v3 = vpop.xlane.xlu1 %1587  ;;  %v1585_v11 = vpop.xlane.xlu0 %1584 }
 0x151   : > { %v12128_v54 = vsel %vm3849_vm3, %v4426_v61, %v4422_v30  ;;  %v12131_v40 = vsel %vm3842_vm2, %v4342_v62, %v4338_v24  ;;  %v2865_v15 = vmul.f32 0.015625, %v1588_v3  ;;  %v2864_v59 = vmul.f32 0.015625, %v1585_v11 }
 0x152   : > { %v2495_v30 = vsel %vm1198_vm0, %v9413_v8, 0.0  ;;  %v8722_v24 = vunpack.c.h.bf16 %v11992_v50  ;;  %v1409_v50 = vsel %vm1198_vm0, %v8689_v39, 0.0  ;;  %v8753_v61 = vunpack.c.l.bf16 %v12146_v34 }
 0x153   : > { %v4495_v21 = vrot.slane %v2865_v15, %v11671_v10  ;;  %v4491_v33 = vrot.slane %v2864_v59, %v11667_v6  ;;  %2403 = vadd.xlane.f32.xlu1 %v2402_v16  ;;  %2400 = vadd.xlane.f32.xlu0 %v2399_v14  ;;  %v12158_v16 = vld [vmem:[%s11536_s28 + $0x258] sm:$0xff]   ;;  %v1556_v59 = vsel %vm1198_vm0, %v8786_v44, 0.0 }
 0x154   : > { %v1681_v36 = vpop.xlane.xlu1 %1680  ;;  %v1639_v37 = vpop.xlane.xlu0 %1638  ;;  %v1460_v49 = vsel %vm1198_vm0, %v8722_v24, 0.0  ;;  %v12175_v24 = vld [vmem:[%s11536_s28 + $0x2d8] sm:$0xff]  }
 0x155   : > { %v12143_v5 = vsel %vm3835_vm1, %v4495_v21, %v4491_v33  ;;  %v2882_v32 = vmul.f32 0.015625, %v1639_v37  ;;  %v2896_v45 = vmul.f32 0.015625, %v1681_v36  ;;  %v8849_v21 = vunpack.c.l.bf16 %v12158_v16 }
 0x156   : > { %v8814_v33 = vunpack.c.h.bf16 %v12014_v25 }
 0x157   : > { %v4579_v53 = vrot.slane %v2882_v32, %v11675_v13  ;;  %2499 = vadd.xlane.f32.xlu1 %v2498_v48  ;;  %2496 = vadd.xlane.f32.xlu0 %v2495_v30  ;;  %v4649_v14 = vrot.slane %v2896_v45, %v11667_v6 }
 0x158   : > { %v1735_v57 = vpop.xlane.xlu1 %1734  ;;  %v1684_v38 = vpop.xlane.xlu0 %1683 }
 0x159   : > { %v12155_v62 = vsel %vm3842_vm2, %v4579_v53, %v12097_v1  ;;  %v2914_v3 = vmul.f32 0.015625, %v1735_v57  ;;  %v2897_v11 = vmul.f32 0.015625, %v1684_v38  ;;  %v1505_v1 = vsel %vm1198_vm0, %v8753_v61, 0.0  ;;  %v12187_v61 = vld [vmem:[%s11536_s28 + $0x310] sm:$0xff]  }
 0x15a   : > { %v1649_v53 = vsel %vm1198_vm0, %v8849_v21, 0.0  ;;  %v8913_v57 = vunpack.c.l.bf16 %v12175_v24  ;;  %v8878_v38 = vunpack.c.h.bf16 %v12025_v51 }
 0x15b   : > { %v4737_v27 = vrot.slane %v2914_v3, %v11675_v13  ;;  %v4653_v8 = vrot.slane %v2897_v11, %v11671_v10  ;;  %1461 = vadd.xlane.f32.xlu1 %v1460_v49  ;;  %1410 = vadd.xlane.f32.xlu0 %v1409_v50 }
 0x15c   : > { %v1828_v4 = vpop.xlane.xlu1 %1827  ;;  %v1825_v15 = vpop.xlane.xlu0 %1824  ;;  %v1694_v51 = vsel %vm1198_vm0, %v8878_v38, 0.0 }
 0x15d   : > { %v12169_v36 = vsel %vm3842_vm2, %v4737_v27, %v12108_v17  ;;  %v12172_v37 = vsel %vm3835_vm1, %v4653_v8, %v4649_v14  ;;  %v2945_v48 = vmul.f32 0.015625, %v1828_v4  ;;  %v2944_v30 = vmul.f32 0.015625, %v1825_v15 }
 0x15e   : > { %v1598_v17 = vsel %vm1198_vm0, %v8814_v33, 0.0  ;;  %v1745_v8 = vsel %vm1198_vm0, %v8913_v57, 0.0  ;;  %v8974_v4 = vunpack.c.h.bf16 %v12036_v7  ;;  %v8941_v15 = vunpack.c.l.bf16 %v12187_v61  ;;  %v12199_v33 = vld [vmem:[%s11536_s28 + $0x390] sm:$0xff]  }
 0x15f   : > { %v4890_v39 = vrot.slane %v2945_v48, %v11671_v10  ;;  %v4886_v32 = vrot.slane %v2944_v30, %v11667_v6  ;;  %1557 = vadd.xlane.f32.xlu1 %v1556_v59  ;;  %1506 = vadd.xlane.f32.xlu0 %v1505_v1 }
 0x160   : > { %v1924_v45 = vpop.xlane.xlu1 %1923  ;;  %v1921_v25 = vpop.xlane.xlu0 %1920  ;;  %v1838_v7 = vsel %vm1198_vm0, %v8974_v4, 0.0 }
 0x161   : > { %v12184_v49 = vsel %vm3835_vm1, %v4890_v39, %v4886_v32  ;;  %v2977_v50 = vmul.f32 0.015625, %v1924_v45  ;;  %v2976_v44 = vmul.f32 0.015625, %v1921_v25  ;;  %v1787_v45 = vsel %vm1198_vm0, %v8941_v15, 0.0 }
 0x162   : > { %v9038_v25 = vunpack.c.h.bf16 %v12049_v31 }
 0x163   : > { %v5048_v3 = vrot.slane %v2977_v50, %v11671_v10  ;;  %v5044_v11 = vrot.slane %v2976_v44, %v11667_v6  ;;  %1650 = vadd.xlane.f32.xlu1 %v1649_v53  ;;  %1599 = vadd.xlane.f32.xlu0 %v1598_v17  ;;  %v9005_v53 = vunpack.c.l.bf16 %v12199_v33  ;;  %v12216_v44 = vld [vmem:[%s11536_s28 + $0x450] sm:$0xff]  }
 0x164   : > { %v1453_v14 = vpop.xlane.xlu1 %1452  ;;  %v1402_v27 = vpop.xlane.xlu0 %1401 }
 0x165   : > { %v12196_v59 = vsel %vm3835_vm1, %v5048_v3, %v5044_v11  ;;  %v2820_v1 = vmul.f32 0.015625, %v1453_v14  ;;  %v2803_v21 = vmul.f32 0.015625, %v1402_v27  ;;  %v1883_v27 = vsel %vm1198_vm0, %v9005_v53, 0.0 }
 0x167   : > { %v4273_v48 = vrot.slane %v2820_v1, %v11694_v29  ;;  %v4189_v30 = vrot.slane %v2803_v21, %v11680_v19  ;;  %1746 = vadd.xlane.f32.xlu1 %v1745_v8  ;;  %1695 = vadd.xlane.f32.xlu0 %v1694_v51  ;;  %v9066_v8 = vunpack.c.h.bf16 %v12059_v46  ;;  %v12233_v21 = vld [vmem:[%s11536_s28 + $0x4d0] sm:$0xff]  }
 0x168   : > { %v1549_v39 = vpop.xlane.xlu1 %1548  ;;  %v1498_v32 = vpop.xlane.xlu0 %1497 }
 0x169   : > { %v12209_v17 = vsel %vm3856_vm4, %v4273_v48, %v12116_v22  ;;  %v12213_v57 = vsel %vm3849_vm3, %v4189_v30, %v12120_v58  ;;  %v2852_v38 = vmul.f32 0.015625, %v1549_v39  ;;  %v2835_v50 = vmul.f32 0.015625, %v1498_v32 }
 0x16a   : > { %v1934_v22 = vsel %vm1198_vm0, %v9038_v25, 0.0  ;;  %v9101_v58 = vunpack.c.l.bf16 %v12216_v44  ;;  %v1976_v32 = vsel %vm1198_vm0, %v9066_v8, 0.0 }
 0x16b   : > { %v4431_v3 = vrot.slane %v2852_v38, %v11694_v29  ;;  %v4347_v11 = vrot.slane %v2835_v50, %v11680_v19  ;;  %1839 = vadd.xlane.f32.xlu1 %v1838_v7  ;;  %1788 = vadd.xlane.f32.xlu0 %v1787_v45  ;;  %v9130_v7 = vunpack.c.h.bf16 %v12071_v55  ;;  %v12250_v50 = vld [vmem:[%s11536_s28 + $0x508] sm:$0xff]  }
 0x16c   : > { %v1642_v31 = vpop.xlane.xlu1 %1641  ;;  %v1591_v14 = vpop.xlane.xlu0 %1590 }
 0x16d   : > { %v12226_v51 = vsel %vm3856_vm4, %v4431_v3, %v12128_v54  ;;  %v12230_v4 = vsel %vm3849_vm3, %v4347_v11, %v12131_v40  ;;  %v2883_v15 = vmul.f32 0.015625, %v1642_v31  ;;  %v2866_v1 = vmul.f32 0.015625, %v1591_v14 }
 0x16e   : > { %v2027_v54 = vsel %vm1198_vm0, %v9101_v58, 0.0  ;;  %v9165_v40 = vunpack.c.l.bf16 %v12233_v21  ;;  %v2072_v14 = vsel %vm1198_vm0, %v9130_v7, 0.0  ;;  %v9762_v7 = vld [vmem:[%s11536_s28 + $0x600] sm:$0xff]  }
 0x16f   : > { %v4584_v48 = vrot.slane %v2883_v15, %v11680_v19  ;;  %v4500_v30 = vrot.slane %v2866_v1, %v11675_v13  ;;  %1935 = vadd.xlane.f32.xlu1 %v1934_v22  ;;  %1884 = vadd.xlane.f32.xlu0 %v1883_v27  ;;  %v9193_v22 = vunpack.c.l.bf16 %v12250_v50  ;;  %v12267_v1 = vld [vmem:[%s11536_s28 + $0x588] sm:$0xff]  }
 0x170   : > { %v1738_v46 = vpop.xlane.xlu1 %1737  ;;  %v1687_v39 = vpop.xlane.xlu0 %1686 }
 0x171   : > { %v12243_v45 = vsel %vm3849_vm3, %v4584_v48, %v12155_v62  ;;  %v12247_v25 = vsel %vm3842_vm2, %v4500_v30, %v12143_v5  ;;  %v2915_v53 = vmul.f32 0.015625, %v1738_v46  ;;  %v2898_v38 = vmul.f32 0.015625, %v1687_v39 }
 0x172   : > { %v2123_v62 = vsel %vm1198_vm0, %v9165_v40, 0.0  ;;  %v9226_v5 = vunpack.c.h.bf16 %v12089_v56  ;;  %v2165_v39 = vsel %vm1198_vm0, %v9193_v22, 0.0 }
 0x173   : > { %v4742_v3 = vrot.slane %v2915_v53, %v11680_v19  ;;  %v4658_v11 = vrot.slane %v2898_v38, %v11675_v13  ;;  %2028 = vadd.xlane.f32.xlu1 %v2027_v54  ;;  %1977 = vadd.xlane.f32.xlu0 %v1976_v32  ;;  %v9257_v54 = vunpack.c.l.bf16 %v12267_v1 }
 0x174   : > { %v1780_v55 = vpop.xlane.xlu1 %1779  ;;  %v1777_v31 = vpop.xlane.xlu0 %1776 }
 0x175   : > { %v12260_v27 = vsel %vm3849_vm3, %v4742_v3, %v12169_v36  ;;  %v12264_v58 = vsel %vm3842_vm2, %v4658_v11, %v12172_v37  ;;  %v2929_v8 = vmul.f32 0.015625, %v1780_v55  ;;  %v2928_v15 = vmul.f32 0.015625, %v1777_v31 }
 0x176   : > { %v2216_v36 = vsel %vm1198_vm0, %v9226_v5, 0.0  ;;  %v9290_v37 = vunpack.c.h.bf16 %v12100_v12  ;;  %v2261_v12 = vsel %vm1198_vm0, %v9257_v54, 0.0  ;;  %v9318_v31 = vunpack.c.h.bf16 %v9762_v7 }
 0x177   : > { %v4811_v48 = vrot.slane %v2929_v8, %v11671_v10  ;;  %v4807_v30 = vrot.slane %v2928_v15, %v11667_v6  ;;  %2124 = vadd.xlane.f32.xlu1 %v2123_v62  ;;  %2073 = vadd.xlane.f32.xlu0 %v2072_v14  ;;  %v9317_v62 = vunpack.c.l.bf16 %v9762_v7  ;;  %v9778_v8 = vld [vmem:[%s11536_s28 + $0x680] sm:$0xff]   ;;  %v12288_v15 = vld [vmem:[%s11536_s28 + $0x648] sm:$0xff]  }
 0x178   : > { %v1873_v56 = vpop.xlane.xlu1 %1872  ;;  %v1831_v46 = vpop.xlane.xlu0 %1830  ;;  %v2312_v55 = vsel %vm1198_vm0, %v9290_v37, 0.0  ;;  %v9381_v37 = vunpack.c.l.bf16 %v9778_v8  ;;  %v9353_v54 = vunpack.c.l.bf16 %v12288_v15 }
 0x179   : > { %v12276_v32 = vsel %vm3835_vm1, %v4811_v48, %v4807_v30  ;;  %v2946_v40 = vmul.f32 0.015625, %v1831_v46  ;;  %v2960_v53 = vmul.f32 0.015625, %v1873_v56 }
 0x17b   : > { %v4895_v38 = vrot.slane %v2946_v40, %v11675_v13  ;;  %2217 = vadd.xlane.f32.xlu1 %v2216_v36  ;;  %2166 = vadd.xlane.f32.xlu0 %v2165_v39  ;;  %v4965_v48 = vrot.slane %v2960_v53, %v11667_v6  ;;  %v2354_v39 = vsel %vm1198_vm0, %v9318_v31, 0.0 }
 0x17c   : > { %v1927_v3 = vpop.xlane.xlu1 %1926  ;;  %v1876_v11 = vpop.xlane.xlu0 %1875 }
 0x17d   : > { %v12284_v14 = vsel %vm3842_vm2, %v4895_v38, %v12184_v49  ;;  %v2978_v5 = vmul.f32 0.015625, %v1927_v3  ;;  %v2961_v22 = vmul.f32 0.015625, %v1876_v11  ;;  %v2351_v49 = vsel %vm1198_vm0, %v9317_v62, 0.0  ;;  %v12304_v3 = vld [vmem:[%s11536_s28 + $0x6c8] sm:$0xff]  }
 0x17e   : > { %v2447_v62 = vsel %vm1198_vm0, %v9381_v37, 0.0 }
 0x17f   : > { %v5053_v30 = vrot.slane %v2978_v5, %v11675_v13  ;;  %v4969_v56 = vrot.slane %v2961_v22, %v11671_v10  ;;  %2313 = vadd.xlane.f32.xlu1 %v2312_v55  ;;  %2262 = vadd.xlane.f32.xlu0 %v2261_v12  ;;  %v9417_v5 = vunpack.c.l.bf16 %v12304_v3  ;;  %v9382_v22 = vunpack.c.h.bf16 %v9778_v8 }
 0x180   : > { %v2020_v46 = vpop.xlane.xlu1 %2019  ;;  %v2017_v36 = vpop.xlane.xlu0 %2016 }
 0x181   : > { %v12298_v40 = vsel %vm3842_vm2, %v5053_v30, %v12196_v59  ;;  %v12301_v7 = vsel %vm3835_vm1, %v4969_v56, %v4965_v48  ;;  %v3009_v53 = vmul.f32 0.015625, %v2020_v46  ;;  %v3008_v38 = vmul.f32 0.015625, %v2017_v36  ;;  %v9802_v46 = vld [vmem:[%s11536_s28 + $0x740] sm:$0xff]  }
 0x182   : > { %v2405_v59 = vsel %vm1198_vm0, %v9353_v54, 0.0  ;;  %v2501_v54 = vsel %vm1198_vm0, %v9417_v5, 0.0  ;;  %v9478_v8 = vunpack.c.h.bf16 %v9802_v46 }
 0x183   : > { %v5206_v11 = vrot.slane %v3009_v53, %v11671_v10  ;;  %v5202_v55 = vrot.slane %v3008_v38, %v11667_v6  ;;  %2355 = vadd.xlane.f32.xlu1 %v2354_v39  ;;  %2352 = vadd.xlane.f32.xlu0 %v2351_v49  ;;  %v2450_v53 = vsel %vm1198_vm0, %v9382_v22, 0.0  ;;  %v9477_v38 = vunpack.c.l.bf16 %v9802_v46 }
 0x184   : > { %v2116_v12 = vpop.xlane.xlu1 %2115  ;;  %v2113_v31 = vpop.xlane.xlu0 %2112  ;;  %v2594_v5 = vsel %vm1198_vm0, %v9478_v8, 0.0 }
 0x185   : > { %v12312_v48 = vsel %vm3835_vm1, %v5206_v11, %v5202_v55  ;;  %v3041_v30 = vmul.f32 0.015625, %v2116_v12  ;;  %v3040_v56 = vmul.f32 0.015625, %v2113_v31  ;;  %v9818_v31 = vld [vmem:[%s11536_s28 + $0x7c0] sm:$0xff]   ;;  %v2591_v22 = vsel %vm1198_vm0, %v9477_v38, 0.0 }
 0x186   : > { %v9542_v46 = vunpack.c.h.bf16 %v9818_v31  ;;  %v9541_v35 = vunpack.c.l.bf16 %v9818_v31  ;;  %v8690_v31 = vunpack.c.h.bf16 %v12134_v18 }
 0x187   : > { %v5364_v36 = vrot.slane %v3041_v30, %v11671_v10  ;;  %v5360_v39 = vrot.slane %v3040_v56, %v11667_v6  ;;  %2448 = vadd.xlane.f32.xlu1 %v2447_v62  ;;  %2406 = vadd.xlane.f32.xlu0 %v2405_v59 }
 0x188   : > { %v1456_v49 = vpop.xlane.xlu1 %1455  ;;  %v1405_v37 = vpop.xlane.xlu0 %1404 }
 0x189   : > { %v12320_v11 = vsel %vm3835_vm1, %v5364_v36, %v5360_v39  ;;  %v2821_v55 = vmul.f32 0.015625, %v1456_v49  ;;  %v2804_v12 = vmul.f32 0.015625, %v1405_v37 }
 0x18b   : > { %v4278_v30 = vrot.slane %v2821_v55, %v11686_v23  ;;  %v4194_v62 = vrot.slane %v2804_v12, %v11694_v29  ;;  %2502 = vadd.xlane.f32.xlu1 %v2501_v54  ;;  %2451 = vadd.xlane.f32.xlu0 %v2450_v53  ;;  %v12336_v54 = vld [vmem:[%s11536_s28 + $0x160] sm:$0xff]   ;;  %v2687_v12 = vsel %vm1198_vm0, %v9541_v35, 0.0 }
 0x18c   : > { %v1552_v59 = vpop.xlane.xlu1 %1551  ;;  %v1501_v56 = vpop.xlane.xlu0 %1500 }
 0x18d   : > { %v12329_v36 = vsel %vm3863_vm5, %v4278_v30, %v12209_v17  ;;  %v12333_v39 = vsel %vm3856_vm4, %v4194_v62, %v12213_v57  ;;  %v2853_v49 = vmul.f32 0.015625, %v1552_v59  ;;  %v2836_v37 = vmul.f32 0.015625, %v1501_v56 }
 0x18e   : > { %v2690_v17 = vsel %vm1198_vm0, %v9542_v46, 0.0  ;;  %v8725_v57 = vunpack.c.l.bf16 %v12336_v54 }
 0x18f   : > { %v4436_v53 = vrot.slane %v2853_v49, %v11686_v23  ;;  %v4352_v8 = vrot.slane %v2836_v37, %v11694_v29  ;;  %2595 = vadd.xlane.f32.xlu1 %v2594_v5  ;;  %2592 = vadd.xlane.f32.xlu0 %v2591_v22  ;;  %v12353_v5 = vld [vmem:[%s11536_s28 + $0x1e0] sm:$0xff]   ;;  %v1412_v49 = vsel %vm1198_vm0, %v8690_v31, 0.0  ;;  %v8754_v37 = vunpack.c.h.bf16 %v12146_v34 }
 0x190   : > { %v1645_v38 = vpop.xlane.xlu1 %1644  ;;  %v1594_v55 = vpop.xlane.xlu0 %1593 }
 0x191   : > { %v12346_v30 = vsel %vm3863_vm5, %v4436_v53, %v12226_v51  ;;  %v12350_v62 = vsel %vm3856_vm4, %v4352_v8, %v12230_v4  ;;  %v2884_v59 = vmul.f32 0.015625, %v1645_v38  ;;  %v2867_v56 = vmul.f32 0.015625, %v1594_v55 }
 0x192   : > { %v1463_v51 = vsel %vm1198_vm0, %v8725_v57, 0.0  ;;  %v8789_v4 = vunpack.c.l.bf16 %v12353_v5 }
 0x193   : > { %v4589_v22 = vrot.slane %v2884_v59, %v11694_v29  ;;  %v4505_v35 = vrot.slane %v2867_v56, %v11680_v19  ;;  %2691 = vadd.xlane.f32.xlu1 %v2690_v17  ;;  %2688 = vadd.xlane.f32.xlu0 %v2687_v12  ;;  %v12370_v17 = vld [vmem:[%s11536_s28 + $0x218] sm:$0xff]   ;;  %v1508_v59 = vsel %vm1198_vm0, %v8754_v37, 0.0 }
 0x194   : > { %v1741_v18 = vpop.xlane.xlu1 %1740  ;;  %v1690_v46 = vpop.xlane.xlu0 %1689  ;;  %v8817_v56 = vunpack.c.l.bf16 %v12370_v17 }
 0x195   : > { %v12363_v53 = vsel %vm3856_vm4, %v4589_v22, %v12243_v45  ;;  %v12367_v8 = vsel %vm3849_vm3, %v4505_v35, %v12247_v25  ;;  %v2916_v38 = vmul.f32 0.015625, %v1741_v18  ;;  %v2899_v55 = vmul.f32 0.015625, %v1690_v46 }
 0x196   : > { %v1559_v45 = vsel %vm1198_vm0, %v8789_v4, 0.0  ;;  %v8850_v25 = vunpack.c.h.bf16 %v12158_v16 }
 0x197   : > { %v4747_v12 = vrot.slane %v2916_v38, %v11694_v29  ;;  %v4663_v57 = vrot.slane %v2899_v55, %v11680_v19  ;;  %1464 = vadd.xlane.f32.xlu1 %v1463_v51  ;;  %1413 = vadd.xlane.f32.xlu0 %v1412_v49  ;;  %v12387_v51 = vld [vmem:[%s11536_s28 + $0x298] sm:$0xff]   ;;  %v1601_v38 = vsel %vm1198_vm0, %v8817_v56, 0.0 }
 0x198   : > { %v1834_v34 = vpop.xlane.xlu1 %1833  ;;  %v1783_v31 = vpop.xlane.xlu0 %1782  ;;  %v8881_v55 = vunpack.c.l.bf16 %v12387_v51 }
 0x199   : > { %v12380_v22 = vsel %vm3856_vm4, %v4747_v12, %v12260_v27  ;;  %v12384_v35 = vsel %vm3849_vm3, %v4663_v57, %v12264_v58  ;;  %v2947_v18 = vmul.f32 0.015625, %v1834_v34  ;;  %v2930_v46 = vmul.f32 0.015625, %v1783_v31 }
 0x19a   : > { %v1652_v27 = vsel %vm1198_vm0, %v8850_v25, 0.0  ;;  %v8914_v58 = vunpack.c.h.bf16 %v12175_v24 }
 0x19b   : > { %v4900_v49 = vrot.slane %v2947_v18, %v11680_v19  ;;  %v4816_v4 = vrot.slane %v2930_v46, %v11675_v13  ;;  %1560 = vadd.xlane.f32.xlu1 %v1559_v45  ;;  %1509 = vadd.xlane.f32.xlu0 %v1508_v59  ;;  %v12404_v45 = vld [vmem:[%s11536_s28 + $0x358] sm:$0xff]   ;;  %v1697_v18 = vsel %vm1198_vm0, %v8881_v55, 0.0  ;;  %v8942_v46 = vunpack.c.h.bf16 %v12187_v61 }
 0x19c   : > { %v1930_v16 = vpop.xlane.xlu1 %1929  ;;  %v1879_v37 = vpop.xlane.xlu0 %1878 }
 0x19d   : > { %v12397_v12 = vsel %vm3849_vm3, %v4900_v49, %v12284_v14  ;;  %v12401_v57 = vsel %vm3842_vm2, %v4816_v4, %v12276_v32  ;;  %v2979_v34 = vmul.f32 0.015625, %v1930_v16  ;;  %v2962_v31 = vmul.f32 0.015625, %v1879_v37 }
 0x19e   : > { %v1748_v14 = vsel %vm1198_vm0, %v8914_v58, 0.0  ;;  %v8977_v32 = vunpack.c.l.bf16 %v12404_v45 }
 0x19f   : > { %v5058_v59 = vrot.slane %v2979_v34, %v11680_v19  ;;  %v4974_v25 = vrot.slane %v2962_v31, %v11675_v13  ;;  %1653 = vadd.xlane.f32.xlu1 %v1652_v27  ;;  %1602 = vadd.xlane.f32.xlu0 %v1601_v38  ;;  %v12421_v27 = vld [vmem:[%s11536_s28 + $0x3d8] sm:$0xff]   ;;  %v1790_v34 = vsel %vm1198_vm0, %v8942_v46, 0.0  ;;  %v9006_v31 = vunpack.c.h.bf16 %v12199_v33 }
 0x1a0   : > { %v1972_v24 = vpop.xlane.xlu1 %1971  ;;  %v1969_v56 = vpop.xlane.xlu0 %1968  ;;  %v9102_v33 = vunpack.c.h.bf16 %v12216_v44 }
 0x1a1   : > { %v12414_v49 = vsel %vm3849_vm3, %v5058_v59, %v12298_v40  ;;  %v12418_v4 = vsel %vm3842_vm2, %v4974_v25, %v12301_v7  ;;  %v2993_v16 = vmul.f32 0.015625, %v1972_v24  ;;  %v2992_v37 = vmul.f32 0.015625, %v1969_v56  ;;  %v12433_v24 = vld [vmem:[%s11536_s28 + $0x410] sm:$0xff]  }
 0x1a2   : > { %v1841_v40 = vsel %vm1198_vm0, %v8977_v32, 0.0  ;;  %v9041_v7 = vunpack.c.l.bf16 %v12421_v27 }
 0x1a3   : > { %v5127_v38 = vrot.slane %v2993_v16, %v11671_v10  ;;  %v5123_v58 = vrot.slane %v2992_v37, %v11667_v6  ;;  %1749 = vadd.xlane.f32.xlu1 %v1748_v14  ;;  %1698 = vadd.xlane.f32.xlu0 %v1697_v18  ;;  %v1886_v16 = vsel %vm1198_vm0, %v9006_v31, 0.0  ;;  %v9069_v37 = vunpack.c.l.bf16 %v12433_v24 }
 0x1a4   : > { %v2065_v61 = vpop.xlane.xlu1 %2064  ;;  %v2023_v55 = vpop.xlane.xlu0 %2022  ;;  %v1937_v46 = vsel %vm1198_vm0, %v9041_v7, 0.0 }
 0x1a5   : > { %v12430_v59 = vsel %vm3835_vm1, %v5127_v38, %v5123_v58  ;;  %v3010_v25 = vmul.f32 0.015625, %v2023_v55  ;;  %v3024_v56 = vmul.f32 0.015625, %v2065_v61  ;;  %v12445_v55 = vld [vmem:[%s11536_s28 + $0x490] sm:$0xff]  }
 0x1a7   : > { %v5211_v14 = vrot.slane %v3010_v25, %v11675_v13  ;;  %1842 = vadd.xlane.f32.xlu1 %v1841_v40  ;;  %1791 = vadd.xlane.f32.xlu0 %v1790_v34  ;;  %v5281_v40 = vrot.slane %v3024_v56, %v11667_v6  ;;  %v2030_v25 = vsel %vm1198_vm0, %v9102_v33, 0.0 }
 0x1a8   : > { %v2119_v18 = vpop.xlane.xlu1 %2118  ;;  %v2068_v32 = vpop.xlane.xlu0 %2067 }
 0x1a9   : > { %v12442_v38 = vsel %vm3842_vm2, %v5211_v14, %v12312_v48  ;;  %v3042_v58 = vmul.f32 0.015625, %v2119_v18  ;;  %v3025_v61 = vmul.f32 0.015625, %v2068_v32  ;;  %v1979_v48 = vsel %vm1198_vm0, %v9069_v37, 0.0 }
 0x1aa   : > { %v9166_v14 = vunpack.c.h.bf16 %v12233_v21  ;;  %v9133_v18 = vunpack.c.l.bf16 %v12445_v55 }
 0x1ab   : > { %v5369_v34 = vrot.slane %v3042_v58, %v11675_v13  ;;  %v5285_v7 = vrot.slane %v3025_v61, %v11671_v10  ;;  %1938 = vadd.xlane.f32.xlu1 %v1937_v46  ;;  %1887 = vadd.xlane.f32.xlu0 %v1886_v16  ;;  %v12462_v16 = vld [vmem:[%s11536_s28 + $0x550] sm:$0xff]  }
 0x1ac   : > { %v2212_v44 = vpop.xlane.xlu1 %2211  ;;  %v2209_v31 = vpop.xlane.xlu0 %2208  ;;  %v2126_v28 = vsel %vm1198_vm0, %v9166_v14, 0.0 }
 0x1ad   : > { %v12456_v32 = vsel %vm3842_vm2, %v5369_v34, %v12320_v11  ;;  %v12459_v56 = vsel %vm3835_vm1, %v5285_v7, %v5281_v40  ;;  %v3073_v58 = vmul.f32 0.015625, %v2212_v44  ;;  %v3072_v46 = vmul.f32 0.015625, %v2209_v31 }
 0x1ae   : > { %v2075_v11 = vsel %vm1198_vm0, %v9133_v18, 0.0  ;;  %v9229_v40 = vunpack.c.l.bf16 %v12462_v16  ;;  %v9194_v34 = vunpack.c.h.bf16 %v12250_v50 }
 0x1af   : > { %v5522_v33 = vrot.slane %v3073_v58, %v11671_v10  ;;  %v5518_v37 = vrot.slane %v3072_v46, %v11667_v6  ;;  %2031 = vadd.xlane.f32.xlu1 %v2030_v25  ;;  %1980 = vadd.xlane.f32.xlu0 %v1979_v48  ;;  %v12474_v58 = vld [vmem:[%s11536_s28 + $0x5d0] sm:$0xff]  }
 0x1b0   : > { %v2308_v21 = vpop.xlane.xlu1 %2307  ;;  %v2305_v61 = vpop.xlane.xlu0 %2304  ;;  %v2219_v46 = vsel %vm1198_vm0, %v9229_v40, 0.0  ;;  %v2168_v50 = vsel %vm1198_vm0, %v9194_v34, 0.0 }
 0x1b1   : > { %v12471_v7 = vsel %vm3835_vm1, %v5522_v33, %v5518_v37  ;;  %v3105_v44 = vmul.f32 0.015625, %v2308_v21  ;;  %v3104_v31 = vmul.f32 0.015625, %v2305_v61  ;;  %v9293_v33 = vunpack.c.l.bf16 %v12474_v58 }
 0x1b2   : > { %v9258_v37 = vunpack.c.h.bf16 %v12267_v1 }
 0x1b3   : > { %v5680_v25 = vrot.slane %v3105_v44, %v11671_v10  ;;  %v5676_v48 = vrot.slane %v3104_v31, %v11667_v6  ;;  %2127 = vadd.xlane.f32.xlu1 %v2126_v28  ;;  %2076 = vadd.xlane.f32.xlu0 %v2075_v11  ;;  %v12486_v44 = vld [vmem:[%s11536_s28 + $0x608] sm:$0xff]   ;;  %v2315_v31 = vsel %vm1198_vm0, %v9293_v33, 0.0 }
 0x1b4   : > { %v1459_v14 = vpop.xlane.xlu1 %1458  ;;  %v1408_v18 = vpop.xlane.xlu0 %1407  ;;  %v2264_v1 = vsel %vm1198_vm0, %v9258_v37, 0.0 }
 0x1b5   : > { %v12483_v21 = vsel %vm3835_vm1, %v5680_v25, %v5676_v48  ;;  %v2822_v61 = vmul.f32 0.015625, %v1459_v14  ;;  %v2805_v9 = vmul.f32 0.015625, %v1408_v18  ;;  %v9354_v25 = vunpack.c.h.bf16 %v12288_v15 }
 0x1b6   : > { %v9321_v48 = vunpack.c.l.bf16 %v12486_v44 }
 0x1b7   : > { %v4283_v28 = vrot.slane %v2822_v61, %v11710_v43  ;;  %v4199_v11 = vrot.slane %v2805_v9, %v11686_v23  ;;  %2220 = vadd.xlane.f32.xlu1 %v2219_v46  ;;  %2169 = vadd.xlane.f32.xlu0 %v2168_v50  ;;  %v12503_v50 = vld [vmem:[%s11536_s28 + $0x688] sm:$0xff]  }
 0x1b8   : > { %v1555_v40 = vpop.xlane.xlu1 %1554  ;;  %v1504_v34 = vpop.xlane.xlu0 %1503 }
 0x1b9   : > { %v12496_v14 = vsel %vm3870_vm6, %v4283_v28, %v12329_v36  ;;  %v12500_v18 = vsel %vm3863_vm5, %v4199_v11, %v12333_v39  ;;  %v2854_v9 = vmul.f32 0.015625, %v1555_v40  ;;  %v2837_v46 = vmul.f32 0.015625, %v1504_v34 }
 0x1ba   : > { %v2408_v36 = vsel %vm1198_vm0, %v9354_v25, 0.0  ;;  %v2357_v28 = vsel %vm1198_vm0, %v9321_v48, 0.0  ;;  %v9418_v39 = vunpack.c.h.bf16 %v12304_v3  ;;  %v9385_v11 = vunpack.c.l.bf16 %v12503_v50 }
 0x1bb   : > { %v4441_v33 = vrot.slane %v2854_v9, %v11710_v43  ;;  %v4357_v37 = vrot.slane %v2837_v46, %v11686_v23  ;;  %2316 = vadd.xlane.f32.xlu1 %v2315_v31  ;;  %2265 = vadd.xlane.f32.xlu0 %v2264_v1  ;;  %v9794_v9 = vld [vmem:[%s11536_s28 + $0x700] sm:$0xff]  }
 0x1bc   : > { %v1648_v15 = vpop.xlane.xlu1 %1647  ;;  %v1597_v61 = vpop.xlane.xlu0 %1596  ;;  %v9446_v60 = vunpack.c.h.bf16 %v9794_v9 }
 0x1bd   : > { %v12513_v40 = vsel %vm3870_vm6, %v4441_v33, %v12346_v30  ;;  %v12517_v34 = vsel %vm3863_vm5, %v4357_v37, %v12350_v62  ;;  %v2885_v31 = vmul.f32 0.015625, %v1648_v15  ;;  %v2868_v1 = vmul.f32 0.015625, %v1597_v61 }
 0x1be   : > { %v2504_v30 = vsel %vm1198_vm0, %v9418_v39, 0.0  ;;  %v2453_v33 = vsel %vm1198_vm0, %v9385_v11, 0.0  ;;  %v9445_v62 = vunpack.c.l.bf16 %v9794_v9 }
 0x1bf   : > { %v4594_v25 = vrot.slane %v2885_v31, %v11686_v23  ;;  %v4510_v48 = vrot.slane %v2868_v1, %v11694_v29  ;;  %2409 = vadd.xlane.f32.xlu1 %v2408_v36  ;;  %2358 = vadd.xlane.f32.xlu0 %v2357_v28  ;;  %v9810_v36 = vld [vmem:[%s11536_s28 + $0x780] sm:$0xff]   ;;  %v12534_v28 = vld [vmem:[%s11536_s28 + $0x748] sm:$0xff]  }
 0x1c0   : > { %v1744_v3 = vpop.xlane.xlu1 %1743  ;;  %v1693_v46 = vpop.xlane.xlu0 %1692 }
 0x1c1   : > { %v12526_v37 = vsel %vm3863_vm5, %v4594_v25, %v12363_v53  ;;  %v12530_v15 = vsel %vm3856_vm4, %v4510_v48, %v12367_v8  ;;  %v2917_v61 = vmul.f32 0.015625, %v1744_v3  ;;  %v2900_v31 = vmul.f32 0.015625, %v1693_v46 }
 0x1c2   : > { %v2546_v53 = vsel %vm1198_vm0, %v9446_v60, 0.0  ;;  %v2543_v25 = vsel %vm1198_vm0, %v9445_v62, 0.0  ;;  %v9509_v8 = vunpack.c.l.bf16 %v9810_v36  ;;  %v9481_v48 = vunpack.c.l.bf16 %v12534_v28 }
 0x1c3   : > { %v4752_v39 = vrot.slane %v2917_v61, %v11686_v23  ;;  %v4668_v11 = vrot.slane %v2900_v31, %v11694_v29  ;;  %2505 = vadd.xlane.f32.xlu1 %v2504_v30  ;;  %2454 = vadd.xlane.f32.xlu0 %v2453_v33  ;;  %v12550_v33 = vld [vmem:[%s11536_s28 + $0x7c8] sm:$0xff]  }
 0x1c4   : > { %v1837_v1 = vpop.xlane.xlu1 %1836  ;;  %v1786_v9 = vpop.xlane.xlu0 %1785 }
 0x1c5   : > { %v12543_v3 = vsel %vm3863_vm5, %v4752_v39, %v12380_v22  ;;  %v12547_v46 = vsel %vm3856_vm4, %v4668_v11, %v12384_v35  ;;  %v2948_v61 = vmul.f32 0.015625, %v1837_v1  ;;  %v2931_v30 = vmul.f32 0.015625, %v1786_v9 }
 0x1c6   : > { %v2639_v22 = vsel %vm1198_vm0, %v9509_v8, 0.0  ;;  %v2597_v39 = vsel %vm1198_vm0, %v9481_v48, 0.0  ;;  %v9545_v35 = vunpack.c.l.bf16 %v12550_v33  ;;  %v9510_v11 = vunpack.c.h.bf16 %v9810_v36 }
 0x1c7   : > { %v4905_v60 = vrot.slane %v2948_v61, %v11694_v29  ;;  %v4821_v62 = vrot.slane %v2931_v30, %v11680_v19  ;;  %2547 = vadd.xlane.f32.xlu1 %v2546_v53  ;;  %2544 = vadd.xlane.f32.xlu0 %v2543_v25  ;;  %v12566_v25 = vld [vmem:[%s11536_s28 + $0x120] sm:$0xff]  }
 0x1c8   : > { %v1933_v31 = vpop.xlane.xlu1 %1932  ;;  %v1882_v0 = vpop.xlane.xlu0 %1881 }
 0x1c9   : > { %v12559_v1 = vsel %vm3856_vm4, %v4905_v60, %v12397_v12  ;;  %v12563_v9 = vsel %vm3849_vm3, %v4821_v62, %v12401_v57  ;;  %v2980_v61 = vmul.f32 0.015625, %v1933_v31  ;;  %v2963_v53 = vmul.f32 0.015625, %v1882_v0 }
 0x1ca   : > { %v2693_v12 = vsel %vm1198_vm0, %v9545_v35, 0.0  ;;  %v2642_v60 = vsel %vm1198_vm0, %v9510_v11, 0.0  ;;  %v8726_v57 = vunpack.c.h.bf16 %v12336_v54  ;;  %v8693_v62 = vunpack.c.l.bf16 %v12566_v25 }
 0x1cb   : > { %v5063_v8 = vrot.slane %v2980_v61, %v11694_v29  ;;  %v4979_v48 = vrot.slane %v2963_v53, %v11680_v19  ;;  %2640 = vadd.xlane.f32.xlu1 %v2639_v22  ;;  %2598 = vadd.xlane.f32.xlu0 %v2597_v39  ;;  %v12583_v61 = vld [vmem:[%s11536_s28 + $0x1a0] sm:$0xff]  }
 0x1cc   : > { %v2026_v36 = vpop.xlane.xlu1 %2025  ;;  %v1975_v30 = vpop.xlane.xlu0 %1974 }
 0x1cd   : > { %v12576_v0 = vsel %vm3856_vm4, %v5063_v8, %v12414_v49  ;;  %v12580_v31 = vsel %vm3849_vm3, %v4979_v48, %v12418_v4  ;;  %v3011_v22 = vmul.f32 0.015625, %v2026_v36  ;;  %v2994_v39 = vmul.f32 0.015625, %v1975_v30 }
 0x1ce   : > { %v1466_v49 = vsel %vm1198_vm0, %v8726_v57, 0.0  ;;  %v1415_v8 = vsel %vm1198_vm0, %v8693_v62, 0.0  ;;  %v8790_v4 = vunpack.c.h.bf16 %v12353_v5  ;;  %v8757_v48 = vunpack.c.l.bf16 %v12583_v61 }
 0x1cf   : > { %v5216_v35 = vrot.slane %v3011_v22, %v11680_v19  ;;  %v5132_v11 = vrot.slane %v2994_v39, %v11675_v13  ;;  %2694 = vadd.xlane.f32.xlu1 %v2693_v12  ;;  %2643 = vadd.xlane.f32.xlu0 %v2642_v60  ;;  %v12600_v22 = vld [vmem:[%s11536_s28 + $0x260] sm:$0xff]  }
 0x1d0   : > { %v2122_v54 = vpop.xlane.xlu1 %2121  ;;  %v2071_v53 = vpop.xlane.xlu0 %2070 }
 0x1d1   : > { %v12593_v36 = vsel %vm3849_vm3, %v5216_v35, %v12442_v38  ;;  %v12597_v30 = vsel %vm3842_vm2, %v5132_v11, %v12430_v59  ;;  %v3043_v12 = vmul.f32 0.015625, %v2122_v54  ;;  %v3026_v60 = vmul.f32 0.015625, %v2071_v53 }
 0x1d2   : > { %v1562_v38 = vsel %vm1198_vm0, %v8790_v4, 0.0  ;;  %v1511_v35 = vsel %vm1198_vm0, %v8757_v48, 0.0  ;;  %v8853_v59 = vunpack.c.l.bf16 %v12600_v22  ;;  %v8818_v11 = vunpack.c.h.bf16 %v12370_v17 }
 0x1d3   : > { %v5374_v57 = vrot.slane %v3043_v12, %v11680_v19  ;;  %v5290_v62 = vrot.slane %v3026_v60, %v11675_v13  ;;  %1467 = vadd.xlane.f32.xlu1 %v1466_v49  ;;  %1416 = vadd.xlane.f32.xlu0 %v1415_v8  ;;  %v12617_v12 = vld [vmem:[%s11536_s28 + $0x2e0] sm:$0xff]  }
 0x1d4   : > { %v2164_v5 = vpop.xlane.xlu1 %2163  ;;  %v2161_v39 = vpop.xlane.xlu0 %2160 }
 0x1d5   : > { %v12610_v54 = vsel %vm3849_vm3, %v5374_v57, %v12456_v32  ;;  %v12614_v53 = vsel %vm3842_vm2, %v5290_v62, %v12459_v56  ;;  %v3057_v49 = vmul.f32 0.015625, %v2164_v5  ;;  %v3056_v8 = vmul.f32 0.015625, %v2161_v39 }
 0x1d6   : > { %v1655_v32 = vsel %vm1198_vm0, %v8853_v59, 0.0  ;;  %v1604_v57 = vsel %vm1198_vm0, %v8818_v11, 0.0  ;;  %v8917_v56 = vunpack.c.l.bf16 %v12617_v12  ;;  %v8882_v62 = vunpack.c.h.bf16 %v12387_v51 }
 0x1d7   : > { %v5443_v4 = vrot.slane %v3057_v49, %v11671_v10  ;;  %v5439_v48 = vrot.slane %v3056_v8, %v11667_v6  ;;  %1563 = vadd.xlane.f32.xlu1 %v1562_v38  ;;  %1512 = vadd.xlane.f32.xlu0 %v1511_v35  ;;  %v12629_v49 = vld [vmem:[%s11536_s28 + $0x318] sm:$0xff]   ;;  %v8978_v51 = vunpack.c.h.bf16 %v12404_v45 }
 0x1d8   : > { %v2257_v17 = vpop.xlane.xlu1 %2256  ;;  %v2215_v60 = vpop.xlane.xlu0 %2214  ;;  %v1751_v11 = vsel %vm1198_vm0, %v8917_v56, 0.0  ;;  %v1700_v52 = vsel %vm1198_vm0, %v8882_v62, 0.0 }
 0x1d9   : > { %v12626_v5 = vsel %vm3835_vm1, %v5443_v4, %v5439_v48  ;;  %v3074_v39 = vmul.f32 0.015625, %v2215_v60  ;;  %v3088_v8 = vmul.f32 0.015625, %v2257_v17  ;;  %v8945_v4 = vunpack.c.l.bf16 %v12629_v49 }
 0x1db   : > { %v5527_v38 = vrot.slane %v3074_v39, %v11675_v13  ;;  %1656 = vadd.xlane.f32.xlu1 %v1655_v32  ;;  %1605 = vadd.xlane.f32.xlu0 %v1604_v57  ;;  %v5597_v32 = vrot.slane %v3088_v8, %v11667_v6  ;;  %v1844_v39 = vsel %vm1198_vm0, %v8978_v51, 0.0 }
 0x1dc   : > { %v2311_v35 = vpop.xlane.xlu1 %2310  ;;  %v2260_v59 = vpop.xlane.xlu0 %2259 }
 0x1dd   : > { %v12638_v48 = vsel %vm3842_vm2, %v5527_v38, %v12471_v7  ;;  %v3106_v60 = vmul.f32 0.015625, %v2311_v35  ;;  %v3089_v17 = vmul.f32 0.015625, %v2260_v59  ;;  %v1793_v7 = vsel %vm1198_vm0, %v8945_v4, 0.0 }
 0x1de   : > { %v9042_v38 = vunpack.c.h.bf16 %v12421_v27  ;;  %v9009_v35 = vunpack.c.l.bf16 %v12641_v41 }
 0x1df   : > { %v5685_v57 = vrot.slane %v3106_v60, %v11675_v13  ;;  %v5601_v56 = vrot.slane %v3089_v17, %v11671_v10  ;;  %1752 = vadd.xlane.f32.xlu1 %v1751_v11  ;;  %1701 = vadd.xlane.f32.xlu0 %v1700_v52  ;;  %v12658_v11 = vld [vmem:[%s11536_s28 + $0x458] sm:$0xff]  }
 0x1e0   : > { %v2404_v45 = vpop.xlane.xlu1 %2403  ;;  %v2401_v62 = vpop.xlane.xlu0 %2400  ;;  %v1940_v47 = vsel %vm1198_vm0, %v9042_v38, 0.0 }
 0x1e1   : > { %v12652_v59 = vsel %vm3842_vm2, %v5685_v57, %v12483_v21  ;;  %v12655_v8 = vsel %vm3835_vm1, %v5601_v56, %v5597_v32  ;;  %v3137_v60 = vmul.f32 0.015625, %v2404_v45  ;;  %v3136_v52 = vmul.f32 0.015625, %v2401_v62 }
 0x1e2   : > { %v1889_v21 = vsel %vm1198_vm0, %v9009_v35, 0.0  ;;  %v9105_v32 = vunpack.c.l.bf16 %v12658_v11  ;;  %v9070_v57 = vunpack.c.h.bf16 %v12433_v24 }
 0x1e3   : > { %v5838_v51 = vrot.slane %v3137_v60, %v11671_v10  ;;  %v5834_v4 = vrot.slane %v3136_v52, %v11667_v6  ;;  %1845 = vadd.xlane.f32.xlu1 %v1844_v39  ;;  %1794 = vadd.xlane.f32.xlu0 %v1793_v7  ;;  %v12670_v60 = vld [vmem:[%s11536_s28 + $0x4d8] sm:$0xff]  }
 0x1e4   : > { %v2500_v27 = vpop.xlane.xlu1 %2499  ;;  %v2497_v17 = vpop.xlane.xlu0 %2496  ;;  %v2033_v52 = vsel %vm1198_vm0, %v9105_v32, 0.0  ;;  %v1982_v24 = vsel %vm1198_vm0, %v9070_v57, 0.0 }
 0x1e5   : > { %v12667_v56 = vsel %vm3835_vm1, %v5838_v51, %v5834_v4  ;;  %v3169_v45 = vmul.f32 0.015625, %v2500_v27  ;;  %v3168_v62 = vmul.f32 0.015625, %v2497_v17  ;;  %v9169_v51 = vunpack.c.l.bf16 %v12670_v60 }
 0x1e6   : > { %v9134_v4 = vunpack.c.h.bf16 %v12445_v55 }
 0x1e7   : > { %v5996_v39 = vrot.slane %v3169_v45, %v11671_v10  ;;  %v5992_v7 = vrot.slane %v3168_v62, %v11667_v6  ;;  %1941 = vadd.xlane.f32.xlu1 %v1940_v47  ;;  %1890 = vadd.xlane.f32.xlu0 %v1889_v21  ;;  %v12682_v45 = vld [vmem:[%s11536_s28 + $0x510] sm:$0xff]   ;;  %v2129_v62 = vsel %vm1198_vm0, %v9169_v51, 0.0 }
 0x1e8   : > { %v1462_v38 = vpop.xlane.xlu1 %1461  ;;  %v1411_v35 = vpop.xlane.xlu0 %1410  ;;  %v2078_v55 = vsel %vm1198_vm0, %v9134_v4, 0.0 }
 0x1e9   : > { %v12679_v27 = vsel %vm3835_vm1, %v5996_v39, %v5992_v7  ;;  %v2823_v17 = vmul.f32 0.015625, %v1462_v38  ;;  %v2806_v20 = vmul.f32 0.015625, %v1411_v35  ;;  %v9230_v39 = vunpack.c.h.bf16 %v12462_v16 }
 0x1ea   : > { %v9197_v7 = vunpack.c.l.bf16 %v12682_v45 }
 0x1eb   : > { %v4288_v47 = vrot.slane %v2823_v17, %v11707_v42  ;;  %v4204_v21 = vrot.slane %v2806_v20, %v11710_v43  ;;  %2034 = vadd.xlane.f32.xlu1 %v2033_v52  ;;  %1983 = vadd.xlane.f32.xlu0 %v1982_v24  ;;  %v12699_v24 = vld [vmem:[%s11536_s28 + $0x590] sm:$0xff]  }
 0x1ec   : > { %v1558_v32 = vpop.xlane.xlu1 %1557  ;;  %v1507_v57 = vpop.xlane.xlu0 %1506 }
 0x1ed   : > { %v12692_v38 = vsel %vm3877_vm7, %v4288_v47, %v12496_v14  ;;  %v12696_v35 = vsel %vm3870_vm6, %v4204_v21, %v12500_v18  ;;  %v2855_v20 = vmul.f32 0.015625, %v1558_v32  ;;  %v2838_v52 = vmul.f32 0.015625, %v1507_v57 }
 0x1ee   : > { %v2222_v14 = vsel %vm1198_vm0, %v9230_v39, 0.0  ;;  %v2171_v47 = vsel %vm1198_vm0, %v9197_v7, 0.0  ;;  %v9294_v18 = vunpack.c.h.bf16 %v12474_v58  ;;  %v9261_v21 = vunpack.c.l.bf16 %v12699_v24 }
 0x1ef   : > { %v4446_v51 = vrot.slane %v2855_v20, %v11707_v42  ;;  %v4362_v4 = vrot.slane %v2838_v52, %v11710_v43  ;;  %2130 = vadd.xlane.f32.xlu1 %v2129_v62  ;;  %2079 = vadd.xlane.f32.xlu0 %v2078_v55  ;;  %v12716_v20 = vld [vmem:[%s11536_s28 + $0x650] sm:$0xff]  }
 0x1f0   : > { %v1651_v16 = vpop.xlane.xlu1 %1650  ;;  %v1600_v17 = vpop.xlane.xlu0 %1599 }
 0x1f1   : > { %v12709_v32 = vsel %vm3877_vm7, %v4446_v51, %v12513_v40  ;;  %v12713_v57 = vsel %vm3870_vm6, %v4362_v4, %v12517_v34  ;;  %v2886_v62 = vmul.f32 0.015625, %v1651_v16  ;;  %v2869_v55 = vmul.f32 0.015625, %v1600_v17 }
 0x1f2   : > { %v2318_v40 = vsel %vm1198_vm0, %v9294_v18, 0.0  ;;  %v2267_v51 = vsel %vm1198_vm0, %v9261_v21, 0.0  ;;  %v9357_v34 = vunpack.c.l.bf16 %v12716_v20  ;;  %v9322_v4 = vunpack.c.h.bf16 %v12486_v44 }
 0x1f3   : > { %v4599_v39 = vrot.slane %v2886_v62, %v11710_v43  ;;  %v4515_v7 = vrot.slane %v2869_v55, %v11686_v23  ;;  %2223 = vadd.xlane.f32.xlu1 %v2222_v14  ;;  %2172 = vadd.xlane.f32.xlu0 %v2171_v47  ;;  %v12733_v62 = vld [vmem:[%s11536_s28 + $0x6d0] sm:$0xff]  }
 0x1f4   : > { %v1747_v58 = vpop.xlane.xlu1 %1746  ;;  %v1696_v52 = vpop.xlane.xlu0 %1695 }
 0x1f5   : > { %v12726_v16 = vsel %vm3870_vm6, %v4599_v39, %v12526_v37  ;;  %v12730_v17 = vsel %vm3863_vm5, %v4515_v7, %v12530_v15  ;;  %v2918_v14 = vmul.f32 0.015625, %v1747_v58  ;;  %v2901_v47 = vmul.f32 0.015625, %v1696_v52 }
 0x1f6   : > { %v2411_v37 = vsel %vm1198_vm0, %v9357_v34, 0.0  ;;  %v2360_v39 = vsel %vm1198_vm0, %v9322_v4, 0.0  ;;  %v9421_v15 = vunpack.c.l.bf16 %v12733_v62  ;;  %v9386_v7 = vunpack.c.h.bf16 %v12503_v50 }
 0x1f7   : > { %v4757_v18 = vrot.slane %v2918_v14, %v11710_v43  ;;  %v4673_v21 = vrot.slane %v2901_v47, %v11686_v23  ;;  %2319 = vadd.xlane.f32.xlu1 %v2318_v40  ;;  %2268 = vadd.xlane.f32.xlu0 %v2267_v51  ;;  %v12750_v14 = vld [vmem:[%s11536_s28 + $0x708] sm:$0xff]  }
 0x1f8   : > { %v1840_v44 = vpop.xlane.xlu1 %1839  ;;  %v1789_v55 = vpop.xlane.xlu0 %1788 }
 0x1f9   : > { %v12743_v58 = vsel %vm3870_vm6, %v4757_v18, %v12543_v3  ;;  %v12747_v52 = vsel %vm3863_vm5, %v4673_v21, %v12547_v46  ;;  %v2949_v40 = vmul.f32 0.015625, %v1840_v44  ;;  %v2932_v51 = vmul.f32 0.015625, %v1789_v55 }
 0x1fa   : > { %v2507_v3 = vsel %vm1198_vm0, %v9421_v15, 0.0  ;;  %v2456_v18 = vsel %vm1198_vm0, %v9386_v7, 0.0  ;;  %v9482_v46 = vunpack.c.h.bf16 %v12534_v28  ;;  %v9449_v21 = vunpack.c.l.bf16 %v12750_v14 }
 0x1fb   : > { %v4910_v34 = vrot.slane %v2949_v40, %v11686_v23  ;;  %v4826_v4 = vrot.slane %v2932_v51, %v11694_v29  ;;  %2412 = vadd.xlane.f32.xlu1 %v2411_v37  ;;  %2361 = vadd.xlane.f32.xlu0 %v2360_v39  ;;  %v12767_v40 = vld [vmem:[%s11536_s28 + $0x788] sm:$0xff]  }
 0x1fc   : > { %v1936_v50 = vpop.xlane.xlu1 %1935  ;;  %v1885_v47 = vpop.xlane.xlu0 %1884 }
 0x1fd   : > { %v12760_v44 = vsel %vm3863_vm5, %v4910_v34, %v12559_v1  ;;  %v12764_v55 = vsel %vm3856_vm4, %v4826_v4, %v12563_v9  ;;  %v2981_v37 = vmul.f32 0.015625, %v1936_v50  ;;  %v2964_v39 = vmul.f32 0.015625, %v1885_v47 }
 0x1fe   : > { %v2600_v1 = vsel %vm1198_vm0, %v9482_v46, 0.0  ;;  %v2549_v34 = vsel %vm1198_vm0, %v9449_v21, 0.0  ;;  %v9546_v9 = vunpack.c.h.bf16 %v12550_v33  ;;  %v9513_v4 = vunpack.c.l.bf16 %v12767_v40 }
 0x1ff   : > { %v5068_v15 = vrot.slane %v2981_v37, %v11686_v23  ;;  %v4984_v7 = vrot.slane %v2964_v39, %v11694_v29  ;;  %2508 = vadd.xlane.f32.xlu1 %v2507_v3  ;;  %2457 = vadd.xlane.f32.xlu0 %v2456_v18  ;;  %v12784_v37 = vld [vmem:[%s11536_s28 + $0x168] sm:$0xff]  }
 0x200   : > { %v2029_v28 = vpop.xlane.xlu1 %2028  ;;  %v1978_v51 = vpop.xlane.xlu0 %1977 }
 0x201   : > { %v12777_v50 = vsel %vm3863_vm5, %v5068_v15, %v12576_v0  ;;  %v12781_v47 = vsel %vm3856_vm4, %v4984_v7, %v12580_v31  ;;  %v3012_v3 = vmul.f32 0.015625, %v2029_v28  ;;  %v2995_v18 = vmul.f32 0.015625, %v1978_v51 }
 0x202   : > { %v2696_v0 = vsel %vm1198_vm0, %v9546_v9, 0.0  ;;  %v2645_v15 = vsel %vm1198_vm0, %v9513_v4, 0.0  ;;  %v8729_v31 = vunpack.c.l.bf16 %v12784_v37  ;;  %v8694_v7 = vunpack.c.h.bf16 %v12566_v25 }
 0x203   : > { %v5221_v46 = vrot.slane %v3012_v3, %v11694_v29  ;;  %v5137_v21 = vrot.slane %v2995_v18, %v11680_v19  ;;  %2601 = vadd.xlane.f32.xlu1 %v2600_v1  ;;  %2550 = vadd.xlane.f32.xlu0 %v2549_v34  ;;  %v12801_v3 = vld [vmem:[%s11536_s28 + $0x1e8] sm:$0xff]  }
 0x204   : > { %v2125_v33 = vpop.xlane.xlu1 %2124  ;;  %v2074_v39 = vpop.xlane.xlu0 %2073 }
 0x205   : > { %v12794_v28 = vsel %vm3856_vm4, %v5221_v46, %v12593_v36  ;;  %v12798_v51 = vsel %vm3849_vm3, %v5137_v21, %v12597_v30  ;;  %v3044_v1 = vmul.f32 0.015625, %v2125_v33  ;;  %v3027_v34 = vmul.f32 0.015625, %v2074_v39 }
 0x206   : > { %v1469_v36 = vsel %vm1198_vm0, %v8729_v31, 0.0  ;;  %v1418_v46 = vsel %vm1198_vm0, %v8694_v7, 0.0  ;;  %v8793_v30 = vunpack.c.l.bf16 %v12801_v3  ;;  %v8758_v21 = vunpack.c.h.bf16 %v12583_v61 }
 0x207   : > { %v5379_v9 = vrot.slane %v3044_v1, %v11694_v29  ;;  %v5295_v4 = vrot.slane %v3027_v34, %v11680_v19  ;;  %2697 = vadd.xlane.f32.xlu1 %v2696_v0  ;;  %2646 = vadd.xlane.f32.xlu0 %v2645_v15  ;;  %v12818_v1 = vld [vmem:[%s11536_s28 + $0x220] sm:$0xff]  }
 0x208   : > { %v2218_v25 = vpop.xlane.xlu1 %2217  ;;  %v2167_v18 = vpop.xlane.xlu0 %2166 }
 0x209   : > { %v12811_v33 = vsel %vm3856_vm4, %v5379_v9, %v12610_v54  ;;  %v12815_v39 = vsel %vm3849_vm3, %v5295_v4, %v12614_v53  ;;  %v3075_v0 = vmul.f32 0.015625, %v2218_v25  ;;  %v3058_v15 = vmul.f32 0.015625, %v2167_v18 }
 0x20a   : > { %v1565_v54 = vsel %vm1198_vm0, %v8793_v30, 0.0  ;;  %v1514_v9 = vsel %vm1198_vm0, %v8758_v21, 0.0  ;;  %v8854_v53 = vunpack.c.h.bf16 %v12600_v22  ;;  %v8821_v4 = vunpack.c.l.bf16 %v12818_v1 }
 0x20b   : > { %v5532_v31 = vrot.slane %v3075_v0, %v11680_v19  ;;  %v5448_v7 = vrot.slane %v3058_v15, %v11675_v13  ;;  %1470 = vadd.xlane.f32.xlu1 %v1469_v36  ;;  %1419 = vadd.xlane.f32.xlu0 %v1418_v46  ;;  %v12835_v0 = vld [vmem:[%s11536_s28 + $0x2a0] sm:$0xff]  }
 0x20c   : > { %v2314_v61 = vpop.xlane.xlu1 %2313  ;;  %v2263_v34 = vpop.xlane.xlu0 %2262 }
 0x20d   : > { %v12828_v25 = vsel %vm3849_vm3, %v5532_v31, %v12638_v48  ;;  %v12832_v18 = vsel %vm3842_vm2, %v5448_v7, %v12626_v5  ;;  %v3107_v36 = vmul.f32 0.015625, %v2314_v61  ;;  %v3090_v46 = vmul.f32 0.015625, %v2263_v34 }
 0x20e   : > { %v1658_v48 = vsel %vm1198_vm0, %v8854_v53, 0.0  ;;  %v1607_v31 = vsel %vm1198_vm0, %v8821_v4, 0.0  ;;  %v8918_v5 = vunpack.c.h.bf16 %v12617_v12  ;;  %v8885_v7 = vunpack.c.l.bf16 %v12835_v0 }
 0x20f   : > { %v5690_v30 = vrot.slane %v3107_v36, %v11680_v19  ;;  %v5606_v21 = vrot.slane %v3090_v46, %v11675_v13  ;;  %1566 = vadd.xlane.f32.xlu1 %v1565_v54  ;;  %1515 = vadd.xlane.f32.xlu0 %v1514_v9  ;;  %v12852_v36 = vld [vmem:[%s11536_s28 + $0x360] sm:$0xff]  }
 0x210   : > { %v2356_v22 = vpop.xlane.xlu1 %2355  ;;  %v2353_v15 = vpop.xlane.xlu0 %2352 }
 0x211   : > { %v12845_v61 = vsel %vm3849_vm3, %v5690_v30, %v12652_v59  ;;  %v12849_v34 = vsel %vm3842_vm2, %v5606_v21, %v12655_v8  ;;  %v3121_v54 = vmul.f32 0.015625, %v2356_v22  ;;  %v3120_v9 = vmul.f32 0.015625, %v2353_v15 }
 0x212   : > { %v1754_v59 = vsel %vm1198_vm0, %v8918_v5, 0.0  ;;  %v1703_v30 = vsel %vm1198_vm0, %v8885_v7, 0.0  ;;  %v8981_v8 = vunpack.c.l.bf16 %v12852_v36  ;;  %v8946_v21 = vunpack.c.h.bf16 %v12629_v49 }
 0x213   : > { %v5759_v53 = vrot.slane %v3121_v54, %v11671_v10  ;;  %v5755_v4 = vrot.slane %v3120_v9, %v11667_v6  ;;  %1659 = vadd.xlane.f32.xlu1 %v1658_v48  ;;  %1608 = vadd.xlane.f32.xlu0 %v1607_v31  ;;  %v12864_v54 = vld [vmem:[%s11536_s28 + $0x3e0] sm:$0xff]  }
 0x214   : > { %v2449_v12 = vpop.xlane.xlu1 %2448  ;;  %v2407_v46 = vpop.xlane.xlu0 %2406  ;;  %v1847_v7 = vsel %vm1198_vm0, %v8981_v8, 0.0  ;;  %v1796_v26 = vsel %vm1198_vm0, %v8946_v21, 0.0  ;;  %v9045_v49 = vunpack.c.l.bf16 %v12864_v54 }
 0x215   : > { %v12861_v22 = vsel %vm3835_vm1, %v5759_v53, %v5755_v4  ;;  %v3138_v15 = vmul.f32 0.015625, %v2407_v46  ;;  %v3152_v9 = vmul.f32 0.015625, %v2449_v12  ;;  %v9010_v53 = vunpack.c.h.bf16 %v12641_v41 }
 0x216   : > { %v1943_v41 = vsel %vm1198_vm0, %v9045_v49, 0.0 }
 0x217   : > { %v5843_v48 = vrot.slane %v3138_v15, %v11675_v13  ;;  %1755 = vadd.xlane.f32.xlu1 %v1754_v59  ;;  %1704 = vadd.xlane.f32.xlu0 %v1703_v30  ;;  %v5913_v59 = vrot.slane %v3152_v9, %v11667_v6 }
 0x218   : > { %v2503_v31 = vpop.xlane.xlu1 %2502  ;;  %v2452_v5 = vpop.xlane.xlu0 %2451 }
 0x219   : > { %v12873_v4 = vsel %vm3842_vm2, %v5843_v48, %v12667_v56  ;;  %v3170_v46 = vmul.f32 0.015625, %v2503_v31  ;;  %v3153_v12 = vmul.f32 0.015625, %v2452_v5  ;;  %v1892_v56 = vsel %vm1198_vm0, %v9010_v53, 0.0 }
 0x21a   : > { %v9106_v48 = vunpack.c.h.bf16 %v12658_v11  ;;  %v9073_v31 = vunpack.c.l.bf16 %v12876_v63 }
 0x21b   : > { %v6001_v30 = vrot.slane %v3170_v46, %v11675_v13  ;;  %v5917_v8 = vrot.slane %v3153_v12, %v11671_v10  ;;  %1848 = vadd.xlane.f32.xlu1 %v1847_v7  ;;  %1797 = vadd.xlane.f32.xlu0 %v1796_v26  ;;  %v12893_v7 = vld [vmem:[%s11536_s28 + $0x498] sm:$0xff]  }
 0x21c   : > { %v2596_v21 = vpop.xlane.xlu1 %2595  ;;  %v2593_v15 = vpop.xlane.xlu0 %2592  ;;  %v2036_v63 = vsel %vm1198_vm0, %v9106_v48, 0.0 }
 0x21d   : > { %v12887_v5 = vsel %vm3842_vm2, %v6001_v30, %v12679_v27  ;;  %v12890_v9 = vsel %vm3835_vm1, %v5917_v8, %v5913_v59  ;;  %v3201_v46 = vmul.f32 0.015625, %v2596_v21  ;;  %v3200_v26 = vmul.f32 0.015625, %v2593_v15 }
 0x21e   : > { %v1985_v27 = vsel %vm1198_vm0, %v9073_v31, 0.0  ;;  %v9170_v59 = vunpack.c.h.bf16 %v12670_v60  ;;  %v9137_v30 = vunpack.c.l.bf16 %v12893_v7 }
 0x21f   : > { %v6154_v49 = vrot.slane %v3201_v46, %v11671_v10  ;;  %v6150_v53 = vrot.slane %v3200_v26, %v11667_v6  ;;  %1944 = vadd.xlane.f32.xlu1 %v1943_v41  ;;  %1893 = vadd.xlane.f32.xlu0 %v1892_v56  ;;  %v12905_v46 = vld [vmem:[%s11536_s28 + $0x558] sm:$0xff]  }
 0x220   : > { %v2692_v11 = vpop.xlane.xlu1 %2691  ;;  %v2689_v12 = vpop.xlane.xlu0 %2688  ;;  %v2132_v60 = vsel %vm1198_vm0, %v9170_v59, 0.0  ;;  %v2081_v26 = vsel %vm1198_vm0, %v9137_v30, 0.0 }
 0x221   : > { %v12902_v8 = vsel %vm3835_vm1, %v6154_v49, %v6150_v53  ;;  %v3233_v21 = vmul.f32 0.015625, %v2692_v11  ;;  %v3232_v15 = vmul.f32 0.015625, %v2689_v12  ;;  %v9233_v49 = vunpack.c.l.bf16 %v12905_v46 }
 0x222   : > { %16025 = vst [vmem:[#allocation17_spill] sm:$0xff] %v12902_v8  ;;  %v9198_v53 = vunpack.c.h.bf16 %v12682_v45 }
 0x223   : > { %v6312_v41 = vrot.slane %v3233_v21, %v11671_v10  ;;  %v6308_v56 = vrot.slane %v3232_v15, %v11667_v6  ;;  %2037 = vadd.xlane.f32.xlu1 %v2036_v63  ;;  %1986 = vadd.xlane.f32.xlu0 %v1985_v27  ;;  %v12917_v21 = vld [vmem:[%s11536_s28 + $0x5d8] sm:$0xff]   ;;  %v2225_v15 = vsel %vm1198_vm0, %v9233_v49, 0.0 }
 0x224   : > { %v1465_v48 = vpop.xlane.xlu1 %1464  ;;  %v1414_v31 = vpop.xlane.xlu0 %1413  ;;  %v2174_v45 = vsel %vm1198_vm0, %v9198_v53, 0.0 }
 0x225   : > { %v12914_v11 = vsel %vm3835_vm1, %v6312_v41, %v6308_v56  ;;  %v2824_v12 = vmul.f32 0.015625, %v1465_v48  ;;  %v2807_v8 = vmul.f32 0.015625, %v1414_v31  ;;  %v9297_v41 = vunpack.c.l.bf16 %v12917_v21 }
 0x226   : > { %v9262_v56 = vunpack.c.h.bf16 %v12699_v24 }
 0x227   : > { %v4293_v63 = vrot.slane %v2824_v12, %v11731_v2  ;;  %v4209_v27 = vrot.slane %v2807_v8, %v11707_v42  ;;  %2133 = vadd.xlane.f32.xlu1 %v2132_v60  ;;  %2082 = vadd.xlane.f32.xlu0 %v2081_v26  ;;  %v12934_v26 = vld [vmem:[%s11536_s28 + $0x610] sm:$0xff]  }
 0x228   : > { %v1561_v59 = vpop.xlane.xlu1 %1560  ;;  %v1510_v30 = vpop.xlane.xlu0 %1509 }
 0x229   : > { %v12927_v48 = vsel %vm3884_vm8, %v4293_v63, %v12692_v38  ;;  %v12931_v31 = vsel %vm3877_vm7, %v4209_v27, %v12696_v35  ;;  %v2856_v8 = vmul.f32 0.015625, %v1561_v59  ;;  %v2839_v60 = vmul.f32 0.015625, %v1510_v30 }
 0x22a   : > { %v2321_v38 = vsel %vm1198_vm0, %v9297_v41, 0.0  ;;  %v2270_v63 = vsel %vm1198_vm0, %v9262_v56, 0.0  ;;  %v9358_v35 = vunpack.c.h.bf16 %v12716_v20  ;;  %v9325_v27 = vunpack.c.l.bf16 %v12934_v26 }
 0x22b   : > { %v4451_v49 = vrot.slane %v2856_v8, %v11731_v2  ;;  %v4367_v53 = vrot.slane %v2839_v60, %v11707_v42  ;;  %2226 = vadd.xlane.f32.xlu1 %v2225_v15  ;;  %2175 = vadd.xlane.f32.xlu0 %v2174_v45  ;;  %v12951_v8 = vld [vmem:[%s11536_s28 + $0x690] sm:$0xff]  }
 0x22c   : > { %v1654_v24 = vpop.xlane.xlu1 %1653  ;;  %v1603_v12 = vpop.xlane.xlu0 %1602 }
 0x22d   : > { %v12944_v59 = vsel %vm3884_vm8, %v4451_v49, %v12709_v32  ;;  %v12948_v30 = vsel %vm3877_vm7, %v4367_v53, %v12713_v57  ;;  %v2887_v15 = vmul.f32 0.015625, %v1654_v24  ;;  %v2870_v45 = vmul.f32 0.015625, %v1603_v12 }
 0x22e   : > { %v2414_v32 = vsel %vm1198_vm0, %v9358_v35, 0.0  ;;  %v2363_v49 = vsel %vm1198_vm0, %v9325_v27, 0.0  ;;  %v9422_v57 = vunpack.c.h.bf16 %v12733_v62  ;;  %v9389_v53 = vunpack.c.l.bf16 %v12951_v8 }
 0x22f   : > { %v4604_v41 = vrot.slane %v2887_v15, %v11707_v42  ;;  %v4520_v56 = vrot.slane %v2870_v45, %v11710_v43  ;;  %2322 = vadd.xlane.f32.xlu1 %v2321_v38  ;;  %2271 = vadd.xlane.f32.xlu0 %v2270_v63  ;;  %v12968_v15 = vld [vmem:[%s11536_s28 + $0x750] sm:$0xff]  }
 0x230   : > { %v1750_v20 = vpop.xlane.xlu1 %1749  ;;  %v1699_v60 = vpop.xlane.xlu0 %1698 }
 0x231   : > { %v12961_v24 = vsel %vm3877_vm7, %v4604_v41, %v12726_v16  ;;  %v12965_v12 = vsel %vm3870_vm6, %v4520_v56, %v12730_v17  ;;  %v2919_v38 = vmul.f32 0.015625, %v1750_v20  ;;  %v2902_v63 = vmul.f32 0.015625, %v1699_v60 }
 0x232   : > { %v2510_v16 = vsel %vm1198_vm0, %v9422_v57, 0.0  ;;  %v2459_v41 = vsel %vm1198_vm0, %v9389_v53, 0.0  ;;  %v9485_v17 = vunpack.c.l.bf16 %v12968_v15  ;;  %v9450_v56 = vunpack.c.h.bf16 %v12750_v14 }
 0x233   : > { %v4762_v35 = vrot.slane %v2919_v38, %v11707_v42  ;;  %v4678_v27 = vrot.slane %v2902_v63, %v11710_v43  ;;  %2415 = vadd.xlane.f32.xlu1 %v2414_v32  ;;  %2364 = vadd.xlane.f32.xlu0 %v2363_v49  ;;  %v12985_v38 = vld [vmem:[%s11536_s28 + $0x7d0] sm:$0xff]  }
 0x234   : > { %v1843_v62 = vpop.xlane.xlu1 %1842  ;;  %v1792_v45 = vpop.xlane.xlu0 %1791 }
 0x235   : > { %v12978_v20 = vsel %vm3877_vm7, %v4762_v35, %v12743_v58  ;;  %v12982_v60 = vsel %vm3870_vm6, %v4678_v27, %v12747_v52  ;;  %v2950_v32 = vmul.f32 0.015625, %v1843_v62  ;;  %v2933_v49 = vmul.f32 0.015625, %v1792_v45 }
 0x236   : > { %v2603_v58 = vsel %vm1198_vm0, %v9485_v17, 0.0  ;;  %v2552_v35 = vsel %vm1198_vm0, %v9450_v56, 0.0  ;;  %v9549_v52 = vunpack.c.l.bf16 %v12985_v38  ;;  %v9514_v27 = vunpack.c.h.bf16 %v12767_v40 }
 0x237   : > { %v4915_v57 = vrot.slane %v2950_v32, %v11710_v43  ;;  %v4831_v53 = vrot.slane %v2933_v49, %v11686_v23  ;;  %2511 = vadd.xlane.f32.xlu1 %v2510_v16  ;;  %2460 = vadd.xlane.f32.xlu0 %v2459_v41  ;;  %v13002_v32 = vld [vmem:[%s11536_s28 + $0x128] sm:$0xff]  }
 0x238   : > { %v1939_v14 = vpop.xlane.xlu1 %1938  ;;  %v1888_v63 = vpop.xlane.xlu0 %1887 }
 0x239   : > { %v12995_v62 = vsel %vm3870_vm6, %v4915_v57, %v12760_v44  ;;  %v12999_v45 = vsel %vm3863_vm5, %v4831_v53, %v12764_v55  ;;  %v2982_v16 = vmul.f32 0.015625, %v1939_v14  ;;  %v2965_v41 = vmul.f32 0.015625, %v1888_v63 }
 0x23a   : > { %v2699_v44 = vsel %vm1198_vm0, %v9549_v52, 0.0  ;;  %v2648_v57 = vsel %vm1198_vm0, %v9514_v27, 0.0  ;;  %v8730_v55 = vunpack.c.h.bf16 %v12784_v37  ;;  %v8697_v53 = vunpack.c.l.bf16 %v13002_v32 }
 0x23b   : > { %v5073_v17 = vrot.slane %v2982_v16, %v11710_v43  ;;  %v4989_v56 = vrot.slane %v2965_v41, %v11686_v23  ;;  %2604 = vadd.xlane.f32.xlu1 %v2603_v58  ;;  %2553 = vadd.xlane.f32.xlu0 %v2552_v35  ;;  %v13019_v16 = vld [vmem:[%s11536_s28 + $0x1a8] sm:$0xff]  }
 0x23c   : > { %v2032_v40 = vpop.xlane.xlu1 %2031  ;;  %v1981_v49 = vpop.xlane.xlu0 %1980 }
 0x23d   : > { %v13012_v14 = vsel %vm3870_vm6, %v5073_v17, %v12777_v50  ;;  %v13016_v63 = vsel %vm3863_vm5, %v4989_v56, %v12781_v47  ;;  %v3013_v58 = vmul.f32 0.015625, %v2032_v40  ;;  %v2996_v35 = vmul.f32 0.015625, %v1981_v49 }
 0x23e   : > { %v1472_v50 = vsel %vm1198_vm0, %v8730_v55, 0.0  ;;  %v1421_v17 = vsel %vm1198_vm0, %v8697_v53, 0.0  ;;  %v8794_v47 = vunpack.c.h.bf16 %v12801_v3  ;;  %v8761_v56 = vunpack.c.l.bf16 %v13019_v16 }
 0x23f   : > { %v5226_v52 = vrot.slane %v3013_v58, %v11686_v23  ;;  %v5142_v27 = vrot.slane %v2996_v35, %v11694_v29  ;;  %2700 = vadd.xlane.f32.xlu1 %v2699_v44  ;;  %2649 = vadd.xlane.f32.xlu0 %v2648_v57  ;;  %v13036_v58 = vld [vmem:[%s11536_s28 + $0x268] sm:$0xff]  }
 0x240   : > { %v2128_v37 = vpop.xlane.xlu1 %2127  ;;  %v2077_v41 = vpop.xlane.xlu0 %2076 }
 0x241   : > { %v13029_v40 = vsel %vm3863_vm5, %v5226_v52, %v12794_v28  ;;  %v13033_v49 = vsel %vm3856_vm4, %v5142_v27, %v12798_v51  ;;  %v3045_v44 = vmul.f32 0.015625, %v2128_v37  ;;  %v3028_v57 = vmul.f32 0.015625, %v2077_v41 }
 0x242   : > { %v1568_v28 = vsel %vm1198_vm0, %v8794_v47, 0.0  ;;  %v1517_v52 = vsel %vm1198_vm0, %v8761_v56, 0.0  ;;  %v8857_v51 = vunpack.c.l.bf16 %v13036_v58  ;;  %v8822_v27 = vunpack.c.h.bf16 %v12818_v1 }
 0x243   : > { %v5384_v55 = vrot.slane %v3045_v44, %v11686_v23  ;;  %v5300_v53 = vrot.slane %v3028_v57, %v11694_v29  ;;  %1473 = vadd.xlane.f32.xlu1 %v1472_v50  ;;  %1422 = vadd.xlane.f32.xlu0 %v1421_v17  ;;  %v13053_v44 = vld [vmem:[%s11536_s28 + $0x2e8] sm:$0xff]  }
 0x244   : > { %v2221_v3 = vpop.xlane.xlu1 %2220  ;;  %v2170_v35 = vpop.xlane.xlu0 %2169 }
 0x245   : > { %v13046_v37 = vsel %vm3863_vm5, %v5384_v55, %v12811_v33  ;;  %v13050_v41 = vsel %vm3856_vm4, %v5300_v53, %v12815_v39  ;;  %v3076_v50 = vmul.f32 0.015625, %v2221_v3  ;;  %v3059_v17 = vmul.f32 0.015625, %v2170_v35 }
 0x246   : > { %v1661_v33 = vsel %vm1198_vm0, %v8857_v51, 0.0  ;;  %v1610_v55 = vsel %vm1198_vm0, %v8822_v27, 0.0  ;;  %v8921_v39 = vunpack.c.l.bf16 %v13053_v44  ;;  %v8886_v53 = vunpack.c.h.bf16 %v12835_v0 }
 0x247   : > { %v5537_v47 = vrot.slane %v3076_v50, %v11694_v29  ;;  %v5453_v56 = vrot.slane %v3059_v17, %v11680_v19  ;;  %1569 = vadd.xlane.f32.xlu1 %v1568_v28  ;;  %1518 = vadd.xlane.f32.xlu0 %v1517_v52  ;;  %v13070_v50 = vld [vmem:[%s11536_s28 + $0x320] sm:$0xff]  }
 0x248   : > { %v2317_v1 = vpop.xlane.xlu1 %2316  ;;  %v2266_v57 = vpop.xlane.xlu0 %2265 }
 0x249   : > { %v13063_v3 = vsel %vm3856_vm4, %v5537_v47, %v12828_v25  ;;  %v13067_v35 = vsel %vm3849_vm3, %v5453_v56, %v12832_v18  ;;  %v3108_v28 = vmul.f32 0.015625, %v2317_v1  ;;  %v3091_v52 = vmul.f32 0.015625, %v2266_v57 }
 0x24a   : > { %v1757_v25 = vsel %vm1198_vm0, %v8921_v39, 0.0  ;;  %v1706_v47 = vsel %vm1198_vm0, %v8886_v53, 0.0  ;;  %v8982_v18 = vunpack.c.h.bf16 %v12852_v36  ;;  %v8949_v56 = vunpack.c.l.bf16 %v13070_v50 }
 0x24b   : > { %v5695_v51 = vrot.slane %v3108_v28, %v11694_v29  ;;  %v5611_v27 = vrot.slane %v3091_v52, %v11680_v19  ;;  %1662 = vadd.xlane.f32.xlu1 %v1661_v33  ;;  %1611 = vadd.xlane.f32.xlu0 %v1610_v55  ;;  %v13087_v28 = vld [vmem:[%s11536_s28 + $0x3a0] sm:$0xff]  }
 0x24c   : > { %v2410_v0 = vpop.xlane.xlu1 %2409  ;;  %v2359_v17 = vpop.xlane.xlu0 %2358 }
 0x24d   : > { %v13080_v1 = vsel %vm3856_vm4, %v5695_v51, %v12845_v61  ;;  %v13084_v57 = vsel %vm3849_vm3, %v5611_v27, %v12849_v34  ;;  %v3139_v33 = vmul.f32 0.015625, %v2410_v0  ;;  %v3122_v55 = vmul.f32 0.015625, %v2359_v17 }
 0x24e   : > { %v1850_v61 = vsel %vm1198_vm0, %v8982_v18, 0.0  ;;  %v1799_v51 = vsel %vm1198_vm0, %v8949_v56, 0.0  ;;  %v9046_v34 = vunpack.c.h.bf16 %v12864_v54  ;;  %v9013_v27 = vunpack.c.l.bf16 %v13087_v28 }
 0x24f   : > { %v5848_v39 = vrot.slane %v3139_v33, %v11680_v19  ;;  %v5764_v53 = vrot.slane %v3122_v55, %v11675_v13  ;;  %1758 = vadd.xlane.f32.xlu1 %v1757_v25  ;;  %1707 = vadd.xlane.f32.xlu0 %v1706_v47  ;;  %v13104_v33 = vld [vmem:[%s11536_s28 + $0x460] sm:$0xff]  }
 0x250   : > { %v2506_v36 = vpop.xlane.xlu1 %2505  ;;  %v2455_v52 = vpop.xlane.xlu0 %2454 }
 0x251   : > { %v13097_v0 = vsel %vm3849_vm3, %v5848_v39, %v12873_v4  ;;  %v13101_v17 = vsel %vm3842_vm2, %v5764_v53, %v12861_v22  ;;  %v3171_v25 = vmul.f32 0.015625, %v2506_v36  ;;  %v3154_v47 = vmul.f32 0.015625, %v2455_v52  ;;  %v16027_v53 = vld [vmem:[#allocation16_spill] sm:$0xff] }
 0x252   : > { %16026 = vst [vmem:[#allocation18_spill] sm:$0xff] %v13101_v17  ;;  %v1946_v4 = vsel %vm1198_vm0, %v9046_v34, 0.0  ;;  %v1895_v39 = vsel %vm1198_vm0, %v9013_v27, 0.0  ;;  %v9109_v22 = vunpack.c.l.bf16 %v13104_v33  ;;  %v9074_v36 = vunpack.c.h.bf16 %v16027_v53 }
 0x253   : > { %v6006_v18 = vrot.slane %v3171_v25, %v11680_v19  ;;  %v5922_v56 = vrot.slane %v3154_v47, %v11675_v13  ;;  %1851 = vadd.xlane.f32.xlu1 %v1850_v61  ;;  %1800 = vadd.xlane.f32.xlu0 %v1799_v51  ;;  %v13121_v47 = vld [vmem:[%s11536_s28 + $0x4e0] sm:$0xff]  }
 0x254   : > { %v2548_v54 = vpop.xlane.xlu1 %2547  ;;  %v2545_v55 = vpop.xlane.xlu0 %2544 }
 0x255   : > { %v13114_v52 = vsel %vm3849_vm3, %v6006_v18, %v12887_v5  ;;  %v13118_v25 = vsel %vm3842_vm2, %v5922_v56, %v12890_v9  ;;  %v3185_v61 = vmul.f32 0.015625, %v2548_v54  ;;  %v3184_v51 = vmul.f32 0.015625, %v2545_v55 }
 0x256   : > { %16028 = vst [vmem:[#allocation16_spill] sm:$0xff] %v13114_v52  ;;  %16029 = vst [vmem:[#allocation19_spill] sm:$0xff] %v13118_v25  ;;  %v2039_v5 = vsel %vm1198_vm0, %v9109_v22, 0.0  ;;  %v1988_v18 = vsel %vm1198_vm0, %v9074_v36, 0.0  ;;  %v9173_v9 = vunpack.c.l.bf16 %v13121_v47  ;;  %v9138_v56 = vunpack.c.h.bf16 %v12893_v7  ;;  %v13145_v52 = vld [vmem:[%s11536_s28 + $0x598] sm:$0xff]  }
 0x257   : > { %v6075_v34 = vrot.slane %v3185_v61, %v11671_v10  ;;  %v6071_v27 = vrot.slane %v3184_v51, %v11667_v6  ;;  %1947 = vadd.xlane.f32.xlu1 %v1946_v4  ;;  %1896 = vadd.xlane.f32.xlu0 %v1895_v39  ;;  %v13133_v61 = vld [vmem:[%s11536_s28 + $0x518] sm:$0xff]   ;;  %v9234_v7 = vunpack.c.h.bf16 %v12905_v46 }
 0x258   : > { %v2641_v53 = vpop.xlane.xlu1 %2640  ;;  %v2599_v17 = vpop.xlane.xlu0 %2598  ;;  %v2135_v36 = vsel %vm1198_vm0, %v9173_v9, 0.0  ;;  %v2084_v25 = vsel %vm1198_vm0, %v9138_v56, 0.0 }
 0x259   : > { %v13130_v54 = vsel %vm3835_vm1, %v6075_v34, %v6071_v27  ;;  %v3202_v55 = vmul.f32 0.015625, %v2599_v17  ;;  %v3216_v51 = vmul.f32 0.015625, %v2641_v53  ;;  %v9201_v34 = vunpack.c.l.bf16 %v13133_v61  ;;  %v16031_v27 = vld [vmem:[#allocation17_spill] sm:$0xff] }
 0x25a   : > { %16030 = vst [vmem:[#allocation20_spill] sm:$0xff] %v13130_v54 }
 0x25b   : > { %v6159_v4 = vrot.slane %v3202_v55, %v11675_v13  ;;  %2040 = vadd.xlane.f32.xlu1 %v2039_v5  ;;  %1989 = vadd.xlane.f32.xlu0 %v1988_v18  ;;  %v6229_v5 = vrot.slane %v3216_v51, %v11667_v6  ;;  %v2228_v55 = vsel %vm1198_vm0, %v9234_v7, 0.0  ;;  %v16032_v51 = vld [vmem:[#allocation5_spill] sm:$0xff] }
 0x25c   : > { %v2695_v39 = vpop.xlane.xlu1 %2694  ;;  %v2644_v22 = vpop.xlane.xlu0 %2643 }
 0x25d   : > { %v13142_v17 = vsel %vm3842_vm2, %v6159_v4, %v16031_v27  ;;  %v3234_v54 = vmul.f32 0.015625, %v2695_v39  ;;  %v3217_v53 = vmul.f32 0.015625, %v2644_v22  ;;  %v2177_v4 = vsel %vm1198_vm0, %v9201_v34, 0.0 }
 0x25e   : > { %v9298_v39 = vunpack.c.h.bf16 %v12917_v21  ;;  %v9265_v22 = vunpack.c.l.bf16 %v13145_v52 }
 0x25f   : > { %v6317_v18 = vrot.slane %v3234_v54, %v11675_v13  ;;  %v6233_v9 = vrot.slane %v3217_v53, %v11671_v10  ;;  %2136 = vadd.xlane.f32.xlu1 %v2135_v36  ;;  %2085 = vadd.xlane.f32.xlu0 %v2084_v25  ;;  %v13162_v25 = vld [vmem:[%s11536_s28 + $0x658] sm:$0xff]  }
 0x260   : > { %v1468_v46 = vpop.xlane.xlu1 %1467  ;;  %v1417_v56 = vpop.xlane.xlu0 %1416  ;;  %v2324_v53 = vsel %vm1198_vm0, %v9298_v39, 0.0 }
 0x261   : > { %v13156_v27 = vsel %vm3842_vm2, %v6317_v18, %v12914_v11  ;;  %v13159_v6 = vsel %vm3835_vm1, %v6233_v9, %v6229_v5  ;;  %v2825_v10 = vmul.f32 0.015625, %v1468_v46  ;;  %v2808_v54 = vmul.f32 0.015625, %v1417_v56 }
 0x262   : > { %v2273_v11 = vsel %vm1198_vm0, %v9265_v22, 0.0  ;;  %v9361_v5 = vunpack.c.l.bf16 %v13162_v25  ;;  %v9326_v18 = vunpack.c.h.bf16 %v12934_v26  ;;  %vm6384_vm1 = vcmask 1041409  }
 0x263   : > { %v4298_v36 = vrot.slane %v2825_v10, %v16032_v51  ;;  %v4214_v7 = vrot.slane %v2808_v54, %v11731_v2  ;;  %2229 = vadd.xlane.f32.xlu1 %v2228_v55  ;;  %2178 = vadd.xlane.f32.xlu0 %v2177_v4  ;;  %v13179_v4 = vld [vmem:[%s11536_s28 + $0x6d8] sm:$0xff]  }
 0x264   : > { %v1564_v21 = vpop.xlane.xlu1 %1563  ;;  %v1513_v34 = vpop.xlane.xlu0 %1512  ;;  %v2366_v54 = vsel %vm1198_vm0, %v9326_v18, 0.0 }
 0x265   : > { %v13172_v9 = vsel %vm3891_vm9, %v4298_v36, %v12927_v48  ;;  %v13176_v46 = vsel %vm3884_vm8, %v4214_v7, %v12931_v31  ;;  %v2857_v56 = vmul.f32 0.015625, %v1564_v21  ;;  %v2840_v55 = vmul.f32 0.015625, %v1513_v34 }
 0x266   : > { %v2417_v48 = vsel %vm1198_vm0, %v9361_v5, 0.0  ;;  %v9425_v31 = vunpack.c.l.bf16 %v13179_v4  ;;  %v9390_v36 = vunpack.c.h.bf16 %v12951_v8 }
 0x267   : > { %v4456_v39 = vrot.slane %v2857_v56, %v16032_v51  ;;  %v4372_v22 = vrot.slane %v2840_v55, %v11731_v2  ;;  %2325 = vadd.xlane.f32.xlu1 %v2324_v53  ;;  %2274 = vadd.xlane.f32.xlu0 %v2273_v11  ;;  %v13196_v11 = vld [vmem:[%s11536_s28 + $0x710] sm:$0xff]  }
 0x268   : > { %v1657_v26 = vpop.xlane.xlu1 %1656  ;;  %v1606_v10 = vpop.xlane.xlu0 %1605  ;;  %v2462_v55 = vsel %vm1198_vm0, %v9390_v36, 0.0 }
 0x269   : > { %v13189_v7 = vsel %vm3891_vm9, %v4456_v39, %v12944_v59  ;;  %v13193_v21 = vsel %vm3884_vm8, %v4372_v22, %v12948_v30  ;;  %v2888_v34 = vmul.f32 0.015625, %v1657_v26  ;;  %v2871_v53 = vmul.f32 0.015625, %v1606_v10 }
 0x26a   : > { %v2513_v59 = vsel %vm1198_vm0, %v9425_v31, 0.0  ;;  %v9486_v30 = vunpack.c.h.bf16 %v12968_v15  ;;  %v9453_v39 = vunpack.c.l.bf16 %v13196_v11 }
 0x26b   : > { %v4609_v5 = vrot.slane %v2888_v34, %v11731_v2  ;;  %v4525_v18 = vrot.slane %v2871_v53, %v11707_v42  ;;  %2418 = vadd.xlane.f32.xlu1 %v2417_v48  ;;  %2367 = vadd.xlane.f32.xlu0 %v2366_v54  ;;  %v13213_v54 = vld [vmem:[%s11536_s28 + $0x790] sm:$0xff]  }
 0x26c   : > { %v1753_v8 = vpop.xlane.xlu1 %1752  ;;  %v1702_v56 = vpop.xlane.xlu0 %1701  ;;  %v2555_v53 = vsel %vm1198_vm0, %v9453_v39, 0.0 }
 0x26d   : > { %v13206_v22 = vsel %vm3884_vm8, %v4609_v5, %v12961_v24  ;;  %v13210_v26 = vsel %vm3877_vm7, %v4525_v18, %v12965_v12  ;;  %v2920_v10 = vmul.f32 0.015625, %v1753_v8  ;;  %v2903_v48 = vmul.f32 0.015625, %v1702_v56 }
 0x26e   : > { %v2606_v24 = vsel %vm1198_vm0, %v9486_v30, 0.0  ;;  %v9550_v12 = vunpack.c.h.bf16 %v12985_v38  ;;  %v9517_v5 = vunpack.c.l.bf16 %v13213_v54 }
 0x26f   : > { %v4767_v31 = vrot.slane %v2920_v10, %v11731_v2  ;;  %v4683_v36 = vrot.slane %v2903_v48, %v11707_v42  ;;  %2514 = vadd.xlane.f32.xlu1 %v2513_v59  ;;  %2463 = vadd.xlane.f32.xlu0 %v2462_v55  ;;  %v13230_v55 = vld [vmem:[%s11536_s28 + $0x170] sm:$0xff]  }
 0x270   : > { %v1846_v15 = vpop.xlane.xlu1 %1845  ;;  %v1795_v34 = vpop.xlane.xlu0 %1794  ;;  %v2651_v48 = vsel %vm1198_vm0, %v9517_v5, 0.0 }
 0x271   : > { %v13223_v18 = vsel %vm3884_vm8, %v4767_v31, %v12978_v20  ;;  %v13227_v8 = vsel %vm3877_vm7, %v4683_v36, %v12982_v60  ;;  %v2951_v56 = vmul.f32 0.015625, %v1846_v15  ;;  %v2934_v59 = vmul.f32 0.015625, %v1795_v34 }
 0x272   : > { %v2702_v20 = vsel %vm1198_vm0, %v9550_v12, 0.0  ;;  %v8733_v60 = vunpack.c.l.bf16 %v13230_v55  ;;  %v8698_v31 = vunpack.c.h.bf16 %v13002_v32 }
 0x273   : > { %v4920_v30 = vrot.slane %v2951_v56, %v11707_v42  ;;  %v4836_v39 = vrot.slane %v2934_v59, %v11710_v43  ;;  %2607 = vadd.xlane.f32.xlu1 %v2606_v24  ;;  %2556 = vadd.xlane.f32.xlu0 %v2555_v53  ;;  %v13247_v53 = vld [vmem:[%s11536_s28 + $0x1f0] sm:$0xff]  }
 0x274   : > { %v1942_v38 = vpop.xlane.xlu1 %1941  ;;  %v1891_v10 = vpop.xlane.xlu0 %1890  ;;  %v1424_v59 = vsel %vm1198_vm0, %v8698_v31, 0.0 }
 0x275   : > { %v13240_v36 = vsel %vm3877_vm7, %v4920_v30, %v12995_v62  ;;  %v13244_v15 = vsel %vm3870_vm6, %v4836_v39, %v12999_v45  ;;  %v2983_v34 = vmul.f32 0.015625, %v1942_v38  ;;  %v2966_v24 = vmul.f32 0.015625, %v1891_v10 }
 0x276   : > { %v1475_v62 = vsel %vm1198_vm0, %v8733_v60, 0.0  ;;  %v8797_v45 = vunpack.c.l.bf16 %v13247_v53  ;;  %v8762_v30 = vunpack.c.h.bf16 %v13019_v16 }
 0x277   : > { %v5078_v12 = vrot.slane %v2983_v34, %v11707_v42  ;;  %v4994_v5 = vrot.slane %v2966_v24, %v11710_v43  ;;  %2703 = vadd.xlane.f32.xlu1 %v2702_v20  ;;  %2652 = vadd.xlane.f32.xlu0 %v2651_v48  ;;  %v13264_v48 = vld [vmem:[%s11536_s28 + $0x228] sm:$0xff]  }
 0x278   : > { %v2035_v32 = vpop.xlane.xlu1 %2034  ;;  %v1984_v56 = vpop.xlane.xlu0 %1983  ;;  %v1520_v24 = vsel %vm1198_vm0, %v8762_v30, 0.0 }
 0x279   : > { %v13257_v39 = vsel %vm3877_vm7, %v5078_v12, %v13012_v14  ;;  %v13261_v38 = vsel %vm3870_vm6, %v4994_v5, %v13016_v63  ;;  %v3014_v10 = vmul.f32 0.015625, %v2035_v32  ;;  %v2997_v20 = vmul.f32 0.015625, %v1984_v56 }
 0x27a   : > { %v1571_v14 = vsel %vm1198_vm0, %v8797_v45, 0.0  ;;  %v8858_v63 = vunpack.c.h.bf16 %v13036_v58  ;;  %v8825_v12 = vunpack.c.l.bf16 %v13264_v48 }
 0x27b   : > { %v5231_v60 = vrot.slane %v3014_v10, %v11710_v43  ;;  %v5147_v31 = vrot.slane %v2997_v20, %v11686_v23  ;;  %1476 = vadd.xlane.f32.xlu1 %v1475_v62  ;;  %1425 = vadd.xlane.f32.xlu0 %v1424_v59  ;;  %v13281_v59 = vld [vmem:[%s11536_s28 + $0x2a8] sm:$0xff]  }
 0x27c   : > { %v2131_v16 = vpop.xlane.xlu1 %2130  ;;  %v2080_v34 = vpop.xlane.xlu0 %2079  ;;  %v1613_v20 = vsel %vm1198_vm0, %v8825_v12, 0.0 }
 0x27d   : > { %v13274_v5 = vsel %vm3870_vm6, %v5231_v60, %v13029_v40  ;;  %v13278_v32 = vsel %vm3863_vm5, %v5147_v31, %v13033_v49  ;;  %v3046_v56 = vmul.f32 0.015625, %v2131_v16  ;;  %v3029_v62 = vmul.f32 0.015625, %v2080_v34 }
 0x27e   : > { %v1664_v40 = vsel %vm1198_vm0, %v8858_v63, 0.0  ;;  %v8922_v49 = vunpack.c.h.bf16 %v13053_v44  ;;  %v8889_v60 = vunpack.c.l.bf16 %v13281_v59 }
 0x27f   : > { %v5389_v45 = vrot.slane %v3046_v56, %v11710_v43  ;;  %v5305_v30 = vrot.slane %v3029_v62, %v11686_v23  ;;  %1572 = vadd.xlane.f32.xlu1 %v1571_v14  ;;  %1521 = vadd.xlane.f32.xlu0 %v1520_v24  ;;  %v13298_v24 = vld [vmem:[%s11536_s28 + $0x368] sm:$0xff]  }
 0x280   : > { %v2224_v58 = vpop.xlane.xlu1 %2223  ;;  %v2173_v10 = vpop.xlane.xlu0 %2172  ;;  %v1709_v62 = vsel %vm1198_vm0, %v8889_v60, 0.0 }
 0x281   : > { %v13291_v31 = vsel %vm3870_vm6, %v5389_v45, %v13046_v37  ;;  %v13295_v16 = vsel %vm3863_vm5, %v5305_v30, %v13050_v41  ;;  %v3077_v34 = vmul.f32 0.015625, %v2224_v58  ;;  %v3060_v14 = vmul.f32 0.015625, %v2173_v10 }
 0x282   : > { %v1760_v37 = vsel %vm1198_vm0, %v8922_v49, 0.0  ;;  %v8985_v41 = vunpack.c.l.bf16 %v13298_v24  ;;  %v8950_v45 = vunpack.c.h.bf16 %v13070_v50 }
 0x283   : > { %v5542_v63 = vrot.slane %v3077_v34, %v11686_v23  ;;  %v5458_v12 = vrot.slane %v3060_v14, %v11694_v29  ;;  %1665 = vadd.xlane.f32.xlu1 %v1664_v40  ;;  %1614 = vadd.xlane.f32.xlu0 %v1613_v20  ;;  %v13315_v20 = vld [vmem:[%s11536_s28 + $0x3e8] sm:$0xff]  }
 0x284   : > { %v2320_v44 = vpop.xlane.xlu1 %2319  ;;  %v2269_v56 = vpop.xlane.xlu0 %2268  ;;  %v1802_v14 = vsel %vm1198_vm0, %v8950_v45, 0.0 }
 0x285   : > { %v13308_v30 = vsel %vm3863_vm5, %v5542_v63, %v13063_v3  ;;  %v13312_v58 = vsel %vm3856_vm4, %v5458_v12, %v13067_v35  ;;  %v3109_v10 = vmul.f32 0.015625, %v2320_v44  ;;  %v3092_v40 = vmul.f32 0.015625, %v2269_v56 }
 0x286   : > { %v1853_v3 = vsel %vm1198_vm0, %v8985_v41, 0.0  ;;  %v9049_v35 = vunpack.c.l.bf16 %v13315_v20  ;;  %v9014_v63 = vunpack.c.h.bf16 %v13087_v28 }
 0x287   : > { %v5700_v49 = vrot.slane %v3109_v10, %v11686_v23  ;;  %v5616_v60 = vrot.slane %v3092_v40, %v11694_v29  ;;  %1761 = vadd.xlane.f32.xlu1 %v1760_v37  ;;  %1710 = vadd.xlane.f32.xlu0 %v1709_v62  ;;  %v13332_v62 = vld [vmem:[%s11536_s28 + $0x420] sm:$0xff]  }
 0x288   : > { %v2413_v50 = vpop.xlane.xlu1 %2412  ;;  %v2362_v34 = vpop.xlane.xlu0 %2361  ;;  %v1898_v40 = vsel %vm1198_vm0, %v9014_v63, 0.0 }
 0x289   : > { %v13325_v12 = vsel %vm3863_vm5, %v5700_v49, %v13080_v1  ;;  %v13329_v44 = vsel %vm3856_vm4, %v5616_v60, %v13084_v57  ;;  %v3140_v56 = vmul.f32 0.015625, %v2413_v50  ;;  %v3123_v37 = vmul.f32 0.015625, %v2362_v34  ;;  %v16033_v50 = vld [vmem:[#allocation18_spill] sm:$0xff] }
 0x28a   : > { %v1949_v1 = vsel %vm1198_vm0, %v9049_v35, 0.0  ;;  %v9110_v57 = vunpack.c.h.bf16 %v13104_v33  ;;  %v9077_v49 = vunpack.c.l.bf16 %v13332_v62 }
 0x28b   : > { %v5853_v41 = vrot.slane %v3140_v56, %v11694_v29  ;;  %v5769_v45 = vrot.slane %v3123_v37, %v11680_v19  ;;  %1854 = vadd.xlane.f32.xlu1 %v1853_v3  ;;  %1803 = vadd.xlane.f32.xlu0 %v1802_v14  ;;  %v13349_v56 = vld [vmem:[%s11536_s28 + $0x4a0] sm:$0xff]  }
 0x28c   : > { %v2509_v28 = vpop.xlane.xlu1 %2508  ;;  %v2458_v10 = vpop.xlane.xlu0 %2457  ;;  %16035 = vst [vmem:[#allocation5_spill] sm:$0xff] %v13349_v56 }
 0x28d   : > { %v13342_v60 = vsel %vm3856_vm4, %v5853_v41, %v13097_v0  ;;  %v13346_v34 = vsel %vm3849_vm3, %v5769_v45, %v16033_v50  ;;  %v3172_v3 = vmul.f32 0.015625, %v2509_v28  ;;  %v3155_v14 = vmul.f32 0.015625, %v2458_v10  ;;  %v16036_v10 = vld [vmem:[#allocation16_spill] sm:$0xff] }
 0x28e   : > { %16034 = vst [vmem:[#allocation17_spill] sm:$0xff] %v13346_v34  ;;  %v2042_v0 = vsel %vm1198_vm0, %v9110_v57, 0.0  ;;  %v1991_v41 = vsel %vm1198_vm0, %v9077_v49, 0.0  ;;  %v9174_v45 = vunpack.c.h.bf16 %v13121_v47  ;;  %v9141_v28 = vunpack.c.l.bf16 %v13349_v56  ;;  %v16037_v34 = vld [vmem:[#allocation19_spill] sm:$0xff] }
 0x28f   : > { %v6011_v35 = vrot.slane %v3172_v3, %v11694_v29  ;;  %v5927_v63 = vrot.slane %v3155_v14, %v11680_v19  ;;  %1950 = vadd.xlane.f32.xlu1 %v1949_v1  ;;  %1899 = vadd.xlane.f32.xlu0 %v1898_v40  ;;  %v13366_v14 = vld [vmem:[%s11536_s28 + $0x560] sm:$0xff]  }
 0x290   : > { %v2602_v33 = vpop.xlane.xlu1 %2601  ;;  %v2551_v37 = vpop.xlane.xlu0 %2550  ;;  %16038 = vst [vmem:[#allocation18_spill] sm:$0xff] %v13366_v14 }
 0x291   : > { %v13359_v50 = vsel %vm3856_vm4, %v6011_v35, %v16036_v10  ;;  %v13363_v3 = vsel %vm3849_vm3, %v5927_v63, %v16037_v34  ;;  %v3203_v1 = vmul.f32 0.015625, %v2602_v33  ;;  %v3186_v40 = vmul.f32 0.015625, %v2551_v37  ;;  %v16039_v37 = vld [vmem:[#allocation20_spill] sm:$0xff] }
 0x292   : > { %v2138_v35 = vsel %vm1198_vm0, %v9174_v45, 0.0  ;;  %v2087_v10 = vsel %vm1198_vm0, %v9141_v28, 0.0  ;;  %v9237_v34 = vunpack.c.l.bf16 %v13366_v14  ;;  %v9202_v63 = vunpack.c.h.bf16 %v13133_v61 }
 0x293   : > { %v6164_v57 = vrot.slane %v3203_v1, %v11680_v19  ;;  %v6080_v49 = vrot.slane %v3186_v40, %v11675_v13  ;;  %2043 = vadd.xlane.f32.xlu1 %v2042_v0  ;;  %1992 = vadd.xlane.f32.xlu0 %v1991_v41  ;;  %v13383_v40 = vld [vmem:[%s11536_s28 + $0x5e0] sm:$0xff]  }
 0x294   : > { %v2698_v47 = vpop.xlane.xlu1 %2697  ;;  %v2647_v56 = vpop.xlane.xlu0 %2646 }
 0x295   : > { %v13376_v33 = vsel %vm3849_vm3, %v6164_v57, %v13142_v17  ;;  %v13380_v1 = vsel %vm3842_vm2, %v6080_v49, %v16039_v37  ;;  %v3235_v0 = vmul.f32 0.015625, %v2698_v47  ;;  %v3218_v41 = vmul.f32 0.015625, %v2647_v56 }
 0x296   : > { %v2231_v17 = vsel %vm1198_vm0, %v9237_v34, 0.0  ;;  %v2180_v57 = vsel %vm1198_vm0, %v9202_v63, 0.0  ;;  %v9301_v49 = vunpack.c.l.bf16 %v13383_v40  ;;  %v9266_v47 = vunpack.c.h.bf16 %v13145_v52  ;;  %v16040_v34 = vld [vmem:[#allocation7_spill] sm:$0xff] }
 0x297   : > { %v6322_v45 = vrot.slane %v3235_v0, %v11680_v19  ;;  %v6238_v28 = vrot.slane %v3218_v41, %v11675_v13  ;;  %2139 = vadd.xlane.f32.xlu1 %v2138_v35  ;;  %2088 = vadd.xlane.f32.xlu0 %v2087_v10  ;;  %v13400_v10 = vld [vmem:[%s11536_s28 + $0x618] sm:$0xff]  }
 0x298   : > { %v1471_v61 = vpop.xlane.xlu1 %1470  ;;  %v1420_v14 = vpop.xlane.xlu0 %1419 }
 0x299   : > { %v13393_v56 = vsel %vm3849_vm3, %v6322_v45, %v13156_v27  ;;  %v13397_v37 = vsel %vm3842_vm2, %v6238_v28, %v13159_v6  ;;  %v2826_v13 = vmul.f32 0.015625, %v1471_v61  ;;  %v2809_v35 = vmul.f32 0.015625, %v1420_v14 }
 0x29a   : > { %v2327_v27 = vsel %vm1198_vm0, %v9301_v49, 0.0  ;;  %v2276_v45 = vsel %vm1198_vm0, %v9266_v47, 0.0  ;;  %v9362_v6 = vunpack.c.h.bf16 %v13162_v25  ;;  %v9329_v28 = vunpack.c.l.bf16 %v13400_v10 }
 0x29b   : > { %v4303_v0 = vrot.slane %v2826_v13, %v16040_v34  ;;  %v4219_v63 = vrot.slane %v2809_v35, %v16032_v51  ;;  %2232 = vadd.xlane.f32.xlu1 %v2231_v17  ;;  %2181 = vadd.xlane.f32.xlu0 %v2180_v57  ;;  %v13417_v13 = vld [vmem:[%s11536_s28 + $0x698] sm:$0xff]   ;;  %vm6386_vm2 = vcmask 1042434  }
 0x29c   : > { %v1567_v52 = vpop.xlane.xlu1 %1566  ;;  %v1516_v41 = vpop.xlane.xlu0 %1515 }
 0x29d   : > { %v13410_v14 = vsel %vm3898_vm10, %v4303_v0, %v13172_v9  ;;  %v13414_v61 = vsel %vm3891_vm9, %v4219_v63, %v13176_v46  ;;  %v2858_v17 = vmul.f32 0.015625, %v1567_v52  ;;  %v2841_v57 = vmul.f32 0.015625, %v1516_v41 }
 0x29e   : > { %v2420_v9 = vsel %vm1198_vm0, %v9362_v6, 0.0  ;;  %v2369_v0 = vsel %vm1198_vm0, %v9329_v28, 0.0  ;;  %v9426_v46 = vunpack.c.h.bf16 %v13179_v4  ;;  %v9393_v63 = vunpack.c.l.bf16 %v13417_v13 }
 0x29f   : > { %v4461_v49 = vrot.slane %v2858_v17, %v16040_v34  ;;  %v4377_v47 = vrot.slane %v2841_v57, %v16032_v51  ;;  %2328 = vadd.xlane.f32.xlu1 %v2327_v27  ;;  %2277 = vadd.xlane.f32.xlu0 %v2276_v45  ;;  %v13434_v17 = vld [vmem:[%s11536_s28 + $0x758] sm:$0xff]  }
 0x2a0   : > { %v1660_v25 = vpop.xlane.xlu1 %1659  ;;  %v1609_v35 = vpop.xlane.xlu0 %1608 }
 0x2a1   : > { %v13427_v52 = vsel %vm3898_vm10, %v4461_v49, %v13189_v7  ;;  %v13431_v41 = vsel %vm3891_vm9, %v4377_v47, %v13193_v21  ;;  %v2889_v27 = vmul.f32 0.015625, %v1660_v25  ;;  %v2872_v45 = vmul.f32 0.015625, %v1609_v35 }
 0x2a2   : > { %v2516_v7 = vsel %vm1198_vm0, %v9426_v46, 0.0  ;;  %v2465_v49 = vsel %vm1198_vm0, %v9393_v63, 0.0  ;;  %v9489_v21 = vunpack.c.l.bf16 %v13434_v17  ;;  %v9454_v47 = vunpack.c.h.bf16 %v13196_v11 }
 0x2a3   : > { %v4614_v6 = vrot.slane %v2889_v27, %v16032_v51  ;;  %v4530_v28 = vrot.slane %v2872_v45, %v11731_v2  ;;  %2421 = vadd.xlane.f32.xlu1 %v2420_v9  ;;  %2370 = vadd.xlane.f32.xlu0 %v2369_v0  ;;  %v13451_v27 = vld [vmem:[%s11536_s28 + $0x7d8] sm:$0xff]  }
 0x2a4   : > { %v1756_v4 = vpop.xlane.xlu1 %1755  ;;  %v1705_v57 = vpop.xlane.xlu0 %1704 }
 0x2a5   : > { %v13444_v25 = vsel %vm3891_vm9, %v4614_v6, %v13206_v22  ;;  %v13448_v35 = vsel %vm3884_vm8, %v4530_v28, %v13210_v26  ;;  %v2921_v9 = vmul.f32 0.015625, %v1756_v4  ;;  %v2904_v0 = vmul.f32 0.015625, %v1705_v57 }
 0x2a6   : > { %v2609_v22 = vsel %vm1198_vm0, %v9489_v21, 0.0  ;;  %v2558_v6 = vsel %vm1198_vm0, %v9454_v47, 0.0  ;;  %v9553_v26 = vunpack.c.l.bf16 %v13451_v27  ;;  %v9518_v28 = vunpack.c.h.bf16 %v13213_v54 }
 0x2a7   : > { %v4772_v46 = vrot.slane %v2921_v9, %v16032_v51  ;;  %v4688_v63 = vrot.slane %v2904_v0, %v11731_v2  ;;  %2517 = vadd.xlane.f32.xlu1 %v2516_v7  ;;  %2466 = vadd.xlane.f32.xlu0 %v2465_v49  ;;  %v13468_v9 = vld [vmem:[%s11536_s28 + $0x130] sm:$0xff]  }
 0x2a8   : > { %v1849_v11 = vpop.xlane.xlu1 %1848  ;;  %v1798_v45 = vpop.xlane.xlu0 %1797 }
 0x2a9   : > { %v13461_v4 = vsel %vm3891_vm9, %v4772_v46, %v13223_v18  ;;  %v13465_v57 = vsel %vm3884_vm8, %v4688_v63, %v13227_v8  ;;  %v2952_v7 = vmul.f32 0.015625, %v1849_v11  ;;  %v2935_v49 = vmul.f32 0.015625, %v1798_v45 }
 0x2aa   : > { %v2705_v18 = vsel %vm1198_vm0, %v9553_v26, 0.0  ;;  %v2654_v46 = vsel %vm1198_vm0, %v9518_v28, 0.0  ;;  %v8734_v8 = vunpack.c.h.bf16 %v13230_v55  ;;  %v8701_v63 = vunpack.c.l.bf16 %v13468_v9 }
 0x2ab   : > { %v4925_v21 = vrot.slane %v2952_v7, %v11731_v2  ;;  %v4841_v47 = vrot.slane %v2935_v49, %v11707_v42  ;;  %2610 = vadd.xlane.f32.xlu1 %v2609_v22  ;;  %2559 = vadd.xlane.f32.xlu0 %v2558_v6  ;;  %v13485_v7 = vld [vmem:[%s11536_s28 + $0x1b0] sm:$0xff]  }
 0x2ac   : > { %v1945_v54 = vpop.xlane.xlu1 %1944  ;;  %v1894_v0 = vpop.xlane.xlu0 %1893 }
 0x2ad   : > { %v13478_v11 = vsel %vm3884_vm8, %v4925_v21, %v13240_v36  ;;  %v13482_v45 = vsel %vm3877_vm7, %v4841_v47, %v13244_v15  ;;  %v2984_v22 = vmul.f32 0.015625, %v1945_v54  ;;  %v2967_v6 = vmul.f32 0.015625, %v1894_v0 }
 0x2ae   : > { %v1478_v36 = vsel %vm1198_vm0, %v8734_v8, 0.0  ;;  %v1427_v21 = vsel %vm1198_vm0, %v8701_v63, 0.0  ;;  %v8798_v15 = vunpack.c.h.bf16 %v13247_v53  ;;  %v8765_v47 = vunpack.c.l.bf16 %v13485_v7 }
 0x2af   : > { %v5083_v26 = vrot.slane %v2984_v22, %v11731_v2  ;;  %v4999_v28 = vrot.slane %v2967_v6, %v11707_v42  ;;  %2706 = vadd.xlane.f32.xlu1 %v2705_v18  ;;  %2655 = vadd.xlane.f32.xlu0 %v2654_v46  ;;  %v13502_v22 = vld [vmem:[%s11536_s28 + $0x270] sm:$0xff]  }
 0x2b0   : > { %v2038_v55 = vpop.xlane.xlu1 %2037  ;;  %v1987_v49 = vpop.xlane.xlu0 %1986 }
 0x2b1   : > { %v13495_v54 = vsel %vm3884_vm8, %v5083_v26, %v13257_v39  ;;  %v13499_v0 = vsel %vm3877_vm7, %v4999_v28, %v13261_v38  ;;  %v3015_v18 = vmul.f32 0.015625, %v2038_v55  ;;  %v2998_v46 = vmul.f32 0.015625, %v1987_v49 }
 0x2b2   : > { %v1574_v39 = vsel %vm1198_vm0, %v8798_v15, 0.0  ;;  %v1523_v26 = vsel %vm1198_vm0, %v8765_v47, 0.0  ;;  %v8861_v38 = vunpack.c.l.bf16 %v13502_v22  ;;  %v8826_v28 = vunpack.c.h.bf16 %v13264_v48 }
 0x2b3   : > { %v5236_v8 = vrot.slane %v3015_v18, %v11707_v42  ;;  %v5152_v63 = vrot.slane %v2998_v46, %v11710_v43  ;;  %1479 = vadd.xlane.f32.xlu1 %v1478_v36  ;;  %1428 = vadd.xlane.f32.xlu0 %v1427_v21  ;;  %v13519_v18 = vld [vmem:[%s11536_s28 + $0x2f0] sm:$0xff]  }
 0x2b4   : > { %v2134_v53 = vpop.xlane.xlu1 %2133  ;;  %v2083_v6 = vpop.xlane.xlu0 %2082 }
 0x2b5   : > { %v13512_v55 = vsel %vm3877_vm7, %v5236_v8, %v13274_v5  ;;  %v13516_v49 = vsel %vm3870_vm6, %v5152_v63, %v13278_v32  ;;  %v3047_v36 = vmul.f32 0.015625, %v2134_v53  ;;  %v3030_v21 = vmul.f32 0.015625, %v2083_v6 }
 0x2b6   : > { %v1667_v5 = vsel %vm1198_vm0, %v8861_v38, 0.0  ;;  %v1616_v8 = vsel %vm1198_vm0, %v8826_v28, 0.0  ;;  %v8925_v32 = vunpack.c.l.bf16 %v13519_v18  ;;  %v8890_v63 = vunpack.c.h.bf16 %v13281_v59 }
 0x2b7   : > { %v5394_v15 = vrot.slane %v3047_v36, %v11707_v42  ;;  %v5310_v47 = vrot.slane %v3030_v21, %v11710_v43  ;;  %1575 = vadd.xlane.f32.xlu1 %v1574_v39  ;;  %1524 = vadd.xlane.f32.xlu0 %v1523_v26  ;;  %v13536_v36 = vld [vmem:[%s11536_s28 + $0x328] sm:$0xff]  }
 0x2b8   : > { %v2227_v48 = vpop.xlane.xlu1 %2226  ;;  %v2176_v46 = vpop.xlane.xlu0 %2175 }
 0x2b9   : > { %v13529_v53 = vsel %vm3877_vm7, %v5394_v15, %v13291_v31  ;;  %v13533_v6 = vsel %vm3870_vm6, %v5310_v47, %v13295_v16  ;;  %v3078_v39 = vmul.f32 0.015625, %v2227_v48  ;;  %v3061_v26 = vmul.f32 0.015625, %v2176_v46 }
 0x2ba   : > { %v1763_v31 = vsel %vm1198_vm0, %v8925_v32, 0.0  ;;  %v1712_v15 = vsel %vm1198_vm0, %v8890_v63, 0.0  ;;  %v8986_v16 = vunpack.c.h.bf16 %v13298_v24  ;;  %v8953_v47 = vunpack.c.l.bf16 %v13536_v36 }
 0x2bb   : > { %v5547_v38 = vrot.slane %v3078_v39, %v11710_v43  ;;  %v5463_v28 = vrot.slane %v3061_v26, %v11686_v23  ;;  %1668 = vadd.xlane.f32.xlu1 %v1667_v5  ;;  %1617 = vadd.xlane.f32.xlu0 %v1616_v8  ;;  %v13553_v39 = vld [vmem:[%s11536_s28 + $0x3a8] sm:$0xff]  }
 0x2bc   : > { %v2323_v59 = vpop.xlane.xlu1 %2322  ;;  %v2272_v21 = vpop.xlane.xlu0 %2271 }
 0x2bd   : > { %v13546_v48 = vsel %vm3870_vm6, %v5547_v38, %v13308_v30  ;;  %v13550_v46 = vsel %vm3863_vm5, %v5463_v28, %v13312_v58  ;;  %v3110_v5 = vmul.f32 0.015625, %v2323_v59  ;;  %v3093_v8 = vmul.f32 0.015625, %v2272_v21 }
 0x2be   : > { %v1856_v30 = vsel %vm1198_vm0, %v8986_v16, 0.0  ;;  %v1805_v38 = vsel %vm1198_vm0, %v8953_v47, 0.0  ;;  %v9050_v58 = vunpack.c.h.bf16 %v13315_v20  ;;  %v9017_v28 = vunpack.c.l.bf16 %v13553_v39 }
 0x2bf   : > { %v5705_v32 = vrot.slane %v3110_v5, %v11710_v43  ;;  %v5621_v63 = vrot.slane %v3093_v8, %v11686_v23  ;;  %1764 = vadd.xlane.f32.xlu1 %v1763_v31  ;;  %1713 = vadd.xlane.f32.xlu0 %v1712_v15  ;;  %v13570_v5 = vld [vmem:[%s11536_s28 + $0x468] sm:$0xff]  }
 0x2c0   : > { %v2416_v24 = vpop.xlane.xlu1 %2415  ;;  %v2365_v26 = vpop.xlane.xlu0 %2364  ;;  %16041 = vst [vmem:[#allocation16_spill] sm:$0xff] %v13570_v5 }
 0x2c1   : > { %v13563_v59 = vsel %vm3870_vm6, %v5705_v32, %v13325_v12  ;;  %v13567_v21 = vsel %vm3863_vm5, %v5621_v63, %v13329_v44  ;;  %v3141_v31 = vmul.f32 0.015625, %v2416_v24  ;;  %v3124_v15 = vmul.f32 0.015625, %v2365_v26  ;;  %v16042_v26 = vld [vmem:[#allocation17_spill] sm:$0xff] }
 0x2c2   : > { %v1952_v12 = vsel %vm1198_vm0, %v9050_v58, 0.0  ;;  %v1901_v32 = vsel %vm1198_vm0, %v9017_v28, 0.0  ;;  %v9113_v44 = vunpack.c.l.bf16 %v13570_v5  ;;  %v9078_v63 = vunpack.c.h.bf16 %v13332_v62 }
 0x2c3   : > { %v5858_v16 = vrot.slane %v3141_v31, %v11686_v23  ;;  %v5774_v47 = vrot.slane %v3124_v15, %v11694_v29  ;;  %1857 = vadd.xlane.f32.xlu1 %v1856_v30  ;;  %1806 = vadd.xlane.f32.xlu0 %v1805_v38  ;;  %v13587_v15 = vld [vmem:[%s11536_s28 + $0x4e8] sm:$0xff]  }
 0x2c4   : > { %v2512_v20 = vpop.xlane.xlu1 %2511  ;;  %v2461_v8 = vpop.xlane.xlu0 %2460  ;;  %16043 = vst [vmem:[#allocation19_spill] sm:$0xff] %v13587_v15 }
 0x2c5   : > { %v13580_v24 = vsel %vm3863_vm5, %v5858_v16, %v13342_v60  ;;  %v13584_v31 = vsel %vm3856_vm4, %v5774_v47, %v16042_v26  ;;  %v3173_v30 = vmul.f32 0.015625, %v2512_v20  ;;  %v3156_v38 = vmul.f32 0.015625, %v2461_v8  ;;  %v16044_v26 = vld [vmem:[#allocation5_spill] sm:$0xff] }
 0x2c6   : > { %v2045_v60 = vsel %vm1198_vm0, %v9113_v44, 0.0  ;;  %v1994_v16 = vsel %vm1198_vm0, %v9078_v63, 0.0  ;;  %v9177_v47 = vunpack.c.l.bf16 %v13587_v15  ;;  %v9142_v20 = vunpack.c.h.bf16 %v16044_v26 }
 0x2c7   : > { %v6016_v58 = vrot.slane %v3173_v30, %v11686_v23  ;;  %v5932_v28 = vrot.slane %v3156_v38, %v11694_v29  ;;  %1953 = vadd.xlane.f32.xlu1 %v1952_v12  ;;  %1902 = vadd.xlane.f32.xlu0 %v1901_v32  ;;  %v13604_v38 = vld [vmem:[%s11536_s28 + $0x520] sm:$0xff]  }
 0x2c8   : > { %v2605_v62 = vpop.xlane.xlu1 %2604  ;;  %v2554_v5 = vpop.xlane.xlu0 %2553 }
 0x2c9   : > { %v13597_v8 = vsel %vm3863_vm5, %v6016_v58, %v13359_v50  ;;  %v13601_v30 = vsel %vm3856_vm4, %v5932_v28, %v13363_v3  ;;  %v3204_v12 = vmul.f32 0.015625, %v2605_v62  ;;  %v3187_v32 = vmul.f32 0.015625, %v2554_v5 }
 0x2ca   : > { %16045 = vst [vmem:[#allocation20_spill] sm:$0xff] %v13597_v8  ;;  %v2141_v50 = vsel %vm1198_vm0, %v9177_v47, 0.0  ;;  %v2090_v58 = vsel %vm1198_vm0, %v9142_v20, 0.0  ;;  %v16046_v8 = vld [vmem:[#allocation18_spill] sm:$0xff]  ;;  %v9205_v28 = vunpack.c.l.bf16 %v13604_v38 }
 0x2cb   : > { %v6169_v44 = vrot.slane %v3204_v12, %v11694_v29  ;;  %v6085_v63 = vrot.slane %v3187_v32, %v11680_v19  ;;  %2046 = vadd.xlane.f32.xlu1 %v2045_v60  ;;  %1995 = vadd.xlane.f32.xlu0 %v1994_v16  ;;  %v9238_v3 = vunpack.c.h.bf16 %v16046_v8  ;;  %v13621_v12 = vld [vmem:[%s11536_s28 + $0x5a0] sm:$0xff]  }
 0x2cc   : > { %v2701_v26 = vpop.xlane.xlu1 %2700  ;;  %v2650_v15 = vpop.xlane.xlu0 %2649 }
 0x2cd   : > { %v13614_v5 = vsel %vm3856_vm4, %v6169_v44, %v13376_v33  ;;  %v13618_v62 = vsel %vm3849_vm3, %v6085_v63, %v13380_v1  ;;  %v3236_v60 = vmul.f32 0.015625, %v2701_v26  ;;  %v3219_v16 = vmul.f32 0.015625, %v2650_v15 }
 0x2ce   : > { %v2234_v33 = vsel %vm1198_vm0, %v9238_v3, 0.0  ;;  %v2183_v44 = vsel %vm1198_vm0, %v9205_v28, 0.0  ;;  %v9302_v1 = vunpack.c.h.bf16 %v13383_v40  ;;  %v9269_v63 = vunpack.c.l.bf16 %v13621_v12  ;;  %v16047_v3 = vld [vmem:[#allocation6_spill] sm:$0xff] }
 0x2cf   : > { %v6327_v47 = vrot.slane %v3236_v60, %v11694_v29  ;;  %v6243_v20 = vrot.slane %v3219_v16, %v11680_v19  ;;  %2142 = vadd.xlane.f32.xlu1 %v2141_v50  ;;  %2091 = vadd.xlane.f32.xlu0 %v2090_v58  ;;  %v13638_v58 = vld [vmem:[%s11536_s28 + $0x660] sm:$0xff]  }
 0x2d0   : > { %v1474_v8 = vpop.xlane.xlu1 %1473  ;;  %v1423_v32 = vpop.xlane.xlu0 %1422 }
 0x2d1   : > { %v13631_v15 = vsel %vm3856_vm4, %v6327_v47, %v13393_v56  ;;  %v13635_v26 = vsel %vm3849_vm3, %v6243_v20, %v13397_v37  ;;  %v2827_v19 = vmul.f32 0.015625, %v1474_v8  ;;  %v2810_v50 = vmul.f32 0.015625, %v1423_v32 }
 0x2d2   : > { %v2330_v56 = vsel %vm1198_vm0, %v9302_v1, 0.0  ;;  %v2279_v47 = vsel %vm1198_vm0, %v9269_v63, 0.0  ;;  %v9365_v37 = vunpack.c.l.bf16 %v13638_v58  ;;  %v9330_v20 = vunpack.c.h.bf16 %v13400_v10 }
 0x2d3   : > { %v4308_v60 = vrot.slane %v2827_v19, %v16047_v3  ;;  %v4224_v28 = vrot.slane %v2810_v50, %v16040_v34  ;;  %2235 = vadd.xlane.f32.xlu1 %v2234_v33  ;;  %2184 = vadd.xlane.f32.xlu0 %v2183_v44  ;;  %v13655_v19 = vld [vmem:[%s11536_s28 + $0x6e0] sm:$0xff]   ;;  %vm6388_vm3 = vcmask 1043459  }
 0x2d4   : > { %v1570_v40 = vpop.xlane.xlu1 %1569  ;;  %v1519_v16 = vpop.xlane.xlu0 %1518 }
 0x2d5   : > { %v13648_v8 = vsel %vm3905_vm11, %v4308_v60, %v13410_v14  ;;  %v13652_v32 = vsel %vm3898_vm10, %v4224_v28, %v13414_v61  ;;  %v2859_v33 = vmul.f32 0.015625, %v1570_v40  ;;  %v2842_v44 = vmul.f32 0.015625, %v1519_v16 }
 0x2d6   : > { %v2423_v14 = vsel %vm1198_vm0, %v9365_v37, 0.0  ;;  %v2372_v60 = vsel %vm1198_vm0, %v9330_v20, 0.0  ;;  %v9429_v61 = vunpack.c.l.bf16 %v13655_v19  ;;  %v9394_v28 = vunpack.c.h.bf16 %v13417_v13 }
 0x2d7   : > { %v4466_v1 = vrot.slane %v2859_v33, %v16047_v3  ;;  %v4382_v63 = vrot.slane %v2842_v44, %v16040_v34  ;;  %2331 = vadd.xlane.f32.xlu1 %v2330_v56  ;;  %2280 = vadd.xlane.f32.xlu0 %v2279_v47  ;;  %v13672_v33 = vld [vmem:[%s11536_s28 + $0x718] sm:$0xff]  }
 0x2d8   : > { %v1663_v10 = vpop.xlane.xlu1 %1662  ;;  %v1612_v50 = vpop.xlane.xlu0 %1611 }
 0x2d9   : > { %v13665_v40 = vsel %vm3905_vm11, %v4466_v1, %v13427_v52  ;;  %v13669_v16 = vsel %vm3898_vm10, %v4382_v63, %v13431_v41  ;;  %v2890_v56 = vmul.f32 0.015625, %v1663_v10  ;;  %v2873_v47 = vmul.f32 0.015625, %v1612_v50 }
 0x2da   : > { %v2519_v52 = vsel %vm1198_vm0, %v9429_v61, 0.0  ;;  %v2468_v1 = vsel %vm1198_vm0, %v9394_v28, 0.0  ;;  %v9490_v41 = vunpack.c.h.bf16 %v13434_v17  ;;  %v9457_v63 = vunpack.c.l.bf16 %v13672_v33 }
 0x2db   : > { %v4619_v37 = vrot.slane %v2890_v56, %v16040_v34  ;;  %v4535_v20 = vrot.slane %v2873_v47, %v16032_v51  ;;  %2424 = vadd.xlane.f32.xlu1 %v2423_v14  ;;  %2373 = vadd.xlane.f32.xlu0 %v2372_v60  ;;  %v13689_v56 = vld [vmem:[%s11536_s28 + $0x798] sm:$0xff]  }
 0x2dc   : > { %v1759_v13 = vpop.xlane.xlu1 %1758  ;;  %v1708_v44 = vpop.xlane.xlu0 %1707 }
 0x2dd   : > { %v13682_v10 = vsel %vm3898_vm10, %v4619_v37, %v13444_v25  ;;  %v13686_v50 = vsel %vm3891_vm9, %v4535_v20, %v13448_v35  ;;  %v2922_v14 = vmul.f32 0.015625, %v1759_v13  ;;  %v2905_v60 = vmul.f32 0.015625, %v1708_v44 }
 0x2de   : > { %v2612_v25 = vsel %vm1198_vm0, %v9490_v41, 0.0  ;;  %v2561_v37 = vsel %vm1198_vm0, %v9457_v63, 0.0  ;;  %v9554_v35 = vunpack.c.h.bf16 %v13451_v27  ;;  %v9521_v20 = vunpack.c.l.bf16 %v13689_v56 }
 0x2df   : > { %v4777_v61 = vrot.slane %v2922_v14, %v16040_v34  ;;  %v4693_v28 = vrot.slane %v2905_v60, %v16032_v51  ;;  %2520 = vadd.xlane.f32.xlu1 %v2519_v52  ;;  %2469 = vadd.xlane.f32.xlu0 %v2468_v1  ;;  %v13706_v14 = vld [vmem:[%s11536_s28 + $0x178] sm:$0xff]  }
 0x2e0   : > { %v1852_v17 = vpop.xlane.xlu1 %1851  ;;  %v1801_v47 = vpop.xlane.xlu0 %1800 }
 0x2e1   : > { %v13699_v13 = vsel %vm3898_vm10, %v4777_v61, %v13461_v4  ;;  %v13703_v44 = vsel %vm3891_vm9, %v4693_v28, %v13465_v57  ;;  %v2953_v52 = vmul.f32 0.015625, %v1852_v17  ;;  %v2936_v1 = vmul.f32 0.015625, %v1801_v47 }
 0x2e2   : > { %v2708_v4 = vsel %vm1198_vm0, %v9554_v35, 0.0  ;;  %v2657_v61 = vsel %vm1198_vm0, %v9521_v20, 0.0  ;;  %v8737_v57 = vunpack.c.l.bf16 %v13706_v14  ;;  %v8702_v28 = vunpack.c.h.bf16 %v13468_v9 }
 0x2e3   : > { %v4930_v41 = vrot.slane %v2953_v52, %v16032_v51  ;;  %v4846_v63 = vrot.slane %v2936_v1, %v11731_v2  ;;  %2613 = vadd.xlane.f32.xlu1 %v2612_v25  ;;  %2562 = vadd.xlane.f32.xlu0 %v2561_v37  ;;  %v13723_v52 = vld [vmem:[%s11536_s28 + $0x1f8] sm:$0xff]  }
 0x2e4   : > { %v1948_v27 = vpop.xlane.xlu1 %1947  ;;  %v1897_v60 = vpop.xlane.xlu0 %1896 }
 0x2e5   : > { %v13716_v17 = vsel %vm3891_vm9, %v4930_v41, %v13478_v11  ;;  %v13720_v47 = vsel %vm3884_vm8, %v4846_v63, %v13482_v45  ;;  %v2985_v25 = vmul.f32 0.015625, %v1948_v27  ;;  %v2968_v37 = vmul.f32 0.015625, %v1897_v60 }
 0x2e6   : > { %v1481_v11 = vsel %vm1198_vm0, %v8737_v57, 0.0  ;;  %v1430_v41 = vsel %vm1198_vm0, %v8702_v28, 0.0  ;;  %v8801_v45 = vunpack.c.l.bf16 %v13723_v52  ;;  %v8766_v63 = vunpack.c.h.bf16 %v13485_v7 }
 0x2e7   : > { %v5088_v35 = vrot.slane %v2985_v25, %v16032_v51  ;;  %v5004_v20 = vrot.slane %v2968_v37, %v11731_v2  ;;  %2709 = vadd.xlane.f32.xlu1 %v2708_v4  ;;  %2658 = vadd.xlane.f32.xlu0 %v2657_v61  ;;  %v13740_v25 = vld [vmem:[%s11536_s28 + $0x230] sm:$0xff]  }
 0x2e8   : > { %v2041_v9 = vpop.xlane.xlu1 %2040  ;;  %v1990_v1 = vpop.xlane.xlu0 %1989 }
 0x2e9   : > { %v13733_v27 = vsel %vm3891_vm9, %v5088_v35, %v13495_v54  ;;  %v13737_v60 = vsel %vm3884_vm8, %v5004_v20, %v13499_v0  ;;  %v3016_v4 = vmul.f32 0.015625, %v2041_v9  ;;  %v2999_v61 = vmul.f32 0.015625, %v1990_v1 }
 0x2ea   : > { %v1577_v54 = vsel %vm1198_vm0, %v8801_v45, 0.0  ;;  %v1526_v35 = vsel %vm1198_vm0, %v8766_v63, 0.0  ;;  %v8862_v0 = vunpack.c.h.bf16 %v13502_v22  ;;  %v8829_v20 = vunpack.c.l.bf16 %v13740_v25 }
 0x2eb   : > { %v5241_v57 = vrot.slane %v3016_v4, %v11731_v2  ;;  %v5157_v28 = vrot.slane %v2999_v61, %v11707_v42  ;;  %1482 = vadd.xlane.f32.xlu1 %v1481_v11  ;;  %1431 = vadd.xlane.f32.xlu0 %v1430_v41  ;;  %v13757_v4 = vld [vmem:[%s11536_s28 + $0x2b0] sm:$0xff]  }
 0x2ec   : > { %v2137_v7 = vpop.xlane.xlu1 %2136  ;;  %v2086_v37 = vpop.xlane.xlu0 %2085 }
 0x2ed   : > { %v13750_v9 = vsel %vm3884_vm8, %v5241_v57, %v13512_v55  ;;  %v13754_v1 = vsel %vm3877_vm7, %v5157_v28, %v13516_v49  ;;  %v3048_v11 = vmul.f32 0.015625, %v2137_v7  ;;  %v3031_v41 = vmul.f32 0.015625, %v2086_v37 }
 0x2ee   : > { %v1670_v55 = vsel %vm1198_vm0, %v8862_v0, 0.0  ;;  %v1619_v57 = vsel %vm1198_vm0, %v8829_v20, 0.0  ;;  %v8926_v49 = vunpack.c.h.bf16 %v13519_v18  ;;  %v8893_v28 = vunpack.c.l.bf16 %v13757_v4 }
 0x2ef   : > { %v5399_v45 = vrot.slane %v3048_v11, %v11731_v2  ;;  %v5315_v63 = vrot.slane %v3031_v41, %v11707_v42  ;;  %1578 = vadd.xlane.f32.xlu1 %v1577_v54  ;;  %1527 = vadd.xlane.f32.xlu0 %v1526_v35  ;;  %v13774_v11 = vld [vmem:[%s11536_s28 + $0x370] sm:$0xff]  }
 0x2f0   : > { %v2230_v22 = vpop.xlane.xlu1 %2229  ;;  %v2179_v61 = vpop.xlane.xlu0 %2178 }
 0x2f1   : > { %v13767_v7 = vsel %vm3884_vm8, %v5399_v45, %v13529_v53  ;;  %v13771_v37 = vsel %vm3877_vm7, %v5315_v63, %v13533_v6  ;;  %v3079_v54 = vmul.f32 0.015625, %v2230_v22  ;;  %v3062_v35 = vmul.f32 0.015625, %v2179_v61 }
 0x2f2   : > { %v1766_v53 = vsel %vm1198_vm0, %v8926_v49, 0.0  ;;  %v1715_v45 = vsel %vm1198_vm0, %v8893_v28, 0.0  ;;  %v8989_v6 = vunpack.c.l.bf16 %v13774_v11  ;;  %v8954_v63 = vunpack.c.h.bf16 %v13536_v36 }
 0x2f3   : > { %v5552_v0 = vrot.slane %v3079_v54, %v11707_v42  ;;  %v5468_v20 = vrot.slane %v3062_v35, %v11710_v43  ;;  %1671 = vadd.xlane.f32.xlu1 %v1670_v55  ;;  %1620 = vadd.xlane.f32.xlu0 %v1619_v57  ;;  %v13791_v54 = vld [vmem:[%s11536_s28 + $0x3f0] sm:$0xff]  }
 0x2f4   : > { %v2326_v18 = vpop.xlane.xlu1 %2325  ;;  %v2275_v41 = vpop.xlane.xlu0 %2274 }
 0x2f5   : > { %v13784_v22 = vsel %vm3877_vm7, %v5552_v0, %v13546_v48  ;;  %v13788_v61 = vsel %vm3870_vm6, %v5468_v20, %v13550_v46  ;;  %v3111_v55 = vmul.f32 0.015625, %v2326_v18  ;;  %v3094_v57 = vmul.f32 0.015625, %v2275_v41 }
 0x2f6   : > { %v1859_v48 = vsel %vm1198_vm0, %v8989_v6, 0.0  ;;  %v1808_v0 = vsel %vm1198_vm0, %v8954_v63, 0.0  ;;  %v9053_v46 = vunpack.c.l.bf16 %v13791_v54  ;;  %v9018_v20 = vunpack.c.h.bf16 %v13553_v39 }
 0x2f7   : > { %v5710_v49 = vrot.slane %v3111_v55, %v11707_v42  ;;  %v5626_v28 = vrot.slane %v3094_v57, %v11710_v43  ;;  %1767 = vadd.xlane.f32.xlu1 %v1766_v53  ;;  %1716 = vadd.xlane.f32.xlu0 %v1715_v45  ;;  %v13808_v55 = vld [vmem:[%s11536_s28 + $0x428] sm:$0xff]  }
 0x2f8   : > { %v2419_v36 = vpop.xlane.xlu1 %2418  ;;  %v2368_v35 = vpop.xlane.xlu0 %2367 }
 0x2f9   : > { %v13801_v18 = vsel %vm3877_vm7, %v5710_v49, %v13563_v59  ;;  %v13805_v41 = vsel %vm3870_vm6, %v5626_v28, %v13567_v21  ;;  %v3142_v53 = vmul.f32 0.015625, %v2419_v36  ;;  %v3125_v45 = vmul.f32 0.015625, %v2368_v35 }
 0x2fa   : > { %16048 = vst [vmem:[#allocation7_spill] sm:$0xff] %v13801_v18  ;;  %v1955_v59 = vsel %vm1198_vm0, %v9053_v46, 0.0  ;;  %v1904_v49 = vsel %vm1198_vm0, %v9018_v20, 0.0  ;;  %v16049_v18 = vld [vmem:[#allocation16_spill] sm:$0xff]  ;;  %v9081_v28 = vunpack.c.l.bf16 %v13808_v55 }
 0x2fb   : > { %v5863_v6 = vrot.slane %v3142_v53, %v11710_v43  ;;  %v5779_v63 = vrot.slane %v3125_v45, %v11686_v23  ;;  %1860 = vadd.xlane.f32.xlu1 %v1859_v48  ;;  %1809 = vadd.xlane.f32.xlu0 %v1808_v0  ;;  %v9114_v21 = vunpack.c.h.bf16 %v16049_v18  ;;  %v13825_v53 = vld [vmem:[%s11536_s28 + $0x4a8] sm:$0xff]  }
 0x2fc   : > { %v2515_v39 = vpop.xlane.xlu1 %2514  ;;  %v2464_v57 = vpop.xlane.xlu0 %2463  ;;  %16051 = vst [vmem:[#allocation5_spill] sm:$0xff] %v13825_v53 }
 0x2fd   : > { %v13818_v36 = vsel %vm3870_vm6, %v5863_v6, %v13580_v24  ;;  %v13822_v35 = vsel %vm3863_vm5, %v5779_v63, %v13584_v31  ;;  %v3174_v48 = vmul.f32 0.015625, %v2515_v39  ;;  %v3157_v0 = vmul.f32 0.015625, %v2464_v57  ;;  %v16053_v39 = vld [vmem:[#allocation20_spill] sm:$0xff] }
 0x2fe   : > { %16050 = vst [vmem:[#allocation17_spill] sm:$0xff] %v13818_v36  ;;  %v2048_v24 = vsel %vm1198_vm0, %v9114_v21, 0.0  ;;  %v1997_v6 = vsel %vm1198_vm0, %v9081_v28, 0.0  ;;  %v16052_v36 = vld [vmem:[#allocation19_spill] sm:$0xff]  ;;  %v9145_v63 = vunpack.c.l.bf16 %v13825_v53 }
 0x2ff   : > { %v6021_v46 = vrot.slane %v3174_v48, %v11710_v43  ;;  %v5937_v20 = vrot.slane %v3157_v0, %v11686_v23  ;;  %1956 = vadd.xlane.f32.xlu1 %v1955_v59  ;;  %1905 = vadd.xlane.f32.xlu0 %v1904_v49  ;;  %v9178_v31 = vunpack.c.h.bf16 %v16052_v36  ;;  %v13842_v0 = vld [vmem:[%s11536_s28 + $0x568] sm:$0xff]  }
 0x300   : > { %v2608_v18 = vpop.xlane.xlu1 %2607  ;;  %v2557_v45 = vpop.xlane.xlu0 %2556 }
 0x301   : > { %v13835_v57 = vsel %vm3870_vm6, %v6021_v46, %v16053_v39  ;;  %v13839_v48 = vsel %vm3863_vm5, %v5937_v20, %v13601_v30  ;;  %v3205_v59 = vmul.f32 0.015625, %v2608_v18  ;;  %v3188_v49 = vmul.f32 0.015625, %v2557_v45 }
 0x302   : > { %v2144_v46 = vsel %vm1198_vm0, %v9178_v31, 0.0  ;;  %v2093_v39 = vsel %vm1198_vm0, %v9145_v63, 0.0  ;;  %v9241_v30 = vunpack.c.l.bf16 %v13842_v0  ;;  %v9206_v20 = vunpack.c.h.bf16 %v13604_v38 }
 0x303   : > { %v6174_v21 = vrot.slane %v3205_v59, %v11686_v23  ;;  %v6090_v28 = vrot.slane %v3188_v49, %v11694_v29  ;;  %2049 = vadd.xlane.f32.xlu1 %v2048_v24  ;;  %1998 = vadd.xlane.f32.xlu0 %v1997_v6  ;;  %v13859_v59 = vld [vmem:[%s11536_s28 + $0x5e8] sm:$0xff]  }
 0x304   : > { %v2704_v36 = vpop.xlane.xlu1 %2703  ;;  %v2653_v53 = vpop.xlane.xlu0 %2652 }
 0x305   : > { %v13852_v18 = vsel %vm3863_vm5, %v6174_v21, %v13614_v5  ;;  %v13856_v45 = vsel %vm3856_vm4, %v6090_v28, %v13618_v62  ;;  %v3237_v24 = vmul.f32 0.015625, %v2704_v36  ;;  %v3220_v6 = vmul.f32 0.015625, %v2653_v53 }
 0x306   : > { %v2237_v5 = vsel %vm1198_vm0, %v9241_v30, 0.0  ;;  %v2186_v21 = vsel %vm1198_vm0, %v9206_v20, 0.0  ;;  %v9305_v62 = vunpack.c.l.bf16 %v13859_v59  ;;  %v9270_v28 = vunpack.c.h.bf16 %v13621_v12  ;;  %v16054_v30 = vld [vmem:[#allocation9_spill] sm:$0xff] }
 0x307   : > { %v6332_v31 = vrot.slane %v3237_v24, %v11686_v23  ;;  %v6248_v63 = vrot.slane %v3220_v6, %v11694_v29  ;;  %2145 = vadd.xlane.f32.xlu1 %v2144_v46  ;;  %2094 = vadd.xlane.f32.xlu0 %v2093_v39  ;;  %v13876_v39 = vld [vmem:[%s11536_s28 + $0x620] sm:$0xff]  }
 0x308   : > { %v1477_v38 = vpop.xlane.xlu1 %1476  ;;  %v1426_v49 = vpop.xlane.xlu0 %1425 }
 0x309   : > { %v13869_v53 = vsel %vm3863_vm5, %v6332_v31, %v13631_v15  ;;  %v13873_v36 = vsel %vm3856_vm4, %v6248_v63, %v13635_v26  ;;  %v2828_v29 = vmul.f32 0.015625, %v1477_v38  ;;  %v2811_v46 = vmul.f32 0.015625, %v1426_v49 }
 0x30a   : > { %v2333_v15 = vsel %vm1198_vm0, %v9305_v62, 0.0  ;;  %v2282_v31 = vsel %vm1198_vm0, %v9270_v28, 0.0  ;;  %v9366_v26 = vunpack.c.h.bf16 %v13638_v58  ;;  %v9333_v63 = vunpack.c.l.bf16 %v13876_v39 }
 0x30b   : > { %v4313_v24 = vrot.slane %v2828_v29, %v16054_v30  ;;  %v4229_v20 = vrot.slane %v2811_v46, %v16047_v3  ;;  %2238 = vadd.xlane.f32.xlu1 %v2237_v5  ;;  %2187 = vadd.xlane.f32.xlu0 %v2186_v21  ;;  %v13893_v29 = vld [vmem:[%s11536_s28 + $0x6a0] sm:$0xff]   ;;  %vm6390_vm4 = vcmask 1044484  }
 0x30c   : > { %v1573_v12 = vpop.xlane.xlu1 %1572  ;;  %v1522_v6 = vpop.xlane.xlu0 %1521 }
 0x30d   : > { %v13886_v38 = vsel %vm3912_vm12, %v4313_v24, %v13648_v8  ;;  %v13890_v49 = vsel %vm3905_vm11, %v4229_v20, %v13652_v32  ;;  %v2860_v5 = vmul.f32 0.015625, %v1573_v12  ;;  %v2843_v21 = vmul.f32 0.015625, %v1522_v6 }
 0x30e   : > { %v2426_v8 = vsel %vm1198_vm0, %v9366_v26, 0.0  ;;  %v2375_v24 = vsel %vm1198_vm0, %v9333_v63, 0.0  ;;  %v9430_v32 = vunpack.c.h.bf16 %v13655_v19  ;;  %v9397_v20 = vunpack.c.l.bf16 %v13893_v29 }
 0x30f   : > { %v4471_v62 = vrot.slane %v2860_v5, %v16054_v30  ;;  %v4387_v28 = vrot.slane %v2843_v21, %v16047_v3  ;;  %2334 = vadd.xlane.f32.xlu1 %v2333_v15  ;;  %2283 = vadd.xlane.f32.xlu0 %v2282_v31  ;;  %v13910_v5 = vld [vmem:[%s11536_s28 + $0x760] sm:$0xff]  }
 0x310   : > { %v1666_v58 = vpop.xlane.xlu1 %1665  ;;  %v1615_v46 = vpop.xlane.xlu0 %1614 }
 0x311   : > { %v13903_v12 = vsel %vm3912_vm12, %v4471_v62, %v13665_v40  ;;  %v13907_v6 = vsel %vm3905_vm11, %v4387_v28, %v13669_v16  ;;  %v2891_v15 = vmul.f32 0.015625, %v1666_v58  ;;  %v2874_v31 = vmul.f32 0.015625, %v1615_v46 }
 0x312   : > { %v2522_v40 = vsel %vm1198_vm0, %v9430_v32, 0.0  ;;  %v2471_v62 = vsel %vm1198_vm0, %v9397_v20, 0.0  ;;  %v9493_v16 = vunpack.c.l.bf16 %v13910_v5  ;;  %v9458_v28 = vunpack.c.h.bf16 %v13672_v33 }
 0x313   : > { %v4624_v26 = vrot.slane %v2891_v15, %v16047_v3  ;;  %v4540_v63 = vrot.slane %v2874_v31, %v16040_v34  ;;  %2427 = vadd.xlane.f32.xlu1 %v2426_v8  ;;  %2376 = vadd.xlane.f32.xlu0 %v2375_v24  ;;  %v13927_v15 = vld [vmem:[%s11536_s28 + $0x7e0] sm:$0xff]  }
 0x314   : > { %v1762_v19 = vpop.xlane.xlu1 %1761  ;;  %v1711_v21 = vpop.xlane.xlu0 %1710 }
 0x315   : > { %v13920_v58 = vsel %vm3905_vm11, %v4624_v26, %v13682_v10  ;;  %v13924_v46 = vsel %vm3898_vm10, %v4540_v63, %v13686_v50  ;;  %v2923_v8 = vmul.f32 0.015625, %v1762_v19  ;;  %v2906_v24 = vmul.f32 0.015625, %v1711_v21 }
 0x316   : > { %v2615_v10 = vsel %vm1198_vm0, %v9493_v16, 0.0  ;;  %v2564_v26 = vsel %vm1198_vm0, %v9458_v28, 0.0  ;;  %v9557_v50 = vunpack.c.l.bf16 %v13927_v15  ;;  %v9522_v63 = vunpack.c.h.bf16 %v13689_v56 }
 0x317   : > { %v4782_v32 = vrot.slane %v2923_v8, %v16047_v3  ;;  %v4698_v20 = vrot.slane %v2906_v24, %v16040_v34  ;;  %2523 = vadd.xlane.f32.xlu1 %v2522_v40  ;;  %2472 = vadd.xlane.f32.xlu0 %v2471_v62  ;;  %v13944_v8 = vld [vmem:[%s11536_s28 + $0x138] sm:$0xff]  }
 0x318   : > { %v1855_v33 = vpop.xlane.xlu1 %1854  ;;  %v1804_v31 = vpop.xlane.xlu0 %1803 }
 0x319   : > { %v13937_v19 = vsel %vm3905_vm11, %v4782_v32, %v13699_v13  ;;  %v13941_v21 = vsel %vm3898_vm10, %v4698_v20, %v13703_v44  ;;  %v2954_v40 = vmul.f32 0.015625, %v1855_v33  ;;  %v2937_v62 = vmul.f32 0.015625, %v1804_v31 }
 0x31a   : > { %v2711_v13 = vsel %vm1198_vm0, %v9557_v50, 0.0  ;;  %v2660_v32 = vsel %vm1198_vm0, %v9522_v63, 0.0  ;;  %v8738_v44 = vunpack.c.h.bf16 %v13706_v14  ;;  %v8705_v20 = vunpack.c.l.bf16 %v13944_v8 }
 0x31b   : > { %v4935_v16 = vrot.slane %v2954_v40, %v16040_v34  ;;  %v4851_v28 = vrot.slane %v2937_v62, %v16032_v51  ;;  %2616 = vadd.xlane.f32.xlu1 %v2615_v10  ;;  %2565 = vadd.xlane.f32.xlu0 %v2564_v26  ;;  %v13961_v40 = vld [vmem:[%s11536_s28 + $0x1b8] sm:$0xff]  }
 0x31c   : > { %v1951_v56 = vpop.xlane.xlu1 %1950  ;;  %v1900_v24 = vpop.xlane.xlu0 %1899 }
 0x31d   : > { %v13954_v33 = vsel %vm3898_vm10, %v4935_v16, %v13716_v17  ;;  %v13958_v31 = vsel %vm3891_vm9, %v4851_v28, %v13720_v47  ;;  %v2986_v10 = vmul.f32 0.015625, %v1951_v56  ;;  %v2969_v26 = vmul.f32 0.015625, %v1900_v24 }
 0x31e   : > { %v1484_v17 = vsel %vm1198_vm0, %v8738_v44, 0.0  ;;  %v1433_v16 = vsel %vm1198_vm0, %v8705_v20, 0.0  ;;  %v8802_v47 = vunpack.c.h.bf16 %v13723_v52  ;;  %v8769_v28 = vunpack.c.l.bf16 %v13961_v40 }
 0x31f   : > { %v5093_v50 = vrot.slane %v2986_v10, %v16040_v34  ;;  %v5009_v63 = vrot.slane %v2969_v26, %v16032_v51  ;;  %2712 = vadd.xlane.f32.xlu1 %v2711_v13  ;;  %2661 = vadd.xlane.f32.xlu0 %v2660_v32  ;;  %v13978_v10 = vld [vmem:[%s11536_s28 + $0x278] sm:$0xff]  }
 0x320   : > { %v2044_v14 = vpop.xlane.xlu1 %2043  ;;  %v1993_v62 = vpop.xlane.xlu0 %1992 }
 0x321   : > { %v13971_v56 = vsel %vm3898_vm10, %v5093_v50, %v13733_v27  ;;  %v13975_v24 = vsel %vm3891_vm9, %v5009_v63, %v13737_v60  ;;  %v3017_v13 = vmul.f32 0.015625, %v2044_v14  ;;  %v3000_v32 = vmul.f32 0.015625, %v1993_v62 }
 0x322   : > { %v1580_v27 = vsel %vm1198_vm0, %v8802_v47, 0.0  ;;  %v1529_v50 = vsel %vm1198_vm0, %v8769_v28, 0.0  ;;  %v8865_v60 = vunpack.c.l.bf16 %v13978_v10  ;;  %v8830_v63 = vunpack.c.h.bf16 %v13740_v25 }
 0x323   : > { %v5246_v44 = vrot.slane %v3017_v13, %v16032_v51  ;;  %v5162_v20 = vrot.slane %v3000_v32, %v11731_v2  ;;  %1485 = vadd.xlane.f32.xlu1 %v1484_v17  ;;  %1434 = vadd.xlane.f32.xlu0 %v1433_v16  ;;  %v13995_v13 = vld [vmem:[%s11536_s28 + $0x2f8] sm:$0xff]  }
 0x324   : > { %v2140_v52 = vpop.xlane.xlu1 %2139  ;;  %v2089_v26 = vpop.xlane.xlu0 %2088 }
 0x325   : > { %v13988_v14 = vsel %vm3891_vm9, %v5246_v44, %v13750_v9  ;;  %v13992_v62 = vsel %vm3884_vm8, %v5162_v20, %v13754_v1  ;;  %v3049_v17 = vmul.f32 0.015625, %v2140_v52  ;;  %v3032_v16 = vmul.f32 0.015625, %v2089_v26 }
 0x326   : > { %v1673_v9 = vsel %vm1198_vm0, %v8865_v60, 0.0  ;;  %v1622_v44 = vsel %vm1198_vm0, %v8830_v63, 0.0  ;;  %v8929_v1 = vunpack.c.l.bf16 %v13995_v13  ;;  %v8894_v20 = vunpack.c.h.bf16 %v13757_v4 }
 0x327   : > { %v5404_v47 = vrot.slane %v3049_v17, %v16032_v51  ;;  %v5320_v28 = vrot.slane %v3032_v16, %v11731_v2  ;;  %1581 = vadd.xlane.f32.xlu1 %v1580_v27  ;;  %1530 = vadd.xlane.f32.xlu0 %v1529_v50  ;;  %v14012_v17 = vld [vmem:[%s11536_s28 + $0x330] sm:$0xff]  }
 0x328   : > { %v2233_v25 = vpop.xlane.xlu1 %2232  ;;  %v2182_v32 = vpop.xlane.xlu0 %2181 }
 0x329   : > { %v14005_v52 = vsel %vm3891_vm9, %v5404_v47, %v13767_v7  ;;  %v14009_v26 = vsel %vm3884_vm8, %v5320_v28, %v13771_v37  ;;  %v3080_v27 = vmul.f32 0.015625, %v2233_v25  ;;  %v3063_v50 = vmul.f32 0.015625, %v2182_v32 }
 0x32a   : > { %v1769_v7 = vsel %vm1198_vm0, %v8929_v1, 0.0  ;;  %v1718_v47 = vsel %vm1198_vm0, %v8894_v20, 0.0  ;;  %v8990_v37 = vunpack.c.h.bf16 %v13774_v11  ;;  %v8957_v28 = vunpack.c.l.bf16 %v14012_v17 }
 0x32b   : > { %v5557_v60 = vrot.slane %v3080_v27, %v11731_v2  ;;  %v5473_v63 = vrot.slane %v3063_v50, %v11707_v42  ;;  %1674 = vadd.xlane.f32.xlu1 %v1673_v9  ;;  %1623 = vadd.xlane.f32.xlu0 %v1622_v44  ;;  %v14029_v27 = vld [vmem:[%s11536_s28 + $0x3b0] sm:$0xff]  }
 0x32c   : > { %v2329_v4 = vpop.xlane.xlu1 %2328  ;;  %v2278_v16 = vpop.xlane.xlu0 %2277 }
 0x32d   : > { %v14022_v25 = vsel %vm3884_vm8, %v5557_v60, %v13784_v22  ;;  %v14026_v32 = vsel %vm3877_vm7, %v5473_v63, %v13788_v61  ;;  %v3112_v9 = vmul.f32 0.015625, %v2329_v4  ;;  %v3095_v44 = vmul.f32 0.015625, %v2278_v16  ;;  %v16056_v4 = vld [vmem:[#allocation7_spill] sm:$0xff] }
 0x32e   : > { %16055 = vst [vmem:[#allocation18_spill] sm:$0xff] %v14026_v32  ;;  %v1862_v22 = vsel %vm1198_vm0, %v8990_v37, 0.0  ;;  %v1811_v60 = vsel %vm1198_vm0, %v8957_v28, 0.0  ;;  %v9054_v61 = vunpack.c.h.bf16 %v13791_v54  ;;  %v9021_v63 = vunpack.c.l.bf16 %v14029_v27 }
 0x32f   : > { %v5715_v1 = vrot.slane %v3112_v9, %v11731_v2  ;;  %v5631_v20 = vrot.slane %v3095_v44, %v11707_v42  ;;  %1770 = vadd.xlane.f32.xlu1 %v1769_v7  ;;  %1719 = vadd.xlane.f32.xlu0 %v1718_v47  ;;  %v14046_v44 = vld [vmem:[%s11536_s28 + $0x470] sm:$0xff]  }
 0x330   : > { %v2422_v11 = vpop.xlane.xlu1 %2421  ;;  %v2371_v50 = vpop.xlane.xlu0 %2370 }
 0x331   : > { %v14039_v16 = vsel %vm3884_vm8, %v5715_v1, %v16056_v4  ;;  %v14043_v9 = vsel %vm3877_vm7, %v5631_v20, %v13805_v41  ;;  %v3143_v7 = vmul.f32 0.015625, %v2422_v11  ;;  %v3126_v47 = vmul.f32 0.015625, %v2371_v50  ;;  %v16058_v11 = vld [vmem:[#allocation17_spill] sm:$0xff] }
 0x332   : > { %16057 = vst [vmem:[#allocation6_spill] sm:$0xff] %v14043_v9  ;;  %v1958_v1 = vsel %vm1198_vm0, %v9054_v61, 0.0  ;;  %v1907_v4 = vsel %vm1198_vm0, %v9021_v63, 0.0  ;;  %v9117_v41 = vunpack.c.l.bf16 %v14046_v44  ;;  %v9082_v20 = vunpack.c.h.bf16 %v13808_v55 }
 0x333   : > { %v5868_v37 = vrot.slane %v3143_v7, %v11707_v42  ;;  %v5784_v28 = vrot.slane %v3126_v47, %v11710_v43  ;;  %1863 = vadd.xlane.f32.xlu1 %v1862_v22  ;;  %1812 = vadd.xlane.f32.xlu0 %v1811_v60  ;;  %v14063_v47 = vld [vmem:[%s11536_s28 + $0x4f0] sm:$0xff]  }
 0x334   : > { %v2518_v54 = vpop.xlane.xlu1 %2517  ;;  %v2467_v32 = vpop.xlane.xlu0 %2466 }
 0x335   : > { %v14056_v50 = vsel %vm3877_vm7, %v5868_v37, %v16058_v11  ;;  %v14060_v7 = vsel %vm3870_vm6, %v5784_v28, %v13822_v35  ;;  %v3175_v22 = vmul.f32 0.015625, %v2518_v54  ;;  %v3158_v60 = vmul.f32 0.015625, %v2467_v32  ;;  %v16060_v28 = vld [vmem:[#allocation5_spill] sm:$0xff] }
 0x336   : > { %16059 = vst [vmem:[#allocation16_spill] sm:$0xff] %v14060_v7  ;;  %v2051_v37 = vsel %vm1198_vm0, %v9117_v41, 0.0  ;;  %v2000_v11 = vsel %vm1198_vm0, %v9082_v20, 0.0  ;;  %v9181_v35 = vunpack.c.l.bf16 %v14063_v47  ;;  %v9146_v54 = vunpack.c.h.bf16 %v16060_v28 }
 0x337   : > { %v6026_v61 = vrot.slane %v3175_v22, %v11707_v42  ;;  %v5942_v63 = vrot.slane %v3158_v60, %v11710_v43  ;;  %1959 = vadd.xlane.f32.xlu1 %v1958_v1  ;;  %1908 = vadd.xlane.f32.xlu0 %v1907_v4  ;;  %v14080_v60 = vld [vmem:[%s11536_s28 + $0x528] sm:$0xff]  }
 0x338   : > { %v2611_v55 = vpop.xlane.xlu1 %2610  ;;  %v2560_v9 = vpop.xlane.xlu0 %2559 }
 0x339   : > { %v14073_v32 = vsel %vm3877_vm7, %v6026_v61, %v13835_v57  ;;  %v14077_v22 = vsel %vm3870_vm6, %v5942_v63, %v13839_v48  ;;  %v3206_v1 = vmul.f32 0.015625, %v2611_v55  ;;  %v3189_v4 = vmul.f32 0.015625, %v2560_v9 }
 0x33a   : > { %v2147_v57 = vsel %vm1198_vm0, %v9181_v35, 0.0  ;;  %v2096_v61 = vsel %vm1198_vm0, %v9146_v54, 0.0  ;;  %v9242_v48 = vunpack.c.h.bf16 %v13842_v0  ;;  %v9209_v63 = vunpack.c.l.bf16 %v14080_v60 }
 0x33b   : > { %v6179_v41 = vrot.slane %v3206_v1, %v11710_v43  ;;  %v6095_v20 = vrot.slane %v3189_v4, %v11686_v23  ;;  %2052 = vadd.xlane.f32.xlu1 %v2051_v37  ;;  %2001 = vadd.xlane.f32.xlu0 %v2000_v11  ;;  %v14097_v1 = vld [vmem:[%s11536_s28 + $0x5a8] sm:$0xff]  }
 0x33c   : > { %v2707_v28 = vpop.xlane.xlu1 %2706  ;;  %v2656_v7 = vpop.xlane.xlu0 %2655 }
 0x33d   : > { %v14090_v9 = vsel %vm3870_vm6, %v6179_v41, %v13852_v18  ;;  %v14094_v55 = vsel %vm3863_vm5, %v6095_v20, %v13856_v45  ;;  %v3238_v37 = vmul.f32 0.015625, %v2707_v28  ;;  %v3221_v11 = vmul.f32 0.015625, %v2656_v7 }
 0x33e   : > { %v2240_v18 = vsel %vm1198_vm0, %v9242_v48, 0.0  ;;  %v2189_v41 = vsel %vm1198_vm0, %v9209_v63, 0.0  ;;  %v9306_v45 = vunpack.c.h.bf16 %v13859_v59  ;;  %v9273_v20 = vunpack.c.l.bf16 %v14097_v1  ;;  %v16061_v48 = vld [vmem:[#allocation8_spill] sm:$0xff] }
 0x33f   : > { %v6337_v35 = vrot.slane %v3238_v37, %v11710_v43  ;;  %v6253_v54 = vrot.slane %v3221_v11, %v11686_v23  ;;  %2148 = vadd.xlane.f32.xlu1 %v2147_v57  ;;  %2097 = vadd.xlane.f32.xlu0 %v2096_v61  ;;  %v14114_v61 = vld [vmem:[%s11536_s28 + $0x668] sm:$0xff]  }
 0x340   : > { %v1480_v0 = vpop.xlane.xlu1 %1479  ;;  %v1429_v4 = vpop.xlane.xlu0 %1428 }
 0x341   : > { %v14107_v7 = vsel %vm3870_vm6, %v6337_v35, %v13869_v53  ;;  %v14111_v28 = vsel %vm3863_vm5, %v6253_v54, %v13873_v36  ;;  %v2829_v23 = vmul.f32 0.015625, %v1480_v0  ;;  %v2812_v57 = vmul.f32 0.015625, %v1429_v4 }
 0x342   : > { %v2336_v53 = vsel %vm1198_vm0, %v9306_v45, 0.0  ;;  %v2285_v35 = vsel %vm1198_vm0, %v9273_v20, 0.0  ;;  %v9369_v36 = vunpack.c.l.bf16 %v14114_v61  ;;  %v9334_v54 = vunpack.c.h.bf16 %v13876_v39 }
 0x343   : > { %v4318_v37 = vrot.slane %v2829_v23, %v16061_v48  ;;  %v4234_v63 = vrot.slane %v2812_v57, %v16054_v30  ;;  %2241 = vadd.xlane.f32.xlu1 %v2240_v18  ;;  %2190 = vadd.xlane.f32.xlu0 %v2189_v41  ;;  %v14131_v23 = vld [vmem:[%s11536_s28 + $0x6e8] sm:$0xff]   ;;  %vm6392_vm5 = vcmask 1045509  }
 0x344   : > { %v1576_v59 = vpop.xlane.xlu1 %1575  ;;  %v1525_v11 = vpop.xlane.xlu0 %1524 }
 0x345   : > { %v14124_v0 = vsel %vm3919_vm13, %v4318_v37, %v13886_v38  ;;  %v14128_v4 = vsel %vm3912_vm12, %v4234_v63, %v13890_v49  ;;  %v2861_v18 = vmul.f32 0.015625, %v1576_v59  ;;  %v2844_v41 = vmul.f32 0.015625, %v1525_v11 }
 0x346   : > { %v2429_v38 = vsel %vm1198_vm0, %v9369_v36, 0.0  ;;  %v2378_v37 = vsel %vm1198_vm0, %v9334_v54, 0.0  ;;  %v9433_v49 = vunpack.c.l.bf16 %v14131_v23  ;;  %v9398_v63 = vunpack.c.h.bf16 %v13893_v29 }
 0x347   : > { %v4476_v45 = vrot.slane %v2861_v18, %v16061_v48  ;;  %v4392_v20 = vrot.slane %v2844_v41, %v16054_v30  ;;  %2337 = vadd.xlane.f32.xlu1 %v2336_v53  ;;  %2286 = vadd.xlane.f32.xlu0 %v2285_v35  ;;  %v14148_v18 = vld [vmem:[%s11536_s28 + $0x720] sm:$0xff]  }
 0x348   : > { %v1669_v39 = vpop.xlane.xlu1 %1668  ;;  %v1618_v57 = vpop.xlane.xlu0 %1617 }
 0x349   : > { %v14141_v59 = vsel %vm3919_vm13, %v4476_v45, %v13903_v12  ;;  %v14145_v11 = vsel %vm3912_vm12, %v4392_v20, %v13907_v6  ;;  %v2892_v53 = vmul.f32 0.015625, %v1669_v39  ;;  %v2875_v35 = vmul.f32 0.015625, %v1618_v57 }
 0x34a   : > { %16062 = vst [vmem:[#allocation19_spill] sm:$0xff] %v14145_v11  ;;  %v2525_v12 = vsel %vm1198_vm0, %v9433_v49, 0.0  ;;  %v2474_v45 = vsel %vm1198_vm0, %v9398_v63, 0.0  ;;  %v9494_v6 = vunpack.c.h.bf16 %v13910_v5  ;;  %v9461_v20 = vunpack.c.l.bf16 %v14148_v18 }
 0x34b   : > { %v4629_v36 = vrot.slane %v2892_v53, %v16054_v30  ;;  %v4545_v54 = vrot.slane %v2875_v35, %v16047_v3  ;;  %2430 = vadd.xlane.f32.xlu1 %v2429_v38  ;;  %2379 = vadd.xlane.f32.xlu0 %v2378_v37  ;;  %v14165_v53 = vld [vmem:[%s11536_s28 + $0x7a0] sm:$0xff]  }
 0x34c   : > { %v1765_v29 = vpop.xlane.xlu1 %1764  ;;  %v1714_v41 = vpop.xlane.xlu0 %1713  ;;  %v2618_v11 = vsel %vm1198_vm0, %v9494_v6, 0.0 }
 0x34d   : > { %v14158_v39 = vsel %vm3912_vm12, %v4629_v36, %v13920_v58  ;;  %v14162_v57 = vsel %vm3905_vm11, %v4545_v54, %v13924_v46  ;;  %v2924_v38 = vmul.f32 0.015625, %v1765_v29  ;;  %v2907_v37 = vmul.f32 0.015625, %v1714_v41 }
 0x34e   : > { %v2567_v58 = vsel %vm1198_vm0, %v9461_v20, 0.0  ;;  %v9558_v36 = vunpack.c.h.bf16 %v13927_v15  ;;  %v9525_v46 = vunpack.c.l.bf16 %v14165_v53 }
 0x34f   : > { %v4787_v49 = vrot.slane %v2924_v38, %v16054_v30  ;;  %v4703_v63 = vrot.slane %v2907_v37, %v16047_v3  ;;  %2526 = vadd.xlane.f32.xlu1 %v2525_v12  ;;  %2475 = vadd.xlane.f32.xlu0 %v2474_v45  ;;  %v8770_v37 = vunpack.c.h.bf16 %v13961_v40 }
 0x350   : > { %v1858_v5 = vpop.xlane.xlu1 %1857  ;;  %v1807_v35 = vpop.xlane.xlu0 %1806  ;;  %v2714_v38 = vsel %vm1198_vm0, %v9558_v36, 0.0 }
 0x351   : > { %v14175_v54 = vsel %vm3912_vm12, %v4787_v49, %v13937_v19  ;;  %v14179_v29 = vsel %vm3905_vm11, %v4703_v63, %v13941_v21  ;;  %v2955_v41 = vmul.f32 0.015625, %v1858_v5  ;;  %v2938_v12 = vmul.f32 0.015625, %v1807_v35  ;;  %v14196_v35 = vld [vmem:[%s11536_s28 + $0x238] sm:$0xff]  }
 0x352   : > { %v2663_v19 = vsel %vm1198_vm0, %v9525_v46, 0.0  ;;  %v8706_v21 = vunpack.c.h.bf16 %v13944_v8 }
 0x353   : > { %v4940_v45 = vrot.slane %v2955_v41, %v16047_v3  ;;  %v4856_v6 = vrot.slane %v2938_v12, %v16040_v34  ;;  %2619 = vadd.xlane.f32.xlu1 %v2618_v11  ;;  %2568 = vadd.xlane.f32.xlu0 %v2567_v58  ;;  %v8833_v41 = vunpack.c.l.bf16 %v14196_v35 }
 0x354   : > { %v1954_v15 = vpop.xlane.xlu1 %1953  ;;  %v1903_v20 = vpop.xlane.xlu0 %1902  ;;  %v1436_v46 = vsel %vm1198_vm0, %v8706_v21, 0.0 }
 0x355   : > { %v14189_v49 = vsel %vm3905_vm11, %v4940_v45, %v13954_v33  ;;  %v14193_v63 = vsel %vm3898_vm10, %v4856_v6, %v13958_v31  ;;  %v2987_v11 = vmul.f32 0.015625, %v1954_v15  ;;  %v2970_v5 = vmul.f32 0.015625, %v1903_v20  ;;  %v14213_v20 = vld [vmem:[%s11536_s28 + $0x2b8] sm:$0xff]  }
 0x356   : > { %v1532_v33 = vsel %vm1198_vm0, %v8770_v37, 0.0  ;;  %v8866_v31 = vunpack.c.h.bf16 %v13978_v10  ;;  %v1625_v21 = vsel %vm1198_vm0, %v8833_v41, 0.0 }
 0x357   : > { %v5098_v58 = vrot.slane %v2987_v11, %v16047_v3  ;;  %v5014_v36 = vrot.slane %v2970_v5, %v16040_v34  ;;  %2715 = vadd.xlane.f32.xlu1 %v2714_v38  ;;  %2664 = vadd.xlane.f32.xlu0 %v2663_v19  ;;  %v8897_v11 = vunpack.c.l.bf16 %v14213_v20 }
 0x358   : > { %v2047_v8 = vpop.xlane.xlu1 %2046  ;;  %v1996_v40 = vpop.xlane.xlu0 %1995 }
 0x359   : > { %v14206_v12 = vsel %vm3905_vm11, %v5098_v58, %v13971_v56  ;;  %v14210_v45 = vsel %vm3898_vm10, %v5014_v36, %v13975_v24  ;;  %v3018_v6 = vmul.f32 0.015625, %v2047_v8  ;;  %v3001_v15 = vmul.f32 0.015625, %v1996_v40  ;;  %v14230_v40 = vld [vmem:[%s11536_s28 + $0x378] sm:$0xff]  }
 0x35a   : > { %v1676_v56 = vsel %vm1198_vm0, %v8866_v31, 0.0  ;;  %v8930_v24 = vunpack.c.h.bf16 %v13995_v13  ;;  %v1721_v41 = vsel %vm1198_vm0, %v8897_v11, 0.0 }
 0x35b   : > { %v5251_v38 = vrot.slane %v3018_v6, %v16040_v34  ;;  %v5167_v19 = vrot.slane %v3001_v15, %v16032_v51  ;;  %1533 = vadd.xlane.f32.xlu1 %v1532_v33  ;;  %1437 = vadd.xlane.f32.xlu0 %v1436_v46  ;;  %v8958_v6 = vunpack.c.h.bf16 %v14012_v17 }
 0x35c   : > { %v2143_v10 = vpop.xlane.xlu1 %2142  ;;  %v2092_v37 = vpop.xlane.xlu0 %2091 }
 0x35d   : > { %v14223_v5 = vsel %vm3898_vm10, %v5251_v38, %v13988_v14  ;;  %v14227_v58 = vsel %vm3891_vm9, %v5167_v19, %v13992_v62  ;;  %v3050_v36 = vmul.f32 0.015625, %v2143_v10  ;;  %v3033_v8 = vmul.f32 0.015625, %v2092_v37  ;;  %v14247_v37 = vld [vmem:[%s11536_s28 + $0x3f8] sm:$0xff]  }
 0x35e   : > { %v1772_v14 = vsel %vm1198_vm0, %v8930_v24, 0.0  ;;  %v8993_v62 = vunpack.c.l.bf16 %v14230_v40  ;;  %v1814_v11 = vsel %vm1198_vm0, %v8958_v6, 0.0 }
 0x35f   : > { %v5409_v33 = vrot.slane %v3050_v36, %v16040_v34  ;;  %v5325_v46 = vrot.slane %v3033_v8, %v16032_v51  ;;  %1677 = vadd.xlane.f32.xlu1 %v1676_v56  ;;  %1626 = vadd.xlane.f32.xlu0 %v1625_v21  ;;  %v9022_v36 = vunpack.c.h.bf16 %v14029_v27 }
 0x360   : > { %v2236_v13 = vpop.xlane.xlu1 %2235  ;;  %v2185_v31 = vpop.xlane.xlu0 %2184 }
 0x361   : > { %v14240_v15 = vsel %vm3898_vm10, %v5409_v33, %v14005_v52  ;;  %v14244_v38 = vsel %vm3891_vm9, %v5325_v46, %v14009_v26  ;;  %v3081_v19 = vmul.f32 0.015625, %v2236_v13  ;;  %v3064_v10 = vmul.f32 0.015625, %v2185_v31  ;;  %v16063_v33 = vld [vmem:[#allocation18_spill] sm:$0xff] }
 0x362   : > { %v1865_v52 = vsel %vm1198_vm0, %v8993_v62, 0.0  ;;  %v9057_v26 = vunpack.c.l.bf16 %v14247_v37 }
 0x363   : > { %v5562_v56 = vrot.slane %v3081_v19, %v16032_v51  ;;  %v5478_v21 = vrot.slane %v3064_v10, %v11731_v2  ;;  %1773 = vadd.xlane.f32.xlu1 %v1772_v14  ;;  %1722 = vadd.xlane.f32.xlu0 %v1721_v41  ;;  %v14264_v14 = vld [vmem:[%s11536_s28 + $0x430] sm:$0xff]   ;;  %v1910_v19 = vsel %vm1198_vm0, %v9022_v36, 0.0  ;;  %v9118_v10 = vunpack.c.h.bf16 %v14046_v44 }
 0x364   : > { %v2332_v17 = vpop.xlane.xlu1 %2331  ;;  %v2281_v24 = vpop.xlane.xlu0 %2280 }
 0x365   : > { %v14257_v8 = vsel %vm3891_vm9, %v5562_v56, %v14022_v25  ;;  %v14261_v46 = vsel %vm3884_vm8, %v5478_v21, %v16063_v33  ;;  %v3113_v13 = vmul.f32 0.015625, %v2332_v17  ;;  %v3096_v31 = vmul.f32 0.015625, %v2281_v24  ;;  %v16064_v17 = vld [vmem:[#allocation6_spill] sm:$0xff]  ;;  %v14281_v33 = vld [vmem:[%s11536_s28 + $0x4b0] sm:$0xff]  }
 0x366   : > { %v1961_v25 = vsel %vm1198_vm0, %v9057_v26, 0.0  ;;  %v9085_v56 = vunpack.c.l.bf16 %v14264_v14 }
 0x367   : > { %v5720_v41 = vrot.slane %v3113_v13, %v16032_v51  ;;  %v5636_v62 = vrot.slane %v3096_v31, %v11731_v2  ;;  %1866 = vadd.xlane.f32.xlu1 %v1865_v52  ;;  %1815 = vadd.xlane.f32.xlu0 %v1814_v11 }
 0x368   : > { %v2425_v27 = vpop.xlane.xlu1 %2424  ;;  %v2374_v6 = vpop.xlane.xlu0 %2373  ;;  %v2003_v31 = vsel %vm1198_vm0, %v9085_v56, 0.0 }
 0x369   : > { %v14274_v21 = vsel %vm3891_vm9, %v5720_v41, %v14039_v16  ;;  %v14278_v24 = vsel %vm3884_vm8, %v5636_v62, %v16064_v17  ;;  %v3144_v52 = vmul.f32 0.015625, %v2425_v27  ;;  %v3127_v11 = vmul.f32 0.015625, %v2374_v6  ;;  %v16065_v6 = vld [vmem:[#allocation16_spill] sm:$0xff] }
 0x36a   : > { %v2054_v16 = vsel %vm1198_vm0, %v9118_v10, 0.0  ;;  %v9182_v41 = vunpack.c.h.bf16 %v14063_v47  ;;  %v9149_v62 = vunpack.c.l.bf16 %v14281_v33 }
 0x36b   : > { %v5873_v26 = vrot.slane %v3144_v52, %v11731_v2  ;;  %v5789_v36 = vrot.slane %v3127_v11, %v11707_v42  ;;  %1962 = vadd.xlane.f32.xlu1 %v1961_v25  ;;  %1911 = vadd.xlane.f32.xlu0 %v1910_v19  ;;  %v14298_v52 = vld [vmem:[%s11536_s28 + $0x570] sm:$0xff]  }
 0x36c   : > { %v2521_v44 = vpop.xlane.xlu1 %2520  ;;  %v2470_v13 = vpop.xlane.xlu0 %2469 }
 0x36d   : > { %v14291_v27 = vsel %vm3884_vm8, %v5873_v26, %v14056_v50  ;;  %v14295_v17 = vsel %vm3877_vm7, %v5789_v36, %v16065_v6  ;;  %v3176_v25 = vmul.f32 0.015625, %v2521_v44  ;;  %v3159_v19 = vmul.f32 0.015625, %v2470_v13 }
 0x36e   : > { %v2150_v50 = vsel %vm1198_vm0, %v9182_v41, 0.0  ;;  %v2099_v26 = vsel %vm1198_vm0, %v9149_v62, 0.0  ;;  %v9245_v36 = vunpack.c.l.bf16 %v14298_v52  ;;  %v9210_v44 = vunpack.c.h.bf16 %v14080_v60 }
 0x36f   : > { %v6031_v10 = vrot.slane %v3176_v25, %v11731_v2  ;;  %v5947_v56 = vrot.slane %v3159_v19, %v11707_v42  ;;  %2055 = vadd.xlane.f32.xlu1 %v2054_v16  ;;  %2004 = vadd.xlane.f32.xlu0 %v2003_v31  ;;  %v14315_v25 = vld [vmem:[%s11536_s28 + $0x5f0] sm:$0xff]  }
 0x370   : > { %v2614_v47 = vpop.xlane.xlu1 %2613  ;;  %v2563_v11 = vpop.xlane.xlu0 %2562 }
 0x371   : > { %v14308_v13 = vsel %vm3884_vm8, %v6031_v10, %v14073_v32  ;;  %v14312_v6 = vsel %vm3877_vm7, %v5947_v56, %v14077_v22  ;;  %v3207_v16 = vmul.f32 0.015625, %v2614_v47  ;;  %v3190_v31 = vmul.f32 0.015625, %v2563_v11 }
 0x372   : > { %v2243_v32 = vsel %vm1198_vm0, %v9245_v36, 0.0  ;;  %v2192_v10 = vsel %vm1198_vm0, %v9210_v44, 0.0  ;;  %v9309_v22 = vunpack.c.l.bf16 %v14315_v25  ;;  %v9274_v56 = vunpack.c.h.bf16 %v14097_v1 }
 0x373   : > { %v6184_v41 = vrot.slane %v3207_v16, %v11707_v42  ;;  %v6100_v62 = vrot.slane %v3190_v31, %v11710_v43  ;;  %2151 = vadd.xlane.f32.xlu1 %v2150_v50  ;;  %2100 = vadd.xlane.f32.xlu0 %v2099_v26  ;;  %v14332_v16 = vld [vmem:[%s11536_s28 + $0x628] sm:$0xff]  }
 0x374   : > { %v2710_v60 = vpop.xlane.xlu1 %2709  ;;  %v2659_v19 = vpop.xlane.xlu0 %2658 }
 0x375   : > { %v14325_v47 = vsel %vm3877_vm7, %v6184_v41, %v14090_v9  ;;  %v14329_v11 = vsel %vm3870_vm6, %v6100_v62, %v14094_v55  ;;  %v3239_v50 = vmul.f32 0.015625, %v2710_v60  ;;  %v3222_v26 = vmul.f32 0.015625, %v2659_v19 }
 0x376   : > { %v2339_v9 = vsel %vm1198_vm0, %v9309_v22, 0.0  ;;  %v2288_v41 = vsel %vm1198_vm0, %v9274_v56, 0.0  ;;  %v9370_v55 = vunpack.c.h.bf16 %v14114_v61  ;;  %v9337_v62 = vunpack.c.l.bf16 %v14332_v16  ;;  %v16066_v22 = vld [vmem:[#allocation11_spill] sm:$0xff] }
 0x377   : > { %v6342_v36 = vrot.slane %v3239_v50, %v11707_v42  ;;  %v6258_v44 = vrot.slane %v3222_v26, %v11710_v43  ;;  %2244 = vadd.xlane.f32.xlu1 %v2243_v32  ;;  %2193 = vadd.xlane.f32.xlu0 %v2192_v10  ;;  %v14349_v10 = vld [vmem:[%s11536_s28 + $0x6a8] sm:$0xff]  }
 0x378   : > { %v1483_v1 = vpop.xlane.xlu1 %1482  ;;  %v1432_v31 = vpop.xlane.xlu0 %1431 }
 0x379   : > { %v14342_v60 = vsel %vm3877_vm7, %v6342_v36, %v14107_v7  ;;  %v14346_v19 = vsel %vm3870_vm6, %v6258_v44, %v14111_v28  ;;  %v2830_v43 = vmul.f32 0.015625, %v1483_v1  ;;  %v2813_v32 = vmul.f32 0.015625, %v1432_v31 }
 0x37a   : > { %v2432_v7 = vsel %vm1198_vm0, %v9370_v55, 0.0  ;;  %v2381_v36 = vsel %vm1198_vm0, %v9337_v62, 0.0  ;;  %v9434_v28 = vunpack.c.h.bf16 %v14131_v23  ;;  %v9401_v44 = vunpack.c.l.bf16 %v14349_v10 }
 0x37b   : > { %v4323_v50 = vrot.slane %v2830_v43, %v16066_v22  ;;  %v4239_v56 = vrot.slane %v2813_v32, %v16061_v48  ;;  %2340 = vadd.xlane.f32.xlu1 %v2339_v9  ;;  %2289 = vadd.xlane.f32.xlu0 %v2288_v41  ;;  %v14366_v43 = vld [vmem:[%s11536_s28 + $0x768] sm:$0xff]   ;;  %vm6394_vm6 = vcmask 1046534  }
 0x37c   : > { %v1579_v61 = vpop.xlane.xlu1 %1578  ;;  %v1528_v26 = vpop.xlane.xlu0 %1527 }
 0x37d   : > { %v14359_v1 = vsel %vm3926_vm14, %v4323_v50, %v14124_v0  ;;  %v14363_v31 = vsel %vm3919_vm13, %v4239_v56, %v14128_v4  ;;  %v2862_v9 = vmul.f32 0.015625, %v1579_v61  ;;  %v2845_v41 = vmul.f32 0.015625, %v1528_v26  ;;  %v16069_v26 = vld [vmem:[#allocation19_spill] sm:$0xff] }
 0x37e   : > { %16067 = vst [vmem:[#allocation20_spill] sm:$0xff] %v14359_v1  ;;  %16068 = vst [vmem:[#allocation9_spill] sm:$0xff] %v14363_v31  ;;  %v2528_v0 = vsel %vm1198_vm0, %v9434_v28, 0.0  ;;  %v2477_v50 = vsel %vm1198_vm0, %v9401_v44, 0.0  ;;  %v9497_v4 = vunpack.c.l.bf16 %v14366_v43  ;;  %v9462_v56 = vunpack.c.h.bf16 %v14148_v18 }
 0x37f   : > { %v4481_v55 = vrot.slane %v2862_v9, %v16066_v22  ;;  %v4397_v62 = vrot.slane %v2845_v41, %v16061_v48  ;;  %2433 = vadd.xlane.f32.xlu1 %v2432_v7  ;;  %2382 = vadd.xlane.f32.xlu0 %v2381_v36  ;;  %v14383_v41 = vld [vmem:[%s11536_s28 + $0x7e8] sm:$0xff]  }
 0x380   : > { %v1672_v23 = vpop.xlane.xlu1 %1671  ;;  %v1621_v32 = vpop.xlane.xlu0 %1620  ;;  %v2621_v1 = vsel %vm1198_vm0, %v9497_v4, 0.0 }
 0x381   : > { %v14376_v61 = vsel %vm3926_vm14, %v4481_v55, %v14141_v59  ;;  %v14380_v9 = vsel %vm3919_vm13, %v4397_v62, %v16069_v26  ;;  %v2893_v7 = vmul.f32 0.015625, %v1672_v23  ;;  %v2876_v36 = vmul.f32 0.015625, %v1621_v32 }
 0x382   : > { %v2570_v59 = vsel %vm1198_vm0, %v9462_v56, 0.0  ;;  %v9561_v55 = vunpack.c.l.bf16 %v14383_v41  ;;  %v9526_v62 = vunpack.c.h.bf16 %v14165_v53 }
 0x383   : > { %v4634_v28 = vrot.slane %v2893_v7, %v16061_v48  ;;  %v4550_v44 = vrot.slane %v2876_v36, %v16054_v30  ;;  %2529 = vadd.xlane.f32.xlu1 %v2528_v0  ;;  %2478 = vadd.xlane.f32.xlu0 %v2477_v50  ;;  %v8898_v36 = vunpack.c.h.bf16 %v14213_v20 }
 0x384   : > { %v1768_v31 = vpop.xlane.xlu1 %1767  ;;  %v1717_v18 = vpop.xlane.xlu0 %1716  ;;  %v2717_v53 = vsel %vm1198_vm0, %v9561_v55, 0.0 }
 0x385   : > { %v14393_v23 = vsel %vm3919_vm13, %v4634_v28, %v14158_v39  ;;  %v14397_v32 = vsel %vm3912_vm12, %v4550_v44, %v14162_v57  ;;  %v2925_v0 = vmul.f32 0.015625, %v1768_v31  ;;  %v2908_v50 = vmul.f32 0.015625, %v1717_v18  ;;  %v14414_v18 = vld [vmem:[%s11536_s28 + $0x338] sm:$0xff]  }
 0x386   : > { %v2666_v39 = vsel %vm1198_vm0, %v9526_v62, 0.0  ;;  %v8834_v57 = vunpack.c.h.bf16 %v14196_v35 }
 0x387   : > { %v4792_v26 = vrot.slane %v2925_v0, %v16061_v48  ;;  %v4708_v4 = vrot.slane %v2908_v50, %v16054_v30  ;;  %2622 = vadd.xlane.f32.xlu1 %v2621_v1  ;;  %2571 = vadd.xlane.f32.xlu0 %v2570_v59  ;;  %v8961_v0 = vunpack.c.l.bf16 %v14414_v18 }
 0x388   : > { %v1861_v56 = vpop.xlane.xlu1 %1860  ;;  %v1810_v7 = vpop.xlane.xlu0 %1809  ;;  %v1628_v62 = vsel %vm1198_vm0, %v8834_v57, 0.0 }
 0x389   : > { %v14407_v31 = vsel %vm3919_vm13, %v4792_v26, %v14175_v54  ;;  %v14411_v28 = vsel %vm3912_vm12, %v4708_v4, %v14179_v29  ;;  %v2956_v1 = vmul.f32 0.015625, %v1861_v56  ;;  %v2939_v44 = vmul.f32 0.015625, %v1810_v7  ;;  %v14431_v7 = vld [vmem:[%s11536_s28 + $0x3b8] sm:$0xff]  }
 0x38a   : > { %v1724_v54 = vsel %vm1198_vm0, %v8898_v36, 0.0  ;;  %v8994_v29 = vunpack.c.h.bf16 %v14230_v40  ;;  %v1817_v57 = vsel %vm1198_vm0, %v8961_v0, 0.0 }
 0x38b   : > { %v4945_v59 = vrot.slane %v2956_v1, %v16054_v30  ;;  %v4861_v55 = vrot.slane %v2939_v44, %v16047_v3  ;;  %2718 = vadd.xlane.f32.xlu1 %v2717_v53  ;;  %2667 = vadd.xlane.f32.xlu0 %v2666_v39  ;;  %v9025_v1 = vunpack.c.l.bf16 %v14431_v7 }
 0x38c   : > { %v1957_v35 = vpop.xlane.xlu1 %1956  ;;  %v1906_v20 = vpop.xlane.xlu0 %1905 }
 0x38d   : > { %v14424_v50 = vsel %vm3912_vm12, %v4945_v59, %v14189_v49  ;;  %v14428_v26 = vsel %vm3905_vm11, %v4861_v55, %v14193_v63  ;;  %v2988_v4 = vmul.f32 0.015625, %v1957_v35  ;;  %v2971_v56 = vmul.f32 0.015625, %v1906_v20  ;;  %v14448_v20 = vld [vmem:[%s11536_s28 + $0x478] sm:$0xff]  }
 0x38e   : > { %v1868_v49 = vsel %vm1198_vm0, %v8994_v29, 0.0  ;;  %v9058_v63 = vunpack.c.h.bf16 %v14247_v37  ;;  %v1913_v0 = vsel %vm1198_vm0, %v9025_v1, 0.0 }
 0x38f   : > { %v5103_v53 = vrot.slane %v2988_v4, %v16054_v30  ;;  %v5019_v39 = vrot.slane %v2971_v56, %v16047_v3  ;;  %1725 = vadd.xlane.f32.xlu1 %v1724_v54  ;;  %1629 = vadd.xlane.f32.xlu0 %v1628_v62  ;;  %v9086_v4 = vunpack.c.h.bf16 %v14264_v14 }
 0x390   : > { %v2050_v40 = vpop.xlane.xlu1 %2049  ;;  %v1999_v36 = vpop.xlane.xlu0 %1998 }
 0x391   : > { %v14441_v44 = vsel %vm3912_vm12, %v5103_v53, %v14206_v12  ;;  %v14445_v59 = vsel %vm3905_vm11, %v5019_v39, %v14210_v45  ;;  %v3019_v55 = vmul.f32 0.015625, %v2050_v40  ;;  %v3002_v35 = vmul.f32 0.015625, %v1999_v36  ;;  %v14465_v36 = vld [vmem:[%s11536_s28 + $0x4f8] sm:$0xff]  }
 0x392   : > { %v1964_v12 = vsel %vm1198_vm0, %v9058_v63, 0.0  ;;  %v9121_v45 = vunpack.c.l.bf16 %v14448_v20  ;;  %v2006_v1 = vsel %vm1198_vm0, %v9086_v4, 0.0 }
 0x393   : > { %v5256_v54 = vrot.slane %v3019_v55, %v16047_v3  ;;  %v5172_v62 = vrot.slane %v3002_v35, %v16040_v34  ;;  %1869 = vadd.xlane.f32.xlu1 %v1868_v49  ;;  %1818 = vadd.xlane.f32.xlu0 %v1817_v57  ;;  %v9150_v55 = vunpack.c.h.bf16 %v14281_v33 }
 0x394   : > { %v2146_v37 = vpop.xlane.xlu1 %2145  ;;  %v2095_v29 = vpop.xlane.xlu0 %2094 }
 0x395   : > { %v14458_v56 = vsel %vm3905_vm11, %v5256_v54, %v14223_v5  ;;  %v14462_v53 = vsel %vm3898_vm10, %v5172_v62, %v14227_v58  ;;  %v3051_v39 = vmul.f32 0.015625, %v2146_v37  ;;  %v3034_v40 = vmul.f32 0.015625, %v2095_v29  ;;  %v14482_v29 = vld [vmem:[%s11536_s28 + $0x530] sm:$0xff]  }
 0x396   : > { %v2057_v5 = vsel %vm1198_vm0, %v9121_v45, 0.0  ;;  %v9185_v58 = vunpack.c.l.bf16 %v14465_v36  ;;  %v2102_v4 = vsel %vm1198_vm0, %v9150_v55, 0.0 }
 0x397   : > { %v5414_v49 = vrot.slane %v3051_v39, %v16047_v3  ;;  %v5330_v57 = vrot.slane %v3034_v40, %v16040_v34  ;;  %1965 = vadd.xlane.f32.xlu1 %v1964_v12  ;;  %1914 = vadd.xlane.f32.xlu0 %v1913_v0  ;;  %v9213_v39 = vunpack.c.l.bf16 %v14482_v29 }
 0x398   : > { %v2239_v14 = vpop.xlane.xlu1 %2238  ;;  %v2188_v63 = vpop.xlane.xlu0 %2187 }
 0x399   : > { %v14475_v35 = vsel %vm3905_vm11, %v5414_v49, %v14240_v15  ;;  %v14479_v54 = vsel %vm3898_vm10, %v5330_v57, %v14244_v38  ;;  %v3082_v62 = vmul.f32 0.015625, %v2239_v14  ;;  %v3065_v37 = vmul.f32 0.015625, %v2188_v63  ;;  %v14499_v63 = vld [vmem:[%s11536_s28 + $0x5b0] sm:$0xff]  }
 0x39a   : > { %v2153_v15 = vsel %vm1198_vm0, %v9185_v58, 0.0  ;;  %v9246_v38 = vunpack.c.h.bf16 %v14298_v52  ;;  %v2195_v55 = vsel %vm1198_vm0, %v9213_v39, 0.0 }
 0x39b   : > { %v5567_v12 = vrot.slane %v3082_v62, %v16040_v34  ;;  %v5483_v0 = vrot.slane %v3065_v37, %v16032_v51  ;;  %2058 = vadd.xlane.f32.xlu1 %v2057_v5  ;;  %2007 = vadd.xlane.f32.xlu0 %v2006_v1  ;;  %v9277_v62 = vunpack.c.l.bf16 %v14499_v63 }
 0x39c   : > { %v2335_v33 = vpop.xlane.xlu1 %2334  ;;  %v2284_v45 = vpop.xlane.xlu0 %2283 }
 0x39d   : > { %v14492_v40 = vsel %vm3898_vm10, %v5567_v12, %v14257_v8  ;;  %v14496_v49 = vsel %vm3891_vm9, %v5483_v0, %v14261_v46  ;;  %v3114_v57 = vmul.f32 0.015625, %v2335_v33  ;;  %v3097_v14 = vmul.f32 0.015625, %v2284_v45  ;;  %v14516_v45 = vld [vmem:[%s11536_s28 + $0x670] sm:$0xff]  }
 0x39e   : > { %v2246_v8 = vsel %vm1198_vm0, %v9246_v38, 0.0  ;;  %v9310_v46 = vunpack.c.h.bf16 %v14315_v25  ;;  %v2291_v39 = vsel %vm1198_vm0, %v9277_v62, 0.0 }
 0x39f   : > { %v5725_v5 = vrot.slane %v3114_v57, %v16040_v34  ;;  %v5641_v1 = vrot.slane %v3097_v14, %v16032_v51  ;;  %2154 = vadd.xlane.f32.xlu1 %v2153_v15  ;;  %2103 = vadd.xlane.f32.xlu0 %v2102_v4  ;;  %v9338_v57 = vunpack.c.h.bf16 %v14332_v16 }
 0x3a0   : > { %v2428_v52 = vpop.xlane.xlu1 %2427  ;;  %v2377_v58 = vpop.xlane.xlu0 %2376 }
 0x3a1   : > { %v14509_v37 = vsel %vm3898_vm10, %v5725_v5, %v14274_v21  ;;  %v14513_v12 = vsel %vm3891_vm9, %v5641_v1, %v14278_v24  ;;  %v3145_v0 = vmul.f32 0.015625, %v2428_v52  ;;  %v3128_v33 = vmul.f32 0.015625, %v2377_v58  ;;  %v14533_v58 = vld [vmem:[%s11536_s28 + $0x6f0] sm:$0xff]  }
 0x3a2   : > { %v2342_v21 = vsel %vm1198_vm0, %v9310_v46, 0.0  ;;  %v9373_v24 = vunpack.c.l.bf16 %v14516_v45  ;;  %v2384_v62 = vsel %vm1198_vm0, %v9338_v57, 0.0 }
 0x3a3   : > { %v5878_v15 = vrot.slane %v3145_v0, %v16032_v51  ;;  %v5794_v4 = vrot.slane %v3128_v33, %v11731_v2  ;;  %2247 = vadd.xlane.f32.xlu1 %v2246_v8  ;;  %2196 = vadd.xlane.f32.xlu0 %v2195_v55  ;;  %v9402_v0 = vunpack.c.h.bf16 %v14349_v10 }
 0x3a4   : > { %v2524_v25 = vpop.xlane.xlu1 %2523  ;;  %v2473_v38 = vpop.xlane.xlu0 %2472 }
 0x3a5   : > { %v14526_v14 = vsel %vm3891_vm9, %v5878_v15, %v14291_v27  ;;  %v14530_v5 = vsel %vm3884_vm8, %v5794_v4, %v14295_v17  ;;  %v3177_v1 = vmul.f32 0.015625, %v2524_v25  ;;  %v3160_v52 = vmul.f32 0.015625, %v2473_v38  ;;  %v14550_v38 = vld [vmem:[%s11536_s28 + $0x728] sm:$0xff]  }
 0x3a6   : > { %v2435_v27 = vsel %vm1198_vm0, %v9373_v24, 0.0  ;;  %v9437_v17 = vunpack.c.l.bf16 %v14533_v58  ;;  %v2480_v57 = vsel %vm1198_vm0, %v9402_v0, 0.0 }
 0x3a7   : > { %v6036_v8 = vrot.slane %v3177_v1, %v16032_v51  ;;  %v5952_v55 = vrot.slane %v3160_v52, %v11731_v2  ;;  %2343 = vadd.xlane.f32.xlu1 %v2342_v21  ;;  %2292 = vadd.xlane.f32.xlu0 %v2291_v39  ;;  %v9465_v1 = vunpack.c.l.bf16 %v14550_v38 }
 0x3a8   : > { %v2617_v16 = vpop.xlane.xlu1 %2616  ;;  %v2566_v46 = vpop.xlane.xlu0 %2565 }
 0x3a9   : > { %v14543_v33 = vsel %vm3891_vm9, %v6036_v8, %v14308_v13  ;;  %v14547_v15 = vsel %vm3884_vm8, %v5952_v55, %v14312_v6  ;;  %v3208_v4 = vmul.f32 0.015625, %v2617_v16  ;;  %v3191_v25 = vmul.f32 0.015625, %v2566_v46  ;;  %v14567_v46 = vld [vmem:[%s11536_s28 + $0x7a8] sm:$0xff]  }
 0x3aa   : > { %v2531_v13 = vsel %vm1198_vm0, %v9437_v17, 0.0  ;;  %v9498_v6 = vunpack.c.h.bf16 %v14366_v43 }
 0x3ab   : > { %v6189_v21 = vrot.slane %v3208_v4, %v11731_v2  ;;  %v6105_v39 = vrot.slane %v3191_v25, %v11707_v42  ;;  %2436 = vadd.xlane.f32.xlu1 %v2435_v27  ;;  %2385 = vadd.xlane.f32.xlu0 %v2384_v62  ;;  %v9562_v4 = vunpack.c.h.bf16 %v14383_v41 }
 0x3ac   : > { %v2713_v10 = vpop.xlane.xlu1 %2712  ;;  %v2662_v24 = vpop.xlane.xlu0 %2661  ;;  %v2624_v0 = vsel %vm1198_vm0, %v9498_v6, 0.0 }
 0x3ad   : > { %v14560_v52 = vsel %vm3884_vm8, %v6189_v21, %v14325_v47  ;;  %v14564_v8 = vsel %vm3877_vm7, %v6105_v39, %v14329_v11  ;;  %v3240_v55 = vmul.f32 0.015625, %v2713_v10  ;;  %v3223_v16 = vmul.f32 0.015625, %v2662_v24  ;;  %v16070_v10 = vld [vmem:[#allocation10_spill] sm:$0xff] }
 0x3ae   : > { %v2573_v47 = vsel %vm1198_vm0, %v9465_v1, 0.0  ;;  %v9529_v11 = vunpack.c.l.bf16 %v14567_v46  ;;  %v2720_v6 = vsel %vm1198_vm0, %v9562_v4, 0.0  ;;  %v9026_v1 = vunpack.c.h.bf16 %v14431_v7 }
 0x3af   : > { %v6347_v27 = vrot.slane %v3240_v55, %v11731_v2  ;;  %v6263_v62 = vrot.slane %v3223_v16, %v11707_v42  ;;  %2532 = vadd.xlane.f32.xlu1 %v2531_v13  ;;  %2481 = vadd.xlane.f32.xlu0 %v2480_v57  ;;  %v16071_v55 = vld [vmem:[#allocation20_spill] sm:$0xff] }
 0x3b0   : > { %v1486_v43 = vpop.xlane.xlu1 %1485  ;;  %v1435_v17 = vpop.xlane.xlu0 %1434 }
 0x3b1   : > { %v14577_v25 = vsel %vm3884_vm8, %v6347_v27, %v14342_v60  ;;  %v14581_v21 = vsel %vm3877_vm7, %v6263_v62, %v14346_v19  ;;  %v2831_v42 = vmul.f32 0.015625, %v1486_v43  ;;  %v2814_v39 = vmul.f32 0.015625, %v1435_v17  ;;  %v16072_v27 = vld [vmem:[#allocation9_spill] sm:$0xff] }
 0x3b2   : > { %v2669_v60 = vsel %vm1198_vm0, %v9529_v11, 0.0  ;;  %v8962_v19 = vunpack.c.h.bf16 %v14414_v18  ;;  %vm6396_vm7 = vcmask 1047559  }
 0x3b3   : > { %v4328_v24 = vrot.slane %v2831_v42, %v16070_v10  ;;  %v4244_v13 = vrot.slane %v2814_v39, %v16066_v22  ;;  %2625 = vadd.xlane.f32.xlu1 %v2624_v0  ;;  %2574 = vadd.xlane.f32.xlu0 %v2573_v47  ;;  %v14596_v0 = vld [vmem:[%s11536_s28 + $0x438] sm:$0xff]   ;;  %v16073_v47 = vld [vmem:[#allocation13_spill] sm:$0xff]  ;;  %v1916_v39 = vsel %vm1198_vm0, %v9026_v1, 0.0 }
 0x3b4   : > { %v1582_v41 = vpop.xlane.xlu1 %1581  ;;  %v1531_v57 = vpop.xlane.xlu0 %1530 }
 0x3b5   : > { %v4329_v16 = vsel %vm3933_vm15, %v4328_v24, %v16071_v55  ;;  %v14593_v62 = vsel %vm3926_vm14, %v4244_v13, %v16072_v27  ;;  %v2863_v43 = vmul.f32 0.015625, %v1582_v41  ;;  %v2846_v17 = vmul.f32 0.015625, %v1531_v57  ;;  %v16074_v27 = vld [vmem:[#allocation15_spill] sm:$0xff] }
 0x3b6   : > { %v14600_v4 = vsel %vm6384_vm1, %v4329_v16, %v16073_v47  ;;  %v1820_v24 = vsel %vm1198_vm0, %v8962_v19, 0.0  ;;  %v9122_v13 = vunpack.c.h.bf16 %v14448_v20  ;;  %v9089_v41 = vunpack.c.l.bf16 %v14596_v0 }
 0x3b7   : > { %v4486_v7 = vrot.slane %v2863_v43, %v16070_v10  ;;  %v4402_v18 = vrot.slane %v2846_v17, %v16066_v22  ;;  %2721 = vadd.xlane.f32.xlu1 %v2720_v6  ;;  %2670 = vadd.xlane.f32.xlu0 %v2669_v60  ;;  %v14615_v60 = vld [vmem:[%s11536_s28 + $0x4b8] sm:$0xff]   ;;  %v9186_v47 = vunpack.c.h.bf16 %v14465_v36 }
 0x3b8   : > { %v1675_v11 = vpop.xlane.xlu1 %1674  ;;  %v1624_v42 = vpop.xlane.xlu0 %1623  ;;  %v2009_v17 = vsel %vm1198_vm0, %v9089_v41, 0.0 }
 0x3b9   : > { %v4487_v57 = vsel %vm3933_vm15, %v4486_v7, %v14376_v61  ;;  %v14612_v55 = vsel %vm3926_vm14, %v4402_v18, %v14380_v9  ;;  %v2894_v16 = vmul.f32 0.015625, %v1675_v11  ;;  %v2877_v6 = vmul.f32 0.015625, %v1624_v42 }
 0x3ba   : > { %v14619_v1 = vsel %vm6384_vm1, %v4487_v57, %v16074_v27  ;;  %v2060_v9 = vsel %vm1198_vm0, %v9122_v13, 0.0  ;;  %v9153_v7 = vunpack.c.l.bf16 %v14615_v60 }
 0x3bb   : > { %v4639_v20 = vrot.slane %v2894_v16, %v16066_v22  ;;  %v4555_v19 = vrot.slane %v2877_v6, %v16061_v48  ;;  %1917 = vadd.xlane.f32.xlu1 %v1916_v39  ;;  %1821 = vadd.xlane.f32.xlu0 %v1820_v24  ;;  %v14636_v24 = vld [vmem:[%s11536_s28 + $0x578] sm:$0xff]   ;;  %v9214_v6 = vunpack.c.h.bf16 %v14482_v29 }
 0x3bc   : > { %v1771_v61 = vpop.xlane.xlu1 %1770  ;;  %v1720_v43 = vpop.xlane.xlu0 %1719  ;;  %v2105_v16 = vsel %vm1198_vm0, %v9153_v7, 0.0 }
 0x3bd   : > { %v14629_v18 = vsel %vm3926_vm14, %v4639_v20, %v14393_v23  ;;  %v14633_v11 = vsel %vm3919_vm13, %v4555_v19, %v14397_v32  ;;  %v2926_v42 = vmul.f32 0.015625, %v1771_v61  ;;  %v2909_v39 = vmul.f32 0.015625, %v1720_v43  ;;  %v14653_v43 = vld [vmem:[%s11536_s28 + $0x5f8] sm:$0xff]  }
 0x3be   : > { %v2156_v23 = vsel %vm1198_vm0, %v9186_v47, 0.0  ;;  %v9249_v32 = vunpack.c.l.bf16 %v14636_v24  ;;  %v2198_v7 = vsel %vm1198_vm0, %v9214_v6, 0.0 }
 0x3bf   : > { %v4797_v13 = vrot.slane %v2926_v42, %v16066_v22  ;;  %v4713_v41 = vrot.slane %v2909_v39, %v16061_v48  ;;  %2061 = vadd.xlane.f32.xlu1 %v2060_v9  ;;  %2010 = vadd.xlane.f32.xlu0 %v2009_v17  ;;  %v9278_v42 = vunpack.c.h.bf16 %v14499_v63 }
 0x3c0   : > { %v1864_v36 = vpop.xlane.xlu1 %1863  ;;  %v1813_v57 = vpop.xlane.xlu0 %1812 }
 0x3c1   : > { %v14646_v27 = vsel %vm3926_vm14, %v4797_v13, %v14407_v31  ;;  %v14650_v20 = vsel %vm3919_vm13, %v4713_v41, %v14411_v28  ;;  %v2957_v19 = vmul.f32 0.015625, %v1864_v36  ;;  %v2940_v61 = vmul.f32 0.015625, %v1813_v57  ;;  %v14670_v57 = vld [vmem:[%s11536_s28 + $0x630] sm:$0xff]  }
 0x3c2   : > { %v2249_v31 = vsel %vm1198_vm0, %v9249_v32, 0.0  ;;  %v9313_v28 = vunpack.c.l.bf16 %v14653_v43  ;;  %v2294_v6 = vsel %vm1198_vm0, %v9278_v42, 0.0 }
 0x3c3   : > { %v4950_v9 = vrot.slane %v2957_v19, %v16061_v48  ;;  %v4866_v17 = vrot.slane %v2940_v61, %v16054_v30  ;;  %2157 = vadd.xlane.f32.xlu1 %v2156_v23  ;;  %2106 = vadd.xlane.f32.xlu0 %v2105_v16  ;;  %v9341_v19 = vunpack.c.l.bf16 %v14670_v57 }
 0x3c4   : > { %v1960_v29 = vpop.xlane.xlu1 %1959  ;;  %v1909_v47 = vpop.xlane.xlu0 %1908 }
 0x3c5   : > { %v14663_v39 = vsel %vm3919_vm13, %v4950_v9, %v14424_v50  ;;  %v14667_v13 = vsel %vm3912_vm12, %v4866_v17, %v14428_v26  ;;  %v2989_v41 = vmul.f32 0.015625, %v1960_v29  ;;  %v2972_v36 = vmul.f32 0.015625, %v1909_v47  ;;  %v14687_v47 = vld [vmem:[%s11536_s28 + $0x6b0] sm:$0xff]  }
 0x3c6   : > { %v2345_v50 = vsel %vm1198_vm0, %v9313_v28, 0.0  ;;  %v9374_v26 = vunpack.c.h.bf16 %v14516_v45  ;;  %v2387_v42 = vsel %vm1198_vm0, %v9341_v19, 0.0 }
 0x3c7   : > { %v5108_v23 = vrot.slane %v2989_v41, %v16061_v48  ;;  %v5024_v16 = vrot.slane %v2972_v36, %v16054_v30  ;;  %2250 = vadd.xlane.f32.xlu1 %v2249_v31  ;;  %2199 = vadd.xlane.f32.xlu0 %v2198_v7  ;;  %v9405_v41 = vunpack.c.l.bf16 %v14687_v47 }
 0x3c8   : > { %v2053_v63 = vpop.xlane.xlu1 %2052  ;;  %v2002_v32 = vpop.xlane.xlu0 %2001 }
 0x3c9   : > { %v14680_v61 = vsel %vm3919_vm13, %v5108_v23, %v14441_v44  ;;  %v14684_v9 = vsel %vm3912_vm12, %v5024_v16, %v14445_v59  ;;  %v3020_v17 = vmul.f32 0.015625, %v2053_v63  ;;  %v3003_v29 = vmul.f32 0.015625, %v2002_v32  ;;  %v14704_v32 = vld [vmem:[%s11536_s28 + $0x770] sm:$0xff]  }
 0x3ca   : > { %v2438_v44 = vsel %vm1198_vm0, %v9374_v26, 0.0  ;;  %v9438_v59 = vunpack.c.h.bf16 %v14533_v58  ;;  %v2483_v19 = vsel %vm1198_vm0, %v9405_v41, 0.0 }
 0x3cb   : > { %v5261_v31 = vrot.slane %v3020_v17, %v16054_v30  ;;  %v5177_v7 = vrot.slane %v3003_v29, %v16047_v3  ;;  %2346 = vadd.xlane.f32.xlu1 %v2345_v50  ;;  %2295 = vadd.xlane.f32.xlu0 %v2294_v6  ;;  %v9466_v17 = vunpack.c.h.bf16 %v14550_v38 }
 0x3cc   : > { %v2149_v45 = vpop.xlane.xlu1 %2148  ;;  %v2098_v28 = vpop.xlane.xlu0 %2097 }
 0x3cd   : > { %v14697_v36 = vsel %vm3912_vm12, %v5261_v31, %v14458_v56  ;;  %v14701_v23 = vsel %vm3905_vm11, %v5177_v7, %v14462_v53  ;;  %v3052_v16 = vmul.f32 0.015625, %v2149_v45  ;;  %v3035_v63 = vmul.f32 0.015625, %v2098_v28  ;;  %v14721_v28 = vld [vmem:[%s11536_s28 + $0x7f0] sm:$0xff]  }
 0x3ce   : > { %v2534_v56 = vsel %vm1198_vm0, %v9438_v59, 0.0  ;;  %v9501_v53 = vunpack.c.l.bf16 %v14704_v32 }
 0x3cf   : > { %v5419_v50 = vrot.slane %v3052_v16, %v16054_v30  ;;  %v5335_v6 = vrot.slane %v3035_v63, %v16047_v3  ;;  %2439 = vadd.xlane.f32.xlu1 %v2438_v44  ;;  %2388 = vadd.xlane.f32.xlu0 %v2387_v42  ;;  %v9565_v16 = vunpack.c.l.bf16 %v14721_v28 }
 0x3d0   : > { %v2242_v58 = vpop.xlane.xlu1 %2241  ;;  %v2191_v26 = vpop.xlane.xlu0 %2190  ;;  %v2627_v41 = vsel %vm1198_vm0, %v9501_v53, 0.0 }
 0x3d1   : > { %v14714_v29 = vsel %vm3912_vm12, %v5419_v50, %v14475_v35  ;;  %v14718_v31 = vsel %vm3905_vm11, %v5335_v6, %v14479_v54  ;;  %v3083_v7 = vmul.f32 0.015625, %v2242_v58  ;;  %v3066_v45 = vmul.f32 0.015625, %v2191_v26 }
 0x3d2   : > { %v2576_v35 = vsel %vm1198_vm0, %v9466_v17, 0.0  ;;  %v9530_v54 = vunpack.c.h.bf16 %v14567_v46  ;;  %v2723_v46 = vsel %vm1198_vm0, %v9565_v16, 0.0  ;;  %v9154_v17 = vunpack.c.h.bf16 %v14615_v60 }
 0x3d3   : > { %v5572_v44 = vrot.slane %v3083_v7, %v16047_v3  ;;  %v5488_v42 = vrot.slane %v3066_v45, %v16040_v34  ;;  %2535 = vadd.xlane.f32.xlu1 %v2534_v56  ;;  %2484 = vadd.xlane.f32.xlu0 %v2483_v19 }
 0x3d4   : > { %v2338_v59 = vpop.xlane.xlu1 %2337  ;;  %v2287_v38 = vpop.xlane.xlu0 %2286 }
 0x3d5   : > { %v14731_v63 = vsel %vm3905_vm11, %v5572_v44, %v14492_v40  ;;  %v14735_v50 = vsel %vm3898_vm10, %v5488_v42, %v14496_v49  ;;  %v3115_v6 = vmul.f32 0.015625, %v2338_v59  ;;  %v3098_v58 = vmul.f32 0.015625, %v2287_v38  ;;  %v14752_v59 = vld [vmem:[%s11536_s28 + $0x538] sm:$0xff]  }
 0x3d6   : > { %16075 = vst [vmem:[#allocation7_spill] sm:$0xff] %v14731_v63  ;;  %v2672_v40 = vsel %vm1198_vm0, %v9530_v54, 0.0  ;;  %v9090_v49 = vunpack.c.h.bf16 %v14596_v0  ;;  %v9217_v16 = vunpack.c.l.bf16 %v14752_v59 }
 0x3d7   : > { %v5730_v26 = vrot.slane %v3115_v6, %v16047_v3  ;;  %v5646_v56 = vrot.slane %v3098_v58, %v16040_v34  ;;  %2628 = vadd.xlane.f32.xlu1 %v2627_v41  ;;  %2577 = vadd.xlane.f32.xlu0 %v2576_v35 }
 0x3d8   : > { %v2431_v19 = vpop.xlane.xlu1 %2430  ;;  %v2380_v53 = vpop.xlane.xlu0 %2379  ;;  %v2012_v35 = vsel %vm1198_vm0, %v9090_v49, 0.0 }
 0x3d9   : > { %v14745_v7 = vsel %vm3905_vm11, %v5730_v26, %v14509_v37  ;;  %v14749_v45 = vsel %vm3898_vm10, %v5646_v56, %v14513_v12  ;;  %v3146_v44 = vmul.f32 0.015625, %v2431_v19  ;;  %v3129_v42 = vmul.f32 0.015625, %v2380_v53  ;;  %v14769_v56 = vld [vmem:[%s11536_s28 + $0x5b8] sm:$0xff]  }
 0x3da   : > { %v2108_v37 = vsel %vm1198_vm0, %v9154_v17, 0.0  ;;  %v9250_v12 = vunpack.c.h.bf16 %v14636_v24  ;;  %v9281_v17 = vunpack.c.l.bf16 %v14769_v56 }
 0x3db   : > { %v5883_v38 = vrot.slane %v3146_v44, %v16040_v34  ;;  %v5799_v41 = vrot.slane %v3129_v42, %v16032_v51  ;;  %2724 = vadd.xlane.f32.xlu1 %v2723_v46  ;;  %2673 = vadd.xlane.f32.xlu0 %v2672_v40  ;;  %v2201_v40 = vsel %vm1198_vm0, %v9217_v16, 0.0 }
 0x3dc   : > { %v2527_v0 = vpop.xlane.xlu1 %2526  ;;  %v2476_v60 = vpop.xlane.xlu0 %2475 }
 0x3dd   : > { %v14762_v54 = vsel %vm3898_vm10, %v5883_v38, %v14526_v14  ;;  %v14766_v6 = vsel %vm3891_vm9, %v5799_v41, %v14530_v5  ;;  %v3178_v58 = vmul.f32 0.015625, %v2527_v0  ;;  %v3161_v26 = vmul.f32 0.015625, %v2476_v60  ;;  %v14786_v41 = vld [vmem:[%s11536_s28 + $0x678] sm:$0xff]  }
 0x3de   : > { %v2252_v14 = vsel %vm1198_vm0, %v9250_v12, 0.0  ;;  %v9314_v5 = vunpack.c.h.bf16 %v14653_v43  ;;  %v9342_v12 = vunpack.c.h.bf16 %v14670_v57 }
 0x3df   : > { %v6041_v19 = vrot.slane %v3178_v58, %v16040_v34  ;;  %v5957_v53 = vrot.slane %v3161_v26, %v16032_v51  ;;  %2109 = vadd.xlane.f32.xlu1 %v2108_v37  ;;  %2013 = vadd.xlane.f32.xlu0 %v2012_v35  ;;  %v2297_v35 = vsel %vm1198_vm0, %v9281_v17, 0.0 }
 0x3e0   : > { %v2620_v24 = vpop.xlane.xlu1 %2619  ;;  %v2569_v46 = vpop.xlane.xlu0 %2568 }
 0x3e1   : > { %v14779_v49 = vsel %vm3898_vm10, %v6041_v19, %v14543_v33  ;;  %v14783_v44 = vsel %vm3891_vm9, %v5957_v53, %v14547_v15  ;;  %v3209_v42 = vmul.f32 0.015625, %v2620_v24  ;;  %v3192_v38 = vmul.f32 0.015625, %v2569_v46  ;;  %v14803_v53 = vld [vmem:[%s11536_s28 + $0x6f8] sm:$0xff]  }
 0x3e2   : > { %v2348_v33 = vsel %vm1198_vm0, %v9314_v5, 0.0  ;;  %v9377_v15 = vunpack.c.l.bf16 %v14786_v41  ;;  %v9406_v5 = vunpack.c.h.bf16 %v14687_v47 }
 0x3e3   : > { %v6194_v0 = vrot.slane %v3209_v42, %v16032_v51  ;;  %v6110_v60 = vrot.slane %v3192_v38, %v11731_v2  ;;  %2253 = vadd.xlane.f32.xlu1 %v2252_v14  ;;  %2202 = vadd.xlane.f32.xlu0 %v2201_v40  ;;  %v2390_v40 = vsel %vm1198_vm0, %v9342_v12, 0.0 }
 0x3e4   : > { %v2716_v43 = vpop.xlane.xlu1 %2715  ;;  %v2665_v37 = vpop.xlane.xlu0 %2664 }
 0x3e5   : > { %v14796_v16 = vsel %vm3891_vm9, %v6194_v0, %v14560_v52  ;;  %v14800_v58 = vsel %vm3884_vm8, %v6110_v60, %v14564_v8  ;;  %v3241_v26 = vmul.f32 0.015625, %v2716_v43  ;;  %v3224_v19 = vmul.f32 0.015625, %v2665_v37  ;;  %v14820_v0 = vld [vmem:[%s11536_s28 + $0x730] sm:$0xff]  }
 0x3e6   : > { %v2441_v52 = vsel %vm1198_vm0, %v9377_v15, 0.0  ;;  %v9441_v8 = vunpack.c.l.bf16 %v14803_v53 }
 0x3e7   : > { %v6352_v24 = vrot.slane %v3241_v26, %v16032_v51  ;;  %v6268_v46 = vrot.slane %v3224_v19, %v11731_v2  ;;  %2349 = vadd.xlane.f32.xlu1 %v2348_v33  ;;  %2298 = vadd.xlane.f32.xlu0 %v2297_v35  ;;  %v2486_v33 = vsel %vm1198_vm0, %v9406_v5, 0.0  ;;  %v9469_v35 = vunpack.c.l.bf16 %v14820_v0  ;;  %v14835_v19 = vld [vmem:[%s11536_s28 + $0x7b0] sm:$0xff]  }
 0x3e8   : > { %v1534_v57 = vpop.xlane.xlu1 %1533  ;;  %v1438_v14 = vpop.xlane.xlu0 %1437  ;;  %v9533_v5 = vunpack.c.l.bf16 %v14835_v19 }
 0x3e9   : > { %v14813_v17 = vsel %vm3891_vm9, %v6352_v24, %v14577_v25  ;;  %v14817_v42 = vsel %vm3884_vm8, %v6268_v46, %v14581_v21  ;;  %v2847_v2 = vmul.f32 0.015625, %v1534_v57  ;;  %v2815_v38 = vmul.f32 0.015625, %v1438_v14  ;;  %v16076_v24 = vld [vmem:[#allocation14_spill] sm:$0xff]  ;;  %v16077_v57 = vld [vmem:[#allocation12_spill] sm:$0xff] }
 0x3ea   : > { %v2537_v25 = vsel %vm1198_vm0, %v9441_v8, 0.0  ;;  %v9502_v21 = vunpack.c.h.bf16 %v14704_v32  ;;  %v9566_v8 = vunpack.c.h.bf16 %v14721_v28  ;;  %vm7687_vm8 = vcmask 521216  }
 0x3eb   : > { %v4407_v60 = vrot.slane %v2847_v2, %v16070_v10  ;;  %v4249_v43 = vrot.slane %v2815_v38, %v16070_v10  ;;  %2442 = vadd.xlane.f32.xlu1 %v2441_v52  ;;  %2391 = vadd.xlane.f32.xlu0 %v2390_v40  ;;  %v2579_v40 = vsel %vm1198_vm0, %v9469_v35, 0.0  ;;  %v14870_v35 = vld [vmem:[%s11536_s28 + $0x638] sm:$0xff]  }
 0x3ec   : > { %v1678_v47 = vpop.xlane.xlu1 %1677  ;;  %v14824_v37 = vpop.xlane.xlu0 %1626  ;;  %v2726_v28 = vsel %vm1198_vm0, %v9566_v8, 0.0 }
 0x3ed   : > { %v4408_v15 = vsel %vm3933_vm15, %v4407_v60, %v14612_v55  ;;  %v4250_v12 = vsel %vm3933_vm15, %v4249_v43, %v14593_v62  ;;  %v2895_v26 = vmul.f32 0.015625, %v1678_v47  ;;  %v2630_v62 = vsel %vm1198_vm0, %v9502_v21, 0.0 }
 0x3ee   : > { %v14839_v46 = vsel %vm6384_vm1, %v4408_v15, %v16076_v24  ;;  %v14843_v14 = vsel %vm6384_vm1, %v4250_v12, %v16077_v57  ;;  %v9218_v21 = vunpack.c.h.bf16 %v14752_v59  ;;  %v9378_v24 = vunpack.c.h.bf16 %v14786_v41  ;;  %v9785_v57 = vld [vmem:[%s11536_s28 + $0x6b8] sm:$0xff]  }
 0x3ef   : > { %v4644_v32 = vrot.slane %v2895_v26, %v16070_v10  ;;  %2538 = vadd.xlane.f32.xlu1 %v2537_v25  ;;  %2487 = vadd.xlane.f32.xlu0 %v2486_v33  ;;  %v2675_v33 = vsel %vm1198_vm0, %v9533_v5, 0.0  ;;  %v9409_v8 = vunpack.c.l.bf16 %v9785_v57  ;;  %v14893_v5 = vld [vmem:[%s11536_s28 + $0x778] sm:$0xff]  }
 0x3f0   : > { %v1774_v55 = vpop.xlane.xlu1 %1773  ;;  %v14846_v52 = vpop.xlane.xlu0 %1722  ;;  %v2204_v59 = vsel %vm1198_vm0, %v9218_v21, 0.0  ;;  %v14902_v21 = vld [vmem:[%s11536_s28 + $0x7f8] sm:$0xff]  }
 0x3f1   : > { %v4645_v2 = vsel %vm3933_vm15, %v4644_v32, %v14629_v18  ;;  %v2927_v38 = vmul.f32 0.015625, %v1774_v55  ;;  %v9282_v18 = vunpack.c.h.bf16 %v14769_v56  ;;  %v2444_v55 = vsel %vm1198_vm0, %v9378_v24, 0.0 }
 0x3f2   : > { %v14856_v60 = vsel %vm6386_vm2, %v4645_v2, %v14600_v4 }
 0x3f3   : > { %v4802_v43 = vrot.slane %v2927_v38, %v16070_v10  ;;  %2631 = vadd.xlane.f32.xlu1 %v2630_v62  ;;  %2580 = vadd.xlane.f32.xlu0 %v2579_v40  ;;  %v2300_v56 = vsel %vm1198_vm0, %v9282_v18, 0.0  ;;  %v9442_v40 = vunpack.c.h.bf16 %v14803_v53 }
 0x3f4   : > { %v14859_v47 = vpop.xlane.xlu1 %1866  ;;  %v14861_v25 = vpop.xlane.xlu0 %1815 }
 0x3f5   : > { %v4803_v4 = vsel %vm3933_vm15, %v4802_v43, %v14646_v27  ;;  %v9345_v27 = vunpack.c.l.bf16 %v14870_v35  ;;  %v2540_v38 = vsel %vm1198_vm0, %v9442_v40, 0.0  ;;  %v2489_v43 = vsel %vm1198_vm0, %v9409_v8, 0.0 }
 0x3f6   : > { %v14874_v15 = vsel %vm6386_vm2, %v4803_v4, %v14619_v1  ;;  %v9410_v8 = vunpack.c.h.bf16 %v9785_v57 }
 0x3f7   : > { %2727 = vadd.xlane.f32.xlu1 %v2726_v28  ;;  %2676 = vadd.xlane.f32.xlu0 %v2675_v33  ;;  %v2393_v62 = vsel %vm1198_vm0, %v9345_v27, 0.0  ;;  %v9505_v28 = vunpack.c.l.bf16 %v14893_v5  ;;  %v9470_v33 = vunpack.c.h.bf16 %v14820_v0  ;;  %v9569_v27 = vunpack.c.l.bf16 %v14902_v21 }
 0x3f8   : > { %v14876_v12 = vpop.xlane.xlu1 %1962  ;;  %v14878_v26 = vpop.xlane.xlu0 %1911 }
 0x3f9   : > { %v2582_v24 = vsel %vm1198_vm0, %v9470_v33, 0.0  ;;  %v9346_v33 = vunpack.c.h.bf16 %v14870_v35  ;;  %v3264_v35 = vld [vmem:[%s15989_s2 + $0x80] sm:$0xff] }
 0x3fb   : > { %2301 = vadd.xlane.f32.xlu1 %v2300_v56  ;;  %2205 = vadd.xlane.f32.xlu0 %v2204_v59  ;;  %v2633_v59 = vsel %vm1198_vm0, %v9505_v28, 0.0 }
 0x3fc   : > { %v14885_v1 = vpop.xlane.xlu1 %2055  ;;  %v14887_v32 = vpop.xlane.xlu0 %2004 }
 0x3ff   : > { %2445 = vadd.xlane.f32.xlu1 %v2444_v55  ;;  %2394 = vadd.xlane.f32.xlu0 %v2393_v62  ;;  %v9534_v55 = vunpack.c.h.bf16 %v14835_v19 }
 0x400   : > { %v14895_v41 = vpop.xlane.xlu1 %2151  ;;  %v2101_v2 = vpop.xlane.xlu0 %2100 }
 0x401   : > { %v3036_v18 = vmul.f32 0.015625, %v2101_v2  ;;  %v2678_v28 = vsel %vm1198_vm0, %v9534_v55, 0.0 }
 0x403   : > { %v5340_v53 = vrot.slane %v3036_v18, %v16054_v30  ;;  %2541 = vadd.xlane.f32.xlu1 %v2540_v38  ;;  %2490 = vadd.xlane.f32.xlu0 %v2489_v43  ;;  %v2729_v43 = vsel %vm1198_vm0, %v9569_v27, 0.0 }
 0x404   : > { %v14905_v4 = vpop.xlane.xlu1 %2244  ;;  %v2194_v56 = vpop.xlane.xlu0 %2193 }
 0x405   : > { %v14913_v0 = vsel %vm3912_vm12, %v5340_v53, %v14718_v31  ;;  %v3067_v62 = vmul.f32 0.015625, %v2194_v56  ;;  %v14924_v53 = vld [vmem:[%s11536_s28 + $0x738] sm:$0xff]  }
 0x407   : > { %v5493_v40 = vrot.slane %v3067_v62, %v16047_v3  ;;  %2634 = vadd.xlane.f32.xlu1 %v2633_v59  ;;  %2583 = vadd.xlane.f32.xlu0 %v2582_v24  ;;  %v2492_v59 = vsel %vm1198_vm0, %v9410_v8, 0.0  ;;  %v3296_v24 = vld [vmem:[%s15989_s2 + $0x180] sm:$0xff]  ;;  %v2396_v62 = vsel %vm1198_vm0, %v9346_v33, 0.0  ;;  %v9473_v8 = vunpack.c.l.bf16 %v14924_v53 }
 0x408   : > { %v2341_v2 = vpop.xlane.xlu1 %2340  ;;  %v2290_v38 = vpop.xlane.xlu0 %2289 }
 0x409   : > { %v14921_v19 = vsel %vm3905_vm11, %v5493_v40, %v14735_v50  ;;  %v3116_v31 = vmul.f32 0.015625, %v2341_v2  ;;  %v3099_v18 = vmul.f32 0.015625, %v2290_v38  ;;  %v3265_v50 = vld [vmem:[%s15989_s2 + $0x88] sm:$0xff]  ;;  %v9506_v40 = vunpack.c.h.bf16 %v14893_v5 }
 0x40a   : > { %16078 = vst [vmem:[#allocation17_spill] sm:$0xff] %v14921_v19  ;;  %v10512_v2 = vpack.c.bf16 %v3265_v50, %v3264_v35  ;;  %v3297_v38 = vld [vmem:[%s15989_s2 + $0x188] sm:$0xff]  ;;  %v14959_v35 = vld [vmem:[%s11536_s28 + $0x7b8] sm:$0xff]   ;;  %v3280_v50 = vld [vmem:[%s15989_s2 + $0x100] sm:$0xff] }
 0x40b   : > { %v5735_v56 = vrot.slane %v3116_v31, %v16054_v30  ;;  %v5651_v57 = vrot.slane %v3099_v18, %v16047_v3  ;;  %2730 = vadd.xlane.f32.xlu1 %v2729_v43  ;;  %2679 = vadd.xlane.f32.xlu0 %v2678_v28  ;;  %v3248_v43 = vld [vmem:[%s15989_s2] sm:$0xff]  ;;  %v3249_v28 = vld [vmem:[%s15989_s2 + $0x8] sm:$0xff]  ;;  %v10544_v63 = vpack.c.bf16 %v3297_v38, %v3296_v24  ;;  %v2636_v38 = vsel %vm1198_vm0, %v9506_v40, 0.0 }
 0x40c   : > { %v2434_v27 = vpop.xlane.xlu1 %2433  ;;  %v2383_v55 = vpop.xlane.xlu0 %2382  ;;  %v3281_v19 = vld [vmem:[%s15989_s2 + $0x108] sm:$0xff]  ;;  %10513 = vmatprep.subr.bf16.mxu0 %v10512_v2 }
 0x40d   : > { %v14952_v33 = vsel %vm3912_vm12, %v5735_v56, %v14745_v7  ;;  %v14956_v5 = vsel %vm3905_vm11, %v5651_v57, %v14749_v45  ;;  %v3147_v31 = vmul.f32 0.015625, %v2434_v27  ;;  %v3130_v18 = vmul.f32 0.015625, %v2383_v55  ;;  %v3266_v27 = vld [vmem:[%s15989_s2 + $0x90] sm:$0xff]  ;;  %v3267_v55 = vld [vmem:[%s15989_s2 + $0x98] sm:$0xff]  ;;  %10545 = vmatprep.subr.bf16.mxu1 %v10544_v63 }
 0x40e   : > { %16079 = vst [vmem:[#allocation5_spill] sm:$0xff] %v14952_v33  ;;  %v10514_v7 = vpack.c.bf16 %v3249_v28, %v3248_v43  ;;  %v10546_v56 = vpack.c.bf16 %v3281_v19, %v3280_v50  ;;  %v9570_v57 = vunpack.c.h.bf16 %v14902_v21  ;;  %v3298_v19 = vld [vmem:[%s15989_s2 + $0x190] sm:$0xff]  ;;  %v9537_v21 = vunpack.c.l.bf16 %v14959_v35  ;;  %v3299_v43 = vld [vmem:[%s15989_s2 + $0x198] sm:$0xff] }
 0x40f   : > { %v5888_v33 = vrot.slane %v3147_v31, %v16047_v3  ;;  %v5804_v45 = vrot.slane %v3130_v18, %v16040_v34  ;;  %2493 = vadd.xlane.f32.xlu1 %v2492_v59  ;;  %2397 = vadd.xlane.f32.xlu0 %v2396_v62  ;;  %v2585_v59 = vsel %vm1198_vm0, %v9473_v8, 0.0  ;;  %v10516_v62 = vpack.c.bf16 %v3267_v55, %v3266_v27  ;;  %v3250_v28 = vld [vmem:[%s15989_s2 + $0x10] sm:$0xff]  ;;  %v3251_v31 = vld [vmem:[%s15989_s2 + $0x18] sm:$0xff] }
 0x410   : > { %v2530_v24 = vpop.xlane.xlu1 %2529  ;;  %v2479_v2 = vpop.xlane.xlu0 %2478  ;;  %10515 = vmatpush3.bf16.msra.mxu0 %v10514_v7  ;;  %10547 = vmatpush3.bf16.msra.mxu1 %v10546_v56  ;;  %v3282_v50 = vld [vmem:[%s15989_s2 + $0x110] sm:$0xff]  ;;  %v3283_v7 = vld [vmem:[%s15989_s2 + $0x118] sm:$0xff]  ;;  %v10548_v27 = vpack.c.bf16 %v3299_v43, %v3298_v19  ;;  %v10518_v55 = vpack.c.bf16 %v3251_v31, %v3250_v28  ;;  %v2732_v56 = vsel %vm1198_vm0, %v9570_v57, 0.0  ;;  %v3269_v19 = vld [vmem:[%s15989_s2 + $0xa8] sm:$0xff]  ;;  %v2681_v57 = vsel %vm1198_vm0, %v9537_v21, 0.0 }
 0x411   : > { %v14993_v40 = vsel %vm3905_vm11, %v5888_v33, %v14762_v54  ;;  %v14997_v63 = vsel %vm3898_vm10, %v5804_v45, %v14766_v6  ;;  %v3179_v8 = vmul.f32 0.015625, %v2530_v24  ;;  %v3162_v18 = vmul.f32 0.015625, %v2479_v2  ;;  %10517 = vmatprep.subr.bf16.mxu0 %v10516_v62  ;;  %v3268_v24 = vld [vmem:[%s15989_s2 + $0xa0] sm:$0xff]  ;;  %v3301_v28 = vld [vmem:[%s15989_s2 + $0x1a8] sm:$0xff] }
 0x412   : > { %v10550_v54 = vpack.c.bf16 %v3283_v7, %v3282_v50  ;;  %v9538_v45 = vunpack.c.h.bf16 %v14959_v35  ;;  %v3300_v2 = vld [vmem:[%s15989_s2 + $0x1a0] sm:$0xff]  ;;  %v15019_v62 = vmul.f32 0.015625, %v14824_v37  ;;  %v9474_v35 = vunpack.c.h.bf16 %v14924_v53  ;;  %10549 = vmatprep.subr.bf16.mxu1 %v10548_v27  ;;  %v3253_v37 = vld [vmem:[%s15989_s2 + $0x28] sm:$0xff] }
 0x413   : > { %v6046_v33 = vrot.slane %v3179_v8, %v16047_v3  ;;  %v5962_v6 = vrot.slane %v3162_v18, %v16040_v34  ;;  %2637 = vadd.xlane.f32.xlu1 %v2636_v38  ;;  %2586 = vadd.xlane.f32.xlu0 %v2585_v59  ;;  %v10520_v43 = vpack.c.bf16 %v3269_v19, %v3268_v24  ;;  %v3252_v31 = vld [vmem:[%s15989_s2 + $0x20] sm:$0xff]  ;;  %v3285_v7 = vld [vmem:[%s15989_s2 + $0x128] sm:$0xff]  ;;  %v15047_v27 = vmul.f32 0.015625, %v14846_v52  ;;  %v3270_v24 = vld [vmem:[%s15989_s2 + $0xb0] sm:$0xff] }
 0x414   : > { %v2623_v38 = vpop.xlane.xlu1 %2622  ;;  %v2572_v59 = vpop.xlane.xlu0 %2571  ;;  %10519 = vmatpush3.bf16.msra.mxu0 %v10518_v55  ;;  %10551 = vmatpush3.bf16.msra.mxu1 %v10550_v54  ;;  %v3284_v50 = vld [vmem:[%s15989_s2 + $0x120] sm:$0xff]  ;;  %v10522_v55 = vpack.c.bf16 %v3253_v37, %v3252_v31  ;;  %v2684_v54 = vsel %vm1198_vm0, %v9538_v45, 0.0  ;;  %v3271_v52 = vld [vmem:[%s15989_s2 + $0xb8] sm:$0xff]  ;;  %v3302_v19 = vld [vmem:[%s15989_s2 + $0x1b0] sm:$0xff]  ;;  %v2588_v45 = vsel %vm1198_vm0, %v9474_v35, 0.0 }
 0x415   : > { %v15034_v21 = vsel %vm3905_vm11, %v6046_v33, %v14779_v49  ;;  %v15038_v53 = vsel %vm3898_vm10, %v5962_v6, %v14783_v44  ;;  %v3210_v8 = vmul.f32 0.015625, %v2623_v38  ;;  %v3193_v18 = vmul.f32 0.015625, %v2572_v59  ;;  %10521 = vmatprep.subr.bf16.mxu0 %v10520_v43  ;;  %v3303_v43 = vld [vmem:[%s15989_s2 + $0x1b8] sm:$0xff] }
 0x416   : > { %v10552_v49 = vpack.c.bf16 %v3301_v28, %v3300_v2  ;;  %v10554_v33 = vpack.c.bf16 %v3285_v7, %v3284_v50  ;;  %v4560_v2 = vrot.slane %v15019_v62, %v16066_v22  ;;  %v3254_v28 = vld [vmem:[%s15989_s2 + $0x30] sm:$0xff]  ;;  %v3255_v62 = vld [vmem:[%s15989_s2 + $0x38] sm:$0xff]  ;;  %v4718_v50 = vrot.slane %v15047_v27, %v16066_v22  ;;  %v3273_v27 = vld [vmem:[%s15989_s2 + $0xc8] sm:$0xff] }
 0x417   : > { %v6199_v44 = vrot.slane %v3210_v8, %v16040_v34  ;;  %v6115_v6 = vrot.slane %v3193_v18, %v16032_v51  ;;  %2733 = vadd.xlane.f32.xlu1 %v2732_v56  ;;  %2682 = vadd.xlane.f32.xlu0 %v2681_v57  ;;  %v2958_v56 = vmul.f32 0.015625, %v14859_v47  ;;  %v10524_v57 = vpack.c.bf16 %v3271_v52, %v3270_v24  ;;  %v3286_v8 = vld [vmem:[%s15989_s2 + $0x130] sm:$0xff]  ;;  %v3287_v18 = vld [vmem:[%s15989_s2 + $0x138] sm:$0xff] }
 0x418   : > { %v2719_v38 = vpop.xlane.xlu1 %2718  ;;  %v2668_v59 = vpop.xlane.xlu0 %2667  ;;  %10553 = vmatprep.subr.bf16.mxu1 %v10552_v49  ;;  %10523 = vmatpush3.bf16.msra.mxu0 %v10522_v55  ;;  %v10526_v7 = vpack.c.bf16 %v3255_v62, %v3254_v28  ;;  %v10558_v49 = vpack.c.bf16 %v3287_v18, %v3286_v8  ;;  %v4719_v28 = vsel %vm3926_vm14, %v4718_v50, %v14650_v20  ;;  %v3275_v20 = vld [vmem:[%s15989_s2 + $0xd8] sm:$0xff]  ;;  %v3306_v50 = vld [vmem:[%s15989_s2 + $0x1d0] sm:$0xff] }
 0x419   : > { %v15076_v47 = vsel %vm3898_vm10, %v6199_v44, %v14796_v16  ;;  %v15080_v35 = vsel %vm3891_vm9, %v6115_v6, %v14800_v58  ;;  %v3242_v31 = vmul.f32 0.015625, %v2719_v38  ;;  %v3225_v37 = vmul.f32 0.015625, %v2668_v59  ;;  %10555 = vmatpush3.bf16.msra.mxu1 %v10554_v33  ;;  %10525 = vmatprep.subr.bf16.mxu0 %v10524_v57  ;;  %v3272_v44 = vld [vmem:[%s15989_s2 + $0xc0] sm:$0xff]  ;;  %v3305_v38 = vld [vmem:[%s15989_s2 + $0x1c8] sm:$0xff] }
 0x41a   : > { %v10556_v16 = vpack.c.bf16 %v3303_v43, %v3302_v19  ;;  %v15091_v58 = vmul.f32 0.015625, %v14861_v25  ;;  %v3304_v6 = vld [vmem:[%s15989_s2 + $0x1c0] sm:$0xff]  ;;  %v4561_v25 = vsel %vm3926_vm14, %v4560_v2, %v14633_v11  ;;  %v4955_v24 = vrot.slane %v2958_v56, %v16066_v22  ;;  %v3257_v11 = vld [vmem:[%s15989_s2 + $0x48] sm:$0xff] }
 0x41b   : > { %v6357_v55 = vrot.slane %v3242_v31, %v16040_v34  ;;  %v6273_v33 = vrot.slane %v3225_v37, %v16032_v51  ;;  %2685 = vadd.xlane.f32.xlu1 %v2684_v54  ;;  %2589 = vadd.xlane.f32.xlu0 %v2588_v45  ;;  %v15108_v51 = vmul.f32 0.015625, %v14876_v12  ;;  %v10528_v19 = vpack.c.bf16 %v3273_v27, %v3272_v44  ;;  %v3256_v59 = vld [vmem:[%s15989_s2 + $0x40] sm:$0xff]  ;;  %v3289_v43 = vld [vmem:[%s15989_s2 + $0x148] sm:$0xff]  ;;  %v3258_v44 = vld [vmem:[%s15989_s2 + $0x50] sm:$0xff] }
 0x41c   : > { %v1726_v54 = vpop.xlane.xlu1 %1725  ;;  %v1630_v52 = vpop.xlane.xlu0 %1629  ;;  %10557 = vmatprep.subr.bf16.mxu1 %v10556_v16  ;;  %10527 = vmatpush3.bf16.msra.mxu0 %v10526_v7  ;;  %v3288_v57 = vld [vmem:[%s15989_s2 + $0x140] sm:$0xff]  ;;  %v10530_v62 = vpack.c.bf16 %v3257_v11, %v3256_v59  ;;  %v2973_v37 = vmul.f32 0.015625, %v14878_v26  ;;  %v3274_v16 = vld [vmem:[%s15989_s2 + $0xd0] sm:$0xff]  ;;  %v4956_v7 = vsel %vm3926_vm14, %v4955_v24, %v14663_v39  ;;  %v3259_v39 = vld [vmem:[%s15989_s2 + $0x58] sm:$0xff] }
 0x41d   : > { %v15121_v12 = vsel %vm3898_vm10, %v6357_v55, %v14813_v17  ;;  %v15125_v2 = vsel %vm3891_vm9, %v6273_v33, %v14817_v42  ;;  %v2911_v56 = vmul.f32 0.015625, %v1726_v54  ;;  %v2879_v45 = vmul.f32 0.015625, %v1630_v52  ;;  %10559 = vmatpush3.bf16.msra.mxu1 %v10558_v49  ;;  %10529 = vmatprep.subr.bf16.mxu0 %v10528_v19  ;;  %v3307_v33 = vld [vmem:[%s15989_s2 + $0x1d8] sm:$0xff]  ;;  %v3290_v54 = vld [vmem:[%s15989_s2 + $0x150] sm:$0xff] }
 0x41e   : > { %v10560_v17 = vpack.c.bf16 %v3305_v38, %v3304_v6  ;;  %v10562_v31 = vpack.c.bf16 %v3289_v43, %v3288_v57  ;;  %v4871_v42 = vrot.slane %v15091_v58, %v16061_v48  ;;  %v5113_v26 = vrot.slane %v15108_v51, %v16066_v22  ;;  %v3291_v52 = vld [vmem:[%s15989_s2 + $0x158] sm:$0xff]  ;;  %v3276_v43 = vld [vmem:[%s15989_s2 + $0xe0] sm:$0xff] }
 0x41f   : > { %v4723_v8 = vrot.slane %v2911_v56, %v16070_v10  ;;  %v4565_v18 = vrot.slane %v2879_v45, %v16070_v10  ;;  %v10532_v55 = vpack.c.bf16 %v3275_v20, %v3274_v16  ;;  %v10534_v59 = vpack.c.bf16 %v3259_v39, %v3258_v44  ;;  %v3260_v16 = vld [vmem:[%s15989_s2 + $0x60] sm:$0xff] }
 0x420   : > { %v1870_v49 = vpop.xlane.xlu1 %1869  ;;  %v1819_v58 = vpop.xlane.xlu0 %1818  ;;  %10561 = vmatprep.subr.bf16.mxu1 %v10560_v17  ;;  %10531 = vmatpush3.bf16.msra.mxu0 %v10530_v62  ;;  %v5029_v11 = vrot.slane %v2973_v37, %v16061_v48  ;;  %v10566_v57 = vpack.c.bf16 %v3291_v52, %v3290_v54  ;;  %v3021_v17 = vmul.f32 0.015625, %v14885_v1  ;;  %v3004_v62 = vmul.f32 0.015625, %v14887_v32 }
 0x421   : > { %v4724_v27 = vsel %vm3933_vm15, %v4723_v8, %v4719_v28  ;;  %v4566_v6 = vsel %vm3933_vm15, %v4565_v18, %v4561_v25  ;;  %v2959_v24 = vmul.f32 0.015625, %v1870_v49  ;;  %v2942_v51 = vmul.f32 0.015625, %v1819_v58  ;;  %10563 = vmatpush3.bf16.msra.mxu1 %v10562_v31  ;;  %10533 = vmatprep.subr.bf16.mxu0 %v10532_v55  ;;  %v3309_v18 = vld [vmem:[%s15989_s2 + $0x1e8] sm:$0xff] }
 0x422   : > { %v15172_v19 = vsel %vm6386_vm2, %v4724_v27, %v14839_v46  ;;  %v15176_v38 = vsel %vm6386_vm2, %v4566_v6, %v14843_v14  ;;  %v10564_v25 = vpack.c.bf16 %v3307_v33, %v3306_v50  ;;  %v3277_v46 = vld [vmem:[%s15989_s2 + $0xe8] sm:$0xff]  ;;  %v3308_v14 = vld [vmem:[%s15989_s2 + $0x1e0] sm:$0xff]  ;;  %v4872_v28 = vsel %vm3919_vm13, %v4871_v42, %v14667_v13 }
 0x423   : > { %v4960_v56 = vrot.slane %v2959_v24, %v16070_v10  ;;  %v4876_v45 = vrot.slane %v2942_v51, %v16066_v22  ;;  %v10536_v8 = vpack.c.bf16 %v3277_v46, %v3276_v43  ;;  %v3261_v13 = vld [vmem:[%s15989_s2 + $0x68] sm:$0xff]  ;;  %v3292_v50 = vld [vmem:[%s15989_s2 + $0x160] sm:$0xff]  ;;  %v5114_v58 = vsel %vm3926_vm14, %v5113_v26, %v14680_v61  ;;  %v3278_v24 = vld [vmem:[%s15989_s2 + $0xf0] sm:$0xff] }
 0x424   : > { %v1966_v31 = vpop.xlane.xlu1 %1965  ;;  %v1915_v37 = vpop.xlane.xlu0 %1914  ;;  %10565 = vmatprep.subr.bf16.mxu1 %v10564_v25  ;;  %10535 = vmatpush3.bf16.msra.mxu0 %v10534_v59  ;;  %v3293_v49 = vld [vmem:[%s15989_s2 + $0x168] sm:$0xff]  ;;  %v10568_v55 = vpack.c.bf16 %v3309_v18, %v3308_v14  ;;  %v5030_v44 = vsel %vm3919_vm13, %v5029_v11, %v14684_v9  ;;  %v3279_v61 = vld [vmem:[%s15989_s2 + $0xf8] sm:$0xff]  ;;  %v5266_v26 = vrot.slane %v3021_v17, %v16061_v48  ;;  %v3053_v51 = vmul.f32 0.015625, %v14895_v41  ;;  %v3262_v11 = vld [vmem:[%s15989_s2 + $0x70] sm:$0xff] }
 0x425   : > { %v4961_v1 = vsel %vm3933_vm15, %v4960_v56, %v4956_v7  ;;  %v15205_v32 = vsel %vm3926_vm14, %v4876_v45, %v4872_v28  ;;  %v2991_v42 = vmul.f32 0.015625, %v1966_v31  ;;  %v2974_v20 = vmul.f32 0.015625, %v1915_v37  ;;  %10567 = vmatpush3.bf16.msra.mxu1 %v10566_v57  ;;  %10537 = vmatprep.subr.bf16.mxu0 %v10536_v8  ;;  %v3311_v59 = vld [vmem:[%s15989_s2 + $0x1f8] sm:$0xff]  ;;  %v3294_v46 = vld [vmem:[%s15989_s2 + $0x170] sm:$0xff] }
 0x426   : > { %v10538_v7 = vpack.c.bf16 %v3261_v13, %v3260_v16  ;;  %v15217_v33 = vsel %vm6388_vm3, %v4961_v1, %v14856_v60  ;;  %v10570_v6 = vpack.c.bf16 %v3293_v49, %v3292_v50  ;;  %v3310_v60 = vld [vmem:[%s15989_s2 + $0x1f0] sm:$0xff]  ;;  %v5182_v9 = vrot.slane %v3004_v62, %v16054_v30  ;;  %10569 = vmatprep.subr.bf16.mxu1 %v10568_v55  ;;  %v3263_v56 = vld [vmem:[%s15989_s2 + $0x78] sm:$0xff] }
 0x427   : > { %v5118_v39 = vrot.slane %v2991_v42, %v16070_v10  ;;  %v5034_v27 = vrot.slane %v2974_v20, %v16066_v22  ;;  %v10540_v25 = vpack.c.bf16 %v3279_v61, %v3278_v24  ;;  %v3295_v14 = vld [vmem:[%s15989_s2 + $0x178] sm:$0xff]  ;;  %v10572_v28 = vpack.c.bf16 %v3311_v59, %v3310_v60  ;;  %v16081_v59 = vld [vmem:[#allocation17_spill] sm:$0xff] }
 0x428   : > { %v2059_v54 = vpop.xlane.xlu1 %2058  ;;  %v2008_v52 = vpop.xlane.xlu0 %2007  ;;  %10539 = vmatpush3.bf16.msra.mxu0 %v10538_v7  ;;  %v10542_v17 = vpack.c.bf16 %v3263_v56, %v3262_v11  ;;  %v10574_v62 = vpack.c.bf16 %v3295_v14, %v3294_v46  ;;  %v5267_v18 = vsel %vm3919_vm13, %v5266_v26, %v14697_v36  ;;  %v5183_v16 = vsel %vm3912_vm12, %v5182_v9, %v14701_v23  ;;  %v11135_v36 = vld [vmem:[%s11536_s28 + $0x40] sm:$0xff]   ;;  %v16082_v14 = vld [vmem:[#allocation5_spill] sm:$0xff] }
 0x429   : > { %v5119_v45 = vsel %vm3933_vm15, %v5118_v39, %v5114_v58  ;;  %v15246_v41 = vsel %vm3926_vm14, %v5034_v27, %v5030_v44  ;;  %v3022_v57 = vmul.f32 0.015625, %v2059_v54  ;;  %v3005_v43 = vmul.f32 0.015625, %v2008_v52  ;;  %10571 = vmatpush3.bf16.msra.mxu1 %v10570_v6  ;;  %10541 = vmatprep.subr.bf16.mxu0 %v10540_v25  ;;  %v11136_v23 = vld [vmem:[%s11536_s28 + $0xc0] sm:$0xff]  }
 0x42a   : > { %v15256_v31 = vsel %vm6388_vm3, %v5119_v45, %v14874_v15  ;;  %v5424_v13 = vrot.slane %v3053_v51, %v16061_v48  ;;  %v3084_v1 = vmul.f32 0.015625, %v14905_v4  ;;  %10573 = vmatprep.subr.bf16.mxu1 %v10572_v28  ;;  %v16080_v51 = vld [vmem:[#allocation7_spill] sm:$0xff]  ;;  %vm11456_vm9 = vmmov 0  }
 0x42b   : > { %v5271_v37 = vrot.slane %v3022_v57, %v16066_v22  ;;  %v5187_v8 = vrot.slane %v3005_v43, %v16061_v48 }
 0x42c   : > { %v2155_v42 = vpop.xlane.xlu1 %2154  ;;  %v2104_v20 = vpop.xlane.xlu0 %2103  ;;  %10543 = vmatpush3.bf16.msra.mxu0 %v10542_v17  ;;  %v5425_v7 = vsel %vm3919_vm13, %v5424_v13, %v14714_v29  ;;  %v5577_v44 = vrot.slane %v3084_v1, %v16054_v30 }
 0x42d   : > { %v15267_v15 = vsel %vm3926_vm14, %v5271_v37, %v5267_v18  ;;  %v15270_v50 = vsel %vm3919_vm13, %v5187_v8, %v5183_v16  ;;  %v3054_v49 = vmul.f32 0.015625, %v2155_v42  ;;  %v3037_v58 = vmul.f32 0.015625, %v2104_v20  ;;  %10575 = vmatpush3.bf16.msra.mxu1 %v10574_v62  ;;  %10577 = vmatprep.subr.bf16.mxu0 %v11135_v36 }
 0x42e   : > { %10609 = vmatprep.subr.bf16.mxu1 %v11136_v23  ;;  %v5578_v29 = vsel %vm3912_vm12, %v5577_v44, %v16080_v51 }
 0x42f   : > { %v5429_v55 = vrot.slane %v3054_v49, %v16066_v22  ;;  %v5345_v4 = vrot.slane %v3037_v58, %v16061_v48 }
 0x430   : > { %v2248_v39 = vpop.xlane.xlu1 %2247  ;;  %v2197_v27 = vpop.xlane.xlu0 %2196 }
 0x431   : > { %v15280_v6 = vsel %vm3926_vm14, %v5429_v55, %v5425_v7  ;;  %v15284_v24 = vsel %vm3919_vm13, %v5345_v4, %v14913_v0  ;;  %v3085_v61 = vmul.f32 0.015625, %v2248_v39  ;;  %v3068_v60 = vmul.f32 0.015625, %v2197_v27 }
 0x433   : > { %v5582_v26 = vrot.slane %v3085_v61, %v16061_v48  ;;  %v5498_v9 = vrot.slane %v3068_v60, %v16054_v30 }
 0x434   : > { %v2344_v54 = vpop.xlane.xlu1 %2343  ;;  %v2293_v52 = vpop.xlane.xlu0 %2292 }
 0x435   : > { %v15291_v25 = vsel %vm3919_vm13, %v5582_v26, %v5578_v29  ;;  %v15295_v11 = vsel %vm3912_vm12, %v5498_v9, %v16081_v59  ;;  %v3117_v0 = vmul.f32 0.015625, %v2344_v54  ;;  %v3100_v56 = vmul.f32 0.015625, %v2293_v52 }
 0x437   : > { %v5740_v45 = vrot.slane %v3117_v0, %v16061_v48  ;;  %v5656_v57 = vrot.slane %v3100_v56, %v16054_v30 }
 0x438   : > { %v2437_v43 = vpop.xlane.xlu1 %2436  ;;  %v2386_v46 = vpop.xlane.xlu0 %2385 }
 0x439   : > { %v15301_v28 = vsel %vm3919_vm13, %v5740_v45, %v16082_v14  ;;  %v15305_v17 = vsel %vm3912_vm12, %v5656_v57, %v14956_v5  ;;  %v3148_v62 = vmul.f32 0.015625, %v2437_v43  ;;  %v3131_v37 = vmul.f32 0.015625, %v2386_v46 }
 0x43b   : > { %v5893_v8 = vrot.slane %v3148_v62, %v16054_v30  ;;  %v5809_v18 = vrot.slane %v3131_v37, %v16047_v3 }
 0x43c   : > { %v2533_v16 = vpop.xlane.xlu1 %2532  ;;  %v2482_v13 = vpop.xlane.xlu0 %2481 }
 0x43d   : > { %v15311_v1 = vsel %vm3912_vm12, %v5893_v8, %v14993_v40  ;;  %v15315_v42 = vsel %vm3905_vm11, %v5809_v18, %v14997_v63  ;;  %v3180_v20 = vmul.f32 0.015625, %v2533_v16  ;;  %v3163_v49 = vmul.f32 0.015625, %v2482_v13 }
 0x43f   : > { %v6051_v5 = vrot.slane %v3180_v20, %v16054_v30  ;;  %v5967_v58 = vrot.slane %v3163_v49, %v16047_v3 }
 0x440   : > { %v2626_v36 = vpop.xlane.xlu1 %2625  ;;  %v2575_v23 = vpop.xlane.xlu0 %2574 }
 0x441   : > { %v15321_v55 = vsel %vm3912_vm12, %v6051_v5, %v15034_v21  ;;  %v15325_v40 = vsel %vm3905_vm11, %v5967_v58, %v15038_v53  ;;  %v3211_v4 = vmul.f32 0.015625, %v2626_v36  ;;  %v3194_v7 = vmul.f32 0.015625, %v2575_v23 }
 0x443   : > { %v6204_v63 = vrot.slane %v3211_v4, %v16047_v3  ;;  %v6120_v44 = vrot.slane %v3194_v7, %v16040_v34 }
 0x444   : > { %v2722_v39 = vpop.xlane.xlu1 %2721  ;;  %v2671_v27 = vpop.xlane.xlu0 %2670 }
 0x445   : > { %v15331_v61 = vsel %vm3905_vm11, %v6204_v63, %v15076_v47  ;;  %v15335_v21 = vsel %vm3898_vm10, %v6120_v44, %v15080_v35  ;;  %v3243_v60 = vmul.f32 0.015625, %v2722_v39  ;;  %v3226_v26 = vmul.f32 0.015625, %v2671_v27 }
 0x447   : > { %v6362_v53 = vrot.slane %v3243_v60, %v16047_v3  ;;  %v6278_v9 = vrot.slane %v3226_v26, %v16040_v34 }
 0x448   : > { %v1918_v51 = vpop.xlane.xlu1 %1917  ;;  %v1822_v29 = vpop.xlane.xlu0 %1821 }
 0x449   : > { %v15341_v54 = vsel %vm3905_vm11, %v6362_v53, %v15121_v12  ;;  %v15345_v47 = vsel %vm3898_vm10, %v6278_v9, %v15125_v2  ;;  %v2975_v52 = vmul.f32 0.015625, %v1918_v51  ;;  %v2943_v59 = vmul.f32 0.015625, %v1822_v29 }
 0x44a   : > { %vm8432_vm10 = vcmask 146432  }
 0x44b   : > { %v5039_v35 = vrot.slane %v2975_v52, %v16070_v10  ;;  %v4881_v0 = vrot.slane %v2943_v59, %v16070_v10 }
 0x44c   : > { %v2062_v56 = vpop.xlane.xlu1 %2061  ;;  %v2011_v45 = vpop.xlane.xlu0 %2010 }
 0x44d   : > { %v5040_v34 = vsel %vm3933_vm15, %v5039_v35, %v15246_v41  ;;  %v4882_v57 = vsel %vm3933_vm15, %v4881_v0, %v15205_v32  ;;  %v3023_v12 = vmul.f32 0.015625, %v2062_v56  ;;  %v3006_v43 = vmul.f32 0.015625, %v2011_v45 }
 0x44e   : > { %v15355_v2 = vsel %vm6388_vm3, %v5040_v34, %v15172_v19  ;;  %v15359_v46 = vsel %vm6388_vm3, %v4882_v57, %v15176_v38 }
 0x44f   : > { %v5276_v14 = vrot.slane %v3023_v12, %v16070_v10  ;;  %v5192_v62 = vrot.slane %v3006_v43, %v16066_v22 }
 0x450   : > { %v2158_v37 = vpop.xlane.xlu1 %2157  ;;  %v2107_v41 = vpop.xlane.xlu0 %2106 }
 0x451   : > { %v5277_v32 = vsel %vm3933_vm15, %v5276_v14, %v15267_v15  ;;  %v5193_v8 = vsel %vm3926_vm14, %v5192_v62, %v15270_v50  ;;  %v3055_v18 = vmul.f32 0.015625, %v2158_v37  ;;  %v3038_v19 = vmul.f32 0.015625, %v2107_v41 }
 0x452   : > { %v15369_v16 = vsel %vm6390_vm4, %v5277_v32, %v15217_v33 }
 0x453   : > { %v5434_v38 = vrot.slane %v3055_v18, %v16070_v10  ;;  %v5350_v13 = vrot.slane %v3038_v19, %v16066_v22 }
 0x454   : > { %v2251_v20 = vpop.xlane.xlu1 %2250  ;;  %v2200_v49 = vpop.xlane.xlu0 %2199 }
 0x455   : > { %v5435_v5 = vsel %vm3933_vm15, %v5434_v38, %v15280_v6  ;;  %v5351_v15 = vsel %vm3926_vm14, %v5350_v13, %v15284_v24  ;;  %v3086_v58 = vmul.f32 0.015625, %v2251_v20  ;;  %v3069_v50 = vmul.f32 0.015625, %v2200_v49 }
 0x456   : > { %v6415_v36 = vsel %vm6390_vm4, %v5435_v5, %v15256_v31 }
 0x457   : > { %v5587_v33 = vrot.slane %v3086_v58, %v16066_v22  ;;  %v5503_v23 = vrot.slane %v3069_v50, %v16061_v48 }
 0x458   : > { %v2347_v4 = vpop.xlane.xlu1 %2346  ;;  %v2296_v7 = vpop.xlane.xlu0 %2295 }
 0x459   : > { %v5588_v63 = vsel %vm3926_vm14, %v5587_v33, %v15291_v25  ;;  %v15385_v6 = vsel %vm3919_vm13, %v5503_v23, %v15295_v11  ;;  %v3118_v44 = vmul.f32 0.015625, %v2347_v4  ;;  %v3101_v24 = vmul.f32 0.015625, %v2296_v7 }
 0x45b   : > { %v5745_v39 = vrot.slane %v3118_v44, %v16066_v22  ;;  %v5661_v27 = vrot.slane %v3101_v24, %v16061_v48 }
 0x45c   : > { %v2440_v31 = vpop.xlane.xlu1 %2439  ;;  %v2389_v60 = vpop.xlane.xlu0 %2388 }
 0x45d   : > { %v5746_v26 = vsel %vm3926_vm14, %v5745_v39, %v15301_v28  ;;  %v15393_v53 = vsel %vm3919_vm13, %v5661_v27, %v15305_v17  ;;  %v3149_v25 = vmul.f32 0.015625, %v2440_v31  ;;  %v3132_v9 = vmul.f32 0.015625, %v2389_v60 }
 0x45f   : > { %v5898_v11 = vrot.slane %v3149_v25, %v16061_v48  ;;  %v5814_v51 = vrot.slane %v3132_v9, %v16054_v30 }
 0x460   : > { %v2536_v29 = vpop.xlane.xlu1 %2535  ;;  %v2485_v52 = vpop.xlane.xlu0 %2484 }
 0x461   : > { %v15399_v59 = vsel %vm3919_vm13, %v5898_v11, %v15311_v1  ;;  %v15403_v35 = vsel %vm3912_vm12, %v5814_v51, %v15315_v42  ;;  %v3181_v28 = vmul.f32 0.015625, %v2536_v29  ;;  %v3164_v0 = vmul.f32 0.015625, %v2485_v52 }
 0x463   : > { %v6056_v17 = vrot.slane %v3181_v28, %v16061_v48  ;;  %v5972_v56 = vrot.slane %v3164_v0, %v16054_v30 }
 0x464   : > { %v15407_v45 = vpop.xlane.xlu1 %2628  ;;  %v2578_v34 = vpop.xlane.xlu0 %2577 }
 0x465   : > { %v15411_v57 = vsel %vm3919_vm13, %v6056_v17, %v15321_v55  ;;  %v15415_v1 = vsel %vm3912_vm12, %v5972_v56, %v15325_v40  ;;  %v3195_v12 = vmul.f32 0.015625, %v2578_v34 }
 0x467   : > { %v6125_v42 = vrot.slane %v3195_v12, %v16047_v3 }
 0x468   : > { %v15418_v43 = vpop.xlane.xlu1 %2724  ;;  %v15420_v14 = vpop.xlane.xlu0 %2673 }
 0x469   : > { %v15424_v62 = vsel %vm3905_vm11, %v6125_v42, %v15335_v21 }
 0x46c   : > { %v2110_v37 = vpop.xlane.xlu1 %2109  ;;  %v2014_v41 = vpop.xlane.xlu0 %2013 }
 0x46d   : > { %v3039_v32 = vmul.f32 0.015625, %v2110_v37  ;;  %v3007_v55 = vmul.f32 0.015625, %v2014_v41 }
 0x46f   : > { %v5355_v18 = vrot.slane %v3039_v32, %v16070_v10  ;;  %v5197_v40 = vrot.slane %v3007_v55, %v16070_v10 }
 0x470   : > { %v2254_v19 = vpop.xlane.xlu1 %2253  ;;  %v2203_v38 = vpop.xlane.xlu0 %2202 }
 0x471   : > { %v5356_v13 = vsel %vm3933_vm15, %v5355_v18, %v5351_v15  ;;  %v5198_v20 = vsel %vm3933_vm15, %v5197_v40, %v5193_v8  ;;  %v3087_v49 = vmul.f32 0.015625, %v2254_v19  ;;  %v3070_v60 = vmul.f32 0.015625, %v2203_v38 }
 0x472   : > { %v6391_v5 = vsel %vm6390_vm4, %v5198_v20, %v15359_v46  ;;  %v6408_v21 = vsel %vm6390_vm4, %v5356_v13, %v15355_v2 }
 0x473   : > { %v5592_v58 = vrot.slane %v3087_v49, %v16070_v10 }
 0x474   : > { %v2350_v50 = vpop.xlane.xlu1 %2349  ;;  %v2299_v33 = vpop.xlane.xlu0 %2298 }
 0x475   : > { %v3119_v23 = vmul.f32 0.015625, %v2350_v50  ;;  %v5593_v4 = vsel %vm3933_vm15, %v5592_v58, %v5588_v63  ;;  %v3102_v25 = vmul.f32 0.015625, %v2299_v33 }
 0x476   : > { %v6402_v15 = vsel %vm6392_vm5, %v5593_v4, %v15369_v16  ;;  %v5508_v16 = vrot.slane %v3070_v60, %v16066_v22 }
 0x477   : > { %v5750_v8 = vrot.slane %v3119_v23, %v16070_v10  ;;  %v5666_v11 = vrot.slane %v3102_v25, %v16066_v22  ;;  %v3212_v23 = vmul.f32 0.015625, %v15407_v45 }
 0x478   : > { %v2443_v7 = vpop.xlane.xlu1 %2442  ;;  %v2392_v44 = vpop.xlane.xlu0 %2391  ;;  %v5509_v17 = vsel %vm3926_vm14, %v5508_v16, %v15385_v6  ;;  %v3244_v16 = vmul.f32 0.015625, %v15418_v43 }
 0x479   : > { %v5751_v46 = vsel %vm3933_vm15, %v5750_v8, %v5746_v26  ;;  %v3150_v51 = vmul.f32 0.015625, %v2443_v7  ;;  %v5667_v56 = vsel %vm3926_vm14, %v5666_v11, %v15393_v53  ;;  %v3133_v8 = vmul.f32 0.015625, %v2392_v44 }
 0x47a   : > { %v6416_v24 = vsel %vm6392_vm5, %v5751_v46, %v6415_v36  ;;  %v6209_v25 = vrot.slane %v3212_v23, %v16054_v30  ;;  %v6367_v43 = vrot.slane %v3244_v16, %v16054_v30 }
 0x47b   : > { %v5903_v34 = vrot.slane %v3150_v51, %v16066_v22  ;;  %v5819_v11 = vrot.slane %v3133_v8, %v16061_v48 }
 0x47c   : > { %v2539_v2 = vpop.xlane.xlu1 %2538  ;;  %v2488_v39 = vpop.xlane.xlu0 %2487 }
 0x47d   : > { %v3182_v12 = vmul.f32 0.015625, %v2539_v2  ;;  %v5904_v13 = vsel %vm3926_vm14, %v5903_v34, %v15399_v59  ;;  %v3165_v7 = vmul.f32 0.015625, %v2488_v39 }
 0x47f   : > { %v6061_v6 = vrot.slane %v3182_v12, %v16066_v22  ;;  %v5977_v45 = vrot.slane %v3165_v7, %v16061_v48 }
 0x480   : > { %v2632_v27 = vpop.xlane.xlu1 %2631  ;;  %v15441_v31 = vpop.xlane.xlu0 %2580 }
 0x481   : > { %v6062_v33 = vsel %vm3926_vm14, %v6061_v6, %v15411_v57  ;;  %v3213_v57 = vmul.f32 0.015625, %v2632_v27  ;;  %v5820_v27 = vsel %vm3919_vm13, %v5819_v11, %v15403_v35 }
 0x484   : > { %v15443_v9 = vpop.xlane.xlu1 %2727  ;;  %v15445_v63 = vpop.xlane.xlu0 %2676 }
 0x488   : > { %v2302_v29 = vpop.xlane.xlu1 %2301  ;;  %v2206_v26 = vpop.xlane.xlu0 %2205 }
 0x489   : > { %v3103_v52 = vmul.f32 0.015625, %v2302_v29  ;;  %v3071_v36 = vmul.f32 0.015625, %v2206_v26  ;;  %v6210_v26 = vsel %vm3912_vm12, %v6209_v25, %v15331_v61 }
 0x48b   : > { %v5671_v28 = vrot.slane %v3103_v52, %v16070_v10  ;;  %v5513_v0 = vrot.slane %v3071_v36, %v16070_v10 }
 0x48c   : > { %v2446_v42 = vpop.xlane.xlu1 %2445  ;;  %v2395_v37 = vpop.xlane.xlu0 %2394 }
 0x48d   : > { %v5672_v41 = vsel %vm3933_vm15, %v5671_v28, %v5667_v56  ;;  %v5514_v32 = vsel %vm3933_vm15, %v5513_v0, %v5509_v17  ;;  %v3151_v55 = vmul.f32 0.015625, %v2446_v42  ;;  %v3134_v46 = vmul.f32 0.015625, %v2395_v37 }
 0x48e   : > { %v6393_v18 = vsel %vm6392_vm5, %v5514_v32, %v6391_v5  ;;  %v6409_v40 = vsel %vm6392_vm5, %v5672_v41, %v6408_v21  ;;  %v3227_v28 = vmul.f32 0.015625, %v15420_v14  ;;  %v6214_v0 = vrot.slane %v3213_v57, %v16061_v48 }
 0x48f   : > { %v5908_v19 = vrot.slane %v3151_v55, %v16070_v10  ;;  %v5824_v51 = vrot.slane %v3134_v46, %v16066_v22  ;;  %v5978_v17 = vsel %vm3919_vm13, %v5977_v45, %v15415_v1  ;;  %v3245_v56 = vmul.f32 0.015625, %v15443_v9 }
 0x490   : > { %v2542_v53 = vpop.xlane.xlu1 %2541  ;;  %v2491_v38 = vpop.xlane.xlu0 %2490  ;;  %v3196_v32 = vmul.f32 0.015625, %v15441_v31  ;;  %v6215_v6 = vsel %vm3919_vm13, %v6214_v0, %v6210_v26  ;;  %v11137_v0 = vld [vmem:[%s11536_s28] sm:$0xff]  }
 0x491   : > { %v3183_v20 = vmul.f32 0.015625, %v2542_v53  ;;  %v5909_v49 = vsel %vm3933_vm15, %v5908_v19, %v5904_v13  ;;  %v3166_v2 = vmul.f32 0.015625, %v2491_v38  ;;  %v5825_v12 = vsel %vm3926_vm14, %v5824_v51, %v5820_v27  ;;  %v15549_v27 = vld [vmem:[%s15988_s1 + $0x18] sm:$0x3f] }
 0x492   : > { %v15466_v58 = vsel %vm6394_vm6, %v5909_v49, %v6402_v15  ;;  %v3228_v19 = vmul.f32 0.015625, %v15445_v63  ;;  %v6372_v13 = vrot.slane %v3245_v56, %v16061_v48  ;;  %v6283_v63 = vrot.slane %v3227_v28, %v16047_v3  ;;  %v11139_v56 = vld [vmem:[%s11536_s28 + $0x48] sm:$0xff]  }
 0x493   : > { %v6066_v5 = vrot.slane %v3183_v20, %v16070_v10  ;;  %v5982_v44 = vrot.slane %v3166_v2, %v16066_v22 }
 0x494   : > { %v2635_v50 = vpop.xlane.xlu1 %2634  ;;  %v2584_v21 = vpop.xlane.xlu0 %2583  ;;  %v6288_v46 = vrot.slane %v3228_v19, %v16054_v30  ;;  %v11152_v19 = vld [vmem:[%s11536_s28 + $0xe0] sm:$0xff]  }
 0x495   : > { %v6067_v4 = vsel %vm3933_vm15, %v6066_v5, %v6062_v33  ;;  %v5983_v42 = vsel %vm3926_vm14, %v5982_v44, %v5978_v17  ;;  %v3197_v20 = vmul.f32 0.015625, %v2584_v21  ;;  %v6130_v21 = vrot.slane %v3196_v32, %v16054_v30  ;;  %v11138_v17 = vld [vmem:[%s11536_s28 + $0x80] sm:$0xff]   ;;  %v11148_v32 = vld [vmem:[%s11536_s28 + $0xd8] sm:$0xff]  }
 0x496   : > { %v15474_v59 = vsel %vm6394_vm6, %v6067_v4, %v6416_v24  ;;  %v3214_v24 = vmul.f32 0.015625, %v2635_v50 }
 0x497   : > { %v6131_v44 = vsel %vm3912_vm12, %v6130_v21, %v15424_v62  ;;  %v11168_v21 = vld [vmem:[%s11536_s28 + $0x1c0] sm:$0xff]  }
 0x498   : > { %v2731_v15 = vpop.xlane.xlu1 %2730  ;;  %v2680_v60 = vpop.xlane.xlu0 %2679  ;;  %v6219_v14 = vrot.slane %v3214_v24, %v16066_v22 }
 0x499   : > { %v3246_v37 = vmul.f32 0.015625, %v2731_v15  ;;  %v3229_v49 = vmul.f32 0.015625, %v2680_v60  ;;  %v6135_v15 = vrot.slane %v3197_v20, %v16061_v48  ;;  %v11157_v20 = vld [vmem:[%s11536_s28 + $0x28] sm:$0xff]  }
 0x49a   : > { %v6220_v4 = vsel %vm3926_vm14, %v6219_v14, %v6215_v6  ;;  %v11144_v14 = vld [vmem:[%s11536_s28 + $0xd0] sm:$0xff]   ;;  %v11153_v6 = vld [vmem:[%s11536_s28 + $0x20] sm:$0xff]  }
 0x49b   : > { %v6377_v31 = vrot.slane %v3246_v37, %v16066_v22  ;;  %v6293_v60 = vrot.slane %v3229_v49, %v16061_v48  ;;  %v11145_v37 = vld [vmem:[%s11536_s28 + $0x10] sm:$0xff]   ;;  %v11158_v49 = vld [vmem:[%s11536_s28 + $0xa8] sm:$0xff]  }
 0x49c   : > { %v2494_v29 = vpop.xlane.xlu1 %2493  ;;  %v2398_v39 = vpop.xlane.xlu0 %2397 }
 0x49d   : > { %v3167_v52 = vmul.f32 0.015625, %v2494_v29  ;;  %v3135_v36 = vmul.f32 0.015625, %v2398_v39 }
 0x49f   : > { %v5987_v34 = vrot.slane %v3167_v52, %v16070_v10  ;;  %v5829_v61 = vrot.slane %v3135_v36, %v16070_v10 }
 0x4a0   : > { %v2638_v41 = vpop.xlane.xlu1 %2637  ;;  %v2587_v35 = vpop.xlane.xlu0 %2586 }
 0x4a1   : > { %v3215_v55 = vmul.f32 0.015625, %v2638_v41  ;;  %v5830_v1 = vsel %vm3933_vm15, %v5829_v61, %v5825_v12  ;;  %v5988_v9 = vsel %vm3933_vm15, %v5987_v34, %v5983_v42  ;;  %v3198_v50 = vmul.f32 0.015625, %v2587_v35  ;;  %v11140_v34 = vld [vmem:[%s11536_s28 + $0xc8] sm:$0xff]   ;;  %v11143_v42 = vld [vmem:[%s11536_s28 + $0x50] sm:$0xff]   ;;  %v11147_v35 = vld [vmem:[%s11536_s28 + $0x58] sm:$0xff]  }
 0x4a2   : > { %v6395_v53 = vsel %vm6394_vm6, %v5830_v1, %v6393_v18  ;;  %v6410_v38 = vsel %vm6394_vm6, %v5988_v9, %v6409_v40  ;;  %v6368_v40 = vsel %vm3912_vm12, %v6367_v43, %v15341_v54  ;;  %v11141_v61 = vld [vmem:[%s11536_s28 + $0x8] sm:$0xff]   ;;  %v11146_v41 = vld [vmem:[%s11536_s28 + $0x90] sm:$0xff]   ;;  %v11150_v1 = vld [vmem:[%s11536_s28 + $0x98] sm:$0xff]  }
 0x4a3   : > { %v6224_v5 = vrot.slane %v3215_v55, %v16070_v10  ;;  %v6373_v25 = vsel %vm3919_vm13, %v6372_v13, %v6368_v40  ;;  %v6140_v16 = vrot.slane %v3198_v50, %v16066_v22  ;;  %v11142_v12 = vld [vmem:[%s11536_s28 + $0x88] sm:$0xff]   ;;  %v11149_v55 = vld [vmem:[%s11536_s28 + $0x18] sm:$0xff]   ;;  %v11151_v9 = vld [vmem:[%s11536_s28 + $0x60] sm:$0xff]  }
 0x4a4   : > { %v2734_v33 = vpop.xlane.xlu1 %2733  ;;  %v2683_v23 = vpop.xlane.xlu0 %2682  ;;  %v6378_v30 = vsel %vm3926_vm14, %v6377_v31, %v6373_v25  ;;  %v11156_v13 = vld [vmem:[%s11536_s28 + $0xe8] sm:$0xff]   ;;  %v11160_v31 = vld [vmem:[%s11536_s28 + $0xf0] sm:$0xff]   ;;  %v11167_v40 = vld [vmem:[%s11536_s28 + $0x140] sm:$0xff]  }
 0x4a5   : > { %v3247_v8 = vmul.f32 0.015625, %v2734_v33  ;;  %v3230_v7 = vmul.f32 0.015625, %v2683_v23  ;;  %v6225_v18 = vsel %vm3933_vm15, %v6224_v5, %v6220_v4  ;;  %v11159_v5 = vld [vmem:[%s11536_s28 + $0x70] sm:$0xff]   ;;  %v11163_v23 = vld [vmem:[%s11536_s28 + $0x78] sm:$0xff]   ;;  %v11174_v25 = vld [vmem:[%s11536_s28 + $0x188] sm:$0xff]  }
 0x4a6   : > { %v6404_v2 = vsel %vm6396_vm7, %v6225_v18, %v15466_v58  ;;  %v6284_v58 = vsel %vm3905_vm11, %v6283_v63, %v15345_v47  ;;  %v11161_v50 = vld [vmem:[%s11536_s28 + $0x30] sm:$0xff]   ;;  %v11164_v4 = vld [vmem:[%s11536_s28 + $0xf8] sm:$0xff]   ;;  %vm8434_vm11 = vcmask 195584  }
 0x4a7   : > { %v6382_v3 = vrot.slane %v3247_v8, %v16070_v10  ;;  %6487 = vmatprep.mubr.f32.mxu0 %v6404_v2  ;;  %v6298_v54 = vrot.slane %v3230_v7, %v16066_v22  ;;  %v6289_v24 = vsel %vm3912_vm12, %v6288_v46, %v6284_v58  ;;  %v6136_v22 = vsel %vm3919_vm13, %v6135_v15, %v6131_v44  ;;  %v11162_v33 = vld [vmem:[%s11536_s28 + $0xb0] sm:$0xff]   ;;  %v11165_v63 = vld [vmem:[%s11536_s28 + $0x38] sm:$0xff]   ;;  %v15586_v7 = vld [vmem:[%s15988_s1] sm:$0x3f] }
 0x4a8   : > { %v2686_v11 = vpop.xlane.xlu1 %2685  ;;  %v2590_v57 = vpop.xlane.xlu0 %2589  ;;  %v6294_v39 = vsel %vm3919_vm13, %v6293_v60, %v6289_v24  ;;  %v6141_v52 = vsel %vm3926_vm14, %v6140_v16, %v6136_v22  ;;  %v11166_v8 = vld [vmem:[%s11536_s28 + $0xb8] sm:$0xff]   ;;  %v15591_v18 = vld [vmem:[%s15988_s1 + $0x10] sm:$0x3f]  ;;  %v11169_v46 = vld [vmem:[%s11536_s28 + $0x100] sm:$0xff]   ;;  %vm8436_vm12 = vcmask 244736   ;;  %vm8438_vm13 = vcmask 293888  }
 0x4a9   : > { %v3231_v45 = vmul.f32 0.015625, %v2686_v11  ;;  %v3199_v51 = vmul.f32 0.015625, %v2590_v57  ;;  %v6383_v48 = vsel %vm3933_vm15, %v6382_v3, %v6378_v30  ;;  %v6299_v62 = vsel %vm3926_vm14, %v6298_v54, %v6294_v39  ;;  %v11170_v2 = vld [vmem:[%s11536_s28 + $0x180] sm:$0xff]   ;;  %v11171_v15 = vld [vmem:[%s11536_s28 + $0x148] sm:$0xff]   ;;  %v11175_v16 = vld [vmem:[%s11536_s28 + $0x150] sm:$0xff]  }
 0x4aa   : > { %v6418_v29 = vsel %vm6396_vm7, %v6383_v48, %v15474_v59  ;;  %v11172_v60 = vld [vmem:[%s11536_s28 + $0x1c8] sm:$0xff]   ;;  %v11176_v54 = vld [vmem:[%s11536_s28 + $0x1d0] sm:$0xff]   ;;  %v11179_v30 = vld [vmem:[%s11536_s28 + $0x158] sm:$0xff]   ;;  %vm8440_vm14 = vcmask 343040  }
 0x4ab   : > { %v6303_v47 = vrot.slane %v3231_v45, %v16070_v10  ;;  %v6145_v26 = vrot.slane %v3199_v51, %v16070_v10  ;;  %6557 = vmatprep.mubr.f32.mxu1 %v6418_v29  ;;  %v15544_v10 = vld [vmem:[%s15988_s1 + $0x8] sm:$0x3f]  ;;  %v11177_v11 = vld [vmem:[%s11536_s28 + $0x110] sm:$0xff]   ;;  %v11180_v58 = vld [vmem:[%s11536_s28 + $0x1d8] sm:$0xff]  }
 0x4ac   : > { %v11173_v3 = vld [vmem:[%s11536_s28 + $0x108] sm:$0xff]   ;;  %v11178_v57 = vld [vmem:[%s11536_s28 + $0x190] sm:$0xff]   ;;  %v11181_v45 = vld [vmem:[%s11536_s28 + $0x118] sm:$0xff]  }
 0x4ad   : > { %v6146_v36 = vsel %vm3933_vm15, %v6145_v26, %v6141_v52  ;;  %v6304_v59 = vsel %vm3933_vm15, %v6303_v47, %v6299_v62  ;;  %v11182_v51 = vld [vmem:[%s11536_s28 + $0x198] sm:$0xff]   ;;  %v11183_v48 = vld [vmem:[%s11536_s28 + $0x160] sm:$0xff]   ;;  %v11187_v22 = vld [vmem:[%s11536_s28 + $0x168] sm:$0xff]   ;;  %vm8442_vm15 = vcmask 392192  }
 0x4ae   : > { %v6397_v43 = vsel %vm6396_vm7, %v6146_v36, %v6395_v53  ;;  %v6411_v28 = vsel %vm6396_vm7, %v6304_v59, %v6410_v38  ;;  %v11154_v53 = vld [vmem:[%s11536_s28 + $0xa0] sm:$0xff]   ;;  %v11155_v38 = vld [vmem:[%s11536_s28 + $0x68] sm:$0xff]   ;;  %v11191_v52 = vld [vmem:[%s11536_s28 + $0x170] sm:$0xff]  }
 0x4af   : > { %6488 = vmatmul.mubr.f32.vlgmr.msra.gmra.mrb[0].mxu0 %v6397_v43  ;;  %6558 = vmatmul.mubr.f32.vlgmr.msra.gmra.mrb[0].mxu1 %v6411_v28  ;;  %v11184_v44 = vld [vmem:[%s11536_s28 + $0x1e0] sm:$0xff]   ;;  %v11188_v39 = vld [vmem:[%s11536_s28 + $0x1e8] sm:$0xff]   ;;  %v11192_v62 = vld [vmem:[%s11536_s28 + $0x1f0] sm:$0xff]  }
 0x4b0   : > { %10579 = vmatpush3.bf16.msra.mxu0 %v11137_v0  ;;  %10611 = vmatpush3.bf16.msra.mxu1 %v11138_v17  ;;  %v11185_v24 = vld [vmem:[%s11536_s28 + $0x120] sm:$0xff]   ;;  %v11189_v47 = vld [vmem:[%s11536_s28 + $0x128] sm:$0xff]   ;;  %v11193_v36 = vld [vmem:[%s11536_s28 + $0x130] sm:$0xff]  }
 0x4b1   : > { %10581 = vmatprep.subr.bf16.mxu0 %v11139_v56  ;;  %10613 = vmatprep.subr.bf16.mxu1 %v11140_v34  ;;  %v11186_v29 = vld [vmem:[%s11536_s28 + $0x1a0] sm:$0xff]   ;;  %v11190_v26 = vld [vmem:[%s11536_s28 + $0x1a8] sm:$0xff]   ;;  %v11194_v59 = vld [vmem:[%s11536_s28 + $0x1b0] sm:$0xff]  }
 0x4b2   : > { %6631 = vmatprep.mubr.f32.mxu0 %v15544_v10  ;;  %6701 = vmatprep.mubr.f32.mxu1 %v15549_v27  ;;  %v11195_v43 = vld [vmem:[%s11536_s28 + $0x178] sm:$0xff]   ;;  %v11199_v56 = vld [vmem:[%s11536_s28 + $0x240] sm:$0xff]  }
 0x4b3   : > { %v11196_v28 = vld [vmem:[%s11536_s28 + $0x1f8] sm:$0xff]   ;;  %v11200_v34 = vld [vmem:[%s11536_s28 + $0x2c0] sm:$0xff]  }
 0x4b4   : > { %10583 = vmatpush3.bf16.msra.mxu0 %v11141_v61  ;;  %10615 = vmatpush3.bf16.msra.mxu1 %v11142_v12  ;;  %v11197_v0 = vld [vmem:[%s11536_s28 + $0x138] sm:$0xff]   ;;  %v11201_v61 = vld [vmem:[%s11536_s28 + $0x200] sm:$0xff]  }
 0x4b5   : > { %10585 = vmatprep.subr.bf16.mxu0 %v11143_v42  ;;  %10617 = vmatprep.subr.bf16.mxu1 %v11144_v14  ;;  %v11198_v17 = vld [vmem:[%s11536_s28 + $0x1b8] sm:$0xff]   ;;  %v11202_v12 = vld [vmem:[%s11536_s28 + $0x280] sm:$0xff]   ;;  %v11203_v42 = vld [vmem:[%s11536_s28 + $0x248] sm:$0xff]  }
 0x4b6   : > { %v11204_v14 = vld [vmem:[%s11536_s28 + $0x2c8] sm:$0xff]  }
 0x4b8   : > { %10587 = vmatpush3.bf16.msra.mxu0 %v11145_v37  ;;  %10619 = vmatpush3.bf16.msra.mxu1 %v11146_v41  ;;  %v11205_v37 = vld [vmem:[%s11536_s28 + $0x208] sm:$0xff]  }
 0x4b9   : > { %10589 = vmatprep.subr.bf16.mxu0 %v11147_v35  ;;  %10621 = vmatprep.subr.bf16.mxu1 %v11148_v32  ;;  %v11206_v41 = vld [vmem:[%s11536_s28 + $0x288] sm:$0xff]   ;;  %v11207_v35 = vld [vmem:[%s11536_s28 + $0x250] sm:$0xff]  }
 0x4ba   : > { %v11208_v32 = vld [vmem:[%s11536_s28 + $0x2d0] sm:$0xff]  }
 0x4bc   : > { %10591 = vmatpush3.bf16.msra.mxu0 %v11149_v55  ;;  %10623 = vmatpush3.bf16.msra.mxu1 %v11150_v1  ;;  %v11209_v55 = vld [vmem:[%s11536_s28 + $0x210] sm:$0xff]  }
 0x4bd   : > { %10593 = vmatprep.subr.bf16.mxu0 %v11151_v9  ;;  %10625 = vmatprep.subr.bf16.mxu1 %v11152_v19  ;;  %v11210_v1 = vld [vmem:[%s11536_s28 + $0x290] sm:$0xff]   ;;  %v11211_v9 = vld [vmem:[%s11536_s28 + $0x258] sm:$0xff]  }
 0x4be   : > { %v11212_v19 = vld [vmem:[%s11536_s28 + $0x2d8] sm:$0xff]  }
 0x4c0   : > { %10595 = vmatpush3.bf16.msra.mxu0 %v11153_v6  ;;  %10627 = vmatpush3.bf16.msra.mxu1 %v11154_v53  ;;  %v11213_v6 = vld [vmem:[%s11536_s28 + $0x218] sm:$0xff]  }
 0x4c1   : > { %10597 = vmatprep.subr.bf16.mxu0 %v11155_v38  ;;  %10629 = vmatprep.subr.bf16.mxu1 %v11156_v13  ;;  %v11214_v53 = vld [vmem:[%s11536_s28 + $0x298] sm:$0xff]   ;;  %v11215_v38 = vld [vmem:[%s11536_s28 + $0x260] sm:$0xff]  }
 0x4c2   : > { %v11216_v13 = vld [vmem:[%s11536_s28 + $0x2e0] sm:$0xff]  }
 0x4c4   : > { %10599 = vmatpush3.bf16.msra.mxu0 %v11157_v20  ;;  %10631 = vmatpush3.bf16.msra.mxu1 %v11158_v49  ;;  %v11217_v20 = vld [vmem:[%s11536_s28 + $0x220] sm:$0xff]  }
 0x4c5   : > { %10601 = vmatprep.subr.bf16.mxu0 %v11159_v5  ;;  %10633 = vmatprep.subr.bf16.mxu1 %v11160_v31  ;;  %v11218_v49 = vld [vmem:[%s11536_s28 + $0x2a0] sm:$0xff]   ;;  %v11219_v5 = vld [vmem:[%s11536_s28 + $0x268] sm:$0xff]  }
 0x4c6   : > { %v11220_v31 = vld [vmem:[%s11536_s28 + $0x2e8] sm:$0xff]  }
 0x4c8   : > { %10603 = vmatpush3.bf16.msra.mxu0 %v11161_v50  ;;  %10635 = vmatpush3.bf16.msra.mxu1 %v11162_v33  ;;  %v11221_v50 = vld [vmem:[%s11536_s28 + $0x228] sm:$0xff]  }
 0x4c9   : > { %10605 = vmatprep.subr.bf16.mxu0 %v11163_v23  ;;  %10637 = vmatprep.subr.bf16.mxu1 %v11164_v4  ;;  %v11222_v33 = vld [vmem:[%s11536_s28 + $0x2a8] sm:$0xff]   ;;  %v11223_v23 = vld [vmem:[%s11536_s28 + $0x270] sm:$0xff]  }
 0x4ca   : > { %v11224_v4 = vld [vmem:[%s11536_s28 + $0x2f0] sm:$0xff]  }
 0x4cc   : > { %10607 = vmatpush3.bf16.msra.mxu0 %v11165_v63  ;;  %10639 = vmatpush3.bf16.msra.mxu1 %v11166_v8  ;;  %v11225_v63 = vld [vmem:[%s11536_s28 + $0x230] sm:$0xff]  }
 0x4cd   : > { %10641 = vmatprep.subr.bf16.mxu0 %v11167_v40  ;;  %10673 = vmatprep.subr.bf16.mxu1 %v11168_v21  ;;  %v11226_v8 = vld [vmem:[%s11536_s28 + $0x2b0] sm:$0xff]   ;;  %v11227_v40 = vld [vmem:[%s11536_s28 + $0x278] sm:$0xff]  }
 0x4ce   : > { %v11228_v21 = vld [vmem:[%s11536_s28 + $0x2f8] sm:$0xff]  }
 0x4cf   : > { %6632 = vmatmul.mubr.f32.vlgmr.msra.gmra.mrb[2].mxu0 %v15586_v7  ;;  %6702 = vmatmul.mubr.f32.vlgmr.msra.gmra.mrb[2].mxu1 %v15591_v18 }
 0x4d0   : > { %10643 = vmatpush3.bf16.msra.mxu0 %v11169_v46  ;;  %10675 = vmatpush3.bf16.msra.mxu1 %v11170_v2  ;;  %v11229_v46 = vld [vmem:[%s11536_s28 + $0x238] sm:$0xff]  }
 0x4d1   : > { %10645 = vmatprep.subr.bf16.mxu0 %v11171_v15  ;;  %10677 = vmatprep.subr.bf16.mxu1 %v11172_v60  ;;  %v11230_v2 = vld [vmem:[%s11536_s28 + $0x2b8] sm:$0xff]   ;;  %v11231_v15 = vld [vmem:[%s11536_s28 + $0x340] sm:$0xff]  }
 0x4d2   : > { %6771 = vmatprep.mubr.f32.mxu0 %v15544_v10  ;;  %6841 = vmatprep.mubr.f32.mxu1 %v15549_v27  ;;  %v11232_v60 = vld [vmem:[%s11536_s28 + $0x3c0] sm:$0xff]  }
 0x4d4   : > { %10647 = vmatpush3.bf16.msra.mxu0 %v11173_v3  ;;  %10679 = vmatpush3.bf16.msra.mxu1 %v11174_v25  ;;  %v11233_v3 = vld [vmem:[%s11536_s28 + $0x300] sm:$0xff]  }
 0x4d5   : > { %10649 = vmatprep.subr.bf16.mxu0 %v11175_v16  ;;  %10681 = vmatprep.subr.bf16.mxu1 %v11176_v54  ;;  %v11234_v25 = vld [vmem:[%s11536_s28 + $0x380] sm:$0xff]   ;;  %v11235_v16 = vld [vmem:[%s11536_s28 + $0x348] sm:$0xff]  }
 0x4d6   : > { %v11236_v54 = vld [vmem:[%s11536_s28 + $0x3c8] sm:$0xff]  }
 0x4d8   : > { %10651 = vmatpush3.bf16.msra.mxu0 %v11177_v11  ;;  %10683 = vmatpush3.bf16.msra.mxu1 %v11178_v57  ;;  %v11237_v11 = vld [vmem:[%s11536_s28 + $0x308] sm:$0xff]  }
 0x4d9   : > { %10653 = vmatprep.subr.bf16.mxu0 %v11179_v30  ;;  %10685 = vmatprep.subr.bf16.mxu1 %v11180_v58  ;;  %v11238_v57 = vld [vmem:[%s11536_s28 + $0x388] sm:$0xff]   ;;  %v11239_v30 = vld [vmem:[%s11536_s28 + $0x350] sm:$0xff]  }
 0x4da   : > { %v11240_v58 = vld [vmem:[%s11536_s28 + $0x3d0] sm:$0xff]  }
 0x4dc   : > { %10655 = vmatpush3.bf16.msra.mxu0 %v11181_v45  ;;  %10687 = vmatpush3.bf16.msra.mxu1 %v11182_v51  ;;  %v11241_v45 = vld [vmem:[%s11536_s28 + $0x310] sm:$0xff]  }
 0x4dd   : > { %10657 = vmatprep.subr.bf16.mxu0 %v11183_v48  ;;  %10689 = vmatprep.subr.bf16.mxu1 %v11184_v44  ;;  %v11242_v51 = vld [vmem:[%s11536_s28 + $0x390] sm:$0xff]   ;;  %v11243_v48 = vld [vmem:[%s11536_s28 + $0x358] sm:$0xff]  }
 0x4de   : > { %v11244_v44 = vld [vmem:[%s11536_s28 + $0x3d8] sm:$0xff]  }
 0x4e0   : > { %10659 = vmatpush3.bf16.msra.mxu0 %v11185_v24  ;;  %10691 = vmatpush3.bf16.msra.mxu1 %v11186_v29  ;;  %v11245_v24 = vld [vmem:[%s11536_s28 + $0x318] sm:$0xff]  }
 0x4e1   : > { %10661 = vmatprep.subr.bf16.mxu0 %v11187_v22  ;;  %10693 = vmatprep.subr.bf16.mxu1 %v11188_v39  ;;  %v11246_v29 = vld [vmem:[%s11536_s28 + $0x398] sm:$0xff]   ;;  %v11247_v22 = vld [vmem:[%s11536_s28 + $0x360] sm:$0xff]  }
 0x4e2   : > { %v11248_v39 = vld [vmem:[%s11536_s28 + $0x3e0] sm:$0xff]  }
 0x4e4   : > { %10663 = vmatpush3.bf16.msra.mxu0 %v11189_v47  ;;  %10695 = vmatpush3.bf16.msra.mxu1 %v11190_v26  ;;  %v11249_v47 = vld [vmem:[%s11536_s28 + $0x320] sm:$0xff]  }
 0x4e5   : > { %10665 = vmatprep.subr.bf16.mxu0 %v11191_v52  ;;  %10697 = vmatprep.subr.bf16.mxu1 %v11192_v62  ;;  %v11250_v26 = vld [vmem:[%s11536_s28 + $0x3a0] sm:$0xff]   ;;  %v11251_v52 = vld [vmem:[%s11536_s28 + $0x368] sm:$0xff]  }
 0x4e6   : > { %v11252_v62 = vld [vmem:[%s11536_s28 + $0x3e8] sm:$0xff]  }
 0x4e8   : > { %10667 = vmatpush3.bf16.msra.mxu0 %v11193_v36  ;;  %10699 = vmatpush3.bf16.msra.mxu1 %v11194_v59  ;;  %v11253_v36 = vld [vmem:[%s11536_s28 + $0x328] sm:$0xff]  }
 0x4e9   : > { %10669 = vmatprep.subr.bf16.mxu0 %v11195_v43  ;;  %10701 = vmatprep.subr.bf16.mxu1 %v11196_v28  ;;  %v11254_v59 = vld [vmem:[%s11536_s28 + $0x3a8] sm:$0xff]   ;;  %v11255_v43 = vld [vmem:[%s11536_s28 + $0x370] sm:$0xff]  }
 0x4ea   : > { %v11256_v28 = vld [vmem:[%s11536_s28 + $0x3f0] sm:$0xff]  }
 0x4ec   : > { %10671 = vmatpush3.bf16.msra.mxu0 %v11197_v0  ;;  %10703 = vmatpush3.bf16.msra.mxu1 %v11198_v17  ;;  %v11257_v0 = vld [vmem:[%s11536_s28 + $0x330] sm:$0xff]  }
 0x4ed   : > { %10705 = vmatprep.subr.bf16.mxu0 %v11199_v56  ;;  %10737 = vmatprep.subr.bf16.mxu1 %v11200_v34  ;;  %v11258_v17 = vld [vmem:[%s11536_s28 + $0x3b0] sm:$0xff]   ;;  %v11259_v56 = vld [vmem:[%s11536_s28 + $0x378] sm:$0xff]  }
 0x4ee   : > { %v11260_v34 = vld [vmem:[%s11536_s28 + $0x3f8] sm:$0xff]  }
 0x4ef   : > { %6772 = vmatmul.mubr.f32.vlgmr.msra.gmra.mrb[4].mxu0 %v15586_v7  ;;  %6842 = vmatmul.mubr.f32.vlgmr.msra.gmra.mrb[4].mxu1 %v15591_v18 }
 0x4f0   : > { %10707 = vmatpush3.bf16.msra.mxu0 %v11201_v61  ;;  %10739 = vmatpush3.bf16.msra.mxu1 %v11202_v12  ;;  %v11261_v61 = vld [vmem:[%s11536_s28 + $0x338] sm:$0xff]  }
 0x4f1   : > { %10709 = vmatprep.subr.bf16.mxu0 %v11203_v42  ;;  %10741 = vmatprep.subr.bf16.mxu1 %v11204_v14  ;;  %v11262_v12 = vld [vmem:[%s11536_s28 + $0x3b8] sm:$0xff]   ;;  %v11263_v42 = vld [vmem:[%s11536_s28 + $0x440] sm:$0xff]  }
 0x4f2   : > { %6911 = vmatprep.mubr.f32.mxu0 %v15544_v10  ;;  %6981 = vmatprep.mubr.f32.mxu1 %v15549_v27  ;;  %v11264_v14 = vld [vmem:[%s11536_s28 + $0x4c0] sm:$0xff]  }
 0x4f4   : > { %10711 = vmatpush3.bf16.msra.mxu0 %v11205_v37  ;;  %10743 = vmatpush3.bf16.msra.mxu1 %v11206_v41  ;;  %v11265_v37 = vld [vmem:[%s11536_s28 + $0x400] sm:$0xff]  }
 0x4f5   : > { %10713 = vmatprep.subr.bf16.mxu0 %v11207_v35  ;;  %10745 = vmatprep.subr.bf16.mxu1 %v11208_v32  ;;  %v11266_v41 = vld [vmem:[%s11536_s28 + $0x480] sm:$0xff]   ;;  %v11267_v35 = vld [vmem:[%s11536_s28 + $0x448] sm:$0xff]  }
 0x4f6   : > { %v11268_v32 = vld [vmem:[%s11536_s28 + $0x4c8] sm:$0xff]  }
 0x4f8   : > { %10715 = vmatpush3.bf16.msra.mxu0 %v11209_v55  ;;  %10747 = vmatpush3.bf16.msra.mxu1 %v11210_v1  ;;  %v11269_v55 = vld [vmem:[%s11536_s28 + $0x408] sm:$0xff]  }
 0x4f9   : > { %10717 = vmatprep.subr.bf16.mxu0 %v11211_v9  ;;  %10749 = vmatprep.subr.bf16.mxu1 %v11212_v19  ;;  %v11270_v1 = vld [vmem:[%s11536_s28 + $0x488] sm:$0xff]   ;;  %v11271_v9 = vld [vmem:[%s11536_s28 + $0x450] sm:$0xff]  }
 0x4fa   : > { %v11272_v19 = vld [vmem:[%s11536_s28 + $0x4d0] sm:$0xff]  }
 0x4fc   : > { %10719 = vmatpush3.bf16.msra.mxu0 %v11213_v6  ;;  %10751 = vmatpush3.bf16.msra.mxu1 %v11214_v53  ;;  %v11273_v6 = vld [vmem:[%s11536_s28 + $0x410] sm:$0xff]  }
 0x4fd   : > { %10721 = vmatprep.subr.bf16.mxu0 %v11215_v38  ;;  %10753 = vmatprep.subr.bf16.mxu1 %v11216_v13  ;;  %v11274_v53 = vld [vmem:[%s11536_s28 + $0x490] sm:$0xff]   ;;  %v11275_v38 = vld [vmem:[%s11536_s28 + $0x458] sm:$0xff]  }
 0x4fe   : > { %v11276_v13 = vld [vmem:[%s11536_s28 + $0x4d8] sm:$0xff]  }
 0x500   : > { %10723 = vmatpush3.bf16.msra.mxu0 %v11217_v20  ;;  %10755 = vmatpush3.bf16.msra.mxu1 %v11218_v49  ;;  %v11277_v20 = vld [vmem:[%s11536_s28 + $0x418] sm:$0xff]  }
 0x501   : > { %10725 = vmatprep.subr.bf16.mxu0 %v11219_v5  ;;  %10757 = vmatprep.subr.bf16.mxu1 %v11220_v31  ;;  %v11278_v49 = vld [vmem:[%s11536_s28 + $0x498] sm:$0xff]   ;;  %v11279_v5 = vld [vmem:[%s11536_s28 + $0x460] sm:$0xff]  }
 0x502   : > { %v11280_v31 = vld [vmem:[%s11536_s28 + $0x4e0] sm:$0xff]  }
 0x504   : > { %10727 = vmatpush3.bf16.msra.mxu0 %v11221_v50  ;;  %10759 = vmatpush3.bf16.msra.mxu1 %v11222_v33  ;;  %v11281_v50 = vld [vmem:[%s11536_s28 + $0x420] sm:$0xff]  }
 0x505   : > { %10729 = vmatprep.subr.bf16.mxu0 %v11223_v23  ;;  %10761 = vmatprep.subr.bf16.mxu1 %v11224_v4  ;;  %v11282_v33 = vld [vmem:[%s11536_s28 + $0x4a0] sm:$0xff]   ;;  %v11283_v23 = vld [vmem:[%s11536_s28 + $0x468] sm:$0xff]  }
 0x506   : > { %v11284_v4 = vld [vmem:[%s11536_s28 + $0x4e8] sm:$0xff]  }
 0x508   : > { %10731 = vmatpush3.bf16.msra.mxu0 %v11225_v63  ;;  %10763 = vmatpush3.bf16.msra.mxu1 %v11226_v8  ;;  %v11285_v63 = vld [vmem:[%s11536_s28 + $0x428] sm:$0xff]  }
 0x509   : > { %10733 = vmatprep.subr.bf16.mxu0 %v11227_v40  ;;  %10765 = vmatprep.subr.bf16.mxu1 %v11228_v21  ;;  %v11286_v8 = vld [vmem:[%s11536_s28 + $0x4a8] sm:$0xff]   ;;  %v11287_v40 = vld [vmem:[%s11536_s28 + $0x470] sm:$0xff]  }
 0x50a   : > { %v11288_v21 = vld [vmem:[%s11536_s28 + $0x4f0] sm:$0xff]  }
 0x50c   : > { %10735 = vmatpush3.bf16.msra.mxu0 %v11229_v46  ;;  %10767 = vmatpush3.bf16.msra.mxu1 %v11230_v2  ;;  %v11289_v46 = vld [vmem:[%s11536_s28 + $0x430] sm:$0xff]  }
 0x50d   : > { %10769 = vmatprep.subr.bf16.mxu0 %v11231_v15  ;;  %10801 = vmatprep.subr.bf16.mxu1 %v11232_v60  ;;  %v11290_v2 = vld [vmem:[%s11536_s28 + $0x4b0] sm:$0xff]   ;;  %v11291_v15 = vld [vmem:[%s11536_s28 + $0x478] sm:$0xff]  }
 0x50e   : > { %v11292_v60 = vld [vmem:[%s11536_s28 + $0x4f8] sm:$0xff]  }
 0x50f   : > { %6912 = vmatmul.mubr.f32.vlgmr.msra.gmra.mrb[6].mxu0 %v15586_v7  ;;  %6982 = vmatmul.mubr.f32.vlgmr.msra.gmra.mrb[6].mxu1 %v15591_v18 }
 0x510   : > { %10771 = vmatpush3.bf16.msra.mxu0 %v11233_v3  ;;  %10803 = vmatpush3.bf16.msra.mxu1 %v11234_v25  ;;  %v11293_v3 = vld [vmem:[%s11536_s28 + $0x438] sm:$0xff]  }
 0x511   : > { %10773 = vmatprep.subr.bf16.mxu0 %v11235_v16  ;;  %10805 = vmatprep.subr.bf16.mxu1 %v11236_v54  ;;  %v11294_v25 = vld [vmem:[%s11536_s28 + $0x4b8] sm:$0xff]   ;;  %v11295_v16 = vld [vmem:[%s11536_s28 + $0x540] sm:$0xff]  }
 0x512   : > { %7051 = vmatprep.mubr.f32.mxu0 %v15544_v10  ;;  %7121 = vmatprep.mubr.f32.mxu1 %v15549_v27  ;;  %v11296_v54 = vld [vmem:[%s11536_s28 + $0x5c0] sm:$0xff]  }
 0x514   : > { %10775 = vmatpush3.bf16.msra.mxu0 %v11237_v11  ;;  %10807 = vmatpush3.bf16.msra.mxu1 %v11238_v57  ;;  %v11297_v11 = vld [vmem:[%s11536_s28 + $0x500] sm:$0xff]  }
 0x515   : > { %10777 = vmatprep.subr.bf16.mxu0 %v11239_v30  ;;  %10809 = vmatprep.subr.bf16.mxu1 %v11240_v58  ;;  %v11298_v57 = vld [vmem:[%s11536_s28 + $0x580] sm:$0xff]   ;;  %v11299_v30 = vld [vmem:[%s11536_s28 + $0x548] sm:$0xff]  }
 0x516   : > { %v11300_v58 = vld [vmem:[%s11536_s28 + $0x5c8] sm:$0xff]  }
 0x518   : > { %10779 = vmatpush3.bf16.msra.mxu0 %v11241_v45  ;;  %10811 = vmatpush3.bf16.msra.mxu1 %v11242_v51  ;;  %v11301_v45 = vld [vmem:[%s11536_s28 + $0x508] sm:$0xff]  }
 0x519   : > { %10781 = vmatprep.subr.bf16.mxu0 %v11243_v48  ;;  %10813 = vmatprep.subr.bf16.mxu1 %v11244_v44  ;;  %v11302_v51 = vld [vmem:[%s11536_s28 + $0x588] sm:$0xff]   ;;  %v11303_v48 = vld [vmem:[%s11536_s28 + $0x550] sm:$0xff]  }
 0x51a   : > { %v11304_v44 = vld [vmem:[%s11536_s28 + $0x5d0] sm:$0xff]  }
 0x51c   : > { %10783 = vmatpush3.bf16.msra.mxu0 %v11245_v24  ;;  %10815 = vmatpush3.bf16.msra.mxu1 %v11246_v29  ;;  %v11305_v24 = vld [vmem:[%s11536_s28 + $0x510] sm:$0xff]  }
 0x51d   : > { %10785 = vmatprep.subr.bf16.mxu0 %v11247_v22  ;;  %10817 = vmatprep.subr.bf16.mxu1 %v11248_v39  ;;  %v11306_v29 = vld [vmem:[%s11536_s28 + $0x590] sm:$0xff]   ;;  %v11307_v22 = vld [vmem:[%s11536_s28 + $0x558] sm:$0xff]  }
 0x51e   : > { %v11308_v39 = vld [vmem:[%s11536_s28 + $0x5d8] sm:$0xff]  }
 0x520   : > { %10787 = vmatpush3.bf16.msra.mxu0 %v11249_v47  ;;  %10819 = vmatpush3.bf16.msra.mxu1 %v11250_v26  ;;  %v11309_v47 = vld [vmem:[%s11536_s28 + $0x518] sm:$0xff]  }
 0x521   : > { %10789 = vmatprep.subr.bf16.mxu0 %v11251_v52  ;;  %10821 = vmatprep.subr.bf16.mxu1 %v11252_v62  ;;  %v11310_v26 = vld [vmem:[%s11536_s28 + $0x598] sm:$0xff]   ;;  %v11311_v52 = vld [vmem:[%s11536_s28 + $0x560] sm:$0xff]  }
 0x522   : > { %v11312_v62 = vld [vmem:[%s11536_s28 + $0x5e0] sm:$0xff]  }
 0x524   : > { %10791 = vmatpush3.bf16.msra.mxu0 %v11253_v36  ;;  %10823 = vmatpush3.bf16.msra.mxu1 %v11254_v59  ;;  %v11313_v36 = vld [vmem:[%s11536_s28 + $0x520] sm:$0xff]  }
 0x525   : > { %10793 = vmatprep.subr.bf16.mxu0 %v11255_v43  ;;  %10825 = vmatprep.subr.bf16.mxu1 %v11256_v28  ;;  %v11314_v59 = vld [vmem:[%s11536_s28 + $0x5a0] sm:$0xff]   ;;  %v11315_v43 = vld [vmem:[%s11536_s28 + $0x568] sm:$0xff]  }
 0x526   : > { %v11316_v28 = vld [vmem:[%s11536_s28 + $0x5e8] sm:$0xff]  }
 0x528   : > { %10795 = vmatpush3.bf16.msra.mxu0 %v11257_v0  ;;  %10827 = vmatpush3.bf16.msra.mxu1 %v11258_v17  ;;  %v11317_v0 = vld [vmem:[%s11536_s28 + $0x528] sm:$0xff]  }
 0x529   : > { %10797 = vmatprep.subr.bf16.mxu0 %v11259_v56  ;;  %10829 = vmatprep.subr.bf16.mxu1 %v11260_v34  ;;  %v11318_v17 = vld [vmem:[%s11536_s28 + $0x5a8] sm:$0xff]   ;;  %v11319_v56 = vld [vmem:[%s11536_s28 + $0x570] sm:$0xff]  }
 0x52a   : > { %v11320_v34 = vld [vmem:[%s11536_s28 + $0x5f0] sm:$0xff]  }
 0x52c   : > { %10799 = vmatpush3.bf16.msra.mxu0 %v11261_v61  ;;  %10831 = vmatpush3.bf16.msra.mxu1 %v11262_v12  ;;  %v11321_v61 = vld [vmem:[%s11536_s28 + $0x530] sm:$0xff]  }
 0x52d   : > { %10833 = vmatprep.subr.bf16.mxu0 %v11263_v42  ;;  %10865 = vmatprep.subr.bf16.mxu1 %v11264_v14  ;;  %v11322_v12 = vld [vmem:[%s11536_s28 + $0x5b0] sm:$0xff]   ;;  %v11323_v42 = vld [vmem:[%s11536_s28 + $0x578] sm:$0xff]  }
 0x52e   : > { %v11324_v14 = vld [vmem:[%s11536_s28 + $0x5f8] sm:$0xff]  }
 0x52f   : > { %7052 = vmatmul.mubr.f32.vlgmr.msra.gmra.mrb[8].mxu0 %v15586_v7  ;;  %7122 = vmatmul.mubr.f32.vlgmr.msra.gmra.mrb[8].mxu1 %v15591_v18 }
 0x530   : > { %10835 = vmatpush3.bf16.msra.mxu0 %v11265_v37  ;;  %10867 = vmatpush3.bf16.msra.mxu1 %v11266_v41  ;;  %v11325_v37 = vld [vmem:[%s11536_s28 + $0x538] sm:$0xff]  }
 0x531   : > { %10837 = vmatprep.subr.bf16.mxu0 %v11267_v35  ;;  %10869 = vmatprep.subr.bf16.mxu1 %v11268_v32  ;;  %v11326_v41 = vld [vmem:[%s11536_s28 + $0x5b8] sm:$0xff]   ;;  %v11327_v35 = vld [vmem:[%s11536_s28 + $0x640] sm:$0xff]  }
 0x532   : > { %7191 = vmatprep.mubr.f32.mxu0 %v15544_v10  ;;  %7261 = vmatprep.mubr.f32.mxu1 %v15549_v27  ;;  %v11328_v32 = vld [vmem:[%s11536_s28 + $0x6c0] sm:$0xff]  }
 0x534   : > { %10839 = vmatpush3.bf16.msra.mxu0 %v11269_v55  ;;  %10871 = vmatpush3.bf16.msra.mxu1 %v11270_v1  ;;  %v11329_v55 = vld [vmem:[%s11536_s28 + $0x600] sm:$0xff]  }
 0x535   : > { %10841 = vmatprep.subr.bf16.mxu0 %v11271_v9  ;;  %10873 = vmatprep.subr.bf16.mxu1 %v11272_v19  ;;  %v11330_v1 = vld [vmem:[%s11536_s28 + $0x680] sm:$0xff]   ;;  %v11331_v9 = vld [vmem:[%s11536_s28 + $0x648] sm:$0xff]  }
 0x536   : > { %v11332_v19 = vld [vmem:[%s11536_s28 + $0x6c8] sm:$0xff]  }
 0x538   : > { %10843 = vmatpush3.bf16.msra.mxu0 %v11273_v6  ;;  %10875 = vmatpush3.bf16.msra.mxu1 %v11274_v53  ;;  %v11333_v6 = vld [vmem:[%s11536_s28 + $0x608] sm:$0xff]  }
 0x539   : > { %10845 = vmatprep.subr.bf16.mxu0 %v11275_v38  ;;  %10877 = vmatprep.subr.bf16.mxu1 %v11276_v13  ;;  %v11334_v53 = vld [vmem:[%s11536_s28 + $0x688] sm:$0xff]   ;;  %v11335_v38 = vld [vmem:[%s11536_s28 + $0x650] sm:$0xff]  }
 0x53a   : > { %v11336_v13 = vld [vmem:[%s11536_s28 + $0x6d0] sm:$0xff]  }
 0x53c   : > { %10847 = vmatpush3.bf16.msra.mxu0 %v11277_v20  ;;  %10879 = vmatpush3.bf16.msra.mxu1 %v11278_v49  ;;  %v11337_v20 = vld [vmem:[%s11536_s28 + $0x610] sm:$0xff]  }
 0x53d   : > { %10849 = vmatprep.subr.bf16.mxu0 %v11279_v5  ;;  %10881 = vmatprep.subr.bf16.mxu1 %v11280_v31  ;;  %v11338_v49 = vld [vmem:[%s11536_s28 + $0x690] sm:$0xff]   ;;  %v11339_v5 = vld [vmem:[%s11536_s28 + $0x658] sm:$0xff]  }
 0x53e   : > { %v11340_v31 = vld [vmem:[%s11536_s28 + $0x6d8] sm:$0xff]  }
 0x540   : > { %10851 = vmatpush3.bf16.msra.mxu0 %v11281_v50  ;;  %10883 = vmatpush3.bf16.msra.mxu1 %v11282_v33  ;;  %v11341_v50 = vld [vmem:[%s11536_s28 + $0x618] sm:$0xff]  }
 0x541   : > { %10853 = vmatprep.subr.bf16.mxu0 %v11283_v23  ;;  %10885 = vmatprep.subr.bf16.mxu1 %v11284_v4  ;;  %v11342_v33 = vld [vmem:[%s11536_s28 + $0x698] sm:$0xff]   ;;  %v11343_v23 = vld [vmem:[%s11536_s28 + $0x660] sm:$0xff]  }
 0x542   : > { %v11344_v4 = vld [vmem:[%s11536_s28 + $0x6e0] sm:$0xff]  }
 0x544   : > { %10855 = vmatpush3.bf16.msra.mxu0 %v11285_v63  ;;  %10887 = vmatpush3.bf16.msra.mxu1 %v11286_v8  ;;  %v11345_v63 = vld [vmem:[%s11536_s28 + $0x620] sm:$0xff]  }
 0x545   : > { %10857 = vmatprep.subr.bf16.mxu0 %v11287_v40  ;;  %10889 = vmatprep.subr.bf16.mxu1 %v11288_v21  ;;  %v11346_v8 = vld [vmem:[%s11536_s28 + $0x6a0] sm:$0xff]   ;;  %v11347_v40 = vld [vmem:[%s11536_s28 + $0x668] sm:$0xff]  }
 0x546   : > { %v11348_v21 = vld [vmem:[%s11536_s28 + $0x6e8] sm:$0xff]  }
 0x548   : > { %10859 = vmatpush3.bf16.msra.mxu0 %v11289_v46  ;;  %10891 = vmatpush3.bf16.msra.mxu1 %v11290_v2 }
 0x549   : > { %10861 = vmatprep.subr.bf16.mxu0 %v11291_v15  ;;  %10893 = vmatprep.subr.bf16.mxu1 %v11292_v60 }
 0x54c   : > { %10863 = vmatpush3.bf16.msra.mxu0 %v11293_v3  ;;  %10895 = vmatpush3.bf16.msra.mxu1 %v11294_v25 }
 0x54d   : > { %10897 = vmatprep.subr.bf16.mxu0 %v11295_v16  ;;  %10929 = vmatprep.subr.bf16.mxu1 %v11296_v54  ;;  %v11349_v16 = vld [vmem:[%s11536_s28 + $0x628] sm:$0xff]  }
 0x54e   : > { %v11350_v54 = vld [vmem:[%s11536_s28 + $0x6a8] sm:$0xff]  }
 0x54f   : > { %7192 = vmatmul.mubr.f32.vlgmr.msra.gmra.mrb[10].mxu0 %v15586_v7  ;;  %7262 = vmatmul.mubr.f32.vlgmr.msra.gmra.mrb[10].mxu1 %v15591_v18 }
 0x550   : > { %10899 = vmatpush3.bf16.msra.mxu0 %v11297_v11  ;;  %10931 = vmatpush3.bf16.msra.mxu1 %v11298_v57  ;;  %v11351_v11 = vld [vmem:[%s11536_s28 + $0x670] sm:$0xff]  }
 0x551   : > { %10901 = vmatprep.subr.bf16.mxu0 %v11299_v30  ;;  %10933 = vmatprep.subr.bf16.mxu1 %v11300_v58  ;;  %v11352_v57 = vld [vmem:[%s11536_s28 + $0x6f0] sm:$0xff]  }
 0x552   : > { %7331 = vmatprep.mubr.f32.mxu0 %v15544_v10  ;;  %7401 = vmatprep.mubr.f32.mxu1 %v15549_v27  ;;  %v11353_v58 = vld [vmem:[%s11536_s28 + $0x630] sm:$0xff]  }
 0x554   : > { %10903 = vmatpush3.bf16.msra.mxu0 %v11301_v45  ;;  %10935 = vmatpush3.bf16.msra.mxu1 %v11302_v51  ;;  %v11354_v45 = vld [vmem:[%s11536_s28 + $0x6b0] sm:$0xff]   ;;  %v11355_v51 = vld [vmem:[%s11536_s28 + $0x678] sm:$0xff]  }
 0x555   : > { %10905 = vmatprep.subr.bf16.mxu0 %v11303_v48  ;;  %10937 = vmatprep.subr.bf16.mxu1 %v11304_v44  ;;  %v11356_v48 = vld [vmem:[%s11536_s28 + $0x6f8] sm:$0xff]  }
 0x556   : > { %v11357_v44 = vld [vmem:[%s11536_s28 + $0x638] sm:$0xff]  }
 0x558   : > { %10907 = vmatpush3.bf16.msra.mxu0 %v11305_v24  ;;  %10939 = vmatpush3.bf16.msra.mxu1 %v11306_v29  ;;  %v11358_v24 = vld [vmem:[%s11536_s28 + $0x6b8] sm:$0xff]   ;;  %v11359_v29 = vld [vmem:[%s11536_s28 + $0x740] sm:$0xff]  }
 0x559   : > { %10909 = vmatprep.subr.bf16.mxu0 %v11307_v22  ;;  %10941 = vmatprep.subr.bf16.mxu1 %v11308_v39  ;;  %v11360_v22 = vld [vmem:[%s11536_s28 + $0x7c0] sm:$0xff]  }
 0x55a   : > { %v11361_v39 = vld [vmem:[%s11536_s28 + $0x700] sm:$0xff]  }
 0x55c   : > { %10911 = vmatpush3.bf16.msra.mxu0 %v11309_v47  ;;  %10943 = vmatpush3.bf16.msra.mxu1 %v11310_v26  ;;  %v11362_v47 = vld [vmem:[%s11536_s28 + $0x780] sm:$0xff]   ;;  %v11363_v26 = vld [vmem:[%s11536_s28 + $0x748] sm:$0xff]  }
 0x55d   : > { %10913 = vmatprep.subr.bf16.mxu0 %v11311_v52  ;;  %10945 = vmatprep.subr.bf16.mxu1 %v11312_v62  ;;  %v11364_v52 = vld [vmem:[%s11536_s28 + $0x7c8] sm:$0xff]  }
 0x55e   : > { %v11365_v62 = vld [vmem:[%s11536_s28 + $0x708] sm:$0xff]  }
 0x560   : > { %10915 = vmatpush3.bf16.msra.mxu0 %v11313_v36  ;;  %10947 = vmatpush3.bf16.msra.mxu1 %v11314_v59  ;;  %v11366_v36 = vld [vmem:[%s11536_s28 + $0x788] sm:$0xff]   ;;  %v11367_v59 = vld [vmem:[%s11536_s28 + $0x750] sm:$0xff]  }
 0x561   : > { %10917 = vmatprep.subr.bf16.mxu0 %v11315_v43  ;;  %10949 = vmatprep.subr.bf16.mxu1 %v11316_v28  ;;  %v11368_v43 = vld [vmem:[%s11536_s28 + $0x7d0] sm:$0xff]  }
 0x562   : > { %v11369_v28 = vld [vmem:[%s11536_s28 + $0x710] sm:$0xff]  }
 0x564   : > { %10919 = vmatpush3.bf16.msra.mxu0 %v11317_v0  ;;  %10951 = vmatpush3.bf16.msra.mxu1 %v11318_v17  ;;  %v11370_v0 = vld [vmem:[%s11536_s28 + $0x790] sm:$0xff]   ;;  %v11373_v17 = vld [vmem:[%s11536_s28 + $0x718] sm:$0xff]  }
 0x565   : > { %10921 = vmatprep.subr.bf16.mxu0 %v11319_v56  ;;  %10953 = vmatprep.subr.bf16.mxu1 %v11320_v34  ;;  %v11374_v56 = vld [vmem:[%s11536_s28 + $0x798] sm:$0xff]   ;;  %v11375_v34 = vld [vmem:[%s11536_s28 + $0x760] sm:$0xff]  }
 0x568   : > { %10923 = vmatpush3.bf16.msra.mxu0 %v11321_v61  ;;  %10955 = vmatpush3.bf16.msra.mxu1 %v11322_v12  ;;  %v11376_v61 = vld [vmem:[%s11536_s28 + $0x7e0] sm:$0xff]  }
 0x569   : > { %10925 = vmatprep.subr.bf16.mxu0 %v11323_v42  ;;  %10957 = vmatprep.subr.bf16.mxu1 %v11324_v14  ;;  %v11377_v12 = vld [vmem:[%s11536_s28 + $0x720] sm:$0xff]   ;;  %v11379_v14 = vld [vmem:[%s11536_s28 + $0x768] sm:$0xff]  }
 0x56a   : > { %v11378_v42 = vld [vmem:[%s11536_s28 + $0x7a0] sm:$0xff]  }
 0x56c   : > { %10927 = vmatpush3.bf16.msra.mxu0 %v11325_v37  ;;  %10959 = vmatpush3.bf16.msra.mxu1 %v11326_v41  ;;  %v11380_v37 = vld [vmem:[%s11536_s28 + $0x7e8] sm:$0xff]  }
 0x56d   : > { %10961 = vmatprep.subr.bf16.mxu0 %v11327_v35  ;;  %10993 = vmatprep.subr.bf16.mxu1 %v11328_v32 }
 0x56f   : > { %7332 = vmatmul.mubr.f32.vlgmr.msra.gmra.mrb[12].mxu0 %v15586_v7  ;;  %7402 = vmatmul.mubr.f32.vlgmr.msra.gmra.mrb[12].mxu1 %v15591_v18 }
 0x570   : > { %10963 = vmatpush3.bf16.msra.mxu0 %v11329_v55  ;;  %10995 = vmatpush3.bf16.msra.mxu1 %v11330_v1 }
 0x571   : > { %10965 = vmatprep.subr.bf16.mxu0 %v11331_v9  ;;  %10997 = vmatprep.subr.bf16.mxu1 %v11332_v19  ;;  %v11381_v19 = vld [vmem:[%s11536_s28 + $0x728] sm:$0xff]  }
 0x572   : > { %7471 = vmatprep.mubr.f32.mxu0 %v15544_v10  ;;  %7541 = vmatprep.mubr.f32.mxu1 %v15549_v27 }
 0x574   : > { %10967 = vmatpush3.bf16.msra.mxu0 %v11333_v6  ;;  %10999 = vmatpush3.bf16.msra.mxu1 %v11334_v53  ;;  %v11382_v6 = vld [vmem:[%s11536_s28 + $0x7a8] sm:$0xff]   ;;  %v11383_v53 = vld [vmem:[%s11536_s28 + $0x770] sm:$0xff]  }
 0x575   : > { %10969 = vmatprep.subr.bf16.mxu0 %v11335_v38  ;;  %11001 = vmatprep.subr.bf16.mxu1 %v11336_v13  ;;  %v11384_v38 = vld [vmem:[%s11536_s28 + $0x7f0] sm:$0xff]  }
 0x578   : > { %10971 = vmatpush3.bf16.msra.mxu0 %v11337_v20  ;;  %11003 = vmatpush3.bf16.msra.mxu1 %v11338_v49  ;;  %v11385_v20 = vld [vmem:[%s11536_s28 + $0x730] sm:$0xff]  }
 0x579   : > { %10973 = vmatprep.subr.bf16.mxu0 %v11339_v5  ;;  %11005 = vmatprep.subr.bf16.mxu1 %v11340_v31  ;;  %v11386_v49 = vld [vmem:[%s11536_s28 + $0x7b0] sm:$0xff]   ;;  %v11387_v31 = vld [vmem:[%s11536_s28 + $0x778] sm:$0xff]  }
 0x57c   : > { %10975 = vmatpush3.bf16.msra.mxu0 %v11341_v50  ;;  %11007 = vmatpush3.bf16.msra.mxu1 %v11342_v33  ;;  %v11388_v50 = vld [vmem:[%s11536_s28 + $0x7f8] sm:$0xff]  }
 0x57d   : > { %10977 = vmatprep.subr.bf16.mxu0 %v11343_v23  ;;  %11009 = vmatprep.subr.bf16.mxu1 %v11344_v4  ;;  %v11389_v33 = vld [vmem:[%s11536_s28 + $0x738] sm:$0xff]   ;;  %v11455_v4 = vmov 0.0  }
 0x57e   : > { %v11390_v23 = vld [vmem:[%s11536_s28 + $0x7b8] sm:$0xff]  }
 0x580   : > { %10979 = vmatpush3.bf16.msra.mxu0 %v11345_v63  ;;  %11011 = vmatpush3.bf16.msra.mxu1 %v11346_v8 }
 0x581   : > { %10981 = vmatprep.subr.bf16.mxu0 %v11347_v40  ;;  %11013 = vmatprep.subr.bf16.mxu1 %v11348_v21 }
 0x582   : > { %v9858_v46 = vpop.f32.mrb[0].mxu0  ;;  %v9893_v2 = vpop.f32.mrb[0].mxu1 }
 0x583   : > { %v9859_v15 = vpop.f32.mrb[1].mxu0  ;;  %v9894_v60 = vpop.f32.mrb[1].mxu1 }
 0x584   : > { %v9860_v3 = vadd.f32 %v9859_v15, %v9858_v46  ;;  %v9895_v25 = vadd.f32 %v9894_v60, %v9893_v2  ;;  %10983 = vmatpush3.bf16.msra.mxu0 %v11349_v16  ;;  %11015 = vmatpush3.bf16.msra.mxu1 %v11350_v54 }
 0x585   : > { %10985 = vmatprep.subr.bf16.mxu0 %v11351_v11  ;;  %11017 = vmatprep.subr.bf16.mxu1 %v11352_v57 }
 0x586   : > { %v15803_v30 = vadd.f32 %v9895_v25, %v9860_v3 }
 0x588   : > { %10987 = vmatpush3.bf16.msra.mxu0 %v11353_v58  ;;  %11019 = vmatpush3.bf16.msra.mxu1 %v11354_v45 }
 0x589   : > { %10989 = vmatprep.subr.bf16.mxu0 %v11355_v51  ;;  %11021 = vmatprep.subr.bf16.mxu1 %v11356_v48 }
 0x58c   : > { %10991 = vmatpush3.bf16.msra.mxu0 %v11357_v44  ;;  %11023 = vmatpush3.bf16.msra.mxu1 %v11358_v24 }
 0x58d   : > { %11025 = vmatprep.subr.bf16.mxu0 %v11359_v29  ;;  %11057 = vmatprep.subr.bf16.mxu1 %v11360_v22 }
 0x58f   : > { %7472 = vmatmul.mubr.f32.vlgmr.msra.gmra.mrb[14].mxu0 %v15586_v7  ;;  %7542 = vmatmul.mubr.f32.vlgmr.msra.gmra.mrb[14].mxu1 %v15591_v18 }
 0x590   : > { %11027 = vmatpush3.bf16.msra.mxu0 %v11361_v39  ;;  %11059 = vmatpush3.bf16.msra.mxu1 %v11362_v47 }
 0x591   : > { %11029 = vmatprep.subr.bf16.mxu0 %v11363_v26  ;;  %11061 = vmatprep.subr.bf16.mxu1 %v11364_v52 }
 0x592   : > { %7611 = vmatprep.mubr.f32.mxu0 %v15544_v10  ;;  %7681 = vmatprep.mubr.f32.mxu1 %v15549_v27  ;;  %v11371_v10 = vld [vmem:[%s11536_s28 + $0x758] sm:$0xff]  }
 0x593   : > { %v11372_v27 = vld [vmem:[%s11536_s28 + $0x7d8] sm:$0xff]   ;;  %s11457_s28 = smov 18  }
 0x594   : > { %11031 = vmatpush3.bf16.msra.mxu0 %v11365_v62  ;;  %11063 = vmatpush3.bf16.msra.mxu1 %v11366_v36 }
 0x595   : > { %11033 = vmatprep.subr.bf16.mxu0 %v11367_v59  ;;  %11065 = vmatprep.subr.bf16.mxu1 %v11368_v43 }
 0x598   : > { %11035 = vmatpush3.bf16.msra.mxu0 %v11369_v28  ;;  %11067 = vmatpush3.bf16.msra.mxu1 %v11370_v0 }
 0x599   : > { %11037 = vmatprep.subr.bf16.mxu0 %v11371_v10  ;;  %11069 = vmatprep.subr.bf16.mxu1 %v11372_v27 }
 0x59c   : > { %11039 = vmatpush3.bf16.msra.mxu0 %v11373_v17  ;;  %11071 = vmatpush3.bf16.msra.mxu1 %v11374_v56 }
 0x59d   : > { %11041 = vmatprep.subr.bf16.mxu0 %v11375_v34  ;;  %11073 = vmatprep.subr.bf16.mxu1 %v11376_v61 }
 0x5a0   : > { %11043 = vmatpush3.bf16.msra.mxu0 %v11377_v12  ;;  %11075 = vmatpush3.bf16.msra.mxu1 %v11378_v42 }
 0x5a1   : > { %11045 = vmatprep.subr.bf16.mxu0 %v11379_v14  ;;  %11077 = vmatprep.subr.bf16.mxu1 %v11380_v37 }
 0x5a2   : > { %v9928_v41 = vpop.f32.mrb[2].mxu0  ;;  %v9963_v35 = vpop.f32.mrb[2].mxu1 }
 0x5a3   : > { %v9929_v32 = vpop.f32.mrb[3].mxu0  ;;  %v9964_v55 = vpop.f32.mrb[3].mxu1 }
 0x5a4   : > { %v9930_v1 = vadd.f32 %v9929_v32, %v9928_v41  ;;  %v9965_v9 = vadd.f32 %v9964_v55, %v9963_v35  ;;  %11047 = vmatpush3.bf16.msra.mxu0 %v11381_v19  ;;  %11079 = vmatpush3.bf16.msra.mxu1 %v11382_v6 }
 0x5a5   : > { %11049 = vmatprep.subr.bf16.mxu0 %v11383_v53  ;;  %11081 = vmatprep.subr.bf16.mxu1 %v11384_v38 }
 0x5a6   : > { %v6704_v13 = vadd.f32 %v9965_v9, %v9930_v1 }
 0x5a8   : > { %11051 = vmatpush3.bf16.msra.mxu0 %v11385_v20  ;;  %11083 = vmatpush3.bf16.msra.mxu1 %v11386_v49  ;;  %v7688_v5 = vsel %vm7687_vm8, %v6704_v13, 0.0 }
 0x5a9   : > { %7689 = vadd.xlane.f32.xlu0 %v7688_v5  ;;  %11053 = vmatprep.subr.bf16.mxu0 %v11387_v31 }
 0x5aa   : > { %11085 = vmatprep.subr.bf16.mxu1 %v11388_v50 }
 0x5ac   : > { %11055 = vmatpush3.bf16.msra.mxu0 %v11389_v33  ;;  %11087 = vmatpush3.bf16.msra.mxu1 %v11390_v23 }
 0x5ad   : > { %10472 = vmatprep.subr.mxu0 %v11455_v4  ;;  %10477 = vmatprep.subr.mxu1 %v11455_v4 }
 0x5af   : > { %7612 = vmatmul.mubr.f32.vlgmr.msra.gmra.mrb[16].mxu0 %v15586_v7  ;;  %7682 = vmatmul.mubr.f32.vlgmr.msra.gmra.mrb[16].mxu1 %v15591_v18 }
 0x5b0   : > { %10474 = vmatprep.mubr.msk.f32.mxu0 %vm11456_vm9, %v11455_v4  ;;  %10479 = vmatprep.mubr.msk.f32.mxu1 %vm11456_vm9, %v11455_v4 }
 0x5c2   : > { %v9998_v63 = vpop.f32.mrb[4].mxu0  ;;  %v10033_v8 = vpop.f32.mrb[4].mxu1 }
 0x5c3   : > { %v9999_v40 = vpop.f32.mrb[5].mxu0  ;;  %v10034_v21 = vpop.f32.mrb[5].mxu1 }
 0x5c4   : > { %v10000_v46 = vadd.f32 %v9999_v40, %v9998_v63  ;;  %v10035_v7 = vadd.f32 %v10034_v21, %v10033_v8 }
 0x5c6   : > { %v6844_v2 = vadd.f32 %v10035_v7, %v10000_v46 }
 0x5c8   : > { %v7691_v18 = vsel %vm7687_vm8, %v6844_v2, 0.0 }
 0x5c9   : > { %7692 = vadd.xlane.f32.xlu1 %v7691_v18 }
 0x5e2   : > { %v10068_v15 = vpop.f32.mrb[6].mxu0  ;;  %v10103_v60 = vpop.f32.mrb[6].mxu1 }
 0x5e3   : > { %v10069_v3 = vpop.f32.mrb[7].mxu0  ;;  %v10104_v25 = vpop.f32.mrb[7].mxu1 }
 0x5e4   : > { %v10070_v16 = vadd.f32 %v10069_v3, %v10068_v15  ;;  %v10105_v54 = vadd.f32 %v10104_v25, %v10103_v60 }
 0x5e6   : > { %v6984_v11 = vadd.f32 %v10105_v54, %v10070_v16 }
 0x5e8   : > { %v7694_v57 = vsel %vm7687_vm8, %v6984_v11, 0.0 }
 0x5e9   : > { %7695 = vadd.xlane.f32.xlu0 %v7694_v57 }
 0x602   : > { %v10138_v58 = vpop.f32.mrb[8].mxu0  ;;  %v10173_v45 = vpop.f32.mrb[8].mxu1 }
 0x603   : > { %v10139_v51 = vpop.f32.mrb[9].mxu0  ;;  %v10174_v48 = vpop.f32.mrb[9].mxu1 }
 0x604   : > { %v10140_v44 = vadd.f32 %v10139_v51, %v10138_v58  ;;  %v10175_v24 = vadd.f32 %v10174_v48, %v10173_v45 }
 0x606   : > { %v7124_v29 = vadd.f32 %v10175_v24, %v10140_v44 }
 0x608   : > { %v7697_v22 = vsel %vm7687_vm8, %v7124_v29, 0.0 }
 0x609   : > { %7698 = vadd.xlane.f32.xlu1 %v7697_v22 }
 0x622   : > { %v10208_v39 = vpop.f32.mrb[10].mxu0  ;;  %v10243_v47 = vpop.f32.mrb[10].mxu1 }
 0x623   : > { %v10209_v26 = vpop.f32.mrb[11].mxu0  ;;  %v10244_v52 = vpop.f32.mrb[11].mxu1 }
 0x624   : > { %v10210_v62 = vadd.f32 %v10209_v26, %v10208_v39  ;;  %v10245_v36 = vadd.f32 %v10244_v52, %v10243_v47 }
 0x626   : > { %v7264_v59 = vadd.f32 %v10245_v36, %v10210_v62 }
 0x628   : > { %v7700_v43 = vsel %vm7687_vm8, %v7264_v59, 0.0 }
 0x629   : > { %7701 = vadd.xlane.f32.xlu0 %v7700_v43 }
 0x636   : > { %v7690_v28 = vpop.xlane.xlu0 %7689 }
 0x637   : > { %v7712_v0 = vmul.f32 0.015625, %v7690_v28 }
 0x639   : > { %v7720_v10 = vsub.f32 %v6704_v13, %v7712_v0 }
 0x63b   : > { %10473 = vmatpush3.xpose.msk.msra.mxu0 %vm1198_vm0, %v7720_v10 }
 0x63c   : > { %10482 = vmatprep.subr.mxu0 %v11455_v4 }
 0x63e   : > { %10475 = vmatmul.mubr.msk.f32.vlgmr.msra.gmra.mrb[18].mxu0 %vm1198_vm0, %v7720_v10 }
 0x63f   : > { %10484 = vmatprep.mubr.msk.f32.mxu0 %vm11456_vm9, %v11455_v4 }
 0x642   : > { %v10278_v27 = vpop.f32.mrb[12].mxu0  ;;  %v10313_v17 = vpop.f32.mrb[12].mxu1 }
 0x643   : > { %v10279_v56 = vpop.f32.mrb[13].mxu0  ;;  %v10314_v34 = vpop.f32.mrb[13].mxu1 }
 0x644   : > { %v10280_v61 = vadd.f32 %v10279_v56, %v10278_v27  ;;  %v10315_v12 = vadd.f32 %v10314_v34, %v10313_v17 }
 0x646   : > { %v7404_v42 = vadd.f32 %v10315_v12, %v10280_v61 }
 0x648   : > { %v7703_v14 = vsel %vm7687_vm8, %v7404_v42, 0.0 }
 0x649   : > { %7704 = vadd.xlane.f32.xlu1 %v7703_v14 }
 0x656   : > { %v7693_v37 = vpop.xlane.xlu1 %7692 }
 0x657   : > { %v7713_v41 = vmul.f32 0.015625, %v7693_v37 }
 0x659   : > { %v7721_v35 = vsub.f32 %v6844_v2, %v7713_v41 }
 0x65b   : > { %10478 = vmatpush3.xpose.msk.msra.mxu1 %vm1198_vm0, %v7721_v35 }
 0x65c   : > { %10487 = vmatprep.subr.mxu1 %v11455_v4 }
 0x65e   : > { %10480 = vmatmul.mubr.msk.f32.vlgmr.msra.gmra.mrb[18].mxu1 %vm1198_vm0, %v7721_v35 }
 0x65f   : > { %10489 = vmatprep.mubr.msk.f32.mxu1 %vm11456_vm9, %v11455_v4 }
 0x662   : > { %v10348_v32 = vpop.f32.mrb[14].mxu0  ;;  %v10383_v55 = vpop.f32.mrb[14].mxu1 }
 0x663   : > { %v10349_v1 = vpop.f32.mrb[15].mxu0  ;;  %v10384_v9 = vpop.f32.mrb[15].mxu1 }
 0x664   : > { %v10350_v19 = vadd.f32 %v10349_v1, %v10348_v32  ;;  %v10385_v6 = vadd.f32 %v10384_v9, %v10383_v55 }
 0x666   : > { %v7544_v53 = vadd.f32 %v10385_v6, %v10350_v19 }
 0x668   : > { %v7706_v38 = vsel %vm7687_vm8, %v7544_v53, 0.0 }
 0x669   : > { %7707 = vadd.xlane.f32.xlu0 %v7706_v38 }
 0x676   : > { %v7696_v13 = vpop.xlane.xlu0 %7695 }
 0x677   : > { %v7714_v20 = vmul.f32 0.015625, %v7696_v13 }
 0x679   : > { %v7722_v49 = vsub.f32 %v6984_v11, %v7714_v20 }
 0x67b   : > { %10483 = vmatpush3.xpose.msk.msra.mxu0 %vm1198_vm0, %v7722_v49 }
 0x67c   : > { %10492 = vmatprep.subr.mxu0 %v11455_v4 }
 0x67e   : > { %10485 = vmatmul.mubr.msk.f32.vlgmr.msra.gmra.mrb[20].mxu0 %vm1198_vm0, %v7722_v49 }
 0x67f   : > { %10494 = vmatprep.mubr.msk.f32.mxu0 %vm11456_vm9, %v11455_v4 }
 0x682   : > { %v10418_v5 = vpop.f32.mrb[16].mxu0  ;;  %v10453_v31 = vpop.f32.mrb[16].mxu1 }
 0x683   : > { %v10419_v50 = vpop.f32.mrb[17].mxu0  ;;  %v10454_v33 = vpop.f32.mrb[17].mxu1 }
 0x684   : > { %v10420_v23 = vadd.f32 %v10419_v50, %v10418_v5  ;;  %v10455_v63 = vadd.f32 %v10454_v33, %v10453_v31 }
 0x686   : > { %v7684_v8 = vadd.f32 %v10455_v63, %v10420_v23 }
 0x688   : > { %v7709_v40 = vsel %vm7687_vm8, %v7684_v8, 0.0 }
 0x689   : > { %7710 = vadd.xlane.f32.xlu1 %v7709_v40 }
 0x696   : > { %v7699_v21 = vpop.xlane.xlu1 %7698 }
 0x697   : > { %v7715_v46 = vmul.f32 0.015625, %v7699_v21 }
 0x699   : > { %v7723_v7 = vsub.f32 %v7124_v29, %v7715_v46 }
 0x69b   : > { %10488 = vmatpush3.xpose.msk.msra.mxu1 %vm1198_vm0, %v7723_v7 }
 0x69c   : > { %10497 = vmatprep.subr.mxu1 %v11455_v4 }
 0x69e   : > { %10490 = vmatmul.mubr.msk.f32.vlgmr.msra.gmra.mrb[20].mxu1 %vm1198_vm0, %v7723_v7 }
 0x69f   : > { %10499 = vmatprep.mubr.msk.f32.mxu1 %vm11456_vm9, %v11455_v4 }
 0x6b6   : > { %v7702_v2 = vpop.xlane.xlu0 %7701 }
 0x6b7   : > { %v7716_v18 = vmul.f32 0.015625, %v7702_v2 }
 0x6b9   : > { %v7724_v15 = vsub.f32 %v7264_v59, %v7716_v18 }
 0x6bb   : > { %10493 = vmatpush3.xpose.msk.msra.mxu0 %vm1198_vm0, %v7724_v15 }
 0x6bc   : > { %10502 = vmatprep.subr.mxu0 %v11455_v4 }
 0x6be   : > { %10495 = vmatmul.mubr.msk.f32.vlgmr.msra.gmra.mrb[22].mxu0 %vm1198_vm0, %v7724_v15 }
 0x6bf   : > { %10504 = vmatprep.mubr.msk.f32.mxu0 %vm11456_vm9, %v11455_v4 }
 0x6d6   : > { %v7705_v60 = vpop.xlane.xlu1 %7704 }
 0x6d7   : > { %v7717_v3 = vmul.f32 0.015625, %v7705_v60 }
 0x6d9   : > { %v7725_v25 = vsub.f32 %v7404_v42, %v7717_v3 }
 0x6db   : > { %10498 = vmatpush3.xpose.msk.msra.mxu1 %vm1198_vm0, %v7725_v25 }
 0x6dc   : > { %10507 = vmatprep.subr.mxu1 %v11455_v4 }
 0x6de   : > { %10500 = vmatmul.mubr.msk.f32.vlgmr.msra.gmra.mrb[22].mxu1 %vm1198_vm0, %v7725_v25 }
 0x6df   : > { %10509 = vmatprep.mubr.msk.f32.mxu1 %vm11456_vm9, %v11455_v4 }
 0x6f6   : > { %v7708_v16 = vpop.xlane.xlu0 %7707 }
 0x6f7   : > { %v7718_v54 = vmul.f32 0.015625, %v7708_v16 }
 0x6f9   : > { %v7726_v11 = vsub.f32 %v7544_v53, %v7718_v54 }
 0x6fb   : > { %10503 = vmatpush3.xpose.msk.msra.mxu0 %vm1198_vm0, %v7726_v11 }
 0x6fe   : > { %10505 = vmatmul.mubr.msk.f32.vlgmr.msra.gmra.mrb[24].mxu0 %vm1198_vm0, %v7726_v11 }
 0x711   : > { %v7797_v57 = vpop.f32.mrb[18].mxu0 }
 0x712   : > { %v10476_v58 = vpop.f32.mrb[19].mxu0  ;;  %v8312_v44 = vmul.f32 0.015873017, %v7797_v57 }
 0x714   : > { %v8345_v22 = vrot.slane %v8312_v44, 1  ;;  %v8362_v39 = vrot.slane %v8312_v44, 2  ;;  %v8379_v47 = vrot.slane %v8312_v44, 3  ;;  %v8396_v26 = vrot.slane %v8312_v44, 4 }
 0x715   : > { %v8413_v43 = vrot.slane %v8312_v44, 5 }
 0x716   : > { %v7711_v45 = vpop.xlane.xlu1 %7710 }
 0x717   : > { %v7719_v51 = vmul.f32 0.015625, %v7711_v45 }
 0x719   : > { %v7727_v48 = vsub.f32 %v7684_v8, %v7719_v51 }
 0x71b   : > { %10508 = vmatpush3.xpose.msk.msra.mxu1 %vm1198_vm0, %v7727_v48 }
 0x71e   : > { %10510 = vmatmul.mubr.msk.f32.vlgmr.msra.gmra.mrb[24].mxu1 %vm1198_vm0, %v7727_v48  ;;  %vm8430_vm0 = vcmask 97280  }
 0x731   : > { %v7870_v24 = vpop.f32.mrb[18].mxu1 }
 0x732   : > { %v8313_v29 = vmul.f32 0.015873017, %v7870_v24  ;;  %v10481_v4 = vpop.f32.mrb[19].mxu1 }
 0x734   : > { %v8328_v52 = vrot.slane %v8313_v29, 7  ;;  %v8363_v62 = vrot.slane %v8313_v29, 1  ;;  %v8380_v36 = vrot.slane %v8313_v29, 2  ;;  %v8397_v59 = vrot.slane %v8313_v29, 3 }
 0x735   : > { %v8414_v28 = vrot.slane %v8313_v29, 4  ;;  %v8346_v0 = vsel %vm6384_vm1, %v8313_v29, %v8345_v22 }
 0x736   : > { %v8329_v10 = vsel %vm6384_vm1, %v8328_v52, %v8312_v44  ;;  %v8364_v27 = vsel %vm6384_vm1, %v8363_v62, %v8362_v39  ;;  %v8398_v17 = vsel %vm6384_vm1, %v8397_v59, %v8396_v26  ;;  %v8381_v56 = vsel %vm6384_vm1, %v8380_v36, %v8379_v47 }
 0x737   : > { %v8415_v34 = vsel %vm6384_vm1, %v8414_v28, %v8413_v43 }
 0x751   : > { %v7943_v61 = vpop.f32.mrb[20].mxu0 }
 0x752   : > { %v8314_v12 = vmul.f32 0.015873017, %v7943_v61  ;;  %v10486_v42 = vpop.f32.mrb[21].mxu0 }
 0x754   : > { %v8330_v14 = vrot.slane %v8314_v12, 6  ;;  %v8347_v37 = vrot.slane %v8314_v12, 7  ;;  %v8382_v41 = vrot.slane %v8314_v12, 1  ;;  %v8399_v35 = vrot.slane %v8314_v12, 2 }
 0x755   : > { %v8416_v32 = vrot.slane %v8314_v12, 3  ;;  %v8365_v55 = vsel %vm6386_vm2, %v8314_v12, %v8364_v27 }
 0x756   : > { %v8348_v1 = vsel %vm6386_vm2, %v8347_v37, %v8346_v0  ;;  %v8331_v9 = vsel %vm6386_vm2, %v8330_v14, %v8329_v10  ;;  %v8400_v19 = vsel %vm6386_vm2, %v8399_v35, %v8398_v17  ;;  %v8383_v6 = vsel %vm6386_vm2, %v8382_v41, %v8381_v56 }
 0x757   : > { %v8417_v53 = vsel %vm6386_vm2, %v8416_v32, %v8415_v34 }
 0x771   : > { %v8016_v38 = vpop.f32.mrb[20].mxu1 }
 0x772   : > { %v8315_v13 = vmul.f32 0.015873017, %v8016_v38  ;;  %v10491_v20 = vpop.f32.mrb[21].mxu1 }
 0x774   : > { %v8349_v49 = vrot.slane %v8315_v13, 6  ;;  %v8332_v5 = vrot.slane %v8315_v13, 5  ;;  %v8366_v31 = vrot.slane %v8315_v13, 7  ;;  %v8401_v50 = vrot.slane %v8315_v13, 1 }
 0x775   : > { %v8384_v33 = vsel %vm6388_vm3, %v8315_v13, %v8383_v6  ;;  %v8418_v23 = vrot.slane %v8315_v13, 2 }
 0x776   : > { %v8350_v63 = vsel %vm6388_vm3, %v8349_v49, %v8348_v1  ;;  %v8333_v8 = vsel %vm6388_vm3, %v8332_v5, %v8331_v9  ;;  %v8367_v40 = vsel %vm6388_vm3, %v8366_v31, %v8365_v55  ;;  %v8402_v21 = vsel %vm6388_vm3, %v8401_v50, %v8400_v19 }
 0x777   : > { %v8419_v46 = vsel %vm6388_vm3, %v8418_v23, %v8417_v53 }
 0x791   : > { %v8089_v7 = vpop.f32.mrb[22].mxu0 }
 0x792   : > { %v8316_v2 = vmul.f32 0.015873017, %v8089_v7  ;;  %v10496_v18 = vpop.f32.mrb[23].mxu0 }
 0x794   : > { %v8351_v15 = vrot.slane %v8316_v2, 5  ;;  %v8334_v60 = vrot.slane %v8316_v2, 4  ;;  %v8368_v3 = vrot.slane %v8316_v2, 6  ;;  %v8403_v25 = vsel %vm6390_vm4, %v8316_v2, %v8402_v21 }
 0x795   : > { %v8385_v16 = vrot.slane %v8316_v2, 7  ;;  %v8420_v54 = vrot.slane %v8316_v2, 1 }
 0x796   : > { %v8352_v11 = vsel %vm6390_vm4, %v8351_v15, %v8350_v63  ;;  %v8335_v57 = vsel %vm6390_vm4, %v8334_v60, %v8333_v8  ;;  %v8369_v58 = vsel %vm6390_vm4, %v8368_v3, %v8367_v40 }
 0x797   : > { %v8386_v45 = vsel %vm6390_vm4, %v8385_v16, %v8384_v33  ;;  %v8421_v51 = vsel %vm6390_vm4, %v8420_v54, %v8419_v46 }
 0x7b1   : > { %v8162_v48 = vpop.f32.mrb[22].mxu1 }
 0x7b2   : > { %v8317_v44 = vmul.f32 0.015873017, %v8162_v48  ;;  %v10501_v24 = vpop.f32.mrb[23].mxu1 }
 0x7b4   : > { %v8353_v29 = vrot.slane %v8317_v44, 4  ;;  %v8336_v4 = vrot.slane %v8317_v44, 3  ;;  %v8370_v22 = vrot.slane %v8317_v44, 5  ;;  %v8404_v39 = vrot.slane %v8317_v44, 7 }
 0x7b5   : > { %v8387_v47 = vrot.slane %v8317_v44, 6  ;;  %v8422_v26 = vsel %vm6392_vm5, %v8317_v44, %v8421_v51 }
 0x7b6   : > { %v8354_v52 = vsel %vm6392_vm5, %v8353_v29, %v8352_v11  ;;  %v8337_v62 = vsel %vm6392_vm5, %v8336_v4, %v8335_v57  ;;  %v8371_v36 = vsel %vm6392_vm5, %v8370_v22, %v8369_v58  ;;  %v8405_v59 = vsel %vm6392_vm5, %v8404_v39, %v8403_v25 }
 0x7b7   : > { %v8388_v43 = vsel %vm6392_vm5, %v8387_v47, %v8386_v45 }
 0x7d1   : > { %v8235_v28 = vpop.f32.mrb[24].mxu0 }
 0x7d2   : > { %v8318_v0 = vmul.f32 0.015873017, %v8235_v28  ;;  %v10506_v10 = vpop.f32.mrb[25].mxu0 }
 0x7d4   : > { %v8355_v27 = vrot.slane %v8318_v0, 3  ;;  %v8338_v17 = vrot.slane %v8318_v0, 2  ;;  %v8372_v56 = vrot.slane %v8318_v0, 4  ;;  %v8406_v34 = vrot.slane %v8318_v0, 6 }
 0x7d5   : > { %v8389_v61 = vrot.slane %v8318_v0, 5  ;;  %v8423_v12 = vrot.slane %v8318_v0, 7 }
 0x7d6   : > { %v8356_v42 = vsel %vm6394_vm6, %v8355_v27, %v8354_v52  ;;  %v8339_v14 = vsel %vm6394_vm6, %v8338_v17, %v8337_v62  ;;  %v8373_v37 = vsel %vm6394_vm6, %v8372_v56, %v8371_v36  ;;  %v8407_v41 = vsel %vm6394_vm6, %v8406_v34, %v8405_v59 }
 0x7d7   : > { %v8390_v35 = vsel %vm6394_vm6, %v8389_v61, %v8388_v43  ;;  %v8424_v32 = vsel %vm6394_vm6, %v8423_v12, %v8422_v26 }
 0x7f1   : > { %v8308_v55 = vpop.f32.mrb[24].mxu1 }
 0x7f2   : > { %v8319_v1 = vmul.f32 0.015873017, %v8308_v55  ;;  %v10511_v9 = vpop.f32.mrb[25].mxu1 }
 0x7f4   : > { %v8357_v19 = vrot.slane %v8319_v1, 2  ;;  %v8340_v6 = vrot.slane %v8319_v1, 1  ;;  %v8374_v53 = vrot.slane %v8319_v1, 3  ;;  %v8408_v38 = vrot.slane %v8319_v1, 5 }
 0x7f5   : > { %v8391_v13 = vrot.slane %v8319_v1, 4  ;;  %v8425_v20 = vrot.slane %v8319_v1, 6 }
 0x7f6   : > { %v8358_v49 = vsel %vm6396_vm7, %v8357_v19, %v8356_v42  ;;  %v8341_v5 = vsel %vm6396_vm7, %v8340_v6, %v8339_v14  ;;  %v8375_v31 = vsel %vm6396_vm7, %v8374_v53, %v8373_v37  ;;  %v8409_v50 = vsel %vm6396_vm7, %v8408_v38, %v8407_v41 }
 0x7f7   : > { %8359 = vrot.lane.b32.xlu1 %v8358_v49, %s11457_s28  ;;  %8342 = vrot.lane.b32.xlu0 %v8341_v5, %s11458_s29  ;;  %v8392_v33 = vsel %vm6396_vm7, %v8391_v13, %v8390_v35  ;;  %v8426_v23 = vsel %vm6396_vm7, %v8425_v20, %v8424_v32 }
 0x7fb   : > { %8376 = vrot.lane.b32.xlu1 %v8375_v31, %s11459_s30  ;;  %8410 = vrot.lane.b32.xlu0 %v8409_v50, %s11460_s4 }
 0x7ff   : > { %8393 = vrot.lane.b32.xlu1 %v8392_v33, %s11461_s5 }
 0x803   : > { %8427 = vrot.lane.b32.xlu1 %v8426_v23, %s11462_s6 }
 0x869   : > { %v8360_v63 = vpop.permute.xlu1 %8359  ;;  %v8343_v8 = vpop.permute.xlu0 %8342 }
 0x86a   : > { %v8431_v40 = vsel %vm8430_vm0, %v15803_v30, %v8343_v8 }
 0x86b   : > { %v8433_v46 = vsel %vm8432_vm10, %v8431_v40, %v8360_v63 }
 0x86d   : > { %v8377_v21 = vpop.permute.xlu1 %8376  ;;  %v8411_v15 = vpop.permute.xlu0 %8410 }
 0x86e   : > { %v8435_v7 = vsel %vm8434_vm11, %v8433_v46, %v8377_v21 }
 0x871   : > { %v8394_v2 = vpop.permute.xlu1 %8393 }
 0x872   : > { %v8437_v18 = vsel %vm8436_vm12, %v8435_v7, %v8394_v2 }
 0x873   : > { %v8439_v3 = vsel %vm8438_vm13, %v8437_v18, %v8411_v15 }
 0x875   : > { %v8428_v60 = vpop.permute.xlu1 %8427 }
 0x876   : > { %v8441_v30 = vsel %vm8440_vm14, %v8439_v3, %v8428_v60 }
 0x877   : > { %v8443_v25 = vsel %vm8442_vm15, %v8441_v30, 0.0 }
 0x878   : > { %8444 = vst [vmem:[%s166_s10] sm:$0xff] %v8443_v25 }
 0x879   : > { %11404 = shalt.err (!%p11401_p3)
}
 0x87a   : > { %s11405_s28 = scalar_lea.hbm %s15945_s20, 128  ;;  %s11409_s4 = scalar_lea.hbm %s15990_s3, 256 }
 0x87b   : > { %p11406_p4 = scmp.ne.s32.totalorder %s15945_s20, %s11405_s28  ;;  %p11410_p9 = scmp.lt.u32.totalorder %s15945_s20, %s15990_s3 }
 0x87c   : > { %p11411_p10 = scmp.lt.u32.totalorder %s11409_s4, %s11405_s28  ;;  %p11413_p12 = scmp.lt.u32.totalorder %s11405_s28, %s15945_s20 }
 0x87d   : > { %p11407_p7 = pnand %p11406_p4, %p11522_p5 }
 0x87e   : > { %p11412_p11 = por %p11411_p10, %p11410_p9 }
 0x87f   : > { %p11408_p8 = pneg %p11407_p7 }
 0x880   : > { %p11414_p13 = por %p11413_p12, %p11412_p11 }
 0x882   : > { %p11415_p0 = pnand %p11414_p13, %p11408_p8 }
 0x884   : > { %11418 = shalt.err (!%p11415_p0)
}
 0x885   : > { %11088 = dma.vmem_to_hbm [thread:$0]  (%p11522_p5), %s15947_s11, 128, %s15945_s20, %s8446_s16  }
 0x886 PF: > { %p11094_p1 = scmp.ge.s32.totalorder %s11453_s15, 2  ;;  %s8471_s7 = sand.u32 1, %s11441_s12  }
 0x887   : > { %s8472_s8 = scalar_lea.sflag [#allocation3], %s8471_s7 }
 0x888   : > { %p11091_p2 = pnand %p11094_p1, %p11526_p6 }
 0x88a   : > { %11436 = dma.done.wait (!%p11091_p2), %s8472_s8, 128  }
 0x88b   : > { %11438 = vsyncadd (!%p11091_p2), %s8472_s8, 4294967168  ;;  %p13_p3 = scmp.ge.s32.totalorder %s11509_s18, 4   ;;  %s16083_s12 = smov %s11445_s13 }
 0x88c   : > { %s16084_s13 = smov %s11449_s14  ;;  %s16085_s14 = smov %s11520_s21 }
 0x88d   : > { %s16086_s15 = smov %s11509_s18  ;;  %15 = sbr.rel (!%p13_p3) target bundleno = 3 (0x3), region = 67 }
 0x894   :  { %8477 = vsyncpa [#allocation3], 1 }
 0x895   :  { %8479 = vsyncpa [#allocation3 + $0x1], 1 }

</bundles_post_ra>
